<compile_context>
chip_gen: v7x
topology: tpu7x:2x2x1
jax: 0.10.0
libtpu: 0.0.40
codegen_flags: <defaults>
</compile_context>

<pallas_src>
import jax
import jax.numpy as jnp
from jax import lax
from jax.experimental import pallas as pl
from jax.experimental.pallas import tpu as pltpu

EPS = 1e-5
LANE = 128
VMEM_LIMIT = 32 * 1024 * 1024  # per-layer working set is ~3 MiB; safe on v5e/v6e/v7x


def _round_up(x, n):
    return ((x + n - 1) // n) * n


def _choose_tile_m(mp):
    """mp is a multiple of 128; largest tile (<=1024) that divides it."""
    for t in (1024, 512, 256, 128):
        if mp % t == 0:
            return t
    return 128


# ----------------------------- Pallas kernels --------------------------------

def _make_fused_conv_bn_relu_kernel(*, n_tiles, tile_m, inv_m, has_res):
    """Fused per-layer kernel:  y = W @ A_tile  (MXU, f32 acc), y kept resident in
    VMEM, per-channel sum / sumsq accumulated per step, BN + ReLU (+ skip add)
    applied at the last grid step and written lane-dense to the (OC, Mp) output."""

    def kernel(*refs):
        if has_res:
            w_ref, a_ref, res_ref, o_ref, ybuf, s_acc, ss_acc = refs
        else:
            w_ref, a_ref, o_ref, ybuf, s_acc, ss_acc = refs
            res_ref = None
        i = pl.program_id(0)

        # conv-as-matmul on the MXU: [OC, Kp] x [Kp, tile_m] -> [OC, tile_m]
        y = jnp.dot(w_ref[...], a_ref[...], preferred_element_type=jnp.float32)
        ybuf[i] = y                                   # stays in VMEM (no HBM trip)

        @pl.when(i == 0)
        def _():
            s_acc[...] = jnp.zeros_like(s_acc)
            ss_acc[...] = jnp.zeros_like(ss_acc)

        s_acc[...] += y                               # elementwise partial stats
        ss_acc[...] += y * y

        @pl.when(i == n_tiles - 1)
        def _():
            # Finalize global BatchNorm stats (training mode, biased variance).
            # Padded M columns are exact zeros and contribute nothing; divide by
            # the true element count via inv_m.
            s = jnp.sum(s_acc[...], axis=1, keepdims=True)    # [OC, 1]
            ss = jnp.sum(ss_acc[...], axis=1, keepdims=True)  # [OC, 1]
            mean = s * inv_m
            var = jnp.maximum(ss * inv_m - mean * mean, 0.0)
            scale = lax.rsqrt(var + EPS)
            shift = -mean * scale
            # Normalize + ReLU (+ fused skip-connection add), static lane slices.
            for j in range(n_tiles):
                yn = jnp.maximum(ybuf[j] * scale + shift, 0.0)
                if has_res:
                    yn = yn + res_ref[:, j * tile_m:(j + 1) * tile_m]
                o_ref[:, j * tile_m:(j + 1) * tile_m] = yn

    return kernel


def _prob_matmul_kernel(w_ref, a_ref, o_ref):
    """Plain tiled matmul for the `prob` head (no BN, no ReLU)."""
    o_ref[...] = jnp.dot(w_ref[...], a_ref[...], preferred_element_type=jnp.float32)


# ------------------------------ conv3d glue ----------------------------------

def _im2col_cf(act_cf, ksize, stride, padding):
    """act_cf: [C, N, D, H, W] (any float dtype) ->
       bf16 patch matrix [k^3*C, N*OD*OH*OW] (K ordering: kd, kh, kw, C) + dims."""
    C, N, D, H, W = act_cf.shape
    k, s, p = ksize, stride, padding
    OD = (D + 2 * p - k) // s + 1
    OH = (H + 2 * p - k) // s + 1
    OW = (W + 2 * p - k) // s + 1
    xp = jnp.pad(act_cf.astype(jnp.bfloat16),
                 ((0, 0), (0, 0), (p, p), (p, p), (p, p)))
    taps = []
    for kd in range(k):
        for kh in range(k):
            for kw in range(k):
                taps.append(xp[:, :, kd:kd + s * OD:s, kh:kh + s * OH:s,
                               kw:kw + s * OW:s].reshape(C, -1))
    a = jnp.concatenate(taps, axis=0)                 # [k^3*C, M]
    return a, (N, OD, OH, OW)


def _weight_matrix(weight):
    """Conv weight [OC, IC, k, k, k] -> bf16 [OC, k^3*IC] matching im2col K order."""
    OC = weight.shape[0]
    return jnp.transpose(weight, (0, 2, 3, 4, 1)).reshape(OC, -1).astype(jnp.bfloat16)


def conv3d_bn_relu(act_cf, weight, *, stride=1, padding=1, residual=None):
    """ReLU(BN(Conv3d(x))) [+ residual].  act_cf / residual: [C, N, D, H, W]."""
    OC = weight.shape[0]
    k = weight.shape[2]
    a, (N, OD, OH, OW) = _im2col_cf(act_cf, k, stride, padding)
    K, M = a.shape
    Kp = _round_up(K, LANE)
    Mp = _round_up(M, LANE)
    tile_m = _choose_tile_m(Mp)
    n_tiles = Mp // tile_m

    a_p = jnp.pad(a, ((0, Kp - K), (0, Mp - M)))               # bf16 [Kp, Mp]
    w_p = jnp.pad(_weight_matrix(weight), ((0, 0), (0, Kp - K)))  # bf16 [OC, Kp]

    in_specs = [pl.BlockSpec((OC, Kp), lambda i: (0, 0)),      # resident weights
                pl.BlockSpec((Kp, tile_m), lambda i: (0, i))]  # pipelined A tiles
    args = [w_p, a_p]
    has_res = residual is not None
    if has_res:
        res_p = jnp.pad(residual.reshape(OC, M).astype(jnp.float32),
                        ((0, 0), (0, Mp - M)))
        in_specs.append(pl.BlockSpec((OC, Mp), lambda i: (0, 0)))  # resident skip
        args.append(res_p)

    kernel = _make_fused_conv_bn_relu_kernel(
        n_tiles=n_tiles, tile_m=tile_m, inv_m=1.0 / M, has_res=has_res)
    cost = pl.CostEstimate(
        flops=2 * OC * Kp * Mp + 6 * OC * Mp,
        transcendentals=OC,
        bytes_accessed=(w_p.size * 2 + a_p.size * 2
                        + OC * Mp * 4 * (2 if has_res else 1)))

    out = pl.pallas_call(
        kernel,
        out_shape=jax.ShapeDtypeStruct((OC, Mp), jnp.float32),
        grid=(n_tiles,),
        in_specs=in_specs,
        out_specs=pl.BlockSpec((OC, Mp), lambda i: (0, 0)),    # resident, lane-dense
        scratch_shapes=[pltpu.VMEM((n_tiles, OC, tile_m), jnp.float32),  # raw y
                        pltpu.VMEM((OC, tile_m), jnp.float32),           # sum acc
                        pltpu.VMEM((OC, tile_m), jnp.float32)],          # sumsq acc
        compiler_params=pltpu.CompilerParams(
            dimension_semantics=("arbitrary",),   # output & stats carried across M
            vmem_limit_bytes=VMEM_LIMIT),
        cost_estimate=cost,
    )(*args)
    return out[:, :M].reshape(OC, N, OD, OH, OW)


def deconv3d_bn_relu(act_cf, weight, *, stride=2, padding=1, output_padding=1,
                     residual=None):
    """ReLU(BN(ConvTranspose3d(x))) [+ residual] as an equivalent stride-1 conv.
    weight: [IC, OC, k, k, k] (PyTorch ConvTranspose3d layout)."""
    k = weight.shape[2]
    lo = k - 1 - padding
    hi = k - 1 - padding + output_padding
    cfg = ((0, 0, 0), (0, 0, 0), (lo, hi, stride - 1), (lo, hi, stride - 1),
           (lo, hi, stride - 1))
    x_dil = lax.pad(act_cf, jnp.array(0.0, act_cf.dtype), cfg)
    w_eq = jnp.transpose(jnp.flip(weight, axis=(2, 3, 4)), (1, 0, 2, 3, 4))
    return conv3d_bn_relu(x_dil, w_eq, stride=1, padding=0, residual=residual)


def conv3d_plain(act_cf, weight, *, stride=1, padding=1):
    """Plain bias-free Conv3d (the `prob` head, OC=1)."""
    OC = weight.shape[0]
    OCp = _round_up(OC, 8)                 # f32 sublane granule only (not 128!)
    k = weight.shape[2]
    a, (N, OD, OH, OW) = _im2col_cf(act_cf, k, stride, padding)
    K, M = a.shape
    Kp = _round_up(K, LANE)
    Mp = _round_up(M, LANE)
    tile_m = _choose_tile_m(Mp)
    n_tiles = Mp // tile_m

    a_p = jnp.pad(a, ((0, Kp - K), (0, Mp - M)))
    w_p = jnp.pad(_weight_matrix(weight), ((0, OCp - OC), (0, Kp - K)))

    cost = pl.CostEstimate(
        flops=2 * OCp * Kp * Mp, transcendentals=0,
        bytes_accessed=w_p.size * 2 + a_p.size * 2 + OCp * Mp * 4)

    out = pl.pallas_call(
        _prob_matmul_kernel,
        out_shape=jax.ShapeDtypeStruct((OCp, Mp), jnp.float32),
        grid=(n_tiles,),
        in_specs=[pl.BlockSpec((OCp, Kp), lambda i: (0, 0)),
                  pl.BlockSpec((Kp, tile_m), lambda i: (0, i))],
        out_specs=pl.BlockSpec((OCp, tile_m), lambda i: (0, i)),
        compiler_params=pltpu.CompilerParams(
            dimension_semantics=("parallel",), vmem_limit_bytes=VMEM_LIMIT),
        cost_estimate=cost,
    )(w_p, a_p)
    return out[:OC, :M].reshape(OC, N, OD, OH, OW)


# ------------------------------ full network ---------------------------------

def costregnet_forward(x, params):
    """x: [N, C, D, H, W] -> (prob [N,1,D,H,W], pro [N,base,D,H,W])."""
    x_cf = jnp.transpose(x, (1, 0, 2, 3, 4)).astype(jnp.float32)  # [C, N, D, H, W]
    c0 = conv3d_bn_relu(x_cf, params["conv0"])
    c1 = conv3d_bn_relu(c0, params["conv1"])
    c2 = conv3d_bn_relu(c1, params["conv2"], stride=2)
    c3 = conv3d_bn_relu(c2, params["conv3"])
    c4 = conv3d_bn_relu(c3, params["conv4"], stride=2)
    c5 = conv3d_bn_relu(c4, params["conv5"])
    x6 = deconv3d_bn_relu(c5, params["conv6"], residual=c3)   # conv3 + conv6(x)
    pro = deconv3d_bn_relu(x6, params["conv7"], residual=c1)  # conv1 + conv7(x)
    prob = conv3d_plain(pro, params["prob"])
    return (jnp.transpose(prob, (1, 0, 2, 3, 4)),
            jnp.transpose(pro, (1, 0, 2, 3, 4)))


# --------------------------- pure-JAX reference -------------------------------

def _ref_conv(x, w, stride=1, padding=1):
    return lax.conv_general_dilated(
        x.astype(jnp.bfloat16), w.astype(jnp.bfloat16),
        window_strides=(stride,) * 3, padding=[(padding, padding)] * 3,
        dimension_numbers=("NCDHW", "OIDHW", "NCDHW"),
        preferred_element_type=jnp.float32)


def _ref_deconv(x, w, stride=2, padding=1, output_padding=1):
    k = w.shape[2]
    w_eq = jnp.transpose(jnp.flip(w, axis=(2, 3, 4)), (1, 0, 2, 3, 4))
    lo = k - 1 - padding
    hi = k - 1 - padding + output_padding
    return lax.conv_general_dilated(
        x.astype(jnp.bfloat16), w_eq.astype(jnp.bfloat16),
        window_strides=(1, 1, 1), padding=[(lo, hi)] * 3,
        lhs_dilation=(stride,) * 3,
        dimension_numbers=("NCDHW", "OIDHW", "NCDHW"),
        preferred_element_type=jnp.float32)


def _ref_bn_relu(y):
    mean = jnp.mean(y, axis=(0, 2, 3, 4), keepdims=True)
    var = jnp.mean(jnp.square(y - mean), axis=(0, 2, 3, 4), keepdims=True)
    return jnp.maximum((y - mean) * lax.rsqrt(var + EPS), 0.0)


def reference_forward(x, params):
    c0 = _ref_bn_relu(_ref_conv(x, params["conv0"]))
    c1 = _ref_bn_relu(_ref_conv(c0, params["conv1"]))
    c2 = _ref_bn_relu(_ref_conv(c1, params["conv2"], stride=2))
    c3 = _ref_bn_relu(_ref_conv(c2, params["conv3"]))
    c4 = _ref_bn_relu(_ref_conv(c3, params["conv4"], stride=2))
    c5 = _ref_bn_relu(_ref_conv(c4, params["conv5"]))
    x6 = c3 + _ref_bn_relu(_ref_deconv(c5, params["conv6"]))
    pro = c1 + _ref_bn_relu(_ref_deconv(x6, params["conv7"]))
    prob = _ref_conv(pro, params["prob"])
    return prob, pro


# ----------------------------------- main -------------------------------------

if __name__ == "__main__":
    key = jax.random.PRNGKey(0)
    ks = jax.random.split(key, 10)

    in_channels, base = 4, 8
    N, D, H, W = 2, 8, 16, 16

    def uinit(k, shape):  # xavier-uniform style init (matches init_method='xavier')
        fan_in = shape[1] * shape[2] * shape[3] * shape[4]
        fan_out = shape[0] * shape[2] * shape[3] * shape[4]
        bound = (6.0 / (fan_in + fan_out)) ** 0.5
        return jax.random.uniform(k, shape, minval=-bound, maxval=bound,
                                  dtype=jnp.float32)

    params = {
        "conv0": uinit(ks[0], (base, in_channels, 3, 3, 3)),
        "conv1": uinit(ks[1], (base, base, 3, 3, 3)),
        "conv2": uinit(ks[2], (2 * base, base, 3, 3, 3)),
        "conv3": uinit(ks[3], (2 * base, 2 * base, 3, 3, 3)),
        "conv4": uinit(ks[4], (4 * base, 2 * base, 3, 3, 3)),
        "conv5": uinit(ks[5], (4 * base, 4 * base, 3, 3, 3)),
        "conv6": uinit(ks[6], (4 * base, 2 * base, 3, 3, 3)),  # ConvTranspose: [IC, OC, ...]
        "conv7": uinit(ks[7], (2 * base, base, 3, 3, 3)),      # ConvTranspose: [IC, OC, ...]
        "prob": uinit(ks[8], (1, base, 3, 3, 3)),
    }
    x = jax.random.normal(ks[9], (N, in_channels, D, H, W), dtype=jnp.float32)

    prob, pro = jax.jit(costregnet_forward)(x, params)
    prob = jax.block_until_ready(prob)
    pro = jax.block_until_ready(pro)

    assert prob.shape == (N, 1, D, H, W), prob.shape
    assert pro.shape == (N, base, D, H, W), pro.shape

    ref_prob, ref_pro = reference_forward(x, params)
    ref_prob = jax.block_until_ready(ref_prob)
    ref_pro = jax.block_until_ready(ref_pro)

    assert jnp.allclose(pro, ref_pro, atol=1e-2, rtol=1e-2), \
        float(jnp.max(jnp.abs(pro - ref_pro)))
    assert jnp.allclose(prob, ref_prob, atol=1e-2, rtol=1e-2), \
        float(jnp.max(jnp.abs(prob - ref_prob)))

    print("KERNEL_OK")
</pallas_src>

<mosaic_0001>
module attributes {stable_mosaic.version = 11 : i64} {
  func.func @kernel(%arg0: i32, %arg1: memref<8x128xbf16, #tpu.memory_space<vmem>>, %arg2: memref<128x1024xbf16, #tpu.memory_space<vmem>>, %arg3: memref<8x4096xf32, #tpu.memory_space<vmem>>, %arg4: memref<4x8x1024xf32, #tpu.memory_space<vmem>>, %arg5: memref<8x1024xf32, #tpu.memory_space<vmem>>, %arg6: memref<8x1024xf32, #tpu.memory_space<vmem>>) attributes {dimension_semantics = [#tpu.dimension_semantics<arbitrary>], iteration_bounds = array<i64: 4>, scalar_prefetch = 0 : i64, scratch_operands = 3 : i64, tpu.core_type = #tpu.core_type<tc>, window_params = [{pipeline_mode = #tpu.pipeline_mode<synchronous>, transform_indices = @transform_0, window_bounds = array<i64: 8, 128>}, {transform_indices = @transform_1, window_bounds = array<i64: 128, 1024>}, {pipeline_mode = #tpu.pipeline_mode<synchronous>, transform_indices = @transform_2, window_bounds = array<i64: 8, 4096>}]} {
    %c0 = arith.constant 0 : index
    %c0_0 = arith.constant 0 : index
    %0 = vector.load %arg1[%c0, %c0_0] : memref<8x128xbf16, #tpu.memory_space<vmem>>, vector<8x128xbf16>
    %c0_1 = arith.constant 0 : index
    %c0_2 = arith.constant 0 : index
    %1 = vector.load %arg2[%c0_1, %c0_2] : memref<128x1024xbf16, #tpu.memory_space<vmem>>, vector<128x1024xbf16>
    %cst = arith.constant dense<0.000000e+00> : vector<8x1024xf32>
    %2 = tpu.matmul %0, %1, %cst {dimension_numbers = #tpu.dot_dimension_numbers<[1], [0], [0], [1], [0, 0, 1, 1], [], []>} : vector<8x128xbf16>, vector<128x1024xbf16>, vector<8x1024xf32> -> vector<8x1024xf32>
    %3 = arith.index_cast %arg0 : i32 to index
    %c0_3 = arith.constant 0 : index
    %c0_4 = arith.constant 0 : index
    %4 = vector.load %arg4[%3, %c0_3, %c0_4] : memref<4x8x1024xf32, #tpu.memory_space<vmem>>, vector<1x8x1024xf32>
    %5 = vector.shape_cast %4 : vector<1x8x1024xf32> to vector<8x1024xf32>
    %6 = vector.shape_cast %2 : vector<8x1024xf32> to vector<1x8x1024xf32>
    tpu.vector_store %arg4[%3, %c0_3, %c0_4], %6 {strides = array<i32>} : memref<4x8x1024xf32, #tpu.memory_space<vmem>>, vector<1x8x1024xf32>,
    %c0_i32 = arith.constant 0 : i32
    %7 = arith.cmpi eq, %arg0, %c0_i32 : i32
    %8 = arith.extui %7 : i1 to i32
    %c0_i32_5 = arith.constant 0 : i32
    %9 = arith.cmpi ne, %8, %c0_i32_5 : i32
    scf.if %9 {
      %cst_15 = arith.constant 0.000000e+00 : f32
      %20 = vector.broadcast %cst_15 : f32 to vector<8x1024xf32>
      %c0_16 = arith.constant 0 : index
      %c0_17 = arith.constant 0 : index
      %21 = vector.load %arg5[%c0_16, %c0_17] : memref<8x1024xf32, #tpu.memory_space<vmem>>, vector<8x1024xf32>
      tpu.vector_store %arg5[%c0_16, %c0_17], %20 {strides = array<i32>} : memref<8x1024xf32, #tpu.memory_space<vmem>>, vector<8x1024xf32>,
      %cst_18 = arith.constant 0.000000e+00 : f32
      %22 = vector.broadcast %cst_18 : f32 to vector<8x1024xf32>
      %c0_19 = arith.constant 0 : index
      %c0_20 = arith.constant 0 : index
      %23 = vector.load %arg6[%c0_19, %c0_20] : memref<8x1024xf32, #tpu.memory_space<vmem>>, vector<8x1024xf32>
      tpu.vector_store %arg6[%c0_19, %c0_20], %22 {strides = array<i32>} : memref<8x1024xf32, #tpu.memory_space<vmem>>, vector<8x1024xf32>,
    } else {
    }
    %c0_6 = arith.constant 0 : index
    %c0_7 = arith.constant 0 : index
    %10 = vector.load %arg5[%c0_6, %c0_7] : memref<8x1024xf32, #tpu.memory_space<vmem>>, vector<8x1024xf32>
    %11 = arith.addf %10, %2 : vector<8x1024xf32>
    %c0_8 = arith.constant 0 : index
    %c0_9 = arith.constant 0 : index
    %12 = vector.load %arg5[%c0_8, %c0_9] : memref<8x1024xf32, #tpu.memory_space<vmem>>, vector<8x1024xf32>
    tpu.vector_store %arg5[%c0_8, %c0_9], %11 {strides = array<i32>} : memref<8x1024xf32, #tpu.memory_space<vmem>>, vector<8x1024xf32>,
    %c0_10 = arith.constant 0 : index
    %c0_11 = arith.constant 0 : index
    %13 = vector.load %arg6[%c0_10, %c0_11] : memref<8x1024xf32, #tpu.memory_space<vmem>>, vector<8x1024xf32>
    %14 = arith.mulf %2, %2 : vector<8x1024xf32>
    %15 = arith.addf %13, %14 : vector<8x1024xf32>
    %c0_12 = arith.constant 0 : index
    %c0_13 = arith.constant 0 : index
    %16 = vector.load %arg6[%c0_12, %c0_13] : memref<8x1024xf32, #tpu.memory_space<vmem>>, vector<8x1024xf32>
    tpu.vector_store %arg6[%c0_12, %c0_13], %15 {strides = array<i32>} : memref<8x1024xf32, #tpu.memory_space<vmem>>, vector<8x1024xf32>,
    %c3_i32 = arith.constant 3 : i32
    %17 = arith.cmpi eq, %arg0, %c3_i32 : i32
    %18 = arith.extui %17 : i1 to i32
    %c0_i32_14 = arith.constant 0 : i32
    %19 = arith.cmpi ne, %18, %c0_i32_14 : i32
    scf.if %19 {
      %c0_15 = arith.constant 0 : index
      %c0_16 = arith.constant 0 : index
      %20 = vector.load %arg5[%c0_15, %c0_16] : memref<8x1024xf32, #tpu.memory_space<vmem>>, vector<8x1024xf32>
      %cst_17 = arith.constant dense<0.000000e+00> : vector<8xf32>
      %21 = vector.multi_reduction <add>, %20, %cst_17 [1] : vector<8x1024xf32> to vector<8xf32>
      %22 = vector.shape_cast %21 : vector<8xf32> to vector<8x1xf32>
      %c0_18 = arith.constant 0 : index
      %c0_19 = arith.constant 0 : index
      %23 = vector.load %arg6[%c0_18, %c0_19] : memref<8x1024xf32, #tpu.memory_space<vmem>>, vector<8x1024xf32>
      %cst_20 = arith.constant dense<0.000000e+00> : vector<8xf32>
      %24 = vector.multi_reduction <add>, %23, %cst_20 [1] : vector<8x1024xf32> to vector<8xf32>
      %25 = vector.shape_cast %24 : vector<8xf32> to vector<8x1xf32>
      %cst_21 = arith.constant 2.44140625E-4 : f32
      %26 = vector.broadcast %cst_21 : f32 to vector<8x1xf32>
      %27 = arith.mulf %22, %26 : vector<8x1xf32>
      %cst_22 = arith.constant 2.44140625E-4 : f32
      %28 = vector.broadcast %cst_22 : f32 to vector<8x1xf32>
      %29 = arith.mulf %25, %28 : vector<8x1xf32>
      %30 = arith.mulf %27, %27 : vector<8x1xf32>
      %31 = arith.subf %29, %30 : vector<8x1xf32>
      %cst_23 = arith.constant 0.000000e+00 : f32
      %32 = vector.broadcast %cst_23 : f32 to vector<8x1xf32>
      %33 = arith.maximumf %31, %32 : vector<8x1xf32>
      %cst_24 = arith.constant 9.99999974E-6 : f32
      %34 = vector.broadcast %cst_24 : f32 to vector<8x1xf32>
      %35 = arith.addf %33, %34 : vector<8x1xf32>
      %36 = math.rsqrt %35 : vector<8x1xf32>
      %cst_25 = arith.constant 0.000000e+00 : f32
      %37 = vector.broadcast %cst_25 : f32 to vector<8x1xf32>
      %38 = arith.subf %37, %27 : vector<8x1xf32>
      %39 = arith.mulf %38, %36 : vector<8x1xf32>
      %c0_26 = arith.constant 0 : index
      %c0_27 = arith.constant 0 : index
      %c0_28 = arith.constant 0 : index
      %40 = vector.load %arg4[%c0_26, %c0_27, %c0_28] : memref<4x8x1024xf32, #tpu.memory_space<vmem>>, vector<1x8x1024xf32>
      %41 = vector.shape_cast %40 : vector<1x8x1024xf32> to vector<8x1024xf32>
      %42 = vector.broadcast %36 : vector<8x1xf32> to vector<8x1024xf32>
      %43 = arith.mulf %41, %42 : vector<8x1024xf32>
      %44 = vector.broadcast %39 : vector<8x1xf32> to vector<8x1024xf32>
      %45 = arith.addf %43, %44 : vector<8x1024xf32>
      %cst_29 = arith.constant 0.000000e+00 : f32
      %46 = vector.broadcast %cst_29 : f32 to vector<8x1024xf32>
      %47 = arith.maximumf %45, %46 : vector<8x1024xf32>
      %c0_30 = arith.constant 0 : index
      %c0_31 = arith.constant 0 : index
      %48 = vector.load %arg3[%c0_30, %c0_31] : memref<8x4096xf32, #tpu.memory_space<vmem>>, vector<8x1024xf32>
      tpu.vector_store %arg3[%c0_30, %c0_31], %47 {strides = array<i32>} : memref<8x4096xf32, #tpu.memory_space<vmem>>, vector<8x1024xf32>,
      %c1 = arith.constant 1 : index
      %c0_32 = arith.constant 0 : index
      %c0_33 = arith.constant 0 : index
      %49 = vector.load %arg4[%c1, %c0_32, %c0_33] : memref<4x8x1024xf32, #tpu.memory_space<vmem>>, vector<1x8x1024xf32>
      %50 = vector.shape_cast %49 : vector<1x8x1024xf32> to vector<8x1024xf32>
      %51 = vector.broadcast %36 : vector<8x1xf32> to vector<8x1024xf32>
      %52 = arith.mulf %50, %51 : vector<8x1024xf32>
      %53 = vector.broadcast %39 : vector<8x1xf32> to vector<8x1024xf32>
      %54 = arith.addf %52, %53 : vector<8x1024xf32>
      %cst_34 = arith.constant 0.000000e+00 : f32
      %55 = vector.broadcast %cst_34 : f32 to vector<8x1024xf32>
      %56 = arith.maximumf %54, %55 : vector<8x1024xf32>
      %c0_35 = arith.constant 0 : index
      %c1024 = arith.constant 1024 : index
      %57 = vector.load %arg3[%c0_35, %c1024] : memref<8x4096xf32, #tpu.memory_space<vmem>>, vector<8x1024xf32>
      tpu.vector_store %arg3[%c0_35, %c1024], %56 {strides = array<i32>} : memref<8x4096xf32, #tpu.memory_space<vmem>>, vector<8x1024xf32>,
      %c2 = arith.constant 2 : index
      %c0_36 = arith.constant 0 : index
      %c0_37 = arith.constant 0 : index
      %58 = vector.load %arg4[%c2, %c0_36, %c0_37] : memref<4x8x1024xf32, #tpu.memory_space<vmem>>, vector<1x8x1024xf32>
      %59 = vector.shape_cast %58 : vector<1x8x1024xf32> to vector<8x1024xf32>
      %60 = vector.broadcast %36 : vector<8x1xf32> to vector<8x1024xf32>
      %61 = arith.mulf %59, %60 : vector<8x1024xf32>
      %62 = vector.broadcast %39 : vector<8x1xf32> to vector<8x1024xf32>
      %63 = arith.addf %61, %62 : vector<8x1024xf32>
      %cst_38 = arith.constant 0.000000e+00 : f32
      %64 = vector.broadcast %cst_38 : f32 to vector<8x1024xf32>
      %65 = arith.maximumf %63, %64 : vector<8x1024xf32>
      %c0_39 = arith.constant 0 : index
      %c2048 = arith.constant 2048 : index
      %66 = vector.load %arg3[%c0_39, %c2048] : memref<8x4096xf32, #tpu.memory_space<vmem>>, vector<8x1024xf32>
      tpu.vector_store %arg3[%c0_39, %c2048], %65 {strides = array<i32>} : memref<8x4096xf32, #tpu.memory_space<vmem>>, vector<8x1024xf32>,
      %c3 = arith.constant 3 : index
      %c0_40 = arith.constant 0 : index
      %c0_41 = arith.constant 0 : index
      %67 = vector.load %arg4[%c3, %c0_40, %c0_41] : memref<4x8x1024xf32, #tpu.memory_space<vmem>>, vector<1x8x1024xf32>
      %68 = vector.shape_cast %67 : vector<1x8x1024xf32> to vector<8x1024xf32>
      %69 = vector.broadcast %36 : vector<8x1xf32> to vector<8x1024xf32>
      %70 = arith.mulf %68, %69 : vector<8x1024xf32>
      %71 = vector.broadcast %39 : vector<8x1xf32> to vector<8x1024xf32>
      %72 = arith.addf %70, %71 : vector<8x1024xf32>
      %cst_42 = arith.constant 0.000000e+00 : f32
      %73 = vector.broadcast %cst_42 : f32 to vector<8x1024xf32>
      %74 = arith.maximumf %72, %73 : vector<8x1024xf32>
      %c0_43 = arith.constant 0 : index
      %c3072 = arith.constant 3072 : index
      %75 = vector.load %arg3[%c0_43, %c3072] : memref<8x4096xf32, #tpu.memory_space<vmem>>, vector<8x1024xf32>
      tpu.vector_store %arg3[%c0_43, %c3072], %74 {strides = array<i32>} : memref<8x4096xf32, #tpu.memory_space<vmem>>, vector<8x1024xf32>,
    } else {
    }
    return
  }
  func.func @transform_0(%arg0: i32) -> (i32, i32) {
    %c0_i32 = arith.constant 0 : i32
    %c0_i32_0 = arith.constant 0 : i32
    %c0_i32_1 = arith.constant 0 : i32
    return %c0_i32, %c0_i32_0 : i32, i32
  }
  func.func @transform_1(%arg0: i32) -> (i32, i32) {
    %c0_i32 = arith.constant 0 : i32
    %c0_i32_0 = arith.constant 0 : i32
    return %c0_i32, %arg0 : i32, i32
  }
  func.func @transform_2(%arg0: i32) -> (i32, i32) {
    %c0_i32 = arith.constant 0 : i32
    %c0_i32_0 = arith.constant 0 : i32
    %c0_i32_1 = arith.constant 0 : i32
    return %c0_i32, %c0_i32_0 : i32, i32
  }
}

module attributes {stable_mosaic.version = 11 : i64} {
  func.func @kernel(%arg0: i32, %arg1: memref<8x256xbf16, #tpu.memory_space<vmem>>, %arg2: memref<256x1024xbf16, #tpu.memory_space<vmem>>, %arg3: memref<8x4096xf32, #tpu.memory_space<vmem>>, %arg4: memref<4x8x1024xf32, #tpu.memory_space<vmem>>, %arg5: memref<8x1024xf32, #tpu.memory_space<vmem>>, %arg6: memref<8x1024xf32, #tpu.memory_space<vmem>>) attributes {dimension_semantics = [#tpu.dimension_semantics<arbitrary>], iteration_bounds = array<i64: 4>, scalar_prefetch = 0 : i64, scratch_operands = 3 : i64, tpu.core_type = #tpu.core_type<tc>, window_params = [{pipeline_mode = #tpu.pipeline_mode<synchronous>, transform_indices = @transform_0, window_bounds = array<i64: 8, 256>}, {transform_indices = @transform_1, window_bounds = array<i64: 256, 1024>}, {pipeline_mode = #tpu.pipeline_mode<synchronous>, transform_indices = @transform_2, window_bounds = array<i64: 8, 4096>}]} {
    %c0 = arith.constant 0 : index
    %c0_0 = arith.constant 0 : index
    %0 = vector.load %arg1[%c0, %c0_0] : memref<8x256xbf16, #tpu.memory_space<vmem>>, vector<8x256xbf16>
    %c0_1 = arith.constant 0 : index
    %c0_2 = arith.constant 0 : index
    %1 = vector.load %arg2[%c0_1, %c0_2] : memref<256x1024xbf16, #tpu.memory_space<vmem>>, vector<256x1024xbf16>
    %cst = arith.constant dense<0.000000e+00> : vector<8x1024xf32>
    %2 = tpu.matmul %0, %1, %cst {dimension_numbers = #tpu.dot_dimension_numbers<[1], [0], [0], [1], [0, 0, 1, 1], [], []>} : vector<8x256xbf16>, vector<256x1024xbf16>, vector<8x1024xf32> -> vector<8x1024xf32>
    %3 = arith.index_cast %arg0 : i32 to index
    %c0_3 = arith.constant 0 : index
    %c0_4 = arith.constant 0 : index
    %4 = vector.load %arg4[%3, %c0_3, %c0_4] : memref<4x8x1024xf32, #tpu.memory_space<vmem>>, vector<1x8x1024xf32>
    %5 = vector.shape_cast %4 : vector<1x8x1024xf32> to vector<8x1024xf32>
    %6 = vector.shape_cast %2 : vector<8x1024xf32> to vector<1x8x1024xf32>
    tpu.vector_store %arg4[%3, %c0_3, %c0_4], %6 {strides = array<i32>} : memref<4x8x1024xf32, #tpu.memory_space<vmem>>, vector<1x8x1024xf32>,
    %c0_i32 = arith.constant 0 : i32
    %7 = arith.cmpi eq, %arg0, %c0_i32 : i32
    %8 = arith.extui %7 : i1 to i32
    %c0_i32_5 = arith.constant 0 : i32
    %9 = arith.cmpi ne, %8, %c0_i32_5 : i32
    scf.if %9 {
      %cst_15 = arith.constant 0.000000e+00 : f32
      %20 = vector.broadcast %cst_15 : f32 to vector<8x1024xf32>
      %c0_16 = arith.constant 0 : index
      %c0_17 = arith.constant 0 : index
      %21 = vector.load %arg5[%c0_16, %c0_17] : memref<8x1024xf32, #tpu.memory_space<vmem>>, vector<8x1024xf32>
      tpu.vector_store %arg5[%c0_16, %c0_17], %20 {strides = array<i32>} : memref<8x1024xf32, #tpu.memory_space<vmem>>, vector<8x1024xf32>,
      %cst_18 = arith.constant 0.000000e+00 : f32
      %22 = vector.broadcast %cst_18 : f32 to vector<8x1024xf32>
      %c0_19 = arith.constant 0 : index
      %c0_20 = arith.constant 0 : index
      %23 = vector.load %arg6[%c0_19, %c0_20] : memref<8x1024xf32, #tpu.memory_space<vmem>>, vector<8x1024xf32>
      tpu.vector_store %arg6[%c0_19, %c0_20], %22 {strides = array<i32>} : memref<8x1024xf32, #tpu.memory_space<vmem>>, vector<8x1024xf32>,
    } else {
    }
    %c0_6 = arith.constant 0 : index
    %c0_7 = arith.constant 0 : index
    %10 = vector.load %arg5[%c0_6, %c0_7] : memref<8x1024xf32, #tpu.memory_space<vmem>>, vector<8x1024xf32>
    %11 = arith.addf %10, %2 : vector<8x1024xf32>
    %c0_8 = arith.constant 0 : index
    %c0_9 = arith.constant 0 : index
    %12 = vector.load %arg5[%c0_8, %c0_9] : memref<8x1024xf32, #tpu.memory_space<vmem>>, vector<8x1024xf32>
    tpu.vector_store %arg5[%c0_8, %c0_9], %11 {strides = array<i32>} : memref<8x1024xf32, #tpu.memory_space<vmem>>, vector<8x1024xf32>,
    %c0_10 = arith.constant 0 : index
    %c0_11 = arith.constant 0 : index
    %13 = vector.load %arg6[%c0_10, %c0_11] : memref<8x1024xf32, #tpu.memory_space<vmem>>, vector<8x1024xf32>
    %14 = arith.mulf %2, %2 : vector<8x1024xf32>
    %15 = arith.addf %13, %14 : vector<8x1024xf32>
    %c0_12 = arith.constant 0 : index
    %c0_13 = arith.constant 0 : index
    %16 = vector.load %arg6[%c0_12, %c0_13] : memref<8x1024xf32, #tpu.memory_space<vmem>>, vector<8x1024xf32>
    tpu.vector_store %arg6[%c0_12, %c0_13], %15 {strides = array<i32>} : memref<8x1024xf32, #tpu.memory_space<vmem>>, vector<8x1024xf32>,
    %c3_i32 = arith.constant 3 : i32
    %17 = arith.cmpi eq, %arg0, %c3_i32 : i32
    %18 = arith.extui %17 : i1 to i32
    %c0_i32_14 = arith.constant 0 : i32
    %19 = arith.cmpi ne, %18, %c0_i32_14 : i32
    scf.if %19 {
      %c0_15 = arith.constant 0 : index
      %c0_16 = arith.constant 0 : index
      %20 = vector.load %arg5[%c0_15, %c0_16] : memref<8x1024xf32, #tpu.memory_space<vmem>>, vector<8x1024xf32>
      %cst_17 = arith.constant dense<0.000000e+00> : vector<8xf32>
      %21 = vector.multi_reduction <add>, %20, %cst_17 [1] : vector<8x1024xf32> to vector<8xf32>
      %22 = vector.shape_cast %21 : vector<8xf32> to vector<8x1xf32>
      %c0_18 = arith.constant 0 : index
      %c0_19 = arith.constant 0 : index
      %23 = vector.load %arg6[%c0_18, %c0_19] : memref<8x1024xf32, #tpu.memory_space<vmem>>, vector<8x1024xf32>
      %cst_20 = arith.constant dense<0.000000e+00> : vector<8xf32>
      %24 = vector.multi_reduction <add>, %23, %cst_20 [1] : vector<8x1024xf32> to vector<8xf32>
      %25 = vector.shape_cast %24 : vector<8xf32> to vector<8x1xf32>
      %cst_21 = arith.constant 2.44140625E-4 : f32
      %26 = vector.broadcast %cst_21 : f32 to vector<8x1xf32>
      %27 = arith.mulf %22, %26 : vector<8x1xf32>
      %cst_22 = arith.constant 2.44140625E-4 : f32
      %28 = vector.broadcast %cst_22 : f32 to vector<8x1xf32>
      %29 = arith.mulf %25, %28 : vector<8x1xf32>
      %30 = arith.mulf %27, %27 : vector<8x1xf32>
      %31 = arith.subf %29, %30 : vector<8x1xf32>
      %cst_23 = arith.constant 0.000000e+00 : f32
      %32 = vector.broadcast %cst_23 : f32 to vector<8x1xf32>
      %33 = arith.maximumf %31, %32 : vector<8x1xf32>
      %cst_24 = arith.constant 9.99999974E-6 : f32
      %34 = vector.broadcast %cst_24 : f32 to vector<8x1xf32>
      %35 = arith.addf %33, %34 : vector<8x1xf32>
      %36 = math.rsqrt %35 : vector<8x1xf32>
      %cst_25 = arith.constant 0.000000e+00 : f32
      %37 = vector.broadcast %cst_25 : f32 to vector<8x1xf32>
      %38 = arith.subf %37, %27 : vector<8x1xf32>
      %39 = arith.mulf %38, %36 : vector<8x1xf32>
      %c0_26 = arith.constant 0 : index
      %c0_27 = arith.constant 0 : index
      %c0_28 = arith.constant 0 : index
      %40 = vector.load %arg4[%c0_26, %c0_27, %c0_28] : memref<4x8x1024xf32, #tpu.memory_space<vmem>>, vector<1x8x1024xf32>
      %41 = vector.shape_cast %40 : vector<1x8x1024xf32> to vector<8x1024xf32>
      %42 = vector.broadcast %36 : vector<8x1xf32> to vector<8x1024xf32>
      %43 = arith.mulf %41, %42 : vector<8x1024xf32>
      %44 = vector.broadcast %39 : vector<8x1xf32> to vector<8x1024xf32>
      %45 = arith.addf %43, %44 : vector<8x1024xf32>
      %cst_29 = arith.constant 0.000000e+00 : f32
      %46 = vector.broadcast %cst_29 : f32 to vector<8x1024xf32>
      %47 = arith.maximumf %45, %46 : vector<8x1024xf32>
      %c0_30 = arith.constant 0 : index
      %c0_31 = arith.constant 0 : index
      %48 = vector.load %arg3[%c0_30, %c0_31] : memref<8x4096xf32, #tpu.memory_space<vmem>>, vector<8x1024xf32>
      tpu.vector_store %arg3[%c0_30, %c0_31], %47 {strides = array<i32>} : memref<8x4096xf32, #tpu.memory_space<vmem>>, vector<8x1024xf32>,
      %c1 = arith.constant 1 : index
      %c0_32 = arith.constant 0 : index
      %c0_33 = arith.constant 0 : index
      %49 = vector.load %arg4[%c1, %c0_32, %c0_33] : memref<4x8x1024xf32, #tpu.memory_space<vmem>>, vector<1x8x1024xf32>
      %50 = vector.shape_cast %49 : vector<1x8x1024xf32> to vector<8x1024xf32>
      %51 = vector.broadcast %36 : vector<8x1xf32> to vector<8x1024xf32>
      %52 = arith.mulf %50, %51 : vector<8x1024xf32>
      %53 = vector.broadcast %39 : vector<8x1xf32> to vector<8x1024xf32>
      %54 = arith.addf %52, %53 : vector<8x1024xf32>
      %cst_34 = arith.constant 0.000000e+00 : f32
      %55 = vector.broadcast %cst_34 : f32 to vector<8x1024xf32>
      %56 = arith.maximumf %54, %55 : vector<8x1024xf32>
      %c0_35 = arith.constant 0 : index
      %c1024 = arith.constant 1024 : index
      %57 = vector.load %arg3[%c0_35, %c1024] : memref<8x4096xf32, #tpu.memory_space<vmem>>, vector<8x1024xf32>
      tpu.vector_store %arg3[%c0_35, %c1024], %56 {strides = array<i32>} : memref<8x4096xf32, #tpu.memory_space<vmem>>, vector<8x1024xf32>,
      %c2 = arith.constant 2 : index
      %c0_36 = arith.constant 0 : index
      %c0_37 = arith.constant 0 : index
      %58 = vector.load %arg4[%c2, %c0_36, %c0_37] : memref<4x8x1024xf32, #tpu.memory_space<vmem>>, vector<1x8x1024xf32>
      %59 = vector.shape_cast %58 : vector<1x8x1024xf32> to vector<8x1024xf32>
      %60 = vector.broadcast %36 : vector<8x1xf32> to vector<8x1024xf32>
      %61 = arith.mulf %59, %60 : vector<8x1024xf32>
      %62 = vector.broadcast %39 : vector<8x1xf32> to vector<8x1024xf32>
      %63 = arith.addf %61, %62 : vector<8x1024xf32>
      %cst_38 = arith.constant 0.000000e+00 : f32
      %64 = vector.broadcast %cst_38 : f32 to vector<8x1024xf32>
      %65 = arith.maximumf %63, %64 : vector<8x1024xf32>
      %c0_39 = arith.constant 0 : index
      %c2048 = arith.constant 2048 : index
      %66 = vector.load %arg3[%c0_39, %c2048] : memref<8x4096xf32, #tpu.memory_space<vmem>>, vector<8x1024xf32>
      tpu.vector_store %arg3[%c0_39, %c2048], %65 {strides = array<i32>} : memref<8x4096xf32, #tpu.memory_space<vmem>>, vector<8x1024xf32>,
      %c3 = arith.constant 3 : index
      %c0_40 = arith.constant 0 : index
      %c0_41 = arith.constant 0 : index
      %67 = vector.load %arg4[%c3, %c0_40, %c0_41] : memref<4x8x1024xf32, #tpu.memory_space<vmem>>, vector<1x8x1024xf32>
      %68 = vector.shape_cast %67 : vector<1x8x1024xf32> to vector<8x1024xf32>
      %69 = vector.broadcast %36 : vector<8x1xf32> to vector<8x1024xf32>
      %70 = arith.mulf %68, %69 : vector<8x1024xf32>
      %71 = vector.broadcast %39 : vector<8x1xf32> to vector<8x1024xf32>
      %72 = arith.addf %70, %71 : vector<8x1024xf32>
      %cst_42 = arith.constant 0.000000e+00 : f32
      %73 = vector.broadcast %cst_42 : f32 to vector<8x1024xf32>
      %74 = arith.maximumf %72, %73 : vector<8x1024xf32>
      %c0_43 = arith.constant 0 : index
      %c3072 = arith.constant 3072 : index
      %75 = vector.load %arg3[%c0_43, %c3072] : memref<8x4096xf32, #tpu.memory_space<vmem>>, vector<8x1024xf32>
      tpu.vector_store %arg3[%c0_43, %c3072], %74 {strides = array<i32>} : memref<8x4096xf32, #tpu.memory_space<vmem>>, vector<8x1024xf32>,
    } else {
    }
    return
  }
  func.func @transform_0(%arg0: i32) -> (i32, i32) {
    %c0_i32 = arith.constant 0 : i32
    %c0_i32_0 = arith.constant 0 : i32
    %c0_i32_1 = arith.constant 0 : i32
    return %c0_i32, %c0_i32_0 : i32, i32
  }
  func.func @transform_1(%arg0: i32) -> (i32, i32) {
    %c0_i32 = arith.constant 0 : i32
    %c0_i32_0 = arith.constant 0 : i32
    return %c0_i32, %arg0 : i32, i32
  }
  func.func @transform_2(%arg0: i32) -> (i32, i32) {
    %c0_i32 = arith.constant 0 : i32
    %c0_i32_0 = arith.constant 0 : i32
    %c0_i32_1 = arith.constant 0 : i32
    return %c0_i32, %c0_i32_0 : i32, i32
  }
}

module attributes {stable_mosaic.version = 11 : i64} {
  func.func @kernel(%arg0: i32, %arg1: memref<16x256xbf16, #tpu.memory_space<vmem>>, %arg2: memref<256x512xbf16, #tpu.memory_space<vmem>>, %arg3: memref<16x512xf32, #tpu.memory_space<vmem>>, %arg4: memref<1x16x512xf32, #tpu.memory_space<vmem>>, %arg5: memref<16x512xf32, #tpu.memory_space<vmem>>, %arg6: memref<16x512xf32, #tpu.memory_space<vmem>>) attributes {dimension_semantics = [#tpu.dimension_semantics<arbitrary>], iteration_bounds = array<i64: 1>, scalar_prefetch = 0 : i64, scratch_operands = 3 : i64, tpu.core_type = #tpu.core_type<tc>, window_params = [{pipeline_mode = #tpu.pipeline_mode<synchronous>, transform_indices = @transform_0, window_bounds = array<i64: 16, 256>}, {transform_indices = @transform_1, window_bounds = array<i64: 256, 512>}, {pipeline_mode = #tpu.pipeline_mode<synchronous>, transform_indices = @transform_2, window_bounds = array<i64: 16, 512>}]} {
    %c0 = arith.constant 0 : index
    %c0_0 = arith.constant 0 : index
    %0 = vector.load %arg1[%c0, %c0_0] : memref<16x256xbf16, #tpu.memory_space<vmem>>, vector<16x256xbf16>
    %c0_1 = arith.constant 0 : index
    %c0_2 = arith.constant 0 : index
    %1 = vector.load %arg2[%c0_1, %c0_2] : memref<256x512xbf16, #tpu.memory_space<vmem>>, vector<256x512xbf16>
    %cst = arith.constant dense<0.000000e+00> : vector<16x512xf32>
    %2 = tpu.matmul %0, %1, %cst {dimension_numbers = #tpu.dot_dimension_numbers<[1], [0], [0], [1], [0, 0, 1, 1], [], []>} : vector<16x256xbf16>, vector<256x512xbf16>, vector<16x512xf32> -> vector<16x512xf32>
    %3 = arith.index_cast %arg0 : i32 to index
    %c0_3 = arith.constant 0 : index
    %c0_4 = arith.constant 0 : index
    %4 = vector.load %arg4[%3, %c0_3, %c0_4] : memref<1x16x512xf32, #tpu.memory_space<vmem>>, vector<1x16x512xf32>
    %5 = vector.shape_cast %4 : vector<1x16x512xf32> to vector<16x512xf32>
    %6 = vector.shape_cast %2 : vector<16x512xf32> to vector<1x16x512xf32>
    tpu.vector_store %arg4[%3, %c0_3, %c0_4], %6 {strides = array<i32>} : memref<1x16x512xf32, #tpu.memory_space<vmem>>, vector<1x16x512xf32>,
    %c0_i32 = arith.constant 0 : i32
    %7 = arith.cmpi eq, %arg0, %c0_i32 : i32
    %8 = arith.extui %7 : i1 to i32
    %c0_i32_5 = arith.constant 0 : i32
    %9 = arith.cmpi ne, %8, %c0_i32_5 : i32
    scf.if %9 {
      %cst_16 = arith.constant 0.000000e+00 : f32
      %20 = vector.broadcast %cst_16 : f32 to vector<16x512xf32>
      %c0_17 = arith.constant 0 : index
      %c0_18 = arith.constant 0 : index
      %21 = vector.load %arg5[%c0_17, %c0_18] : memref<16x512xf32, #tpu.memory_space<vmem>>, vector<16x512xf32>
      tpu.vector_store %arg5[%c0_17, %c0_18], %20 {strides = array<i32>} : memref<16x512xf32, #tpu.memory_space<vmem>>, vector<16x512xf32>,
      %cst_19 = arith.constant 0.000000e+00 : f32
      %22 = vector.broadcast %cst_19 : f32 to vector<16x512xf32>
      %c0_20 = arith.constant 0 : index
      %c0_21 = arith.constant 0 : index
      %23 = vector.load %arg6[%c0_20, %c0_21] : memref<16x512xf32, #tpu.memory_space<vmem>>, vector<16x512xf32>
      tpu.vector_store %arg6[%c0_20, %c0_21], %22 {strides = array<i32>} : memref<16x512xf32, #tpu.memory_space<vmem>>, vector<16x512xf32>,
    } else {
    }
    %c0_6 = arith.constant 0 : index
    %c0_7 = arith.constant 0 : index
    %10 = vector.load %arg5[%c0_6, %c0_7] : memref<16x512xf32, #tpu.memory_space<vmem>>, vector<16x512xf32>
    %11 = arith.addf %10, %2 : vector<16x512xf32>
    %c0_8 = arith.constant 0 : index
    %c0_9 = arith.constant 0 : index
    %12 = vector.load %arg5[%c0_8, %c0_9] : memref<16x512xf32, #tpu.memory_space<vmem>>, vector<16x512xf32>
    tpu.vector_store %arg5[%c0_8, %c0_9], %11 {strides = array<i32>} : memref<16x512xf32, #tpu.memory_space<vmem>>, vector<16x512xf32>,
    %c0_10 = arith.constant 0 : index
    %c0_11 = arith.constant 0 : index
    %13 = vector.load %arg6[%c0_10, %c0_11] : memref<16x512xf32, #tpu.memory_space<vmem>>, vector<16x512xf32>
    %14 = arith.mulf %2, %2 : vector<16x512xf32>
    %15 = arith.addf %13, %14 : vector<16x512xf32>
    %c0_12 = arith.constant 0 : index
    %c0_13 = arith.constant 0 : index
    %16 = vector.load %arg6[%c0_12, %c0_13] : memref<16x512xf32, #tpu.memory_space<vmem>>, vector<16x512xf32>
    tpu.vector_store %arg6[%c0_12, %c0_13], %15 {strides = array<i32>} : memref<16x512xf32, #tpu.memory_space<vmem>>, vector<16x512xf32>,
    %c0_i32_14 = arith.constant 0 : i32
    %17 = arith.cmpi eq, %arg0, %c0_i32_14 : i32
    %18 = arith.extui %17 : i1 to i32
    %c0_i32_15 = arith.constant 0 : i32
    %19 = arith.cmpi ne, %18, %c0_i32_15 : i32
    scf.if %19 {
      %c0_16 = arith.constant 0 : index
      %c0_17 = arith.constant 0 : index
      %20 = vector.load %arg5[%c0_16, %c0_17] : memref<16x512xf32, #tpu.memory_space<vmem>>, vector<16x512xf32>
      %cst_18 = arith.constant dense<0.000000e+00> : vector<16xf32>
      %21 = vector.multi_reduction <add>, %20, %cst_18 [1] : vector<16x512xf32> to vector<16xf32>
      %22 = vector.shape_cast %21 : vector<16xf32> to vector<16x1xf32>
      %c0_19 = arith.constant 0 : index
      %c0_20 = arith.constant 0 : index
      %23 = vector.load %arg6[%c0_19, %c0_20] : memref<16x512xf32, #tpu.memory_space<vmem>>, vector<16x512xf32>
      %cst_21 = arith.constant dense<0.000000e+00> : vector<16xf32>
      %24 = vector.multi_reduction <add>, %23, %cst_21 [1] : vector<16x512xf32> to vector<16xf32>
      %25 = vector.shape_cast %24 : vector<16xf32> to vector<16x1xf32>
      %cst_22 = arith.constant 0.001953125 : f32
      %26 = vector.broadcast %cst_22 : f32 to vector<16x1xf32>
      %27 = arith.mulf %22, %26 : vector<16x1xf32>
      %cst_23 = arith.constant 0.001953125 : f32
      %28 = vector.broadcast %cst_23 : f32 to vector<16x1xf32>
      %29 = arith.mulf %25, %28 : vector<16x1xf32>
      %30 = arith.mulf %27, %27 : vector<16x1xf32>
      %31 = arith.subf %29, %30 : vector<16x1xf32>
      %cst_24 = arith.constant 0.000000e+00 : f32
      %32 = vector.broadcast %cst_24 : f32 to vector<16x1xf32>
      %33 = arith.maximumf %31, %32 : vector<16x1xf32>
      %cst_25 = arith.constant 9.99999974E-6 : f32
      %34 = vector.broadcast %cst_25 : f32 to vector<16x1xf32>
      %35 = arith.addf %33, %34 : vector<16x1xf32>
      %36 = math.rsqrt %35 : vector<16x1xf32>
      %cst_26 = arith.constant 0.000000e+00 : f32
      %37 = vector.broadcast %cst_26 : f32 to vector<16x1xf32>
      %38 = arith.subf %37, %27 : vector<16x1xf32>
      %39 = arith.mulf %38, %36 : vector<16x1xf32>
      %c0_27 = arith.constant 0 : index
      %c0_28 = arith.constant 0 : index
      %c0_29 = arith.constant 0 : index
      %40 = vector.load %arg4[%c0_27, %c0_28, %c0_29] : memref<1x16x512xf32, #tpu.memory_space<vmem>>, vector<1x16x512xf32>
      %41 = vector.shape_cast %40 : vector<1x16x512xf32> to vector<16x512xf32>
      %42 = vector.broadcast %36 : vector<16x1xf32> to vector<16x512xf32>
      %43 = arith.mulf %41, %42 : vector<16x512xf32>
      %44 = vector.broadcast %39 : vector<16x1xf32> to vector<16x512xf32>
      %45 = arith.addf %43, %44 : vector<16x512xf32>
      %cst_30 = arith.constant 0.000000e+00 : f32
      %46 = vector.broadcast %cst_30 : f32 to vector<16x512xf32>
      %47 = arith.maximumf %45, %46 : vector<16x512xf32>
      %c0_31 = arith.constant 0 : index
      %c0_32 = arith.constant 0 : index
      %48 = vector.load %arg3[%c0_31, %c0_32] : memref<16x512xf32, #tpu.memory_space<vmem>>, vector<16x512xf32>
      tpu.vector_store %arg3[%c0_31, %c0_32], %47 {strides = array<i32>} : memref<16x512xf32, #tpu.memory_space<vmem>>, vector<16x512xf32>,
    } else {
    }
    return
  }
  func.func @transform_0(%arg0: i32) -> (i32, i32) {
    %c0_i32 = arith.constant 0 : i32
    %c0_i32_0 = arith.constant 0 : i32
    %c0_i32_1 = arith.constant 0 : i32
    return %c0_i32, %c0_i32_0 : i32, i32
  }
  func.func @transform_1(%arg0: i32) -> (i32, i32) {
    %c0_i32 = arith.constant 0 : i32
    %c0_i32_0 = arith.constant 0 : i32
    return %c0_i32, %arg0 : i32, i32
  }
  func.func @transform_2(%arg0: i32) -> (i32, i32) {
    %c0_i32 = arith.constant 0 : i32
    %c0_i32_0 = arith.constant 0 : i32
    %c0_i32_1 = arith.constant 0 : i32
    return %c0_i32, %c0_i32_0 : i32, i32
  }
}

module attributes {stable_mosaic.version = 11 : i64} {
  func.func @kernel(%arg0: i32, %arg1: memref<16x512xbf16, #tpu.memory_space<vmem>>, %arg2: memref<512x512xbf16, #tpu.memory_space<vmem>>, %arg3: memref<16x512xf32, #tpu.memory_space<vmem>>, %arg4: memref<1x16x512xf32, #tpu.memory_space<vmem>>, %arg5: memref<16x512xf32, #tpu.memory_space<vmem>>, %arg6: memref<16x512xf32, #tpu.memory_space<vmem>>) attributes {dimension_semantics = [#tpu.dimension_semantics<arbitrary>], iteration_bounds = array<i64: 1>, scalar_prefetch = 0 : i64, scratch_operands = 3 : i64, tpu.core_type = #tpu.core_type<tc>, window_params = [{pipeline_mode = #tpu.pipeline_mode<synchronous>, transform_indices = @transform_0, window_bounds = array<i64: 16, 512>}, {transform_indices = @transform_1, window_bounds = array<i64: 512, 512>}, {pipeline_mode = #tpu.pipeline_mode<synchronous>, transform_indices = @transform_2, window_bounds = array<i64: 16, 512>}]} {
    %c0 = arith.constant 0 : index
    %c0_0 = arith.constant 0 : index
    %0 = vector.load %arg1[%c0, %c0_0] : memref<16x512xbf16, #tpu.memory_space<vmem>>, vector<16x512xbf16>
    %c0_1 = arith.constant 0 : index
    %c0_2 = arith.constant 0 : index
    %1 = vector.load %arg2[%c0_1, %c0_2] : memref<512x512xbf16, #tpu.memory_space<vmem>>, vector<512x512xbf16>
    %cst = arith.constant dense<0.000000e+00> : vector<16x512xf32>
    %2 = tpu.matmul %0, %1, %cst {dimension_numbers = #tpu.dot_dimension_numbers<[1], [0], [0], [1], [0, 0, 1, 1], [], []>} : vector<16x512xbf16>, vector<512x512xbf16>, vector<16x512xf32> -> vector<16x512xf32>
    %3 = arith.index_cast %arg0 : i32 to index
    %c0_3 = arith.constant 0 : index
    %c0_4 = arith.constant 0 : index
    %4 = vector.load %arg4[%3, %c0_3, %c0_4] : memref<1x16x512xf32, #tpu.memory_space<vmem>>, vector<1x16x512xf32>
    %5 = vector.shape_cast %4 : vector<1x16x512xf32> to vector<16x512xf32>
    %6 = vector.shape_cast %2 : vector<16x512xf32> to vector<1x16x512xf32>
    tpu.vector_store %arg4[%3, %c0_3, %c0_4], %6 {strides = array<i32>} : memref<1x16x512xf32, #tpu.memory_space<vmem>>, vector<1x16x512xf32>,
    %c0_i32 = arith.constant 0 : i32
    %7 = arith.cmpi eq, %arg0, %c0_i32 : i32
    %8 = arith.extui %7 : i1 to i32
    %c0_i32_5 = arith.constant 0 : i32
    %9 = arith.cmpi ne, %8, %c0_i32_5 : i32
    scf.if %9 {
      %cst_16 = arith.constant 0.000000e+00 : f32
      %20 = vector.broadcast %cst_16 : f32 to vector<16x512xf32>
      %c0_17 = arith.constant 0 : index
      %c0_18 = arith.constant 0 : index
      %21 = vector.load %arg5[%c0_17, %c0_18] : memref<16x512xf32, #tpu.memory_space<vmem>>, vector<16x512xf32>
      tpu.vector_store %arg5[%c0_17, %c0_18], %20 {strides = array<i32>} : memref<16x512xf32, #tpu.memory_space<vmem>>, vector<16x512xf32>,
      %cst_19 = arith.constant 0.000000e+00 : f32
      %22 = vector.broadcast %cst_19 : f32 to vector<16x512xf32>
      %c0_20 = arith.constant 0 : index
      %c0_21 = arith.constant 0 : index
      %23 = vector.load %arg6[%c0_20, %c0_21] : memref<16x512xf32, #tpu.memory_space<vmem>>, vector<16x512xf32>
      tpu.vector_store %arg6[%c0_20, %c0_21], %22 {strides = array<i32>} : memref<16x512xf32, #tpu.memory_space<vmem>>, vector<16x512xf32>,
    } else {
    }
    %c0_6 = arith.constant 0 : index
    %c0_7 = arith.constant 0 : index
    %10 = vector.load %arg5[%c0_6, %c0_7] : memref<16x512xf32, #tpu.memory_space<vmem>>, vector<16x512xf32>
    %11 = arith.addf %10, %2 : vector<16x512xf32>
    %c0_8 = arith.constant 0 : index
    %c0_9 = arith.constant 0 : index
    %12 = vector.load %arg5[%c0_8, %c0_9] : memref<16x512xf32, #tpu.memory_space<vmem>>, vector<16x512xf32>
    tpu.vector_store %arg5[%c0_8, %c0_9], %11 {strides = array<i32>} : memref<16x512xf32, #tpu.memory_space<vmem>>, vector<16x512xf32>,
    %c0_10 = arith.constant 0 : index
    %c0_11 = arith.constant 0 : index
    %13 = vector.load %arg6[%c0_10, %c0_11] : memref<16x512xf32, #tpu.memory_space<vmem>>, vector<16x512xf32>
    %14 = arith.mulf %2, %2 : vector<16x512xf32>
    %15 = arith.addf %13, %14 : vector<16x512xf32>
    %c0_12 = arith.constant 0 : index
    %c0_13 = arith.constant 0 : index
    %16 = vector.load %arg6[%c0_12, %c0_13] : memref<16x512xf32, #tpu.memory_space<vmem>>, vector<16x512xf32>
    tpu.vector_store %arg6[%c0_12, %c0_13], %15 {strides = array<i32>} : memref<16x512xf32, #tpu.memory_space<vmem>>, vector<16x512xf32>,
    %c0_i32_14 = arith.constant 0 : i32
    %17 = arith.cmpi eq, %arg0, %c0_i32_14 : i32
    %18 = arith.extui %17 : i1 to i32
    %c0_i32_15 = arith.constant 0 : i32
    %19 = arith.cmpi ne, %18, %c0_i32_15 : i32
    scf.if %19 {
      %c0_16 = arith.constant 0 : index
      %c0_17 = arith.constant 0 : index
      %20 = vector.load %arg5[%c0_16, %c0_17] : memref<16x512xf32, #tpu.memory_space<vmem>>, vector<16x512xf32>
      %cst_18 = arith.constant dense<0.000000e+00> : vector<16xf32>
      %21 = vector.multi_reduction <add>, %20, %cst_18 [1] : vector<16x512xf32> to vector<16xf32>
      %22 = vector.shape_cast %21 : vector<16xf32> to vector<16x1xf32>
      %c0_19 = arith.constant 0 : index
      %c0_20 = arith.constant 0 : index
      %23 = vector.load %arg6[%c0_19, %c0_20] : memref<16x512xf32, #tpu.memory_space<vmem>>, vector<16x512xf32>
      %cst_21 = arith.constant dense<0.000000e+00> : vector<16xf32>
      %24 = vector.multi_reduction <add>, %23, %cst_21 [1] : vector<16x512xf32> to vector<16xf32>
      %25 = vector.shape_cast %24 : vector<16xf32> to vector<16x1xf32>
      %cst_22 = arith.constant 0.001953125 : f32
      %26 = vector.broadcast %cst_22 : f32 to vector<16x1xf32>
      %27 = arith.mulf %22, %26 : vector<16x1xf32>
      %cst_23 = arith.constant 0.001953125 : f32
      %28 = vector.broadcast %cst_23 : f32 to vector<16x1xf32>
      %29 = arith.mulf %25, %28 : vector<16x1xf32>
      %30 = arith.mulf %27, %27 : vector<16x1xf32>
      %31 = arith.subf %29, %30 : vector<16x1xf32>
      %cst_24 = arith.constant 0.000000e+00 : f32
      %32 = vector.broadcast %cst_24 : f32 to vector<16x1xf32>
      %33 = arith.maximumf %31, %32 : vector<16x1xf32>
      %cst_25 = arith.constant 9.99999974E-6 : f32
      %34 = vector.broadcast %cst_25 : f32 to vector<16x1xf32>
      %35 = arith.addf %33, %34 : vector<16x1xf32>
      %36 = math.rsqrt %35 : vector<16x1xf32>
      %cst_26 = arith.constant 0.000000e+00 : f32
      %37 = vector.broadcast %cst_26 : f32 to vector<16x1xf32>
      %38 = arith.subf %37, %27 : vector<16x1xf32>
      %39 = arith.mulf %38, %36 : vector<16x1xf32>
      %c0_27 = arith.constant 0 : index
      %c0_28 = arith.constant 0 : index
      %c0_29 = arith.constant 0 : index
      %40 = vector.load %arg4[%c0_27, %c0_28, %c0_29] : memref<1x16x512xf32, #tpu.memory_space<vmem>>, vector<1x16x512xf32>
      %41 = vector.shape_cast %40 : vector<1x16x512xf32> to vector<16x512xf32>
      %42 = vector.broadcast %36 : vector<16x1xf32> to vector<16x512xf32>
      %43 = arith.mulf %41, %42 : vector<16x512xf32>
      %44 = vector.broadcast %39 : vector<16x1xf32> to vector<16x512xf32>
      %45 = arith.addf %43, %44 : vector<16x512xf32>
      %cst_30 = arith.constant 0.000000e+00 : f32
      %46 = vector.broadcast %cst_30 : f32 to vector<16x512xf32>
      %47 = arith.maximumf %45, %46 : vector<16x512xf32>
      %c0_31 = arith.constant 0 : index
      %c0_32 = arith.constant 0 : index
      %48 = vector.load %arg3[%c0_31, %c0_32] : memref<16x512xf32, #tpu.memory_space<vmem>>, vector<16x512xf32>
      tpu.vector_store %arg3[%c0_31, %c0_32], %47 {strides = array<i32>} : memref<16x512xf32, #tpu.memory_space<vmem>>, vector<16x512xf32>,
    } else {
    }
    return
  }
  func.func @transform_0(%arg0: i32) -> (i32, i32) {
    %c0_i32 = arith.constant 0 : i32
    %c0_i32_0 = arith.constant 0 : i32
    %c0_i32_1 = arith.constant 0 : i32
    return %c0_i32, %c0_i32_0 : i32, i32
  }
  func.func @transform_1(%arg0: i32) -> (i32, i32) {
    %c0_i32 = arith.constant 0 : i32
    %c0_i32_0 = arith.constant 0 : i32
    return %c0_i32, %arg0 : i32, i32
  }
  func.func @transform_2(%arg0: i32) -> (i32, i32) {
    %c0_i32 = arith.constant 0 : i32
    %c0_i32_0 = arith.constant 0 : i32
    %c0_i32_1 = arith.constant 0 : i32
    return %c0_i32, %c0_i32_0 : i32, i32
  }
}

module attributes {stable_mosaic.version = 11 : i64} {
  func.func @kernel(%arg0: i32, %arg1: memref<32x512xbf16, #tpu.memory_space<vmem>>, %arg2: memref<512x128xbf16, #tpu.memory_space<vmem>>, %arg3: memref<32x128xf32, #tpu.memory_space<vmem>>, %arg4: memref<1x32x128xf32, #tpu.memory_space<vmem>>, %arg5: memref<32x128xf32, #tpu.memory_space<vmem>>, %arg6: memref<32x128xf32, #tpu.memory_space<vmem>>) attributes {dimension_semantics = [#tpu.dimension_semantics<arbitrary>], iteration_bounds = array<i64: 1>, scalar_prefetch = 0 : i64, scratch_operands = 3 : i64, tpu.core_type = #tpu.core_type<tc>, window_params = [{pipeline_mode = #tpu.pipeline_mode<synchronous>, transform_indices = @transform_0, window_bounds = array<i64: 32, 512>}, {transform_indices = @transform_1, window_bounds = array<i64: 512, 128>}, {pipeline_mode = #tpu.pipeline_mode<synchronous>, transform_indices = @transform_2, window_bounds = array<i64: 32, 128>}]} {
    %c0 = arith.constant 0 : index
    %c0_0 = arith.constant 0 : index
    %0 = vector.load %arg1[%c0, %c0_0] : memref<32x512xbf16, #tpu.memory_space<vmem>>, vector<32x512xbf16>
    %c0_1 = arith.constant 0 : index
    %c0_2 = arith.constant 0 : index
    %1 = vector.load %arg2[%c0_1, %c0_2] : memref<512x128xbf16, #tpu.memory_space<vmem>>, vector<512x128xbf16>
    %cst = arith.constant dense<0.000000e+00> : vector<32x128xf32>
    %2 = tpu.matmul %0, %1, %cst {dimension_numbers = #tpu.dot_dimension_numbers<[1], [0], [0], [1], [0, 0, 1, 1], [], []>} : vector<32x512xbf16>, vector<512x128xbf16>, vector<32x128xf32> -> vector<32x128xf32>
    %3 = arith.index_cast %arg0 : i32 to index
    %c0_3 = arith.constant 0 : index
    %c0_4 = arith.constant 0 : index
    %4 = vector.load %arg4[%3, %c0_3, %c0_4] : memref<1x32x128xf32, #tpu.memory_space<vmem>>, vector<1x32x128xf32>
    %5 = vector.shape_cast %4 : vector<1x32x128xf32> to vector<32x128xf32>
    %6 = vector.shape_cast %2 : vector<32x128xf32> to vector<1x32x128xf32>
    tpu.vector_store %arg4[%3, %c0_3, %c0_4], %6 {strides = array<i32>} : memref<1x32x128xf32, #tpu.memory_space<vmem>>, vector<1x32x128xf32>,
    %c0_i32 = arith.constant 0 : i32
    %7 = arith.cmpi eq, %arg0, %c0_i32 : i32
    %8 = arith.extui %7 : i1 to i32
    %c0_i32_5 = arith.constant 0 : i32
    %9 = arith.cmpi ne, %8, %c0_i32_5 : i32
    scf.if %9 {
      %cst_16 = arith.constant 0.000000e+00 : f32
      %20 = vector.broadcast %cst_16 : f32 to vector<32x128xf32>
      %c0_17 = arith.constant 0 : index
      %c0_18 = arith.constant 0 : index
      %21 = vector.load %arg5[%c0_17, %c0_18] : memref<32x128xf32, #tpu.memory_space<vmem>>, vector<32x128xf32>
      tpu.vector_store %arg5[%c0_17, %c0_18], %20 {strides = array<i32>} : memref<32x128xf32, #tpu.memory_space<vmem>>, vector<32x128xf32>,
      %cst_19 = arith.constant 0.000000e+00 : f32
      %22 = vector.broadcast %cst_19 : f32 to vector<32x128xf32>
      %c0_20 = arith.constant 0 : index
      %c0_21 = arith.constant 0 : index
      %23 = vector.load %arg6[%c0_20, %c0_21] : memref<32x128xf32, #tpu.memory_space<vmem>>, vector<32x128xf32>
      tpu.vector_store %arg6[%c0_20, %c0_21], %22 {strides = array<i32>} : memref<32x128xf32, #tpu.memory_space<vmem>>, vector<32x128xf32>,
    } else {
    }
    %c0_6 = arith.constant 0 : index
    %c0_7 = arith.constant 0 : index
    %10 = vector.load %arg5[%c0_6, %c0_7] : memref<32x128xf32, #tpu.memory_space<vmem>>, vector<32x128xf32>
    %11 = arith.addf %10, %2 : vector<32x128xf32>
    %c0_8 = arith.constant 0 : index
    %c0_9 = arith.constant 0 : index
    %12 = vector.load %arg5[%c0_8, %c0_9] : memref<32x128xf32, #tpu.memory_space<vmem>>, vector<32x128xf32>
    tpu.vector_store %arg5[%c0_8, %c0_9], %11 {strides = array<i32>} : memref<32x128xf32, #tpu.memory_space<vmem>>, vector<32x128xf32>,
    %c0_10 = arith.constant 0 : index
    %c0_11 = arith.constant 0 : index
    %13 = vector.load %arg6[%c0_10, %c0_11] : memref<32x128xf32, #tpu.memory_space<vmem>>, vector<32x128xf32>
    %14 = arith.mulf %2, %2 : vector<32x128xf32>
    %15 = arith.addf %13, %14 : vector<32x128xf32>
    %c0_12 = arith.constant 0 : index
    %c0_13 = arith.constant 0 : index
    %16 = vector.load %arg6[%c0_12, %c0_13] : memref<32x128xf32, #tpu.memory_space<vmem>>, vector<32x128xf32>
    tpu.vector_store %arg6[%c0_12, %c0_13], %15 {strides = array<i32>} : memref<32x128xf32, #tpu.memory_space<vmem>>, vector<32x128xf32>,
    %c0_i32_14 = arith.constant 0 : i32
    %17 = arith.cmpi eq, %arg0, %c0_i32_14 : i32
    %18 = arith.extui %17 : i1 to i32
    %c0_i32_15 = arith.constant 0 : i32
    %19 = arith.cmpi ne, %18, %c0_i32_15 : i32
    scf.if %19 {
      %c0_16 = arith.constant 0 : index
      %c0_17 = arith.constant 0 : index
      %20 = vector.load %arg5[%c0_16, %c0_17] : memref<32x128xf32, #tpu.memory_space<vmem>>, vector<32x128xf32>
      %cst_18 = arith.constant dense<0.000000e+00> : vector<32xf32>
      %21 = vector.multi_reduction <add>, %20, %cst_18 [1] : vector<32x128xf32> to vector<32xf32>
      %22 = vector.shape_cast %21 : vector<32xf32> to vector<32x1xf32>
      %c0_19 = arith.constant 0 : index
      %c0_20 = arith.constant 0 : index
      %23 = vector.load %arg6[%c0_19, %c0_20] : memref<32x128xf32, #tpu.memory_space<vmem>>, vector<32x128xf32>
      %cst_21 = arith.constant dense<0.000000e+00> : vector<32xf32>
      %24 = vector.multi_reduction <add>, %23, %cst_21 [1] : vector<32x128xf32> to vector<32xf32>
      %25 = vector.shape_cast %24 : vector<32xf32> to vector<32x1xf32>
      %cst_22 = arith.constant 1.562500e-02 : f32
      %26 = vector.broadcast %cst_22 : f32 to vector<32x1xf32>
      %27 = arith.mulf %22, %26 : vector<32x1xf32>
      %cst_23 = arith.constant 1.562500e-02 : f32
      %28 = vector.broadcast %cst_23 : f32 to vector<32x1xf32>
      %29 = arith.mulf %25, %28 : vector<32x1xf32>
      %30 = arith.mulf %27, %27 : vector<32x1xf32>
      %31 = arith.subf %29, %30 : vector<32x1xf32>
      %cst_24 = arith.constant 0.000000e+00 : f32
      %32 = vector.broadcast %cst_24 : f32 to vector<32x1xf32>
      %33 = arith.maximumf %31, %32 : vector<32x1xf32>
      %cst_25 = arith.constant 9.99999974E-6 : f32
      %34 = vector.broadcast %cst_25 : f32 to vector<32x1xf32>
      %35 = arith.addf %33, %34 : vector<32x1xf32>
      %36 = math.rsqrt %35 : vector<32x1xf32>
      %cst_26 = arith.constant 0.000000e+00 : f32
      %37 = vector.broadcast %cst_26 : f32 to vector<32x1xf32>
      %38 = arith.subf %37, %27 : vector<32x1xf32>
      %39 = arith.mulf %38, %36 : vector<32x1xf32>
      %c0_27 = arith.constant 0 : index
      %c0_28 = arith.constant 0 : index
      %c0_29 = arith.constant 0 : index
      %40 = vector.load %arg4[%c0_27, %c0_28, %c0_29] : memref<1x32x128xf32, #tpu.memory_space<vmem>>, vector<1x32x128xf32>
      %41 = vector.shape_cast %40 : vector<1x32x128xf32> to vector<32x128xf32>
      %42 = vector.broadcast %36 : vector<32x1xf32> to vector<32x128xf32>
      %43 = arith.mulf %41, %42 : vector<32x128xf32>
      %44 = vector.broadcast %39 : vector<32x1xf32> to vector<32x128xf32>
      %45 = arith.addf %43, %44 : vector<32x128xf32>
      %cst_30 = arith.constant 0.000000e+00 : f32
      %46 = vector.broadcast %cst_30 : f32 to vector<32x128xf32>
      %47 = arith.maximumf %45, %46 : vector<32x128xf32>
      %c0_31 = arith.constant 0 : index
      %c0_32 = arith.constant 0 : index
      %48 = vector.load %arg3[%c0_31, %c0_32] : memref<32x128xf32, #tpu.memory_space<vmem>>, vector<32x128xf32>
      tpu.vector_store %arg3[%c0_31, %c0_32], %47 {strides = array<i32>} : memref<32x128xf32, #tpu.memory_space<vmem>>, vector<32x128xf32>,
    } else {
    }
    return
  }
  func.func @transform_0(%arg0: i32) -> (i32, i32) {
    %c0_i32 = arith.constant 0 : i32
    %c0_i32_0 = arith.constant 0 : i32
    %c0_i32_1 = arith.constant 0 : i32
    return %c0_i32, %c0_i32_0 : i32, i32
  }
  func.func @transform_1(%arg0: i32) -> (i32, i32) {
    %c0_i32 = arith.constant 0 : i32
    %c0_i32_0 = arith.constant 0 : i32
    return %c0_i32, %arg0 : i32, i32
  }
  func.func @transform_2(%arg0: i32) -> (i32, i32) {
    %c0_i32 = arith.constant 0 : i32
    %c0_i32_0 = arith.constant 0 : i32
    %c0_i32_1 = arith.constant 0 : i32
    return %c0_i32, %c0_i32_0 : i32, i32
  }
}

module attributes {stable_mosaic.version = 11 : i64} {
  func.func @kernel(%arg0: i32, %arg1: memref<32x896xbf16, #tpu.memory_space<vmem>>, %arg2: memref<896x128xbf16, #tpu.memory_space<vmem>>, %arg3: memref<32x128xf32, #tpu.memory_space<vmem>>, %arg4: memref<1x32x128xf32, #tpu.memory_space<vmem>>, %arg5: memref<32x128xf32, #tpu.memory_space<vmem>>, %arg6: memref<32x128xf32, #tpu.memory_space<vmem>>) attributes {dimension_semantics = [#tpu.dimension_semantics<arbitrary>], iteration_bounds = array<i64: 1>, scalar_prefetch = 0 : i64, scratch_operands = 3 : i64, tpu.core_type = #tpu.core_type<tc>, window_params = [{pipeline_mode = #tpu.pipeline_mode<synchronous>, transform_indices = @transform_0, window_bounds = array<i64: 32, 896>}, {transform_indices = @transform_1, window_bounds = array<i64: 896, 128>}, {pipeline_mode = #tpu.pipeline_mode<synchronous>, transform_indices = @transform_2, window_bounds = array<i64: 32, 128>}]} {
    %c0 = arith.constant 0 : index
    %c0_0 = arith.constant 0 : index
    %0 = vector.load %arg1[%c0, %c0_0] : memref<32x896xbf16, #tpu.memory_space<vmem>>, vector<32x896xbf16>
    %c0_1 = arith.constant 0 : index
    %c0_2 = arith.constant 0 : index
    %1 = vector.load %arg2[%c0_1, %c0_2] : memref<896x128xbf16, #tpu.memory_space<vmem>>, vector<896x128xbf16>
    %cst = arith.constant dense<0.000000e+00> : vector<32x128xf32>
    %2 = tpu.matmul %0, %1, %cst {dimension_numbers = #tpu.dot_dimension_numbers<[1], [0], [0], [1], [0, 0, 1, 1], [], []>} : vector<32x896xbf16>, vector<896x128xbf16>, vector<32x128xf32> -> vector<32x128xf32>
    %3 = arith.index_cast %arg0 : i32 to index
    %c0_3 = arith.constant 0 : index
    %c0_4 = arith.constant 0 : index
    %4 = vector.load %arg4[%3, %c0_3, %c0_4] : memref<1x32x128xf32, #tpu.memory_space<vmem>>, vector<1x32x128xf32>
    %5 = vector.shape_cast %4 : vector<1x32x128xf32> to vector<32x128xf32>
    %6 = vector.shape_cast %2 : vector<32x128xf32> to vector<1x32x128xf32>
    tpu.vector_store %arg4[%3, %c0_3, %c0_4], %6 {strides = array<i32>} : memref<1x32x128xf32, #tpu.memory_space<vmem>>, vector<1x32x128xf32>,
    %c0_i32 = arith.constant 0 : i32
    %7 = arith.cmpi eq, %arg0, %c0_i32 : i32
    %8 = arith.extui %7 : i1 to i32
    %c0_i32_5 = arith.constant 0 : i32
    %9 = arith.cmpi ne, %8, %c0_i32_5 : i32
    scf.if %9 {
      %cst_16 = arith.constant 0.000000e+00 : f32
      %20 = vector.broadcast %cst_16 : f32 to vector<32x128xf32>
      %c0_17 = arith.constant 0 : index
      %c0_18 = arith.constant 0 : index
      %21 = vector.load %arg5[%c0_17, %c0_18] : memref<32x128xf32, #tpu.memory_space<vmem>>, vector<32x128xf32>
      tpu.vector_store %arg5[%c0_17, %c0_18], %20 {strides = array<i32>} : memref<32x128xf32, #tpu.memory_space<vmem>>, vector<32x128xf32>,
      %cst_19 = arith.constant 0.000000e+00 : f32
      %22 = vector.broadcast %cst_19 : f32 to vector<32x128xf32>
      %c0_20 = arith.constant 0 : index
      %c0_21 = arith.constant 0 : index
      %23 = vector.load %arg6[%c0_20, %c0_21] : memref<32x128xf32, #tpu.memory_space<vmem>>, vector<32x128xf32>
      tpu.vector_store %arg6[%c0_20, %c0_21], %22 {strides = array<i32>} : memref<32x128xf32, #tpu.memory_space<vmem>>, vector<32x128xf32>,
    } else {
    }
    %c0_6 = arith.constant 0 : index
    %c0_7 = arith.constant 0 : index
    %10 = vector.load %arg5[%c0_6, %c0_7] : memref<32x128xf32, #tpu.memory_space<vmem>>, vector<32x128xf32>
    %11 = arith.addf %10, %2 : vector<32x128xf32>
    %c0_8 = arith.constant 0 : index
    %c0_9 = arith.constant 0 : index
    %12 = vector.load %arg5[%c0_8, %c0_9] : memref<32x128xf32, #tpu.memory_space<vmem>>, vector<32x128xf32>
    tpu.vector_store %arg5[%c0_8, %c0_9], %11 {strides = array<i32>} : memref<32x128xf32, #tpu.memory_space<vmem>>, vector<32x128xf32>,
    %c0_10 = arith.constant 0 : index
    %c0_11 = arith.constant 0 : index
    %13 = vector.load %arg6[%c0_10, %c0_11] : memref<32x128xf32, #tpu.memory_space<vmem>>, vector<32x128xf32>
    %14 = arith.mulf %2, %2 : vector<32x128xf32>
    %15 = arith.addf %13, %14 : vector<32x128xf32>
    %c0_12 = arith.constant 0 : index
    %c0_13 = arith.constant 0 : index
    %16 = vector.load %arg6[%c0_12, %c0_13] : memref<32x128xf32, #tpu.memory_space<vmem>>, vector<32x128xf32>
    tpu.vector_store %arg6[%c0_12, %c0_13], %15 {strides = array<i32>} : memref<32x128xf32, #tpu.memory_space<vmem>>, vector<32x128xf32>,
    %c0_i32_14 = arith.constant 0 : i32
    %17 = arith.cmpi eq, %arg0, %c0_i32_14 : i32
    %18 = arith.extui %17 : i1 to i32
    %c0_i32_15 = arith.constant 0 : i32
    %19 = arith.cmpi ne, %18, %c0_i32_15 : i32
    scf.if %19 {
      %c0_16 = arith.constant 0 : index
      %c0_17 = arith.constant 0 : index
      %20 = vector.load %arg5[%c0_16, %c0_17] : memref<32x128xf32, #tpu.memory_space<vmem>>, vector<32x128xf32>
      %cst_18 = arith.constant dense<0.000000e+00> : vector<32xf32>
      %21 = vector.multi_reduction <add>, %20, %cst_18 [1] : vector<32x128xf32> to vector<32xf32>
      %22 = vector.shape_cast %21 : vector<32xf32> to vector<32x1xf32>
      %c0_19 = arith.constant 0 : index
      %c0_20 = arith.constant 0 : index
      %23 = vector.load %arg6[%c0_19, %c0_20] : memref<32x128xf32, #tpu.memory_space<vmem>>, vector<32x128xf32>
      %cst_21 = arith.constant dense<0.000000e+00> : vector<32xf32>
      %24 = vector.multi_reduction <add>, %23, %cst_21 [1] : vector<32x128xf32> to vector<32xf32>
      %25 = vector.shape_cast %24 : vector<32xf32> to vector<32x1xf32>
      %cst_22 = arith.constant 1.562500e-02 : f32
      %26 = vector.broadcast %cst_22 : f32 to vector<32x1xf32>
      %27 = arith.mulf %22, %26 : vector<32x1xf32>
      %cst_23 = arith.constant 1.562500e-02 : f32
      %28 = vector.broadcast %cst_23 : f32 to vector<32x1xf32>
      %29 = arith.mulf %25, %28 : vector<32x1xf32>
      %30 = arith.mulf %27, %27 : vector<32x1xf32>
      %31 = arith.subf %29, %30 : vector<32x1xf32>
      %cst_24 = arith.constant 0.000000e+00 : f32
      %32 = vector.broadcast %cst_24 : f32 to vector<32x1xf32>
      %33 = arith.maximumf %31, %32 : vector<32x1xf32>
      %cst_25 = arith.constant 9.99999974E-6 : f32
      %34 = vector.broadcast %cst_25 : f32 to vector<32x1xf32>
      %35 = arith.addf %33, %34 : vector<32x1xf32>
      %36 = math.rsqrt %35 : vector<32x1xf32>
      %cst_26 = arith.constant 0.000000e+00 : f32
      %37 = vector.broadcast %cst_26 : f32 to vector<32x1xf32>
      %38 = arith.subf %37, %27 : vector<32x1xf32>
      %39 = arith.mulf %38, %36 : vector<32x1xf32>
      %c0_27 = arith.constant 0 : index
      %c0_28 = arith.constant 0 : index
      %c0_29 = arith.constant 0 : index
      %40 = vector.load %arg4[%c0_27, %c0_28, %c0_29] : memref<1x32x128xf32, #tpu.memory_space<vmem>>, vector<1x32x128xf32>
      %41 = vector.shape_cast %40 : vector<1x32x128xf32> to vector<32x128xf32>
      %42 = vector.broadcast %36 : vector<32x1xf32> to vector<32x128xf32>
      %43 = arith.mulf %41, %42 : vector<32x128xf32>
      %44 = vector.broadcast %39 : vector<32x1xf32> to vector<32x128xf32>
      %45 = arith.addf %43, %44 : vector<32x128xf32>
      %cst_30 = arith.constant 0.000000e+00 : f32
      %46 = vector.broadcast %cst_30 : f32 to vector<32x128xf32>
      %47 = arith.maximumf %45, %46 : vector<32x128xf32>
      %c0_31 = arith.constant 0 : index
      %c0_32 = arith.constant 0 : index
      %48 = vector.load %arg3[%c0_31, %c0_32] : memref<32x128xf32, #tpu.memory_space<vmem>>, vector<32x128xf32>
      tpu.vector_store %arg3[%c0_31, %c0_32], %47 {strides = array<i32>} : memref<32x128xf32, #tpu.memory_space<vmem>>, vector<32x128xf32>,
    } else {
    }
    return
  }
  func.func @transform_0(%arg0: i32) -> (i32, i32) {
    %c0_i32 = arith.constant 0 : i32
    %c0_i32_0 = arith.constant 0 : i32
    %c0_i32_1 = arith.constant 0 : i32
    return %c0_i32, %c0_i32_0 : i32, i32
  }
  func.func @transform_1(%arg0: i32) -> (i32, i32) {
    %c0_i32 = arith.constant 0 : i32
    %c0_i32_0 = arith.constant 0 : i32
    return %c0_i32, %arg0 : i32, i32
  }
  func.func @transform_2(%arg0: i32) -> (i32, i32) {
    %c0_i32 = arith.constant 0 : i32
    %c0_i32_0 = arith.constant 0 : i32
    %c0_i32_1 = arith.constant 0 : i32
    return %c0_i32, %c0_i32_0 : i32, i32
  }
}

module attributes {stable_mosaic.version = 11 : i64} {
  func.func @kernel(%arg0: i32, %arg1: memref<16x896xbf16, #tpu.memory_space<vmem>>, %arg2: memref<896x512xbf16, #tpu.memory_space<vmem>>, %arg3: memref<16x512xf32, #tpu.memory_space<vmem>>, %arg4: memref<16x512xf32, #tpu.memory_space<vmem>>, %arg5: memref<1x16x512xf32, #tpu.memory_space<vmem>>, %arg6: memref<16x512xf32, #tpu.memory_space<vmem>>, %arg7: memref<16x512xf32, #tpu.memory_space<vmem>>) attributes {dimension_semantics = [#tpu.dimension_semantics<arbitrary>], iteration_bounds = array<i64: 1>, scalar_prefetch = 0 : i64, scratch_operands = 3 : i64, tpu.core_type = #tpu.core_type<tc>, window_params = [{pipeline_mode = #tpu.pipeline_mode<synchronous>, transform_indices = @transform_0, window_bounds = array<i64: 16, 896>}, {transform_indices = @transform_1, window_bounds = array<i64: 896, 512>}, {pipeline_mode = #tpu.pipeline_mode<synchronous>, transform_indices = @transform_2, window_bounds = array<i64: 16, 512>}, {pipeline_mode = #tpu.pipeline_mode<synchronous>, transform_indices = @transform_3, window_bounds = array<i64: 16, 512>}]} {
    %c0 = arith.constant 0 : index
    %c0_0 = arith.constant 0 : index
    %0 = vector.load %arg1[%c0, %c0_0] : memref<16x896xbf16, #tpu.memory_space<vmem>>, vector<16x896xbf16>
    %c0_1 = arith.constant 0 : index
    %c0_2 = arith.constant 0 : index
    %1 = vector.load %arg2[%c0_1, %c0_2] : memref<896x512xbf16, #tpu.memory_space<vmem>>, vector<896x512xbf16>
    %cst = arith.constant dense<0.000000e+00> : vector<16x512xf32>
    %2 = tpu.matmul %0, %1, %cst {dimension_numbers = #tpu.dot_dimension_numbers<[1], [0], [0], [1], [0, 0, 1, 1], [], []>} : vector<16x896xbf16>, vector<896x512xbf16>, vector<16x512xf32> -> vector<16x512xf32>
    %3 = arith.index_cast %arg0 : i32 to index
    %c0_3 = arith.constant 0 : index
    %c0_4 = arith.constant 0 : index
    %4 = vector.load %arg5[%3, %c0_3, %c0_4] : memref<1x16x512xf32, #tpu.memory_space<vmem>>, vector<1x16x512xf32>
    %5 = vector.shape_cast %4 : vector<1x16x512xf32> to vector<16x512xf32>
    %6 = vector.shape_cast %2 : vector<16x512xf32> to vector<1x16x512xf32>
    tpu.vector_store %arg5[%3, %c0_3, %c0_4], %6 {strides = array<i32>} : memref<1x16x512xf32, #tpu.memory_space<vmem>>, vector<1x16x512xf32>,
    %c0_i32 = arith.constant 0 : i32
    %7 = arith.cmpi eq, %arg0, %c0_i32 : i32
    %8 = arith.extui %7 : i1 to i32
    %c0_i32_5 = arith.constant 0 : i32
    %9 = arith.cmpi ne, %8, %c0_i32_5 : i32
    scf.if %9 {
      %cst_16 = arith.constant 0.000000e+00 : f32
      %20 = vector.broadcast %cst_16 : f32 to vector<16x512xf32>
      %c0_17 = arith.constant 0 : index
      %c0_18 = arith.constant 0 : index
      %21 = vector.load %arg6[%c0_17, %c0_18] : memref<16x512xf32, #tpu.memory_space<vmem>>, vector<16x512xf32>
      tpu.vector_store %arg6[%c0_17, %c0_18], %20 {strides = array<i32>} : memref<16x512xf32, #tpu.memory_space<vmem>>, vector<16x512xf32>,
      %cst_19 = arith.constant 0.000000e+00 : f32
      %22 = vector.broadcast %cst_19 : f32 to vector<16x512xf32>
      %c0_20 = arith.constant 0 : index
      %c0_21 = arith.constant 0 : index
      %23 = vector.load %arg7[%c0_20, %c0_21] : memref<16x512xf32, #tpu.memory_space<vmem>>, vector<16x512xf32>
      tpu.vector_store %arg7[%c0_20, %c0_21], %22 {strides = array<i32>} : memref<16x512xf32, #tpu.memory_space<vmem>>, vector<16x512xf32>,
    } else {
    }
    %c0_6 = arith.constant 0 : index
    %c0_7 = arith.constant 0 : index
    %10 = vector.load %arg6[%c0_6, %c0_7] : memref<16x512xf32, #tpu.memory_space<vmem>>, vector<16x512xf32>
    %11 = arith.addf %10, %2 : vector<16x512xf32>
    %c0_8 = arith.constant 0 : index
    %c0_9 = arith.constant 0 : index
    %12 = vector.load %arg6[%c0_8, %c0_9] : memref<16x512xf32, #tpu.memory_space<vmem>>, vector<16x512xf32>
    tpu.vector_store %arg6[%c0_8, %c0_9], %11 {strides = array<i32>} : memref<16x512xf32, #tpu.memory_space<vmem>>, vector<16x512xf32>,
    %c0_10 = arith.constant 0 : index
    %c0_11 = arith.constant 0 : index
    %13 = vector.load %arg7[%c0_10, %c0_11] : memref<16x512xf32, #tpu.memory_space<vmem>>, vector<16x512xf32>
    %14 = arith.mulf %2, %2 : vector<16x512xf32>
    %15 = arith.addf %13, %14 : vector<16x512xf32>
    %c0_12 = arith.constant 0 : index
    %c0_13 = arith.constant 0 : index
    %16 = vector.load %arg7[%c0_12, %c0_13] : memref<16x512xf32, #tpu.memory_space<vmem>>, vector<16x512xf32>
    tpu.vector_store %arg7[%c0_12, %c0_13], %15 {strides = array<i32>} : memref<16x512xf32, #tpu.memory_space<vmem>>, vector<16x512xf32>,
    %c0_i32_14 = arith.constant 0 : i32
    %17 = arith.cmpi eq, %arg0, %c0_i32_14 : i32
    %18 = arith.extui %17 : i1 to i32
    %c0_i32_15 = arith.constant 0 : i32
    %19 = arith.cmpi ne, %18, %c0_i32_15 : i32
    scf.if %19 {
      %c0_16 = arith.constant 0 : index
      %c0_17 = arith.constant 0 : index
      %20 = vector.load %arg6[%c0_16, %c0_17] : memref<16x512xf32, #tpu.memory_space<vmem>>, vector<16x512xf32>
      %cst_18 = arith.constant dense<0.000000e+00> : vector<16xf32>
      %21 = vector.multi_reduction <add>, %20, %cst_18 [1] : vector<16x512xf32> to vector<16xf32>
      %22 = vector.shape_cast %21 : vector<16xf32> to vector<16x1xf32>
      %c0_19 = arith.constant 0 : index
      %c0_20 = arith.constant 0 : index
      %23 = vector.load %arg7[%c0_19, %c0_20] : memref<16x512xf32, #tpu.memory_space<vmem>>, vector<16x512xf32>
      %cst_21 = arith.constant dense<0.000000e+00> : vector<16xf32>
      %24 = vector.multi_reduction <add>, %23, %cst_21 [1] : vector<16x512xf32> to vector<16xf32>
      %25 = vector.shape_cast %24 : vector<16xf32> to vector<16x1xf32>
      %cst_22 = arith.constant 0.001953125 : f32
      %26 = vector.broadcast %cst_22 : f32 to vector<16x1xf32>
      %27 = arith.mulf %22, %26 : vector<16x1xf32>
      %cst_23 = arith.constant 0.001953125 : f32
      %28 = vector.broadcast %cst_23 : f32 to vector<16x1xf32>
      %29 = arith.mulf %25, %28 : vector<16x1xf32>
      %30 = arith.mulf %27, %27 : vector<16x1xf32>
      %31 = arith.subf %29, %30 : vector<16x1xf32>
      %cst_24 = arith.constant 0.000000e+00 : f32
      %32 = vector.broadcast %cst_24 : f32 to vector<16x1xf32>
      %33 = arith.maximumf %31, %32 : vector<16x1xf32>
      %cst_25 = arith.constant 9.99999974E-6 : f32
      %34 = vector.broadcast %cst_25 : f32 to vector<16x1xf32>
      %35 = arith.addf %33, %34 : vector<16x1xf32>
      %36 = math.rsqrt %35 : vector<16x1xf32>
      %cst_26 = arith.constant 0.000000e+00 : f32
      %37 = vector.broadcast %cst_26 : f32 to vector<16x1xf32>
      %38 = arith.subf %37, %27 : vector<16x1xf32>
      %39 = arith.mulf %38, %36 : vector<16x1xf32>
      %c0_27 = arith.constant 0 : index
      %c0_28 = arith.constant 0 : index
      %c0_29 = arith.constant 0 : index
      %40 = vector.load %arg5[%c0_27, %c0_28, %c0_29] : memref<1x16x512xf32, #tpu.memory_space<vmem>>, vector<1x16x512xf32>
      %41 = vector.shape_cast %40 : vector<1x16x512xf32> to vector<16x512xf32>
      %42 = vector.broadcast %36 : vector<16x1xf32> to vector<16x512xf32>
      %43 = arith.mulf %41, %42 : vector<16x512xf32>
      %44 = vector.broadcast %39 : vector<16x1xf32> to vector<16x512xf32>
      %45 = arith.addf %43, %44 : vector<16x512xf32>
      %cst_30 = arith.constant 0.000000e+00 : f32
      %46 = vector.broadcast %cst_30 : f32 to vector<16x512xf32>
      %47 = arith.maximumf %45, %46 : vector<16x512xf32>
      %c0_31 = arith.constant 0 : index
      %c0_32 = arith.constant 0 : index
      %48 = vector.load %arg3[%c0_31, %c0_32] : memref<16x512xf32, #tpu.memory_space<vmem>>, vector<16x512xf32>
      %49 = arith.addf %47, %48 : vector<16x512xf32>
      %c0_33 = arith.constant 0 : index
      %c0_34 = arith.constant 0 : index
      %50 = vector.load %arg4[%c0_33, %c0_34] : memref<16x512xf32, #tpu.memory_space<vmem>>, vector<16x512xf32>
      tpu.vector_store %arg4[%c0_33, %c0_34], %49 {strides = array<i32>} : memref<16x512xf32, #tpu.memory_space<vmem>>, vector<16x512xf32>,
    } else {
    }
    return
  }
  func.func @transform_0(%arg0: i32) -> (i32, i32) {
    %c0_i32 = arith.constant 0 : i32
    %c0_i32_0 = arith.constant 0 : i32
    %c0_i32_1 = arith.constant 0 : i32
    return %c0_i32, %c0_i32_0 : i32, i32
  }
  func.func @transform_1(%arg0: i32) -> (i32, i32) {
    %c0_i32 = arith.constant 0 : i32
    %c0_i32_0 = arith.constant 0 : i32
    return %c0_i32, %arg0 : i32, i32
  }
  func.func @transform_2(%arg0: i32) -> (i32, i32) {
    %c0_i32 = arith.constant 0 : i32
    %c0_i32_0 = arith.constant 0 : i32
    %c0_i32_1 = arith.constant 0 : i32
    return %c0_i32, %c0_i32_0 : i32, i32
  }
  func.func @transform_3(%arg0: i32) -> (i32, i32) {
    %c0_i32 = arith.constant 0 : i32
    %c0_i32_0 = arith.constant 0 : i32
    %c0_i32_1 = arith.constant 0 : i32
    return %c0_i32, %c0_i32_0 : i32, i32
  }
}

module attributes {stable_mosaic.version = 11 : i64} {
  func.func @kernel(%arg0: i32, %arg1: memref<8x512xbf16, #tpu.memory_space<vmem>>, %arg2: memref<512x1024xbf16, #tpu.memory_space<vmem>>, %arg3: memref<8x4096xf32, #tpu.memory_space<vmem>>, %arg4: memref<8x4096xf32, #tpu.memory_space<vmem>>, %arg5: memref<4x8x1024xf32, #tpu.memory_space<vmem>>, %arg6: memref<8x1024xf32, #tpu.memory_space<vmem>>, %arg7: memref<8x1024xf32, #tpu.memory_space<vmem>>) attributes {dimension_semantics = [#tpu.dimension_semantics<arbitrary>], iteration_bounds = array<i64: 4>, scalar_prefetch = 0 : i64, scratch_operands = 3 : i64, tpu.core_type = #tpu.core_type<tc>, window_params = [{pipeline_mode = #tpu.pipeline_mode<synchronous>, transform_indices = @transform_0, window_bounds = array<i64: 8, 512>}, {transform_indices = @transform_1, window_bounds = array<i64: 512, 1024>}, {pipeline_mode = #tpu.pipeline_mode<synchronous>, transform_indices = @transform_2, window_bounds = array<i64: 8, 4096>}, {pipeline_mode = #tpu.pipeline_mode<synchronous>, transform_indices = @transform_3, window_bounds = array<i64: 8, 4096>}]} {
    %c0 = arith.constant 0 : index
    %c0_0 = arith.constant 0 : index
    %0 = vector.load %arg1[%c0, %c0_0] : memref<8x512xbf16, #tpu.memory_space<vmem>>, vector<8x512xbf16>
    %c0_1 = arith.constant 0 : index
    %c0_2 = arith.constant 0 : index
    %1 = vector.load %arg2[%c0_1, %c0_2] : memref<512x1024xbf16, #tpu.memory_space<vmem>>, vector<512x1024xbf16>
    %cst = arith.constant dense<0.000000e+00> : vector<8x1024xf32>
    %2 = tpu.matmul %0, %1, %cst {dimension_numbers = #tpu.dot_dimension_numbers<[1], [0], [0], [1], [0, 0, 1, 1], [], []>} : vector<8x512xbf16>, vector<512x1024xbf16>, vector<8x1024xf32> -> vector<8x1024xf32>
    %3 = arith.index_cast %arg0 : i32 to index
    %c0_3 = arith.constant 0 : index
    %c0_4 = arith.constant 0 : index
    %4 = vector.load %arg5[%3, %c0_3, %c0_4] : memref<4x8x1024xf32, #tpu.memory_space<vmem>>, vector<1x8x1024xf32>
    %5 = vector.shape_cast %4 : vector<1x8x1024xf32> to vector<8x1024xf32>
    %6 = vector.shape_cast %2 : vector<8x1024xf32> to vector<1x8x1024xf32>
    tpu.vector_store %arg5[%3, %c0_3, %c0_4], %6 {strides = array<i32>} : memref<4x8x1024xf32, #tpu.memory_space<vmem>>, vector<1x8x1024xf32>,
    %c0_i32 = arith.constant 0 : i32
    %7 = arith.cmpi eq, %arg0, %c0_i32 : i32
    %8 = arith.extui %7 : i1 to i32
    %c0_i32_5 = arith.constant 0 : i32
    %9 = arith.cmpi ne, %8, %c0_i32_5 : i32
    scf.if %9 {
      %cst_15 = arith.constant 0.000000e+00 : f32
      %20 = vector.broadcast %cst_15 : f32 to vector<8x1024xf32>
      %c0_16 = arith.constant 0 : index
      %c0_17 = arith.constant 0 : index
      %21 = vector.load %arg6[%c0_16, %c0_17] : memref<8x1024xf32, #tpu.memory_space<vmem>>, vector<8x1024xf32>
      tpu.vector_store %arg6[%c0_16, %c0_17], %20 {strides = array<i32>} : memref<8x1024xf32, #tpu.memory_space<vmem>>, vector<8x1024xf32>,
      %cst_18 = arith.constant 0.000000e+00 : f32
      %22 = vector.broadcast %cst_18 : f32 to vector<8x1024xf32>
      %c0_19 = arith.constant 0 : index
      %c0_20 = arith.constant 0 : index
      %23 = vector.load %arg7[%c0_19, %c0_20] : memref<8x1024xf32, #tpu.memory_space<vmem>>, vector<8x1024xf32>
      tpu.vector_store %arg7[%c0_19, %c0_20], %22 {strides = array<i32>} : memref<8x1024xf32, #tpu.memory_space<vmem>>, vector<8x1024xf32>,
    } else {
    }
    %c0_6 = arith.constant 0 : index
    %c0_7 = arith.constant 0 : index
    %10 = vector.load %arg6[%c0_6, %c0_7] : memref<8x1024xf32, #tpu.memory_space<vmem>>, vector<8x1024xf32>
    %11 = arith.addf %10, %2 : vector<8x1024xf32>
    %c0_8 = arith.constant 0 : index
    %c0_9 = arith.constant 0 : index
    %12 = vector.load %arg6[%c0_8, %c0_9] : memref<8x1024xf32, #tpu.memory_space<vmem>>, vector<8x1024xf32>
    tpu.vector_store %arg6[%c0_8, %c0_9], %11 {strides = array<i32>} : memref<8x1024xf32, #tpu.memory_space<vmem>>, vector<8x1024xf32>,
    %c0_10 = arith.constant 0 : index
    %c0_11 = arith.constant 0 : index
    %13 = vector.load %arg7[%c0_10, %c0_11] : memref<8x1024xf32, #tpu.memory_space<vmem>>, vector<8x1024xf32>
    %14 = arith.mulf %2, %2 : vector<8x1024xf32>
    %15 = arith.addf %13, %14 : vector<8x1024xf32>
    %c0_12 = arith.constant 0 : index
    %c0_13 = arith.constant 0 : index
    %16 = vector.load %arg7[%c0_12, %c0_13] : memref<8x1024xf32, #tpu.memory_space<vmem>>, vector<8x1024xf32>
    tpu.vector_store %arg7[%c0_12, %c0_13], %15 {strides = array<i32>} : memref<8x1024xf32, #tpu.memory_space<vmem>>, vector<8x1024xf32>,
    %c3_i32 = arith.constant 3 : i32
    %17 = arith.cmpi eq, %arg0, %c3_i32 : i32
    %18 = arith.extui %17 : i1 to i32
    %c0_i32_14 = arith.constant 0 : i32
    %19 = arith.cmpi ne, %18, %c0_i32_14 : i32
    scf.if %19 {
      %c0_15 = arith.constant 0 : index
      %c0_16 = arith.constant 0 : index
      %20 = vector.load %arg6[%c0_15, %c0_16] : memref<8x1024xf32, #tpu.memory_space<vmem>>, vector<8x1024xf32>
      %cst_17 = arith.constant dense<0.000000e+00> : vector<8xf32>
      %21 = vector.multi_reduction <add>, %20, %cst_17 [1] : vector<8x1024xf32> to vector<8xf32>
      %22 = vector.shape_cast %21 : vector<8xf32> to vector<8x1xf32>
      %c0_18 = arith.constant 0 : index
      %c0_19 = arith.constant 0 : index
      %23 = vector.load %arg7[%c0_18, %c0_19] : memref<8x1024xf32, #tpu.memory_space<vmem>>, vector<8x1024xf32>
      %cst_20 = arith.constant dense<0.000000e+00> : vector<8xf32>
      %24 = vector.multi_reduction <add>, %23, %cst_20 [1] : vector<8x1024xf32> to vector<8xf32>
      %25 = vector.shape_cast %24 : vector<8xf32> to vector<8x1xf32>
      %cst_21 = arith.constant 2.44140625E-4 : f32
      %26 = vector.broadcast %cst_21 : f32 to vector<8x1xf32>
      %27 = arith.mulf %22, %26 : vector<8x1xf32>
      %cst_22 = arith.constant 2.44140625E-4 : f32
      %28 = vector.broadcast %cst_22 : f32 to vector<8x1xf32>
      %29 = arith.mulf %25, %28 : vector<8x1xf32>
      %30 = arith.mulf %27, %27 : vector<8x1xf32>
      %31 = arith.subf %29, %30 : vector<8x1xf32>
      %cst_23 = arith.constant 0.000000e+00 : f32
      %32 = vector.broadcast %cst_23 : f32 to vector<8x1xf32>
      %33 = arith.maximumf %31, %32 : vector<8x1xf32>
      %cst_24 = arith.constant 9.99999974E-6 : f32
      %34 = vector.broadcast %cst_24 : f32 to vector<8x1xf32>
      %35 = arith.addf %33, %34 : vector<8x1xf32>
      %36 = math.rsqrt %35 : vector<8x1xf32>
      %cst_25 = arith.constant 0.000000e+00 : f32
      %37 = vector.broadcast %cst_25 : f32 to vector<8x1xf32>
      %38 = arith.subf %37, %27 : vector<8x1xf32>
      %39 = arith.mulf %38, %36 : vector<8x1xf32>
      %c0_26 = arith.constant 0 : index
      %c0_27 = arith.constant 0 : index
      %c0_28 = arith.constant 0 : index
      %40 = vector.load %arg5[%c0_26, %c0_27, %c0_28] : memref<4x8x1024xf32, #tpu.memory_space<vmem>>, vector<1x8x1024xf32>
      %41 = vector.shape_cast %40 : vector<1x8x1024xf32> to vector<8x1024xf32>
      %42 = vector.broadcast %36 : vector<8x1xf32> to vector<8x1024xf32>
      %43 = arith.mulf %41, %42 : vector<8x1024xf32>
      %44 = vector.broadcast %39 : vector<8x1xf32> to vector<8x1024xf32>
      %45 = arith.addf %43, %44 : vector<8x1024xf32>
      %cst_29 = arith.constant 0.000000e+00 : f32
      %46 = vector.broadcast %cst_29 : f32 to vector<8x1024xf32>
      %47 = arith.maximumf %45, %46 : vector<8x1024xf32>
      %c0_30 = arith.constant 0 : index
      %c0_31 = arith.constant 0 : index
      %48 = vector.load %arg3[%c0_30, %c0_31] : memref<8x4096xf32, #tpu.memory_space<vmem>>, vector<8x1024xf32>
      %49 = arith.addf %47, %48 : vector<8x1024xf32>
      %c0_32 = arith.constant 0 : index
      %c0_33 = arith.constant 0 : index
      %50 = vector.load %arg4[%c0_32, %c0_33] : memref<8x4096xf32, #tpu.memory_space<vmem>>, vector<8x1024xf32>
      tpu.vector_store %arg4[%c0_32, %c0_33], %49 {strides = array<i32>} : memref<8x4096xf32, #tpu.memory_space<vmem>>, vector<8x1024xf32>,
      %c1 = arith.constant 1 : index
      %c0_34 = arith.constant 0 : index
      %c0_35 = arith.constant 0 : index
      %51 = vector.load %arg5[%c1, %c0_34, %c0_35] : memref<4x8x1024xf32, #tpu.memory_space<vmem>>, vector<1x8x1024xf32>
      %52 = vector.shape_cast %51 : vector<1x8x1024xf32> to vector<8x1024xf32>
      %53 = vector.broadcast %36 : vector<8x1xf32> to vector<8x1024xf32>
      %54 = arith.mulf %52, %53 : vector<8x1024xf32>
      %55 = vector.broadcast %39 : vector<8x1xf32> to vector<8x1024xf32>
      %56 = arith.addf %54, %55 : vector<8x1024xf32>
      %cst_36 = arith.constant 0.000000e+00 : f32
      %57 = vector.broadcast %cst_36 : f32 to vector<8x1024xf32>
      %58 = arith.maximumf %56, %57 : vector<8x1024xf32>
      %c0_37 = arith.constant 0 : index
      %c1024 = arith.constant 1024 : index
      %59 = vector.load %arg3[%c0_37, %c1024] : memref<8x4096xf32, #tpu.memory_space<vmem>>, vector<8x1024xf32>
      %60 = arith.addf %58, %59 : vector<8x1024xf32>
      %c0_38 = arith.constant 0 : index
      %c1024_39 = arith.constant 1024 : index
      %61 = vector.load %arg4[%c0_38, %c1024_39] : memref<8x4096xf32, #tpu.memory_space<vmem>>, vector<8x1024xf32>
      tpu.vector_store %arg4[%c0_38, %c1024_39], %60 {strides = array<i32>} : memref<8x4096xf32, #tpu.memory_space<vmem>>, vector<8x1024xf32>,
      %c2 = arith.constant 2 : index
      %c0_40 = arith.constant 0 : index
      %c0_41 = arith.constant 0 : index
      %62 = vector.load %arg5[%c2, %c0_40, %c0_41] : memref<4x8x1024xf32, #tpu.memory_space<vmem>>, vector<1x8x1024xf32>
      %63 = vector.shape_cast %62 : vector<1x8x1024xf32> to vector<8x1024xf32>
      %64 = vector.broadcast %36 : vector<8x1xf32> to vector<8x1024xf32>
      %65 = arith.mulf %63, %64 : vector<8x1024xf32>
      %66 = vector.broadcast %39 : vector<8x1xf32> to vector<8x1024xf32>
      %67 = arith.addf %65, %66 : vector<8x1024xf32>
      %cst_42 = arith.constant 0.000000e+00 : f32
      %68 = vector.broadcast %cst_42 : f32 to vector<8x1024xf32>
      %69 = arith.maximumf %67, %68 : vector<8x1024xf32>
      %c0_43 = arith.constant 0 : index
      %c2048 = arith.constant 2048 : index
      %70 = vector.load %arg3[%c0_43, %c2048] : memref<8x4096xf32, #tpu.memory_space<vmem>>, vector<8x1024xf32>
      %71 = arith.addf %69, %70 : vector<8x1024xf32>
      %c0_44 = arith.constant 0 : index
      %c2048_45 = arith.constant 2048 : index
      %72 = vector.load %arg4[%c0_44, %c2048_45] : memref<8x4096xf32, #tpu.memory_space<vmem>>, vector<8x1024xf32>
      tpu.vector_store %arg4[%c0_44, %c2048_45], %71 {strides = array<i32>} : memref<8x4096xf32, #tpu.memory_space<vmem>>, vector<8x1024xf32>,
      %c3 = arith.constant 3 : index
      %c0_46 = arith.constant 0 : index
      %c0_47 = arith.constant 0 : index
      %73 = vector.load %arg5[%c3, %c0_46, %c0_47] : memref<4x8x1024xf32, #tpu.memory_space<vmem>>, vector<1x8x1024xf32>
      %74 = vector.shape_cast %73 : vector<1x8x1024xf32> to vector<8x1024xf32>
      %75 = vector.broadcast %36 : vector<8x1xf32> to vector<8x1024xf32>
      %76 = arith.mulf %74, %75 : vector<8x1024xf32>
      %77 = vector.broadcast %39 : vector<8x1xf32> to vector<8x1024xf32>
      %78 = arith.addf %76, %77 : vector<8x1024xf32>
      %cst_48 = arith.constant 0.000000e+00 : f32
      %79 = vector.broadcast %cst_48 : f32 to vector<8x1024xf32>
      %80 = arith.maximumf %78, %79 : vector<8x1024xf32>
      %c0_49 = arith.constant 0 : index
      %c3072 = arith.constant 3072 : index
      %81 = vector.load %arg3[%c0_49, %c3072] : memref<8x4096xf32, #tpu.memory_space<vmem>>, vector<8x1024xf32>
      %82 = arith.addf %80, %81 : vector<8x1024xf32>
      %c0_50 = arith.constant 0 : index
      %c3072_51 = arith.constant 3072 : index
      %83 = vector.load %arg4[%c0_50, %c3072_51] : memref<8x4096xf32, #tpu.memory_space<vmem>>, vector<8x1024xf32>
      tpu.vector_store %arg4[%c0_50, %c3072_51], %82 {strides = array<i32>} : memref<8x4096xf32, #tpu.memory_space<vmem>>, vector<8x1024xf32>,
    } else {
    }
    return
  }
  func.func @transform_0(%arg0: i32) -> (i32, i32) {
    %c0_i32 = arith.constant 0 : i32
    %c0_i32_0 = arith.constant 0 : i32
    %c0_i32_1 = arith.constant 0 : i32
    return %c0_i32, %c0_i32_0 : i32, i32
  }
  func.func @transform_1(%arg0: i32) -> (i32, i32) {
    %c0_i32 = arith.constant 0 : i32
    %c0_i32_0 = arith.constant 0 : i32
    return %c0_i32, %arg0 : i32, i32
  }
  func.func @transform_2(%arg0: i32) -> (i32, i32) {
    %c0_i32 = arith.constant 0 : i32
    %c0_i32_0 = arith.constant 0 : i32
    %c0_i32_1 = arith.constant 0 : i32
    return %c0_i32, %c0_i32_0 : i32, i32
  }
  func.func @transform_3(%arg0: i32) -> (i32, i32) {
    %c0_i32 = arith.constant 0 : i32
    %c0_i32_0 = arith.constant 0 : i32
    %c0_i32_1 = arith.constant 0 : i32
    return %c0_i32, %c0_i32_0 : i32, i32
  }
}

module attributes {stable_mosaic.version = 11 : i64} {
  func.func @_prob_matmul_kernel(%arg0: i32, %arg1: memref<8x256xbf16, #tpu.memory_space<vmem>>, %arg2: memref<256x1024xbf16, #tpu.memory_space<vmem>>, %arg3: memref<8x1024xf32, #tpu.memory_space<vmem>>) attributes {dimension_semantics = [#tpu.dimension_semantics<parallel>], iteration_bounds = array<i64: 4>, scalar_prefetch = 0 : i64, scratch_operands = 0 : i64, tpu.core_type = #tpu.core_type<tc>, window_params = [{pipeline_mode = #tpu.pipeline_mode<synchronous>, transform_indices = @transform_0, window_bounds = array<i64: 8, 256>}, {transform_indices = @transform_1, window_bounds = array<i64: 256, 1024>}, {transform_indices = @transform_2, window_bounds = array<i64: 8, 1024>}]} {
    %c0 = arith.constant 0 : index
    %c0_0 = arith.constant 0 : index
    %0 = vector.load %arg1[%c0, %c0_0] : memref<8x256xbf16, #tpu.memory_space<vmem>>, vector<8x256xbf16>
    %c0_1 = arith.constant 0 : index
    %c0_2 = arith.constant 0 : index
    %1 = vector.load %arg2[%c0_1, %c0_2] : memref<256x1024xbf16, #tpu.memory_space<vmem>>, vector<256x1024xbf16>
    %cst = arith.constant dense<0.000000e+00> : vector<8x1024xf32>
    %2 = tpu.matmul %0, %1, %cst {dimension_numbers = #tpu.dot_dimension_numbers<[1], [0], [0], [1], [0, 0, 1, 1], [], []>} : vector<8x256xbf16>, vector<256x1024xbf16>, vector<8x1024xf32> -> vector<8x1024xf32>
    %c0_3 = arith.constant 0 : index
    %c0_4 = arith.constant 0 : index
    %3 = vector.load %arg3[%c0_3, %c0_4] : memref<8x1024xf32, #tpu.memory_space<vmem>>, vector<8x1024xf32>
    tpu.vector_store %arg3[%c0_3, %c0_4], %2 {strides = array<i32>} : memref<8x1024xf32, #tpu.memory_space<vmem>>, vector<8x1024xf32>,
    return
  }
  func.func @transform_0(%arg0: i32) -> (i32, i32) {
    %c0_i32 = arith.constant 0 : i32
    %c0_i32_0 = arith.constant 0 : i32
    %c0_i32_1 = arith.constant 0 : i32
    return %c0_i32, %c0_i32_0 : i32, i32
  }
  func.func @transform_1(%arg0: i32) -> (i32, i32) {
    %c0_i32 = arith.constant 0 : i32
    %c0_i32_0 = arith.constant 0 : i32
    return %c0_i32, %arg0 : i32, i32
  }
  func.func @transform_2(%arg0: i32) -> (i32, i32) {
    %c0_i32 = arith.constant 0 : i32
    %c0_i32_0 = arith.constant 0 : i32
    return %c0_i32, %arg0 : i32, i32
  }
}

</mosaic_0001>

<bundles_post_ra>
// kernel: costregnet_forward.9
= control target key start
LH: loop header
LB: loop body
LE: loop exit
PB: predicated region body
PF: predicated region fallthrough
CT: control target
= control target key end

     0   :  { %s1308_s9 = smov 0   ;;  %s1310_s10 = smov 0   ;;  %s1742_s0 = inlined_call_operand.vmem [shape: bf16[8,128], index: 0, kind: input, shape index: {}]   ;;  %s1743_s1 = inlined_call_operand.vmem [shape: bf16[128,4096], index: 1, kind: input, shape index: {}]   ;;  %s1744_s2 = inlined_call_operand.vmem [shape: f32[8,4096], index: 2, kind: output, shape index: {}]  }
   0x1   :  { %s1312_s11 = smov 0  }
   0x2 LB: > { %s1324_s12 = sadd.s32 4294967295, %s1289_s11   ;;  %s1327_s13 = sadd.s32 1, %s1289_s11   ;;  %s1289_s11 = sphi %s1312_s11, %s1747_s11   ;;  %s1285_s10 = sphi %s1310_s10, %s1746_s10   ;;  %s1281_s9 = sphi %s1308_s9, %s1745_s9  }
   0x3   : > { %s37_s14 = ssub.s32 %s1289_s11, %s1327_s13  ;;  %s40_s15 = sadd.s32 1, %s1285_s10 }
   0x4   : > { %p38_p0 = scmp.eq.s32.totalorder %s37_s14, 0  ;;  %p47_p1 = scmp.ne.s32.totalorder %s1285_s10, %s1281_s9 }
   0x5   : > { %p48_p2 = scmp.eq.s32.totalorder %s1289_s11, 0  ;;  %p1161_p4 = scmp.ge.s32.totalorder %s1289_s11, 4 }
   0x6   : > { %s1336_s16 = scalar_select %p38_p0, %s1285_s10, %s40_s15  }
   0x7   : > { %p49_p3 = por %p48_p2, %p47_p1  ;;  %97 = sbr.rel (%p1161_p4) target bundleno = 50 (0x32), region = 20 }
   0xe   : > { %100 = sbr.rel (!%p49_p3) target bundleno = 50 (0x32), region = 24  ;;  %s102_s17 = sand.u32 (%p49_p3), 1, %s1285_s10  }
   0xf   : > { %s1237_s18 = sshll.u32 (%p49_p3), %s1289_s11, 5  ;;  %s1162_s19 = sshll.u32 (%p49_p3), %s102_s17, 9 }
  0x10   : > { %s1344_s22 = scalar_lea.vmem (%p49_p3), %s1743_s1, %s1237_s18  ;;  %s1349_s23 = scalar_lea.vmem (%p49_p3), [#allocation5], %s1162_s19 }
  0x11   : > { %v120_v0 = vld [vmem:[%s1344_s22] sm:$0xff] (%p49_p3)  ;;  %v122_v1 = vld [vmem:[%s1344_s22 + $0x8] sm:$0xff] (%p49_p3)  ;;  %v124_v2 = vld [vmem:[%s1344_s22 + $0x10] sm:$0xff] (%p49_p3) }
  0x12   : > { %121 = vst [vmem:[%s1349_s23] sm:$0xff] (%p49_p3), %v120_v0  ;;  %123 = vst [vmem:[%s1349_s23 + $0x8] sm:$0xff] (%p49_p3), %v122_v1  ;;  %v126_v3 = vld [vmem:[%s1344_s22 + $0x18] sm:$0xff] (%p49_p3)  ;;  %v128_v4 = vld [vmem:[%s1344_s22 + $0x80] sm:$0xff] (%p49_p3) }
  0x13   : > { %125 = vst [vmem:[%s1349_s23 + $0x10] sm:$0xff] (%p49_p3), %v124_v2  ;;  %v130_v5 = vld [vmem:[%s1344_s22 + $0x88] sm:$0xff] (%p49_p3)  ;;  %127 = vst [vmem:[%s1349_s23 + $0x18] sm:$0xff] (%p49_p3), %v126_v3  ;;  %v132_v6 = vld [vmem:[%s1344_s22 + $0x90] sm:$0xff] (%p49_p3) }
  0x14   : > { %129 = vst [vmem:[%s1349_s23 + $0x20] sm:$0xff] (%p49_p3), %v128_v4  ;;  %131 = vst [vmem:[%s1349_s23 + $0x28] sm:$0xff] (%p49_p3), %v130_v5  ;;  %v134_v7 = vld [vmem:[%s1344_s22 + $0x98] sm:$0xff] (%p49_p3)  ;;  %v136_v8 = vld [vmem:[%s1344_s22 + $0x100] sm:$0xff] (%p49_p3) }
  0x15   : > { %133 = vst [vmem:[%s1349_s23 + $0x30] sm:$0xff] %v132_v6  ;;  %135 = vst [vmem:[%s1349_s23 + $0x38] sm:$0xff] %v134_v7  ;;  %v138_v9 = vld [vmem:[%s1344_s22 + $0x108] sm:$0xff]  ;;  %v140_v10 = vld [vmem:[%s1344_s22 + $0x110] sm:$0xff] }
  0x16   : > { %137 = vst [vmem:[%s1349_s23 + $0x40] sm:$0xff] %v136_v8  ;;  %v142_v11 = vld [vmem:[%s1344_s22 + $0x118] sm:$0xff]  ;;  %139 = vst [vmem:[%s1349_s23 + $0x48] sm:$0xff] %v138_v9  ;;  %v144_v12 = vld [vmem:[%s1344_s22 + $0x180] sm:$0xff] }
  0x17   : > { %141 = vst [vmem:[%s1349_s23 + $0x50] sm:$0xff] %v140_v10  ;;  %143 = vst [vmem:[%s1349_s23 + $0x58] sm:$0xff] %v142_v11  ;;  %v146_v13 = vld [vmem:[%s1344_s22 + $0x188] sm:$0xff]  ;;  %v148_v14 = vld [vmem:[%s1344_s22 + $0x190] sm:$0xff] }
  0x18   : > { %145 = vst [vmem:[%s1349_s23 + $0x60] sm:$0xff] %v144_v12  ;;  %147 = vst [vmem:[%s1349_s23 + $0x68] sm:$0xff] %v146_v13  ;;  %v150_v15 = vld [vmem:[%s1344_s22 + $0x198] sm:$0xff]  ;;  %v152_v16 = vld [vmem:[%s1344_s22 + $0x200] sm:$0xff] }
  0x19   : > { %149 = vst [vmem:[%s1349_s23 + $0x70] sm:$0xff] %v148_v14  ;;  %v154_v17 = vld [vmem:[%s1344_s22 + $0x208] sm:$0xff]  ;;  %151 = vst [vmem:[%s1349_s23 + $0x78] sm:$0xff] %v150_v15  ;;  %v156_v18 = vld [vmem:[%s1344_s22 + $0x210] sm:$0xff] }
  0x1a   : > { %153 = vst [vmem:[%s1349_s23 + $0x80] sm:$0xff] %v152_v16  ;;  %155 = vst [vmem:[%s1349_s23 + $0x88] sm:$0xff] %v154_v17  ;;  %v158_v19 = vld [vmem:[%s1344_s22 + $0x218] sm:$0xff]  ;;  %v160_v20 = vld [vmem:[%s1344_s22 + $0x280] sm:$0xff] }
  0x1b   : > { %157 = vst [vmem:[%s1349_s23 + $0x90] sm:$0xff] %v156_v18  ;;  %159 = vst [vmem:[%s1349_s23 + $0x98] sm:$0xff] %v158_v19  ;;  %v162_v21 = vld [vmem:[%s1344_s22 + $0x288] sm:$0xff]  ;;  %v164_v22 = vld [vmem:[%s1344_s22 + $0x290] sm:$0xff] }
  0x1c   : > { %161 = vst [vmem:[%s1349_s23 + $0xa0] sm:$0xff] %v160_v20  ;;  %v166_v23 = vld [vmem:[%s1344_s22 + $0x298] sm:$0xff]  ;;  %163 = vst [vmem:[%s1349_s23 + $0xa8] sm:$0xff] %v162_v21  ;;  %v168_v24 = vld [vmem:[%s1344_s22 + $0x300] sm:$0xff] }
  0x1d   : > { %165 = vst [vmem:[%s1349_s23 + $0xb0] sm:$0xff] %v164_v22  ;;  %167 = vst [vmem:[%s1349_s23 + $0xb8] sm:$0xff] %v166_v23  ;;  %v170_v25 = vld [vmem:[%s1344_s22 + $0x308] sm:$0xff]  ;;  %v172_v26 = vld [vmem:[%s1344_s22 + $0x310] sm:$0xff] }
  0x1e   : > { %169 = vst [vmem:[%s1349_s23 + $0xc0] sm:$0xff] %v168_v24  ;;  %171 = vst [vmem:[%s1349_s23 + $0xc8] sm:$0xff] %v170_v25  ;;  %v174_v27 = vld [vmem:[%s1344_s22 + $0x318] sm:$0xff]  ;;  %v176_v28 = vld [vmem:[%s1344_s22 + $0x380] sm:$0xff] }
  0x1f   : > { %173 = vst [vmem:[%s1349_s23 + $0xd0] sm:$0xff] %v172_v26  ;;  %v178_v29 = vld [vmem:[%s1344_s22 + $0x388] sm:$0xff]  ;;  %175 = vst [vmem:[%s1349_s23 + $0xd8] sm:$0xff] %v174_v27  ;;  %v180_v30 = vld [vmem:[%s1344_s22 + $0x390] sm:$0xff] }
  0x20   : > { %177 = vst [vmem:[%s1349_s23 + $0xe0] sm:$0xff] %v176_v28  ;;  %179 = vst [vmem:[%s1349_s23 + $0xe8] sm:$0xff] %v178_v29  ;;  %v182_v31 = vld [vmem:[%s1344_s22 + $0x398] sm:$0xff]  ;;  %v184_v32 = vld [vmem:[%s1344_s22 + $0x400] sm:$0xff] }
  0x21   : > { %181 = vst [vmem:[%s1349_s23 + $0xf0] sm:$0xff] %v180_v30  ;;  %183 = vst [vmem:[%s1349_s23 + $0xf8] sm:$0xff] %v182_v31  ;;  %v186_v33 = vld [vmem:[%s1344_s22 + $0x408] sm:$0xff]  ;;  %v188_v34 = vld [vmem:[%s1344_s22 + $0x410] sm:$0xff] }
  0x22   : > { %185 = vst [vmem:[%s1349_s23 + $0x100] sm:$0xff] %v184_v32  ;;  %v190_v35 = vld [vmem:[%s1344_s22 + $0x418] sm:$0xff]  ;;  %187 = vst [vmem:[%s1349_s23 + $0x108] sm:$0xff] %v186_v33  ;;  %v192_v36 = vld [vmem:[%s1344_s22 + $0x480] sm:$0xff] }
  0x23   : > { %189 = vst [vmem:[%s1349_s23 + $0x110] sm:$0xff] %v188_v34  ;;  %191 = vst [vmem:[%s1349_s23 + $0x118] sm:$0xff] %v190_v35  ;;  %v194_v37 = vld [vmem:[%s1344_s22 + $0x488] sm:$0xff]  ;;  %v196_v38 = vld [vmem:[%s1344_s22 + $0x490] sm:$0xff] }
  0x24   : > { %193 = vst [vmem:[%s1349_s23 + $0x120] sm:$0xff] %v192_v36  ;;  %195 = vst [vmem:[%s1349_s23 + $0x128] sm:$0xff] %v194_v37  ;;  %v198_v39 = vld [vmem:[%s1344_s22 + $0x498] sm:$0xff]  ;;  %v200_v40 = vld [vmem:[%s1344_s22 + $0x500] sm:$0xff] }
  0x25   : > { %197 = vst [vmem:[%s1349_s23 + $0x130] sm:$0xff] %v196_v38  ;;  %v202_v41 = vld [vmem:[%s1344_s22 + $0x508] sm:$0xff]  ;;  %199 = vst [vmem:[%s1349_s23 + $0x138] sm:$0xff] %v198_v39  ;;  %v204_v42 = vld [vmem:[%s1344_s22 + $0x510] sm:$0xff] }
  0x26   : > { %201 = vst [vmem:[%s1349_s23 + $0x140] sm:$0xff] %v200_v40  ;;  %203 = vst [vmem:[%s1349_s23 + $0x148] sm:$0xff] %v202_v41  ;;  %v206_v43 = vld [vmem:[%s1344_s22 + $0x518] sm:$0xff]  ;;  %v208_v44 = vld [vmem:[%s1344_s22 + $0x580] sm:$0xff] }
  0x27   : > { %205 = vst [vmem:[%s1349_s23 + $0x150] sm:$0xff] %v204_v42  ;;  %207 = vst [vmem:[%s1349_s23 + $0x158] sm:$0xff] %v206_v43  ;;  %v210_v45 = vld [vmem:[%s1344_s22 + $0x588] sm:$0xff]  ;;  %v212_v46 = vld [vmem:[%s1344_s22 + $0x590] sm:$0xff] }
  0x28   : > { %209 = vst [vmem:[%s1349_s23 + $0x160] sm:$0xff] %v208_v44  ;;  %v214_v47 = vld [vmem:[%s1344_s22 + $0x598] sm:$0xff]  ;;  %211 = vst [vmem:[%s1349_s23 + $0x168] sm:$0xff] %v210_v45  ;;  %v216_v48 = vld [vmem:[%s1344_s22 + $0x600] sm:$0xff] }
  0x29   : > { %213 = vst [vmem:[%s1349_s23 + $0x170] sm:$0xff] %v212_v46  ;;  %215 = vst [vmem:[%s1349_s23 + $0x178] sm:$0xff] %v214_v47  ;;  %v218_v49 = vld [vmem:[%s1344_s22 + $0x608] sm:$0xff]  ;;  %v220_v50 = vld [vmem:[%s1344_s22 + $0x610] sm:$0xff] }
  0x2a   : > { %217 = vst [vmem:[%s1349_s23 + $0x180] sm:$0xff] %v216_v48  ;;  %219 = vst [vmem:[%s1349_s23 + $0x188] sm:$0xff] %v218_v49  ;;  %v222_v51 = vld [vmem:[%s1344_s22 + $0x618] sm:$0xff]  ;;  %v224_v52 = vld [vmem:[%s1344_s22 + $0x680] sm:$0xff] }
  0x2b   : > { %221 = vst [vmem:[%s1349_s23 + $0x190] sm:$0xff] %v220_v50  ;;  %v226_v53 = vld [vmem:[%s1344_s22 + $0x688] sm:$0xff]  ;;  %223 = vst [vmem:[%s1349_s23 + $0x198] sm:$0xff] %v222_v51  ;;  %v228_v54 = vld [vmem:[%s1344_s22 + $0x690] sm:$0xff] }
  0x2c   : > { %225 = vst [vmem:[%s1349_s23 + $0x1a0] sm:$0xff] %v224_v52  ;;  %227 = vst [vmem:[%s1349_s23 + $0x1a8] sm:$0xff] %v226_v53  ;;  %v230_v55 = vld [vmem:[%s1344_s22 + $0x698] sm:$0xff]  ;;  %v232_v56 = vld [vmem:[%s1344_s22 + $0x700] sm:$0xff] }
  0x2d   : > { %229 = vst [vmem:[%s1349_s23 + $0x1b0] sm:$0xff] %v228_v54  ;;  %231 = vst [vmem:[%s1349_s23 + $0x1b8] sm:$0xff] %v230_v55  ;;  %v234_v57 = vld [vmem:[%s1344_s22 + $0x708] sm:$0xff]  ;;  %v236_v58 = vld [vmem:[%s1344_s22 + $0x710] sm:$0xff] }
  0x2e   : > { %233 = vst [vmem:[%s1349_s23 + $0x1c0] sm:$0xff] %v232_v56  ;;  %v238_v59 = vld [vmem:[%s1344_s22 + $0x718] sm:$0xff]  ;;  %235 = vst [vmem:[%s1349_s23 + $0x1c8] sm:$0xff] %v234_v57  ;;  %v240_v60 = vld [vmem:[%s1344_s22 + $0x780] sm:$0xff] }
  0x2f   : > { %237 = vst [vmem:[%s1349_s23 + $0x1d0] sm:$0xff] %v236_v58  ;;  %239 = vst [vmem:[%s1349_s23 + $0x1d8] sm:$0xff] %v238_v59  ;;  %v242_v61 = vld [vmem:[%s1344_s22 + $0x788] sm:$0xff]  ;;  %v244_v62 = vld [vmem:[%s1344_s22 + $0x790] sm:$0xff] }
  0x30   : > { %241 = vst [vmem:[%s1349_s23 + $0x1e0] sm:$0xff] %v240_v60  ;;  %243 = vst [vmem:[%s1349_s23 + $0x1e8] sm:$0xff] %v242_v61  ;;  %v246_v63 = vld [vmem:[%s1344_s22 + $0x798] sm:$0xff] }
  0x31   : > { %245 = vst [vmem:[%s1349_s23 + $0x1f0] sm:$0xff] %v244_v62  ;;  %247 = vst [vmem:[%s1349_s23 + $0x1f8] sm:$0xff] %v246_v63 }
  0x32 PF: > { %p1165_p5 = scmp.ge.s32.totalorder %s1289_s11, 1  ;;  %p252_p6 = scmp.lt.s32.totalorder %s1289_s11, 5 }
  0x34   : > { %p253_p7 = pnand %p1165_p5, %p252_p6 }
  0x35   : > { %s259_s24 = sand.u32 (!%p253_p7), 1, %s1281_s9   ;;  %v1291_v0 = vmov (!%p253_p7), 0   ;;  %s1238_s29 = sshll.u32 (!%p253_p7), %s1324_s12, 6 }
  0x36   : > { %256 = sbr.rel (%p253_p7) target bundleno = 560 (0x230), region = 47  ;;  %s1166_s25 = sshll.u32 (!%p253_p7), %s259_s24, 9  ;;  %694 = vmatprep.mubr.bf16.mxu0 (!%p253_p7), %v1291_v0  ;;  %735 = vmatprep.mubr.bf16.mxu1 (!%p253_p7), %v1291_v0 }
  0x37   : > { %s1481_s26 = scalar_lea.vmem (!%p253_p7), [#allocation5], %s1166_s25  ;;  %s828_s30 = scalar_lea.vmem (!%p253_p7), [#allocation2], %s1238_s29 }
  0x38   : > { %v278_v1 = vld [vmem:[%s1481_s26] sm:$0xff] (!%p253_p7)  ;;  %v279_v3 = vld [vmem:[%s1481_s26 + $0x8] sm:$0xff] (!%p253_p7)  ;;  %v280_v63 = vld [vmem:[%s1481_s26 + $0x10] sm:$0xff] (!%p253_p7)  ;;  %p1233_p8 = scmp.ne.s32.totalorder (!%p253_p7), %s1324_s12, 0 }
  0x39   : > { %v282_v2 = vld [vmem:[%s1481_s26 + $0x20] sm:$0xff] (!%p253_p7)  ;;  %v283_v5 = vld [vmem:[%s1481_s26 + $0x28] sm:$0xff] (!%p253_p7) }
  0x3a   : > { %v1168_v4 = vcombine.high (!%p253_p7), %v278_v1, %v282_v2  ;;  %v1167_v6 = vcombine.low (!%p253_p7), %v278_v1, %v282_v2  ;;  %v286_v7 = vld [vmem:[%s1481_s26 + $0x40] sm:$0xff] (!%p253_p7)  ;;  %v1170_v9 = vcombine.high (!%p253_p7), %v279_v3, %v283_v5  ;;  %v1169_v10 = vcombine.low (!%p253_p7), %v279_v3, %v283_v5  ;;  %v287_v12 = vld [vmem:[%s1481_s26 + $0x48] sm:$0xff] (!%p253_p7)  ;;  %v284_v1 = vld [vmem:[%s1481_s26 + $0x30] sm:$0xff] (!%p253_p7) }
  0x3b   : > { %v290_v8 = vld [vmem:[%s1481_s26 + $0x60] sm:$0xff] (!%p253_p7)  ;;  %v291_v13 = vld [vmem:[%s1481_s26 + $0x68] sm:$0xff] (!%p253_p7)  ;;  %v281_v2 = vld [vmem:[%s1481_s26 + $0x18] sm:$0xff] (!%p253_p7) }
  0x3c   : > { %v1176_v11 = vcombine.high (!%p253_p7), %v286_v7, %v290_v8  ;;  %v294_v14 = vld [vmem:[%s1481_s26 + $0x80] sm:$0xff] (!%p253_p7)  ;;  %662 = vmatprep.subr.bf16.mxu0 (!%p253_p7), %v1168_v4  ;;  %v1178_v15 = vcombine.high (!%p253_p7), %v287_v12, %v291_v13  ;;  %v295_v17 = vld [vmem:[%s1481_s26 + $0x88] sm:$0xff] (!%p253_p7)  ;;  %703 = vmatprep.subr.bf16.mxu1 (!%p253_p7), %v1170_v9  ;;  %v1175_v19 = vcombine.low (!%p253_p7), %v286_v7, %v290_v8  ;;  %v285_v3 = vld [vmem:[%s1481_s26 + $0x38] sm:$0xff] (!%p253_p7) }
  0x3d   : > { %v298_v16 = vld [vmem:[%s1481_s26 + $0xa0] sm:$0xff]  ;;  %v299_v18 = vld [vmem:[%s1481_s26 + $0xa8] sm:$0xff]  ;;  %663 = vmatpush1.bf16.msra.mxu0 %v1167_v6  ;;  %704 = vmatpush1.bf16.msra.mxu1 %v1169_v10  ;;  %v1177_v20 = vcombine.low %v287_v12, %v291_v13  ;;  %v1172_v6 = vcombine.high %v280_v63, %v284_v1  ;;  %v1174_v7 = vcombine.high %v281_v2, %v285_v3  ;;  %v288_v8 = vld [vmem:[%s1481_s26 + $0x50] sm:$0xff] }
  0x3e   : > { %664 = vmatprep.subr.bf16.mxu0 %v1176_v11  ;;  %v1184_v21 = vcombine.high %v294_v14, %v298_v16  ;;  %705 = vmatprep.subr.bf16.mxu1 %v1178_v15  ;;  %v1186_v22 = vcombine.high %v295_v17, %v299_v18  ;;  %v302_v23 = vld [vmem:[%s1481_s26 + $0xc0] sm:$0xff]  ;;  %v303_v25 = vld [vmem:[%s1481_s26 + $0xc8] sm:$0xff]  ;;  %v1183_v27 = vcombine.low %v294_v14, %v298_v16  ;;  %v292_v9 = vld [vmem:[%s1481_s26 + $0x70] sm:$0xff] }
  0x3f   : > { %v306_v24 = vld [vmem:[%s1481_s26 + $0xe0] sm:$0xff]  ;;  %v307_v26 = vld [vmem:[%s1481_s26 + $0xe8] sm:$0xff]  ;;  %v1185_v28 = vcombine.low %v295_v17, %v299_v18  ;;  %v289_v10 = vld [vmem:[%s1481_s26 + $0x58] sm:$0xff]  ;;  %v1171_v13 = vcombine.low %v280_v63, %v284_v1  ;;  %v1173_v14 = vcombine.low %v281_v2, %v285_v3  ;;  %v1180_v15 = vcombine.high %v288_v8, %v292_v9 }
  0x40   : > { %v1192_v29 = vcombine.high %v302_v23, %v306_v24  ;;  %v1194_v30 = vcombine.high %v303_v25, %v307_v26  ;;  %v310_v31 = vld [vmem:[%s1481_s26 + $0x100] sm:$0xff]  ;;  %v311_v33 = vld [vmem:[%s1481_s26 + $0x108] sm:$0xff]  ;;  %v1191_v35 = vcombine.low %v302_v23, %v306_v24  ;;  %v1193_v36 = vcombine.low %v303_v25, %v307_v26  ;;  %v293_v11 = vld [vmem:[%s1481_s26 + $0x78] sm:$0xff] }
  0x41   : > { %665 = vmatpush1.bf16.msra.mxu0 %v1175_v19  ;;  %706 = vmatpush1.bf16.msra.mxu1 %v1177_v20  ;;  %v314_v32 = vld [vmem:[%s1481_s26 + $0x120] sm:$0xff]  ;;  %v315_v34 = vld [vmem:[%s1481_s26 + $0x128] sm:$0xff]  ;;  %v1182_v16 = vcombine.high %v289_v10, %v293_v11  ;;  %v296_v17 = vld [vmem:[%s1481_s26 + $0x90] sm:$0xff] }
  0x42   : > { %666 = vmatprep.subr.bf16.mxu0 %v1184_v21  ;;  %707 = vmatprep.subr.bf16.mxu1 %v1186_v22  ;;  %v1200_v37 = vcombine.high %v310_v31, %v314_v32  ;;  %v1202_v38 = vcombine.high %v311_v33, %v315_v34  ;;  %v318_v39 = vld [vmem:[%s1481_s26 + $0x140] sm:$0xff]  ;;  %v319_v41 = vld [vmem:[%s1481_s26 + $0x148] sm:$0xff]  ;;  %v1199_v43 = vcombine.low %v310_v31, %v314_v32  ;;  %v300_v18 = vld [vmem:[%s1481_s26 + $0xb0] sm:$0xff] }
  0x43   : > { %v322_v40 = vld [vmem:[%s1481_s26 + $0x160] sm:$0xff]  ;;  %v323_v42 = vld [vmem:[%s1481_s26 + $0x168] sm:$0xff]  ;;  %v1201_v44 = vcombine.low %v311_v33, %v315_v34  ;;  %v297_v19 = vld [vmem:[%s1481_s26 + $0x98] sm:$0xff]  ;;  %v1179_v21 = vcombine.low %v288_v8, %v292_v9  ;;  %v1181_v22 = vcombine.low %v289_v10, %v293_v11  ;;  %v1188_v23 = vcombine.high %v296_v17, %v300_v18 }
  0x44   : > { %v1208_v45 = vcombine.high %v318_v39, %v322_v40  ;;  %v1210_v46 = vcombine.high %v319_v41, %v323_v42  ;;  %v326_v47 = vld [vmem:[%s1481_s26 + $0x180] sm:$0xff]  ;;  %v327_v49 = vld [vmem:[%s1481_s26 + $0x188] sm:$0xff]  ;;  %v1207_v51 = vcombine.low %v318_v39, %v322_v40  ;;  %v1209_v52 = vcombine.low %v319_v41, %v323_v42  ;;  %v301_v20 = vld [vmem:[%s1481_s26 + $0xb8] sm:$0xff] }
  0x45   : > { %667 = vmatpush1.bf16.msra.mxu0 %v1183_v27  ;;  %708 = vmatpush1.bf16.msra.mxu1 %v1185_v28  ;;  %v330_v48 = vld [vmem:[%s1481_s26 + $0x1a0] sm:$0xff]  ;;  %v331_v50 = vld [vmem:[%s1481_s26 + $0x1a8] sm:$0xff]  ;;  %v1190_v24 = vcombine.high %v297_v19, %v301_v20  ;;  %v304_v25 = vld [vmem:[%s1481_s26 + $0xd0] sm:$0xff] }
  0x46   : > { %668 = vmatprep.subr.bf16.mxu0 %v1192_v29  ;;  %709 = vmatprep.subr.bf16.mxu1 %v1194_v30  ;;  %v1216_v53 = vcombine.high %v326_v47, %v330_v48  ;;  %v1218_v54 = vcombine.high %v327_v49, %v331_v50  ;;  %v334_v55 = vld [vmem:[%s1481_s26 + $0x1c0] sm:$0xff]  ;;  %v335_v57 = vld [vmem:[%s1481_s26 + $0x1c8] sm:$0xff]  ;;  %v1215_v59 = vcombine.low %v326_v47, %v330_v48  ;;  %v308_v26 = vld [vmem:[%s1481_s26 + $0xf0] sm:$0xff] }
  0x47   : > { %v338_v56 = vld [vmem:[%s1481_s26 + $0x1e0] sm:$0xff]  ;;  %v339_v58 = vld [vmem:[%s1481_s26 + $0x1e8] sm:$0xff]  ;;  %v1217_v60 = vcombine.low %v327_v49, %v331_v50  ;;  %v305_v27 = vld [vmem:[%s1481_s26 + $0xd8] sm:$0xff]  ;;  %v1187_v29 = vcombine.low %v296_v17, %v300_v18  ;;  %v1189_v30 = vcombine.low %v297_v19, %v301_v20  ;;  %v1196_v31 = vcombine.high %v304_v25, %v308_v26 }
  0x48   : > { %v1224_v61 = vcombine.high %v334_v55, %v338_v56  ;;  %v1226_v62 = vcombine.high %v335_v57, %v339_v58  ;;  %v1223_v4 = vcombine.low %v334_v55, %v338_v56  ;;  %v1225_v5 = vcombine.low %v335_v57, %v339_v58  ;;  %v1526_v12 = vld [vmem:[%s1742_s0] sm:$0xf]  ;;  %v309_v28 = vld [vmem:[%s1481_s26 + $0xf8] sm:$0xff]  ;;  %v312_v33 = vld [vmem:[%s1481_s26 + $0x110] sm:$0xff] }
  0x49   : > { %669 = vmatpush1.bf16.msra.mxu0 %v1191_v35  ;;  %710 = vmatpush1.bf16.msra.mxu1 %v1193_v36  ;;  %v1198_v32 = vcombine.high %v305_v27, %v309_v28  ;;  %v316_v34 = vld [vmem:[%s1481_s26 + $0x130] sm:$0xff]  ;;  %v313_v35 = vld [vmem:[%s1481_s26 + $0x118] sm:$0xff]  ;;  %v1292_v19 = vmov (!%p1233_p8), 0.0  }
  0x4a   : > { %670 = vmatprep.subr.bf16.mxu0 %v1200_v37  ;;  %711 = vmatprep.subr.bf16.mxu1 %v1202_v38  ;;  %v317_v36 = vld [vmem:[%s1481_s26 + $0x138] sm:$0xff]  ;;  %v1195_v37 = vcombine.low %v304_v25, %v308_v26  ;;  %v1204_v38 = vcombine.high %v312_v33, %v316_v34  ;;  %v320_v40 = vld [vmem:[%s1481_s26 + $0x150] sm:$0xff]  ;;  %841 = vst [vmem:[#allocation3] sm:$0xff] (!%p1233_p8), %v1292_v19  ;;  %842 = vst [vmem:[#allocation3 + $0x8] sm:$0xff] (!%p1233_p8), %v1292_v19 }
  0x4b   : > { %v1206_v39 = vcombine.high %v313_v35, %v317_v36  ;;  %v324_v41 = vld [vmem:[%s1481_s26 + $0x170] sm:$0xff]  ;;  %v321_v42 = vld [vmem:[%s1481_s26 + $0x158] sm:$0xff]  ;;  %843 = vst [vmem:[#allocation3 + $0x10] sm:$0xff] (!%p1233_p8), %v1292_v19  ;;  %844 = vst [vmem:[#allocation3 + $0x18] sm:$0xff] (!%p1233_p8), %v1292_v19 }
  0x4c   : > { %v328_v48 = vld [vmem:[%s1481_s26 + $0x190] sm:$0xff]  ;;  %v329_v50 = vld [vmem:[%s1481_s26 + $0x198] sm:$0xff]  ;;  %845 = vst [vmem:[#allocation3 + $0x20] sm:$0xff] (!%p1233_p8), %v1292_v19  ;;  %846 = vst [vmem:[#allocation3 + $0x28] sm:$0xff] (!%p1233_p8), %v1292_v19 }
  0x4d   : > { %671 = vmatpush1.bf16.msra.mxu0 %v1199_v43  ;;  %712 = vmatpush1.bf16.msra.mxu1 %v1201_v44  ;;  %v325_v43 = vld [vmem:[%s1481_s26 + $0x178] sm:$0xff]  ;;  %v1203_v44 = vcombine.low %v312_v33, %v316_v34  ;;  %v332_v49 = vld [vmem:[%s1481_s26 + $0x1b0] sm:$0xff]  ;;  %847 = vst [vmem:[#allocation3 + $0x30] sm:$0xff] (!%p1233_p8), %v1292_v19  ;;  %848 = vst [vmem:[#allocation3 + $0x38] sm:$0xff] (!%p1233_p8), %v1292_v19 }
  0x4e   : > { %672 = vmatprep.subr.bf16.mxu0 %v1208_v45  ;;  %713 = vmatprep.subr.bf16.mxu1 %v1210_v46  ;;  %v1205_v45 = vcombine.low %v313_v35, %v317_v36  ;;  %v1212_v46 = vcombine.high %v320_v40, %v324_v41  ;;  %v1214_v47 = vcombine.high %v321_v42, %v325_v43  ;;  %v336_v56 = vld [vmem:[%s1481_s26 + $0x1d0] sm:$0xff]  ;;  %v337_v58 = vld [vmem:[%s1481_s26 + $0x1d8] sm:$0xff] }
  0x4f   : > { %v340_v57 = vld [vmem:[%s1481_s26 + $0x1f0] sm:$0xff]  ;;  %849 = vst [vmem:[#allocation4] sm:$0xff] (!%p1233_p8), %v1292_v19  ;;  %850 = vst [vmem:[#allocation4 + $0x8] sm:$0xff] (!%p1233_p8), %v1292_v19 }
  0x50   : > { %v1227_v1 = vcombine.low %v336_v56, %v340_v57  ;;  %851 = vst [vmem:[#allocation4 + $0x10] sm:$0xff] (!%p1233_p8), %v1292_v19  ;;  %852 = vst [vmem:[#allocation4 + $0x18] sm:$0xff] (!%p1233_p8), %v1292_v19 }
  0x51   : > { %673 = vmatpush1.bf16.msra.mxu0 %v1207_v51  ;;  %714 = vmatpush1.bf16.msra.mxu1 %v1209_v52  ;;  %v333_v51 = vld [vmem:[%s1481_s26 + $0x1b8] sm:$0xff]  ;;  %v1211_v52 = vcombine.low %v320_v40, %v324_v41  ;;  %853 = vst [vmem:[#allocation4 + $0x20] sm:$0xff] (!%p1233_p8), %v1292_v19  ;;  %854 = vst [vmem:[#allocation4 + $0x28] sm:$0xff] (!%p1233_p8), %v1292_v19 }
  0x52   : > { %674 = vmatprep.subr.bf16.mxu0 %v1216_v53  ;;  %715 = vmatprep.subr.bf16.mxu1 %v1218_v54  ;;  %v1213_v53 = vcombine.low %v321_v42, %v325_v43  ;;  %v1220_v54 = vcombine.high %v328_v48, %v332_v49  ;;  %v1222_v55 = vcombine.high %v329_v50, %v333_v51 }
  0x53   : > { %855 = vst [vmem:[#allocation4 + $0x30] sm:$0xff] (!%p1233_p8), %v1292_v19  ;;  %856 = vst [vmem:[#allocation4 + $0x38] sm:$0xff] (!%p1233_p8), %v1292_v19 }
  0x55   : > { %675 = vmatpush1.bf16.msra.mxu0 %v1215_v59  ;;  %716 = vmatpush1.bf16.msra.mxu1 %v1217_v60  ;;  %v341_v59 = vld [vmem:[%s1481_s26 + $0x1f8] sm:$0xff]  ;;  %v1219_v60 = vcombine.low %v328_v48, %v332_v49 }
  0x56   : > { %676 = vmatprep.subr.bf16.mxu0 %v1224_v61  ;;  %717 = vmatprep.subr.bf16.mxu1 %v1226_v62  ;;  %v1221_v61 = vcombine.low %v329_v50, %v333_v51  ;;  %v1228_v62 = vcombine.high %v336_v56, %v340_v57  ;;  %v1230_v63 = vcombine.high %v337_v58, %v341_v59 }
  0x57   : > { %v1229_v2 = vcombine.low %v337_v58, %v341_v59 }
  0x59   : > { %677 = vmatpush1.bf16.msra.mxu0 %v1223_v4  ;;  %718 = vmatpush1.bf16.msra.mxu1 %v1225_v5 }
  0x5a   : > { %744 = vmatprep.subr.bf16.mxu0 %v1172_v6  ;;  %785 = vmatprep.subr.bf16.mxu1 %v1174_v7 }
  0x5c   : > { %695 = vmatmul.mubr.bf16.vlgmr.msra.gmra.mrb[0].mxu0 %v1526_v12  ;;  %736 = vmatmul.mubr.bf16.vlgmr.msra.gmra.mrb[0].mxu1 %v1526_v12 }
  0x5d   : > { %745 = vmatpush1.bf16.msra.mxu0 %v1171_v13  ;;  %786 = vmatpush1.bf16.msra.mxu1 %v1173_v14 }
  0x5e   : > { %746 = vmatprep.subr.bf16.mxu0 %v1180_v15  ;;  %787 = vmatprep.subr.bf16.mxu1 %v1182_v16 }
  0x5f   : > { %776 = vmatprep.mubr.bf16.mxu0 %v1291_v0  ;;  %817 = vmatprep.mubr.bf16.mxu1 %v1291_v0  ;;  %v1197_v0 = vcombine.low %v305_v27, %v309_v28 }
  0x61   : > { %747 = vmatpush1.bf16.msra.mxu0 %v1179_v21  ;;  %788 = vmatpush1.bf16.msra.mxu1 %v1181_v22 }
  0x62   : > { %748 = vmatprep.subr.bf16.mxu0 %v1188_v23  ;;  %789 = vmatprep.subr.bf16.mxu1 %v1190_v24 }
  0x65   : > { %749 = vmatpush1.bf16.msra.mxu0 %v1187_v29  ;;  %790 = vmatpush1.bf16.msra.mxu1 %v1189_v30 }
  0x66   : > { %750 = vmatprep.subr.bf16.mxu0 %v1196_v31  ;;  %791 = vmatprep.subr.bf16.mxu1 %v1198_v32 }
  0x69   : > { %751 = vmatpush1.bf16.msra.mxu0 %v1195_v37  ;;  %792 = vmatpush1.bf16.msra.mxu1 %v1197_v0 }
  0x6a   : > { %752 = vmatprep.subr.bf16.mxu0 %v1204_v38  ;;  %793 = vmatprep.subr.bf16.mxu1 %v1206_v39 }
  0x6d   : > { %753 = vmatpush1.bf16.msra.mxu0 %v1203_v44  ;;  %794 = vmatpush1.bf16.msra.mxu1 %v1205_v45 }
  0x6e   : > { %754 = vmatprep.subr.bf16.mxu0 %v1212_v46  ;;  %795 = vmatprep.subr.bf16.mxu1 %v1214_v47 }
  0x71   : > { %755 = vmatpush1.bf16.msra.mxu0 %v1211_v52  ;;  %796 = vmatpush1.bf16.msra.mxu1 %v1213_v53 }
  0x72   : > { %756 = vmatprep.subr.bf16.mxu0 %v1220_v54  ;;  %797 = vmatprep.subr.bf16.mxu1 %v1222_v55 }
  0x75   : > { %757 = vmatpush1.bf16.msra.mxu0 %v1219_v60  ;;  %798 = vmatpush1.bf16.msra.mxu1 %v1221_v61 }
  0x76   : > { %758 = vmatprep.subr.bf16.mxu0 %v1228_v62  ;;  %799 = vmatprep.subr.bf16.mxu1 %v1230_v63 }
  0x79   : > { %759 = vmatpush1.bf16.msra.mxu0 %v1227_v1  ;;  %800 = vmatpush1.bf16.msra.mxu1 %v1229_v2 }
  0x7c   : > { %777 = vmatmul.mubr.bf16.vlgmr.msra.gmra.mrb[4].mxu0 %v1526_v12  ;;  %818 = vmatmul.mubr.bf16.vlgmr.msra.gmra.mrb[4].mxu1 %v1526_v12 }
 0x12f   : > { %v696_v3 = vpop.f32.mrb[0].mxu0  ;;  %v737_v4 = vpop.f32.mrb[0].mxu1 }
 0x130   : > { %829 = vst [vmem:[%s828_s30] sm:$0xff] %v696_v3  ;;  %v698_v5 = vpop.f32.mrb[1].mxu0  ;;  %831 = vst [vmem:[%s828_s30 + $0x10] sm:$0xff] %v737_v4  ;;  %v739_v6 = vpop.f32.mrb[1].mxu1 }
 0x131   : > { %830 = vst [vmem:[%s828_s30 + $0x8] sm:$0xff] %v698_v5  ;;  %v700_v7 = vpop.f32.mrb[2].mxu0  ;;  %832 = vst [vmem:[%s828_s30 + $0x18] sm:$0xff] %v739_v6  ;;  %v741_v8 = vpop.f32.mrb[2].mxu1 }
 0x132   : > { %v701_v9 = vpop.f32.mrb[3].mxu0  ;;  %v742_v10 = vpop.f32.mrb[3].mxu1 }
 0x14c   : > { %840 = sbr.rel (%p1233_p8) target bundleno = 339 (0x153), region = 55 }
 0x14f   : > { %v778_v11 = vpop.f32.mrb[4].mxu0  ;;  %v819_v13 = vpop.f32.mrb[4].mxu1 }
 0x150   : > { %833 = vst [vmem:[%s828_s30 + $0x20] sm:$0xff] %v778_v11  ;;  %v780_v14 = vpop.f32.mrb[5].mxu0  ;;  %835 = vst [vmem:[%s828_s30 + $0x30] sm:$0xff] %v819_v13  ;;  %v1559_v12 = vpop.f32.mrb[5].mxu1 }
 0x151   : > { %834 = vst [vmem:[%s828_s30 + $0x28] sm:$0xff] %v780_v14  ;;  %v782_v15 = vpop.f32.mrb[6].mxu0  ;;  %836 = vst [vmem:[%s828_s30 + $0x38] sm:$0xff] %v1559_v12  ;;  %v823_v16 = vpop.f32.mrb[6].mxu1 }
 0x152   : > { %v783_v17 = vpop.f32.mrb[7].mxu0  ;;  %v824_v18 = vpop.f32.mrb[7].mxu1 }
 0x153 PF: > { %v857_v20 = vld [vmem:[#allocation3] sm:$0xff]  ;;  %v858_v21 = vld [vmem:[#allocation3 + $0x8] sm:$0xff]  ;;  %v859_v22 = vld [vmem:[#allocation3 + $0x10] sm:$0xff]  ;;  %v889_v23 = vmul.f32 %v696_v3, %v696_v3  ;;  %v890_v24 = vmul.f32 %v698_v5, %v698_v5  ;;  %v891_v25 = vmul.f32 %v737_v4, %v737_v4  ;;  %v892_v26 = vmul.f32 %v739_v6, %v739_v6  ;;  %p1234_p9 = scmp.ne.s32.totalorder %s1324_s12, 3 }
 0x154   : > { %v865_v27 = vadd.f32 %v857_v20, %v696_v3  ;;  %v866_v28 = vadd.f32 %v858_v21, %v698_v5  ;;  %v867_v29 = vadd.f32 %v859_v22, %v737_v4  ;;  %v860_v30 = vld [vmem:[#allocation3 + $0x18] sm:$0xff]  ;;  %v861_v31 = vld [vmem:[#allocation3 + $0x20] sm:$0xff]  ;;  %v862_v32 = vld [vmem:[#allocation3 + $0x28] sm:$0xff]  ;;  %v893_v33 = vmul.f32 %v778_v11, %v778_v11 }
 0x155   : > { %v868_v34 = vadd.f32 %v860_v30, %v739_v6  ;;  %v869_v35 = vadd.f32 %v861_v31, %v778_v11  ;;  %v870_v36 = vadd.f32 %v862_v32, %v780_v14  ;;  %v863_v37 = vld [vmem:[#allocation3 + $0x30] sm:$0xff]  ;;  %v864_v0 = vld [vmem:[#allocation3 + $0x38] sm:$0xff]  ;;  %v881_v38 = vld [vmem:[#allocation4] sm:$0xff]  ;;  %v894_v39 = vmul.f32 %v780_v14, %v780_v14 }
 0x156   : > { %873 = vst [vmem:[#allocation3] sm:$0xff] %v865_v27  ;;  %874 = vst [vmem:[#allocation3 + $0x8] sm:$0xff] %v866_v28  ;;  %v871_v40 = vadd.f32 %v863_v37, %v819_v13  ;;  %v872_v41 = vadd.f32 %v864_v0, %v1559_v12  ;;  %v897_v42 = vadd.f32 %v889_v23, %v881_v38  ;;  %v882_v43 = vld [vmem:[#allocation4 + $0x8] sm:$0xff]  ;;  %v883_v44 = vld [vmem:[#allocation4 + $0x10] sm:$0xff] }
 0x157   : > { %875 = vst [vmem:[#allocation3 + $0x10] sm:$0xff] %v867_v29  ;;  %v884_v45 = vld [vmem:[#allocation4 + $0x18] sm:$0xff]  ;;  %v895_v46 = vmul.f32 %v819_v13, %v819_v13  ;;  %876 = vst [vmem:[#allocation3 + $0x18] sm:$0xff] %v868_v34  ;;  %v898_v47 = vadd.f32 %v890_v24, %v882_v43  ;;  %v899_v48 = vadd.f32 %v891_v25, %v883_v44  ;;  %v885_v50 = vld [vmem:[#allocation4 + $0x20] sm:$0xff]  ;;  %916 = sbr.rel (%p1234_p9) target bundleno = 560 (0x230), region = 59 }
 0x158   : > { %877 = vst [vmem:[#allocation3 + $0x20] sm:$0xff] %v869_v35  ;;  %878 = vst [vmem:[#allocation3 + $0x28] sm:$0xff] %v870_v36  ;;  %v900_v49 = vadd.f32 %v892_v26, %v884_v45  ;;  %v886_v51 = vld [vmem:[#allocation4 + $0x28] sm:$0xff]  ;;  %v887_v52 = vld [vmem:[#allocation4 + $0x30] sm:$0xff]  ;;  %v896_v53 = vmul.f32 %v1559_v12, %v1559_v12  ;;  %v901_v54 = vadd.f32 %v893_v33, %v885_v50 }
 0x159   : > { %879 = vst [vmem:[#allocation3 + $0x30] sm:$0xff] %v871_v40  ;;  %880 = vst [vmem:[#allocation3 + $0x38] sm:$0xff] %v872_v41  ;;  %v902_v55 = vadd.f32 %v894_v39, %v886_v51  ;;  %v903_v56 = vadd.f32 %v895_v46, %v887_v52  ;;  %v888_v57 = vld [vmem:[#allocation4 + $0x38] sm:$0xff]  ;;  %v960_v34 = vld [vmem:[#allocation2] sm:$0xff] (!%p1234_p9) }
 0x15a   : > { %905 = vst [vmem:[#allocation4] sm:$0xff] %v897_v42  ;;  %906 = vst [vmem:[#allocation4 + $0x8] sm:$0xff] %v898_v47  ;;  %v904_v58 = vadd.f32 %v896_v53, %v888_v57  ;;  %v961_v35 = vld [vmem:[#allocation2 + $0x8] sm:$0xff] (!%p1234_p9)  ;;  %v962_v36 = vld [vmem:[#allocation2 + $0x10] sm:$0xff] (!%p1234_p9) }
 0x15b   : > { %907 = vst [vmem:[#allocation4 + $0x10] sm:$0xff] %v899_v48  ;;  %908 = vst [vmem:[#allocation4 + $0x18] sm:$0xff] %v900_v49  ;;  %v963_v37 = vld [vmem:[#allocation2 + $0x18] sm:$0xff] (!%p1234_p9)  ;;  %v964_v38 = vld [vmem:[#allocation2 + $0x20] sm:$0xff] (!%p1234_p9) }
 0x15c   : > { %909 = vst [vmem:[#allocation4 + $0x20] sm:$0xff] %v901_v54  ;;  %910 = vst [vmem:[#allocation4 + $0x28] sm:$0xff] %v902_v55  ;;  %v965_v39 = vld [vmem:[#allocation2 + $0x28] sm:$0xff] (!%p1234_p9)  ;;  %v966_v40 = vld [vmem:[#allocation2 + $0x30] sm:$0xff] (!%p1234_p9) }
 0x15d   : > { %911 = vst [vmem:[#allocation4 + $0x30] sm:$0xff] %v903_v56  ;;  %912 = vst [vmem:[#allocation4 + $0x38] sm:$0xff] %v904_v58  ;;  %v917_v59 = vld [vmem:[#allocation3] sm:$0xff] (!%p1234_p9)  ;;  %v918_v60 = vld [vmem:[#allocation3 + $0x8] sm:$0xff] (!%p1234_p9) }
 0x15e   : > { %v919_v61 = vld [vmem:[#allocation3 + $0x10] sm:$0xff]  ;;  %v925_v62 = vadd.f32 %v918_v60, %v917_v59  ;;  %v920_v63 = vld [vmem:[#allocation3 + $0x18] sm:$0xff]  ;;  %v1001_v51 = vld [vmem:[#allocation2 + $0x40] sm:$0xff] }
 0x15f   : > { %v921_v5 = vld [vmem:[#allocation3 + $0x20] sm:$0xff]  ;;  %v922_v9 = vld [vmem:[#allocation3 + $0x28] sm:$0xff]  ;;  %v967_v42 = vld [vmem:[#allocation2 + $0x38] sm:$0xff] }
 0x160   : > { %v926_v2 = vadd.f32 %v925_v62, %v919_v61  ;;  %v923_v14 = vld [vmem:[#allocation3 + $0x30] sm:$0xff]  ;;  %v924_v17 = vld [vmem:[#allocation3 + $0x38] sm:$0xff]  ;;  %v1002_v56 = vld [vmem:[#allocation2 + $0x48] sm:$0xff] }
 0x161   : > { %v934_v1 = vld [vmem:[#allocation4] sm:$0xff]  ;;  %v935_v3 = vld [vmem:[#allocation4 + $0x8] sm:$0xff]  ;;  %v1003_v57 = vld [vmem:[#allocation2 + $0x50] sm:$0xff] }
 0x162   : > { %v936_v4 = vld [vmem:[#allocation4 + $0x10] sm:$0xff]  ;;  %v942_v6 = vadd.f32 %v935_v3, %v934_v1  ;;  %v927_v7 = vadd.f32 %v926_v2, %v920_v63  ;;  %v937_v8 = vld [vmem:[#allocation4 + $0x18] sm:$0xff]  ;;  %v1005_v63 = vld [vmem:[#allocation2 + $0x60] sm:$0xff] }
 0x163   : > { %v938_v13 = vld [vmem:[#allocation4 + $0x20] sm:$0xff]  ;;  %v939_v16 = vld [vmem:[#allocation4 + $0x28] sm:$0xff]  ;;  %v1004_v58 = vld [vmem:[#allocation2 + $0x58] sm:$0xff] }
 0x164   : > { %v943_v10 = vadd.f32 %v942_v6, %v936_v4  ;;  %v928_v11 = vadd.f32 %v927_v7, %v921_v5  ;;  %v940_v20 = vld [vmem:[#allocation4 + $0x30] sm:$0xff]  ;;  %v941_v23 = vld [vmem:[#allocation4 + $0x38] sm:$0xff]  ;;  %v1006_v1 = vld [vmem:[#allocation2 + $0x68] sm:$0xff] }
 0x165   : > { %v1007_v2 = vld [vmem:[#allocation2 + $0x70] sm:$0xff]  ;;  %v1008_v7 = vld [vmem:[#allocation2 + $0x78] sm:$0xff] }
 0x166   : > { %v944_v12 = vadd.f32 %v943_v10, %v937_v8  ;;  %v929_v15 = vadd.f32 %v928_v11, %v922_v9 }
 0x168   : > { %v945_v18 = vadd.f32 %v944_v12, %v938_v13  ;;  %v930_v19 = vadd.f32 %v929_v15, %v923_v14 }
 0x16a   : > { %v946_v21 = vadd.f32 %v945_v18, %v939_v16  ;;  %v931_v22 = vadd.f32 %v930_v19, %v924_v17 }
 0x16c   : > { %v947_v24 = vadd.f32 %v946_v21, %v940_v20  ;;  %932 = vadd.xlane.f32.xlu0 %v931_v22  ;;  %v1042_v20 = vld [vmem:[#allocation2 + $0x80] sm:$0xff] }
 0x16e   : > { %v948_v25 = vadd.f32 %v947_v24, %v941_v23 }
 0x170   : > { %949 = vadd.xlane.f32.xlu0 %v948_v25  ;;  %v1043_v25 = vld [vmem:[#allocation2 + $0x88] sm:$0xff] }
 0x1f9   : > { %v933_v26 = vpop.xlane.xlu0 %932 }
 0x1fa   : > { %v951_v27 = vmul.f32 0.00024414063, %v933_v26  ;;  %v1044_v26 = vld [vmem:[#allocation2 + $0x90] sm:$0xff] }
 0x1fc   : > { %v953_v29 = vmul.f32 %v951_v27, %v951_v27  ;;  %v958_v0 = vsub.f32 0.0, %v951_v27  ;;  %v1045_v27 = vld [vmem:[#allocation2 + $0x98] sm:$0xff] }
 0x1fd   : > { %v950_v28 = vpop.xlane.xlu0 %949 }
 0x1fe   : > { %v952_v30 = vmul.f32 0.00024414063, %v950_v28 }
 0x200   : > { %v954_v31 = vsub.f32 %v952_v30, %v953_v29 }
 0x202   : > { %v955_v32 = vmax.f32 %v954_v31, 0.0 }
 0x204   : > { %v956_v33 = vadd.f32 1e-05, %v955_v32  ;;  %v1046_v32 = vld [vmem:[#allocation2 + $0xa0] sm:$0xff] }
 0x206   : > { %1265 = vrsqrt.f32 %v956_v33  ;;  %v1047_v33 = vld [vmem:[#allocation2 + $0xa8] sm:$0xff] }
 0x210   : > { %v1567_v41 = vpop.eup %1265 }
 0x211   : > { %v1570_v43 = vmul.f32 %v1567_v41, %v958_v0  ;;  %v968_v44 = vmul.f32 %v1567_v41, %v960_v34  ;;  %v969_v45 = vmul.f32 %v1567_v41, %v961_v35  ;;  %v970_v46 = vmul.f32 %v1567_v41, %v962_v36  ;;  %v1048_v34 = vld [vmem:[#allocation2 + $0xb0] sm:$0xff] }
 0x212   : > { %v971_v47 = vmul.f32 %v1567_v41, %v963_v37  ;;  %v972_v48 = vmul.f32 %v1567_v41, %v964_v38  ;;  %v973_v49 = vmul.f32 %v1567_v41, %v965_v39  ;;  %v974_v50 = vmul.f32 %v1567_v41, %v966_v40  ;;  %v1049_v38 = vld [vmem:[#allocation2 + $0xb8] sm:$0xff] }
 0x213   : > { %v975_v52 = vmul.f32 %v1567_v41, %v967_v42  ;;  %v976_v53 = vadd.f32 %v968_v44, %v1570_v43  ;;  %v977_v54 = vadd.f32 %v969_v45, %v1570_v43  ;;  %v978_v55 = vadd.f32 %v970_v46, %v1570_v43 }
 0x214   : > { %v979_v59 = vadd.f32 %v971_v47, %v1570_v43  ;;  %v980_v60 = vadd.f32 %v972_v48, %v1570_v43  ;;  %v981_v61 = vadd.f32 %v973_v49, %v1570_v43  ;;  %v982_v62 = vadd.f32 %v974_v50, %v1570_v43 }
 0x215   : > { %v983_v3 = vadd.f32 %v975_v52, %v1570_v43  ;;  %v984_v4 = vmax.f32 %v976_v53, 0.0  ;;  %v985_v5 = vmax.f32 %v977_v54, 0.0  ;;  %v986_v6 = vmax.f32 %v978_v55, 0.0  ;;  %v1083_v53 = vld [vmem:[#allocation2 + $0xc0] sm:$0xff] }
 0x216   : > { %v987_v8 = vmax.f32 %v979_v59, 0.0  ;;  %v988_v9 = vmax.f32 %v980_v60, 0.0  ;;  %v989_v10 = vmax.f32 %v981_v61, 0.0  ;;  %v990_v11 = vmax.f32 %v982_v62, 0.0  ;;  %v1085_v59 = vld [vmem:[#allocation2 + $0xd0] sm:$0xff]  ;;  %v1086_v60 = vld [vmem:[#allocation2 + $0xd8] sm:$0xff] }
 0x217   : > { %v991_v13 = vmax.f32 %v983_v3, 0.0  ;;  %992 = vst [vmem:[%s1744_s2] sm:$0xff] %v984_v4  ;;  %993 = vst [vmem:[%s1744_s2 + $0x8] sm:$0xff] %v985_v5  ;;  %v1009_v14 = vmul.f32 %v1567_v41, %v1001_v51  ;;  %v1010_v12 = vmul.f32 %v1567_v41, %v1002_v56  ;;  %v1011_v15 = vmul.f32 %v1567_v41, %v1003_v57  ;;  %v1088_v3 = vld [vmem:[#allocation2 + $0xe8] sm:$0xff]  ;;  %v1089_v4 = vld [vmem:[#allocation2 + $0xf0] sm:$0xff] }
 0x218   : > { %994 = vst [vmem:[%s1744_s2 + $0x10] sm:$0xff] %v986_v6  ;;  %995 = vst [vmem:[%s1744_s2 + $0x18] sm:$0xff] %v987_v8  ;;  %v1012_v16 = vmul.f32 %v1567_v41, %v1004_v58  ;;  %v1013_v17 = vmul.f32 %v1567_v41, %v1005_v63  ;;  %v1014_v18 = vmul.f32 %v1567_v41, %v1006_v1  ;;  %v1084_v58 = vld [vmem:[#allocation2 + $0xc8] sm:$0xff] }
 0x219   : > { %996 = vst [vmem:[%s1744_s2 + $0x20] sm:$0xff] %v988_v9  ;;  %997 = vst [vmem:[%s1744_s2 + $0x28] sm:$0xff] %v989_v10  ;;  %v1015_v19 = vmul.f32 %v1567_v41, %v1007_v2  ;;  %v1016_v21 = vmul.f32 %v1567_v41, %v1008_v7  ;;  %v1017_v22 = vadd.f32 %v1009_v14, %v1570_v43  ;;  %v1087_v2 = vld [vmem:[#allocation2 + $0xe0] sm:$0xff]  ;;  %v1090_v9 = vld [vmem:[#allocation2 + $0xf8] sm:$0xff] }
 0x21a   : > { %998 = vst [vmem:[%s1744_s2 + $0x30] sm:$0xff] %v990_v11  ;;  %999 = vst [vmem:[%s1744_s2 + $0x38] sm:$0xff] %v991_v13  ;;  %v1018_v23 = vadd.f32 %v1010_v12, %v1570_v43  ;;  %v1019_v24 = vadd.f32 %v1011_v15, %v1570_v43  ;;  %v1020_v28 = vadd.f32 %v1012_v16, %v1570_v43 }
 0x21b   : > { %v1021_v29 = vadd.f32 %v1013_v17, %v1570_v43  ;;  %v1022_v30 = vadd.f32 %v1014_v18, %v1570_v43  ;;  %v1023_v31 = vadd.f32 %v1015_v19, %v1570_v43  ;;  %v1024_v35 = vadd.f32 %v1016_v21, %v1570_v43 }
 0x21c   : > { %v1025_v36 = vmax.f32 %v1017_v22, 0.0  ;;  %v1026_v37 = vmax.f32 %v1018_v23, 0.0  ;;  %v1027_v0 = vmax.f32 %v1019_v24, 0.0  ;;  %v1028_v39 = vmax.f32 %v1020_v28, 0.0 }
 0x21d   : > { %v1029_v40 = vmax.f32 %v1021_v29, 0.0  ;;  %v1030_v42 = vmax.f32 %v1022_v30, 0.0  ;;  %v1031_v44 = vmax.f32 %v1023_v31, 0.0  ;;  %v1032_v45 = vmax.f32 %v1024_v35, 0.0 }
 0x21e   : > { %1033 = vst [vmem:[%s1744_s2 + $0x40] sm:$0xff] %v1025_v36  ;;  %1034 = vst [vmem:[%s1744_s2 + $0x48] sm:$0xff] %v1026_v37  ;;  %v1050_v46 = vmul.f32 %v1567_v41, %v1042_v20  ;;  %v1051_v47 = vmul.f32 %v1567_v41, %v1043_v25  ;;  %v1052_v48 = vmul.f32 %v1567_v41, %v1044_v26 }
 0x21f   : > { %1035 = vst [vmem:[%s1744_s2 + $0x50] sm:$0xff] %v1027_v0  ;;  %1036 = vst [vmem:[%s1744_s2 + $0x58] sm:$0xff] %v1028_v39  ;;  %v1053_v49 = vmul.f32 %v1567_v41, %v1045_v27  ;;  %v1054_v50 = vmul.f32 %v1567_v41, %v1046_v32  ;;  %v1055_v51 = vmul.f32 %v1567_v41, %v1047_v33 }
 0x220   : > { %1037 = vst [vmem:[%s1744_s2 + $0x60] sm:$0xff] %v1029_v40  ;;  %1038 = vst [vmem:[%s1744_s2 + $0x68] sm:$0xff] %v1030_v42  ;;  %v1056_v52 = vmul.f32 %v1567_v41, %v1048_v34  ;;  %v1057_v54 = vmul.f32 %v1567_v41, %v1049_v38  ;;  %v1058_v55 = vadd.f32 %v1050_v46, %v1570_v43 }
 0x221   : > { %1039 = vst [vmem:[%s1744_s2 + $0x70] sm:$0xff] %v1031_v44  ;;  %1040 = vst [vmem:[%s1744_s2 + $0x78] sm:$0xff] %v1032_v45  ;;  %v1059_v56 = vadd.f32 %v1051_v47, %v1570_v43  ;;  %v1060_v57 = vadd.f32 %v1052_v48, %v1570_v43  ;;  %v1061_v61 = vadd.f32 %v1053_v49, %v1570_v43 }
 0x222   : > { %v1062_v62 = vadd.f32 %v1054_v50, %v1570_v43  ;;  %v1063_v63 = vadd.f32 %v1055_v51, %v1570_v43  ;;  %v1064_v1 = vadd.f32 %v1056_v52, %v1570_v43  ;;  %v1065_v5 = vadd.f32 %v1057_v54, %v1570_v43 }
 0x223   : > { %v1066_v6 = vmax.f32 %v1058_v55, 0.0  ;;  %v1067_v7 = vmax.f32 %v1059_v56, 0.0  ;;  %v1068_v8 = vmax.f32 %v1060_v57, 0.0  ;;  %v1069_v10 = vmax.f32 %v1061_v61, 0.0 }
 0x224   : > { %v1070_v11 = vmax.f32 %v1062_v62, 0.0  ;;  %v1071_v13 = vmax.f32 %v1063_v63, 0.0  ;;  %v1072_v14 = vmax.f32 %v1064_v1, 0.0  ;;  %v1073_v12 = vmax.f32 %v1065_v5, 0.0 }
 0x225   : > { %1074 = vst [vmem:[%s1744_s2 + $0x80] sm:$0xff] %v1066_v6  ;;  %1075 = vst [vmem:[%s1744_s2 + $0x88] sm:$0xff] %v1067_v7  ;;  %v1091_v15 = vmul.f32 %v1567_v41, %v1083_v53  ;;  %v1092_v16 = vmul.f32 %v1567_v41, %v1084_v58  ;;  %v1093_v17 = vmul.f32 %v1567_v41, %v1085_v59 }
 0x226   : > { %1076 = vst [vmem:[%s1744_s2 + $0x90] sm:$0xff] %v1068_v8  ;;  %1077 = vst [vmem:[%s1744_s2 + $0x98] sm:$0xff] %v1069_v10  ;;  %v1094_v18 = vmul.f32 %v1567_v41, %v1086_v60  ;;  %v1095_v19 = vmul.f32 %v1567_v41, %v1087_v2  ;;  %v1096_v20 = vmul.f32 %v1567_v41, %v1088_v3 }
 0x227   : > { %1078 = vst [vmem:[%s1744_s2 + $0xa0] sm:$0xff] %v1070_v11  ;;  %1079 = vst [vmem:[%s1744_s2 + $0xa8] sm:$0xff] %v1071_v13  ;;  %v1097_v21 = vmul.f32 %v1567_v41, %v1089_v4  ;;  %v1098_v22 = vmul.f32 %v1567_v41, %v1090_v9  ;;  %v1099_v23 = vadd.f32 %v1091_v15, %v1570_v43 }
 0x228   : > { %1080 = vst [vmem:[%s1744_s2 + $0xb0] sm:$0xff] %v1072_v14  ;;  %1081 = vst [vmem:[%s1744_s2 + $0xb8] sm:$0xff] %v1073_v12  ;;  %v1100_v24 = vadd.f32 %v1092_v16, %v1570_v43  ;;  %v1101_v25 = vadd.f32 %v1093_v17, %v1570_v43  ;;  %v1102_v26 = vadd.f32 %v1094_v18, %v1570_v43 }
 0x229   : > { %v1103_v27 = vadd.f32 %v1095_v19, %v1570_v43  ;;  %v1104_v28 = vadd.f32 %v1096_v20, %v1570_v43  ;;  %v1105_v29 = vadd.f32 %v1097_v21, %v1570_v43  ;;  %v1106_v30 = vadd.f32 %v1098_v22, %v1570_v43 }
 0x22a   : > { %v1107_v31 = vmax.f32 %v1099_v23, 0.0  ;;  %v1108_v32 = vmax.f32 %v1100_v24, 0.0  ;;  %v1109_v33 = vmax.f32 %v1101_v25, 0.0  ;;  %v1110_v41 = vmax.f32 %v1102_v26, 0.0 }
 0x22b   : > { %v1111_v34 = vmax.f32 %v1103_v27, 0.0  ;;  %v1112_v35 = vmax.f32 %v1104_v28, 0.0  ;;  %v1113_v36 = vmax.f32 %v1105_v29, 0.0  ;;  %v1114_v37 = vmax.f32 %v1106_v30, 0.0 }
 0x22c   : > { %1115 = vst [vmem:[%s1744_s2 + $0xc0] sm:$0xff] %v1107_v31  ;;  %1116 = vst [vmem:[%s1744_s2 + $0xc8] sm:$0xff] %v1108_v32 }
 0x22d   : > { %1117 = vst [vmem:[%s1744_s2 + $0xd0] sm:$0xff] %v1109_v33  ;;  %1118 = vst [vmem:[%s1744_s2 + $0xd8] sm:$0xff] %v1110_v41 }
 0x22e   : > { %1119 = vst [vmem:[%s1744_s2 + $0xe0] sm:$0xff] %v1111_v34  ;;  %1120 = vst [vmem:[%s1744_s2 + $0xe8] sm:$0xff] %v1112_v35 }
 0x22f   : > { %1121 = vst [vmem:[%s1744_s2 + $0xf0] sm:$0xff] %v1113_v36  ;;  %1122 = vst [vmem:[%s1744_s2 + $0xf8] sm:$0xff] %v1114_v37 }
 0x230 PF: > { %p9_p10 = scmp.ge.s32.totalorder %s1327_s13, 6   ;;  %s1745_s9 = smov %s1285_s10 }
 0x231   : > { %s1746_s10 = smov %s1336_s16  ;;  %s1747_s11 = smov %s1327_s13 }
 0x232   :  { %11 = sbr.rel (!%p9_p10) target bundleno = 2 (0x2), region = 94 }

// kernel: costregnet_forward.10
= control target key start
LH: loop header
LB: loop body
LE: loop exit
PB: predicated region body
PF: predicated region fallthrough
CT: control target
= control target key end

     0   :  { %s1892_s9 = smov 0   ;;  %s1894_s10 = smov 0   ;;  %s2526_s0 = inlined_call_operand.vmem [shape: bf16[8,256], index: 0, kind: input, shape index: {}]   ;;  %s2527_s1 = inlined_call_operand.vmem [shape: bf16[256,4096], index: 1, kind: input, shape index: {}]   ;;  %s2528_s2 = inlined_call_operand.vmem [shape: f32[8,4096], index: 2, kind: output, shape index: {}]  }
   0x1   :  { %s1896_s11 = smov 0  }
   0x2 LB: > { %s1908_s12 = sadd.s32 4294967295, %s1874_s11   ;;  %s1911_s13 = sadd.s32 1, %s1874_s11   ;;  %s1874_s11 = sphi %s1896_s11, %s2531_s11   ;;  %s1870_s10 = sphi %s1894_s10, %s2530_s10   ;;  %s1866_s9 = sphi %s1892_s9, %s2529_s9  }
   0x3   : > { %s37_s14 = ssub.s32 %s1874_s11, %s1911_s13  ;;  %s40_s15 = sadd.s32 1, %s1870_s10 }
   0x4   : > { %p38_p0 = scmp.eq.s32.totalorder %s37_s14, 0  ;;  %p47_p1 = scmp.ne.s32.totalorder %s1870_s10, %s1866_s9 }
   0x5   : > { %p48_p2 = scmp.eq.s32.totalorder %s1874_s11, 0  ;;  %p1679_p4 = scmp.ge.s32.totalorder %s1874_s11, 4 }
   0x6   : > { %s1920_s16 = scalar_select %p38_p0, %s1870_s10, %s40_s15  }
   0x7   : > { %p49_p3 = por %p48_p2, %p47_p1  ;;  %97 = sbr.rel (%p1679_p4) target bundleno = 82 (0x52), region = 20 }
   0xe   : > { %100 = sbr.rel (!%p49_p3) target bundleno = 82 (0x52), region = 24  ;;  %s102_s17 = sand.u32 (%p49_p3), 1, %s1870_s10  }
   0xf   : > { %s1821_s18 = sshll.u32 (%p49_p3), %s1874_s11, 5  ;;  %s1680_s19 = sshll.u32 (%p49_p3), %s102_s17, 10 }
  0x10   : > { %s1928_s22 = scalar_lea.vmem (%p49_p3), %s2527_s1, %s1821_s18  ;;  %s1933_s23 = scalar_lea.vmem (%p49_p3), [#allocation5], %s1680_s19 }
  0x11   : > { %v120_v0 = vld [vmem:[%s1928_s22] sm:$0xff] (%p49_p3)  ;;  %v122_v1 = vld [vmem:[%s1928_s22 + $0x8] sm:$0xff] (%p49_p3)  ;;  %v124_v2 = vld [vmem:[%s1928_s22 + $0x10] sm:$0xff] (%p49_p3) }
  0x12   : > { %121 = vst [vmem:[%s1933_s23] sm:$0xff] (%p49_p3), %v120_v0  ;;  %123 = vst [vmem:[%s1933_s23 + $0x8] sm:$0xff] (%p49_p3), %v122_v1  ;;  %v126_v3 = vld [vmem:[%s1928_s22 + $0x18] sm:$0xff] (%p49_p3)  ;;  %v128_v4 = vld [vmem:[%s1928_s22 + $0x80] sm:$0xff] (%p49_p3) }
  0x13   : > { %125 = vst [vmem:[%s1933_s23 + $0x10] sm:$0xff] (%p49_p3), %v124_v2  ;;  %v130_v5 = vld [vmem:[%s1928_s22 + $0x88] sm:$0xff] (%p49_p3)  ;;  %127 = vst [vmem:[%s1933_s23 + $0x18] sm:$0xff] (%p49_p3), %v126_v3  ;;  %v132_v6 = vld [vmem:[%s1928_s22 + $0x90] sm:$0xff] (%p49_p3) }
  0x14   : > { %129 = vst [vmem:[%s1933_s23 + $0x20] sm:$0xff] (%p49_p3), %v128_v4  ;;  %131 = vst [vmem:[%s1933_s23 + $0x28] sm:$0xff] (%p49_p3), %v130_v5  ;;  %v134_v7 = vld [vmem:[%s1928_s22 + $0x98] sm:$0xff] (%p49_p3)  ;;  %v136_v8 = vld [vmem:[%s1928_s22 + $0x100] sm:$0xff] (%p49_p3) }
  0x15   : > { %133 = vst [vmem:[%s1933_s23 + $0x30] sm:$0xff] %v132_v6  ;;  %135 = vst [vmem:[%s1933_s23 + $0x38] sm:$0xff] %v134_v7  ;;  %v138_v9 = vld [vmem:[%s1928_s22 + $0x108] sm:$0xff]  ;;  %v140_v10 = vld [vmem:[%s1928_s22 + $0x110] sm:$0xff] }
  0x16   : > { %137 = vst [vmem:[%s1933_s23 + $0x40] sm:$0xff] %v136_v8  ;;  %v142_v11 = vld [vmem:[%s1928_s22 + $0x118] sm:$0xff]  ;;  %139 = vst [vmem:[%s1933_s23 + $0x48] sm:$0xff] %v138_v9  ;;  %v144_v12 = vld [vmem:[%s1928_s22 + $0x180] sm:$0xff] }
  0x17   : > { %141 = vst [vmem:[%s1933_s23 + $0x50] sm:$0xff] %v140_v10  ;;  %143 = vst [vmem:[%s1933_s23 + $0x58] sm:$0xff] %v142_v11  ;;  %v146_v13 = vld [vmem:[%s1928_s22 + $0x188] sm:$0xff]  ;;  %v148_v14 = vld [vmem:[%s1928_s22 + $0x190] sm:$0xff] }
  0x18   : > { %145 = vst [vmem:[%s1933_s23 + $0x60] sm:$0xff] %v144_v12  ;;  %147 = vst [vmem:[%s1933_s23 + $0x68] sm:$0xff] %v146_v13  ;;  %v150_v15 = vld [vmem:[%s1928_s22 + $0x198] sm:$0xff]  ;;  %v152_v16 = vld [vmem:[%s1928_s22 + $0x200] sm:$0xff] }
  0x19   : > { %149 = vst [vmem:[%s1933_s23 + $0x70] sm:$0xff] %v148_v14  ;;  %v154_v17 = vld [vmem:[%s1928_s22 + $0x208] sm:$0xff]  ;;  %151 = vst [vmem:[%s1933_s23 + $0x78] sm:$0xff] %v150_v15  ;;  %v156_v18 = vld [vmem:[%s1928_s22 + $0x210] sm:$0xff] }
  0x1a   : > { %153 = vst [vmem:[%s1933_s23 + $0x80] sm:$0xff] %v152_v16  ;;  %155 = vst [vmem:[%s1933_s23 + $0x88] sm:$0xff] %v154_v17  ;;  %v158_v19 = vld [vmem:[%s1928_s22 + $0x218] sm:$0xff]  ;;  %v160_v20 = vld [vmem:[%s1928_s22 + $0x280] sm:$0xff] }
  0x1b   : > { %157 = vst [vmem:[%s1933_s23 + $0x90] sm:$0xff] %v156_v18  ;;  %159 = vst [vmem:[%s1933_s23 + $0x98] sm:$0xff] %v158_v19  ;;  %v162_v21 = vld [vmem:[%s1928_s22 + $0x288] sm:$0xff]  ;;  %v164_v22 = vld [vmem:[%s1928_s22 + $0x290] sm:$0xff] }
  0x1c   : > { %161 = vst [vmem:[%s1933_s23 + $0xa0] sm:$0xff] %v160_v20  ;;  %v166_v23 = vld [vmem:[%s1928_s22 + $0x298] sm:$0xff]  ;;  %163 = vst [vmem:[%s1933_s23 + $0xa8] sm:$0xff] %v162_v21  ;;  %v168_v24 = vld [vmem:[%s1928_s22 + $0x300] sm:$0xff] }
  0x1d   : > { %165 = vst [vmem:[%s1933_s23 + $0xb0] sm:$0xff] %v164_v22  ;;  %167 = vst [vmem:[%s1933_s23 + $0xb8] sm:$0xff] %v166_v23  ;;  %v170_v25 = vld [vmem:[%s1928_s22 + $0x308] sm:$0xff]  ;;  %v172_v26 = vld [vmem:[%s1928_s22 + $0x310] sm:$0xff] }
  0x1e   : > { %169 = vst [vmem:[%s1933_s23 + $0xc0] sm:$0xff] %v168_v24  ;;  %171 = vst [vmem:[%s1933_s23 + $0xc8] sm:$0xff] %v170_v25  ;;  %v174_v27 = vld [vmem:[%s1928_s22 + $0x318] sm:$0xff]  ;;  %v176_v28 = vld [vmem:[%s1928_s22 + $0x380] sm:$0xff] }
  0x1f   : > { %173 = vst [vmem:[%s1933_s23 + $0xd0] sm:$0xff] %v172_v26  ;;  %v178_v29 = vld [vmem:[%s1928_s22 + $0x388] sm:$0xff]  ;;  %175 = vst [vmem:[%s1933_s23 + $0xd8] sm:$0xff] %v174_v27  ;;  %v180_v30 = vld [vmem:[%s1928_s22 + $0x390] sm:$0xff] }
  0x20   : > { %177 = vst [vmem:[%s1933_s23 + $0xe0] sm:$0xff] %v176_v28  ;;  %179 = vst [vmem:[%s1933_s23 + $0xe8] sm:$0xff] %v178_v29  ;;  %v182_v31 = vld [vmem:[%s1928_s22 + $0x398] sm:$0xff]  ;;  %v184_v32 = vld [vmem:[%s1928_s22 + $0x400] sm:$0xff] }
  0x21   : > { %181 = vst [vmem:[%s1933_s23 + $0xf0] sm:$0xff] %v180_v30  ;;  %183 = vst [vmem:[%s1933_s23 + $0xf8] sm:$0xff] %v182_v31  ;;  %v186_v33 = vld [vmem:[%s1928_s22 + $0x408] sm:$0xff]  ;;  %v188_v34 = vld [vmem:[%s1928_s22 + $0x410] sm:$0xff] }
  0x22   : > { %185 = vst [vmem:[%s1933_s23 + $0x100] sm:$0xff] %v184_v32  ;;  %v190_v35 = vld [vmem:[%s1928_s22 + $0x418] sm:$0xff]  ;;  %187 = vst [vmem:[%s1933_s23 + $0x108] sm:$0xff] %v186_v33  ;;  %v192_v36 = vld [vmem:[%s1928_s22 + $0x480] sm:$0xff] }
  0x23   : > { %189 = vst [vmem:[%s1933_s23 + $0x110] sm:$0xff] %v188_v34  ;;  %191 = vst [vmem:[%s1933_s23 + $0x118] sm:$0xff] %v190_v35  ;;  %v194_v37 = vld [vmem:[%s1928_s22 + $0x488] sm:$0xff]  ;;  %v196_v38 = vld [vmem:[%s1928_s22 + $0x490] sm:$0xff] }
  0x24   : > { %193 = vst [vmem:[%s1933_s23 + $0x120] sm:$0xff] %v192_v36  ;;  %195 = vst [vmem:[%s1933_s23 + $0x128] sm:$0xff] %v194_v37  ;;  %v198_v39 = vld [vmem:[%s1928_s22 + $0x498] sm:$0xff]  ;;  %v200_v40 = vld [vmem:[%s1928_s22 + $0x500] sm:$0xff] }
  0x25   : > { %197 = vst [vmem:[%s1933_s23 + $0x130] sm:$0xff] %v196_v38  ;;  %v202_v41 = vld [vmem:[%s1928_s22 + $0x508] sm:$0xff]  ;;  %199 = vst [vmem:[%s1933_s23 + $0x138] sm:$0xff] %v198_v39  ;;  %v204_v42 = vld [vmem:[%s1928_s22 + $0x510] sm:$0xff] }
  0x26   : > { %201 = vst [vmem:[%s1933_s23 + $0x140] sm:$0xff] %v200_v40  ;;  %203 = vst [vmem:[%s1933_s23 + $0x148] sm:$0xff] %v202_v41  ;;  %v206_v43 = vld [vmem:[%s1928_s22 + $0x518] sm:$0xff]  ;;  %v208_v44 = vld [vmem:[%s1928_s22 + $0x580] sm:$0xff] }
  0x27   : > { %205 = vst [vmem:[%s1933_s23 + $0x150] sm:$0xff] %v204_v42  ;;  %207 = vst [vmem:[%s1933_s23 + $0x158] sm:$0xff] %v206_v43  ;;  %v210_v45 = vld [vmem:[%s1928_s22 + $0x588] sm:$0xff]  ;;  %v212_v46 = vld [vmem:[%s1928_s22 + $0x590] sm:$0xff] }
  0x28   : > { %209 = vst [vmem:[%s1933_s23 + $0x160] sm:$0xff] %v208_v44  ;;  %v214_v47 = vld [vmem:[%s1928_s22 + $0x598] sm:$0xff]  ;;  %211 = vst [vmem:[%s1933_s23 + $0x168] sm:$0xff] %v210_v45  ;;  %v216_v48 = vld [vmem:[%s1928_s22 + $0x600] sm:$0xff] }
  0x29   : > { %213 = vst [vmem:[%s1933_s23 + $0x170] sm:$0xff] %v212_v46  ;;  %215 = vst [vmem:[%s1933_s23 + $0x178] sm:$0xff] %v214_v47  ;;  %v218_v49 = vld [vmem:[%s1928_s22 + $0x608] sm:$0xff]  ;;  %v220_v50 = vld [vmem:[%s1928_s22 + $0x610] sm:$0xff] }
  0x2a   : > { %217 = vst [vmem:[%s1933_s23 + $0x180] sm:$0xff] %v216_v48  ;;  %219 = vst [vmem:[%s1933_s23 + $0x188] sm:$0xff] %v218_v49  ;;  %v222_v51 = vld [vmem:[%s1928_s22 + $0x618] sm:$0xff]  ;;  %v224_v52 = vld [vmem:[%s1928_s22 + $0x680] sm:$0xff] }
  0x2b   : > { %221 = vst [vmem:[%s1933_s23 + $0x190] sm:$0xff] %v220_v50  ;;  %v226_v53 = vld [vmem:[%s1928_s22 + $0x688] sm:$0xff]  ;;  %223 = vst [vmem:[%s1933_s23 + $0x198] sm:$0xff] %v222_v51  ;;  %v228_v54 = vld [vmem:[%s1928_s22 + $0x690] sm:$0xff] }
  0x2c   : > { %225 = vst [vmem:[%s1933_s23 + $0x1a0] sm:$0xff] %v224_v52  ;;  %227 = vst [vmem:[%s1933_s23 + $0x1a8] sm:$0xff] %v226_v53  ;;  %v230_v55 = vld [vmem:[%s1928_s22 + $0x698] sm:$0xff]  ;;  %v232_v56 = vld [vmem:[%s1928_s22 + $0x700] sm:$0xff] }
  0x2d   : > { %229 = vst [vmem:[%s1933_s23 + $0x1b0] sm:$0xff] %v228_v54  ;;  %231 = vst [vmem:[%s1933_s23 + $0x1b8] sm:$0xff] %v230_v55  ;;  %v234_v57 = vld [vmem:[%s1928_s22 + $0x708] sm:$0xff]  ;;  %v236_v58 = vld [vmem:[%s1928_s22 + $0x710] sm:$0xff] }
  0x2e   : > { %233 = vst [vmem:[%s1933_s23 + $0x1c0] sm:$0xff] %v232_v56  ;;  %v238_v59 = vld [vmem:[%s1928_s22 + $0x718] sm:$0xff]  ;;  %235 = vst [vmem:[%s1933_s23 + $0x1c8] sm:$0xff] %v234_v57  ;;  %v240_v60 = vld [vmem:[%s1928_s22 + $0x780] sm:$0xff] }
  0x2f   : > { %237 = vst [vmem:[%s1933_s23 + $0x1d0] sm:$0xff] %v236_v58  ;;  %239 = vst [vmem:[%s1933_s23 + $0x1d8] sm:$0xff] %v238_v59  ;;  %v242_v61 = vld [vmem:[%s1928_s22 + $0x788] sm:$0xff]  ;;  %v244_v62 = vld [vmem:[%s1928_s22 + $0x790] sm:$0xff] }
  0x30   : > { %241 = vst [vmem:[%s1933_s23 + $0x1e0] sm:$0xff] %v240_v60  ;;  %243 = vst [vmem:[%s1933_s23 + $0x1e8] sm:$0xff] %v242_v61  ;;  %v246_v63 = vld [vmem:[%s1928_s22 + $0x798] sm:$0xff]  ;;  %v248_v0 = vld [vmem:[%s1928_s22 + $0x800] sm:$0xff] }
  0x31   : > { %245 = vst [vmem:[%s1933_s23 + $0x1f0] sm:$0xff] %v244_v62  ;;  %v250_v1 = vld [vmem:[%s1928_s22 + $0x808] sm:$0xff]  ;;  %247 = vst [vmem:[%s1933_s23 + $0x1f8] sm:$0xff] %v246_v63  ;;  %v252_v2 = vld [vmem:[%s1928_s22 + $0x810] sm:$0xff] }
  0x32   : > { %249 = vst [vmem:[%s1933_s23 + $0x200] sm:$0xff] %v248_v0  ;;  %251 = vst [vmem:[%s1933_s23 + $0x208] sm:$0xff] %v250_v1  ;;  %v254_v3 = vld [vmem:[%s1928_s22 + $0x818] sm:$0xff]  ;;  %v256_v4 = vld [vmem:[%s1928_s22 + $0x880] sm:$0xff] }
  0x33   : > { %253 = vst [vmem:[%s1933_s23 + $0x210] sm:$0xff] %v252_v2  ;;  %255 = vst [vmem:[%s1933_s23 + $0x218] sm:$0xff] %v254_v3  ;;  %v258_v5 = vld [vmem:[%s1928_s22 + $0x888] sm:$0xff]  ;;  %v260_v6 = vld [vmem:[%s1928_s22 + $0x890] sm:$0xff] }
  0x34   : > { %257 = vst [vmem:[%s1933_s23 + $0x220] sm:$0xff] %v256_v4  ;;  %v262_v7 = vld [vmem:[%s1928_s22 + $0x898] sm:$0xff]  ;;  %259 = vst [vmem:[%s1933_s23 + $0x228] sm:$0xff] %v258_v5  ;;  %v264_v8 = vld [vmem:[%s1928_s22 + $0x900] sm:$0xff] }
  0x35   : > { %261 = vst [vmem:[%s1933_s23 + $0x230] sm:$0xff] %v260_v6  ;;  %263 = vst [vmem:[%s1933_s23 + $0x238] sm:$0xff] %v262_v7  ;;  %v266_v9 = vld [vmem:[%s1928_s22 + $0x908] sm:$0xff]  ;;  %v268_v10 = vld [vmem:[%s1928_s22 + $0x910] sm:$0xff] }
  0x36   : > { %265 = vst [vmem:[%s1933_s23 + $0x240] sm:$0xff] %v264_v8  ;;  %267 = vst [vmem:[%s1933_s23 + $0x248] sm:$0xff] %v266_v9  ;;  %v270_v11 = vld [vmem:[%s1928_s22 + $0x918] sm:$0xff]  ;;  %v272_v12 = vld [vmem:[%s1928_s22 + $0x980] sm:$0xff] }
  0x37   : > { %269 = vst [vmem:[%s1933_s23 + $0x250] sm:$0xff] %v268_v10  ;;  %v274_v13 = vld [vmem:[%s1928_s22 + $0x988] sm:$0xff]  ;;  %271 = vst [vmem:[%s1933_s23 + $0x258] sm:$0xff] %v270_v11  ;;  %v276_v14 = vld [vmem:[%s1928_s22 + $0x990] sm:$0xff] }
  0x38   : > { %273 = vst [vmem:[%s1933_s23 + $0x260] sm:$0xff] %v272_v12  ;;  %275 = vst [vmem:[%s1933_s23 + $0x268] sm:$0xff] %v274_v13  ;;  %v278_v15 = vld [vmem:[%s1928_s22 + $0x998] sm:$0xff]  ;;  %v280_v16 = vld [vmem:[%s1928_s22 + $0xa00] sm:$0xff] }
  0x39   : > { %277 = vst [vmem:[%s1933_s23 + $0x270] sm:$0xff] %v276_v14  ;;  %279 = vst [vmem:[%s1933_s23 + $0x278] sm:$0xff] %v278_v15  ;;  %v282_v17 = vld [vmem:[%s1928_s22 + $0xa08] sm:$0xff]  ;;  %v284_v18 = vld [vmem:[%s1928_s22 + $0xa10] sm:$0xff] }
  0x3a   : > { %281 = vst [vmem:[%s1933_s23 + $0x280] sm:$0xff] %v280_v16  ;;  %v286_v19 = vld [vmem:[%s1928_s22 + $0xa18] sm:$0xff]  ;;  %283 = vst [vmem:[%s1933_s23 + $0x288] sm:$0xff] %v282_v17  ;;  %v288_v20 = vld [vmem:[%s1928_s22 + $0xa80] sm:$0xff] }
  0x3b   : > { %285 = vst [vmem:[%s1933_s23 + $0x290] sm:$0xff] %v284_v18  ;;  %287 = vst [vmem:[%s1933_s23 + $0x298] sm:$0xff] %v286_v19  ;;  %v290_v21 = vld [vmem:[%s1928_s22 + $0xa88] sm:$0xff]  ;;  %v292_v22 = vld [vmem:[%s1928_s22 + $0xa90] sm:$0xff] }
  0x3c   : > { %289 = vst [vmem:[%s1933_s23 + $0x2a0] sm:$0xff] %v288_v20  ;;  %291 = vst [vmem:[%s1933_s23 + $0x2a8] sm:$0xff] %v290_v21  ;;  %v294_v23 = vld [vmem:[%s1928_s22 + $0xa98] sm:$0xff]  ;;  %v296_v24 = vld [vmem:[%s1928_s22 + $0xb00] sm:$0xff] }
  0x3d   : > { %293 = vst [vmem:[%s1933_s23 + $0x2b0] sm:$0xff] %v292_v22  ;;  %v298_v25 = vld [vmem:[%s1928_s22 + $0xb08] sm:$0xff]  ;;  %295 = vst [vmem:[%s1933_s23 + $0x2b8] sm:$0xff] %v294_v23  ;;  %v300_v26 = vld [vmem:[%s1928_s22 + $0xb10] sm:$0xff] }
  0x3e   : > { %297 = vst [vmem:[%s1933_s23 + $0x2c0] sm:$0xff] %v296_v24  ;;  %299 = vst [vmem:[%s1933_s23 + $0x2c8] sm:$0xff] %v298_v25  ;;  %v302_v27 = vld [vmem:[%s1928_s22 + $0xb18] sm:$0xff]  ;;  %v304_v28 = vld [vmem:[%s1928_s22 + $0xb80] sm:$0xff] }
  0x3f   : > { %301 = vst [vmem:[%s1933_s23 + $0x2d0] sm:$0xff] %v300_v26  ;;  %303 = vst [vmem:[%s1933_s23 + $0x2d8] sm:$0xff] %v302_v27  ;;  %v306_v29 = vld [vmem:[%s1928_s22 + $0xb88] sm:$0xff]  ;;  %v308_v30 = vld [vmem:[%s1928_s22 + $0xb90] sm:$0xff] }
  0x40   : > { %305 = vst [vmem:[%s1933_s23 + $0x2e0] sm:$0xff] %v304_v28  ;;  %v310_v31 = vld [vmem:[%s1928_s22 + $0xb98] sm:$0xff]  ;;  %307 = vst [vmem:[%s1933_s23 + $0x2e8] sm:$0xff] %v306_v29  ;;  %v312_v32 = vld [vmem:[%s1928_s22 + $0xc00] sm:$0xff] }
  0x41   : > { %309 = vst [vmem:[%s1933_s23 + $0x2f0] sm:$0xff] %v308_v30  ;;  %311 = vst [vmem:[%s1933_s23 + $0x2f8] sm:$0xff] %v310_v31  ;;  %v314_v33 = vld [vmem:[%s1928_s22 + $0xc08] sm:$0xff]  ;;  %v316_v34 = vld [vmem:[%s1928_s22 + $0xc10] sm:$0xff] }
  0x42   : > { %313 = vst [vmem:[%s1933_s23 + $0x300] sm:$0xff] %v312_v32  ;;  %315 = vst [vmem:[%s1933_s23 + $0x308] sm:$0xff] %v314_v33  ;;  %v318_v35 = vld [vmem:[%s1928_s22 + $0xc18] sm:$0xff]  ;;  %v320_v36 = vld [vmem:[%s1928_s22 + $0xc80] sm:$0xff] }
  0x43   : > { %317 = vst [vmem:[%s1933_s23 + $0x310] sm:$0xff] %v316_v34  ;;  %v322_v37 = vld [vmem:[%s1928_s22 + $0xc88] sm:$0xff]  ;;  %319 = vst [vmem:[%s1933_s23 + $0x318] sm:$0xff] %v318_v35  ;;  %v324_v38 = vld [vmem:[%s1928_s22 + $0xc90] sm:$0xff] }
  0x44   : > { %321 = vst [vmem:[%s1933_s23 + $0x320] sm:$0xff] %v320_v36  ;;  %323 = vst [vmem:[%s1933_s23 + $0x328] sm:$0xff] %v322_v37  ;;  %v326_v39 = vld [vmem:[%s1928_s22 + $0xc98] sm:$0xff]  ;;  %v328_v40 = vld [vmem:[%s1928_s22 + $0xd00] sm:$0xff] }
  0x45   : > { %325 = vst [vmem:[%s1933_s23 + $0x330] sm:$0xff] %v324_v38  ;;  %327 = vst [vmem:[%s1933_s23 + $0x338] sm:$0xff] %v326_v39  ;;  %v330_v41 = vld [vmem:[%s1928_s22 + $0xd08] sm:$0xff]  ;;  %v332_v42 = vld [vmem:[%s1928_s22 + $0xd10] sm:$0xff] }
  0x46   : > { %329 = vst [vmem:[%s1933_s23 + $0x340] sm:$0xff] %v328_v40  ;;  %v334_v43 = vld [vmem:[%s1928_s22 + $0xd18] sm:$0xff]  ;;  %331 = vst [vmem:[%s1933_s23 + $0x348] sm:$0xff] %v330_v41  ;;  %v336_v44 = vld [vmem:[%s1928_s22 + $0xd80] sm:$0xff] }
  0x47   : > { %333 = vst [vmem:[%s1933_s23 + $0x350] sm:$0xff] %v332_v42  ;;  %335 = vst [vmem:[%s1933_s23 + $0x358] sm:$0xff] %v334_v43  ;;  %v338_v45 = vld [vmem:[%s1928_s22 + $0xd88] sm:$0xff]  ;;  %v340_v46 = vld [vmem:[%s1928_s22 + $0xd90] sm:$0xff] }
  0x48   : > { %337 = vst [vmem:[%s1933_s23 + $0x360] sm:$0xff] %v336_v44  ;;  %339 = vst [vmem:[%s1933_s23 + $0x368] sm:$0xff] %v338_v45  ;;  %v342_v47 = vld [vmem:[%s1928_s22 + $0xd98] sm:$0xff]  ;;  %v344_v48 = vld [vmem:[%s1928_s22 + $0xe00] sm:$0xff] }
  0x49   : > { %341 = vst [vmem:[%s1933_s23 + $0x370] sm:$0xff] %v340_v46  ;;  %v346_v49 = vld [vmem:[%s1928_s22 + $0xe08] sm:$0xff]  ;;  %343 = vst [vmem:[%s1933_s23 + $0x378] sm:$0xff] %v342_v47  ;;  %v348_v50 = vld [vmem:[%s1928_s22 + $0xe10] sm:$0xff] }
  0x4a   : > { %345 = vst [vmem:[%s1933_s23 + $0x380] sm:$0xff] %v344_v48  ;;  %347 = vst [vmem:[%s1933_s23 + $0x388] sm:$0xff] %v346_v49  ;;  %v350_v51 = vld [vmem:[%s1928_s22 + $0xe18] sm:$0xff]  ;;  %v352_v52 = vld [vmem:[%s1928_s22 + $0xe80] sm:$0xff] }
  0x4b   : > { %349 = vst [vmem:[%s1933_s23 + $0x390] sm:$0xff] %v348_v50  ;;  %351 = vst [vmem:[%s1933_s23 + $0x398] sm:$0xff] %v350_v51  ;;  %v354_v53 = vld [vmem:[%s1928_s22 + $0xe88] sm:$0xff]  ;;  %v356_v54 = vld [vmem:[%s1928_s22 + $0xe90] sm:$0xff] }
  0x4c   : > { %353 = vst [vmem:[%s1933_s23 + $0x3a0] sm:$0xff] %v352_v52  ;;  %v358_v55 = vld [vmem:[%s1928_s22 + $0xe98] sm:$0xff]  ;;  %355 = vst [vmem:[%s1933_s23 + $0x3a8] sm:$0xff] %v354_v53  ;;  %v360_v56 = vld [vmem:[%s1928_s22 + $0xf00] sm:$0xff] }
  0x4d   : > { %357 = vst [vmem:[%s1933_s23 + $0x3b0] sm:$0xff] %v356_v54  ;;  %359 = vst [vmem:[%s1933_s23 + $0x3b8] sm:$0xff] %v358_v55  ;;  %v362_v57 = vld [vmem:[%s1928_s22 + $0xf08] sm:$0xff]  ;;  %v364_v58 = vld [vmem:[%s1928_s22 + $0xf10] sm:$0xff] }
  0x4e   : > { %361 = vst [vmem:[%s1933_s23 + $0x3c0] sm:$0xff] %v360_v56  ;;  %363 = vst [vmem:[%s1933_s23 + $0x3c8] sm:$0xff] %v362_v57  ;;  %v366_v59 = vld [vmem:[%s1928_s22 + $0xf18] sm:$0xff]  ;;  %v368_v60 = vld [vmem:[%s1928_s22 + $0xf80] sm:$0xff] }
  0x4f   : > { %365 = vst [vmem:[%s1933_s23 + $0x3d0] sm:$0xff] %v364_v58  ;;  %v370_v61 = vld [vmem:[%s1928_s22 + $0xf88] sm:$0xff]  ;;  %367 = vst [vmem:[%s1933_s23 + $0x3d8] sm:$0xff] %v366_v59  ;;  %v372_v62 = vld [vmem:[%s1928_s22 + $0xf90] sm:$0xff] }
  0x50   : > { %369 = vst [vmem:[%s1933_s23 + $0x3e0] sm:$0xff] %v368_v60  ;;  %371 = vst [vmem:[%s1933_s23 + $0x3e8] sm:$0xff] %v370_v61  ;;  %v374_v63 = vld [vmem:[%s1928_s22 + $0xf98] sm:$0xff] }
  0x51   : > { %373 = vst [vmem:[%s1933_s23 + $0x3f0] sm:$0xff] %v372_v62  ;;  %375 = vst [vmem:[%s1933_s23 + $0x3f8] sm:$0xff] %v374_v63 }
  0x52 PF: > { %p1683_p5 = scmp.ge.s32.totalorder %s1874_s11, 1  ;;  %p380_p6 = scmp.lt.s32.totalorder %s1874_s11, 5 }
  0x54   : > { %p381_p7 = pnand %p1683_p5, %p380_p6 }
  0x55   : > { %s387_s24 = sand.u32 (!%p381_p7), 1, %s1866_s9   ;;  %v2194_v0 = vld [vmem:[%s2526_s0] sm:$0xff] (!%p381_p7)  ;;  %s1822_s29 = sshll.u32 (!%p381_p7), %s1908_s12, 6 }
  0x56   : > { %384 = sbr.rel (%p381_p7) target bundleno = 656 (0x290), region = 47  ;;  %s1684_s27 = sshll.u32 (!%p381_p7), %s387_s24, 10  ;;  %v2198_v1 = vcombine.high (!%p381_p7), %v2194_v0, %v2194_v0 }
  0x57   : > { %s2200_s28 = scalar_lea.vmem (!%p381_p7), [#allocation5], %s1684_s27  ;;  %s1346_s30 = scalar_lea.vmem (!%p381_p7), [#allocation2], %s1822_s29 }
  0x58   : > { %v405_v2 = vld [vmem:[%s2200_s28] sm:$0xff] (!%p381_p7)  ;;  %v406_v4 = vld [vmem:[%s2200_s28 + $0x8] sm:$0xff] (!%p381_p7)  ;;  %1212 = vmatprep.mubr.bf16.mxu0 (!%p381_p7), %v2198_v1  ;;  %1253 = vmatprep.mubr.bf16.mxu1 (!%p381_p7), %v2198_v1  ;;  %p1817_p8 = scmp.ne.s32.totalorder (!%p381_p7), %s1908_s12, 0 }
  0x59   : > { %v409_v3 = vld [vmem:[%s2200_s28 + $0x20] sm:$0xff] (!%p381_p7)  ;;  %v410_v6 = vld [vmem:[%s2200_s28 + $0x28] sm:$0xff] (!%p381_p7) }
  0x5a   : > { %v1688_v5 = vcombine.high (!%p381_p7), %v405_v2, %v409_v3  ;;  %v1687_v7 = vcombine.low (!%p381_p7), %v405_v2, %v409_v3  ;;  %v413_v8 = vld [vmem:[%s2200_s28 + $0x40] sm:$0xff] (!%p381_p7)  ;;  %v1690_v10 = vcombine.high (!%p381_p7), %v406_v4, %v410_v6  ;;  %v1689_v11 = vcombine.low (!%p381_p7), %v406_v4, %v410_v6  ;;  %v414_v13 = vld [vmem:[%s2200_s28 + $0x48] sm:$0xff] (!%p381_p7) }
  0x5b   : > { %v417_v9 = vld [vmem:[%s2200_s28 + $0x60] sm:$0xff] (!%p381_p7)  ;;  %v418_v14 = vld [vmem:[%s2200_s28 + $0x68] sm:$0xff] (!%p381_p7) }
  0x5c   : > { %v1696_v12 = vcombine.high (!%p381_p7), %v413_v8, %v417_v9  ;;  %v421_v15 = vld [vmem:[%s2200_s28 + $0x80] sm:$0xff] (!%p381_p7)  ;;  %1180 = vmatprep.subr.bf16.mxu0 (!%p381_p7), %v1688_v5  ;;  %v1698_v16 = vcombine.high (!%p381_p7), %v414_v13, %v418_v14  ;;  %v422_v18 = vld [vmem:[%s2200_s28 + $0x88] sm:$0xff] (!%p381_p7)  ;;  %1221 = vmatprep.subr.bf16.mxu1 (!%p381_p7), %v1690_v10  ;;  %v1695_v20 = vcombine.low (!%p381_p7), %v413_v8, %v417_v9 }
  0x5d   : > { %v425_v17 = vld [vmem:[%s2200_s28 + $0xa0] sm:$0xff]  ;;  %v426_v19 = vld [vmem:[%s2200_s28 + $0xa8] sm:$0xff]  ;;  %1181 = vmatpush1.bf16.msra.mxu0 %v1687_v7  ;;  %1222 = vmatpush1.bf16.msra.mxu1 %v1689_v11  ;;  %v1697_v21 = vcombine.low %v414_v13, %v418_v14 }
  0x5e   : > { %1182 = vmatprep.subr.bf16.mxu0 %v1696_v12  ;;  %v1704_v22 = vcombine.high %v421_v15, %v425_v17  ;;  %1223 = vmatprep.subr.bf16.mxu1 %v1698_v16  ;;  %v1706_v23 = vcombine.high %v422_v18, %v426_v19  ;;  %v429_v24 = vld [vmem:[%s2200_s28 + $0xc0] sm:$0xff]  ;;  %v430_v26 = vld [vmem:[%s2200_s28 + $0xc8] sm:$0xff]  ;;  %v1703_v28 = vcombine.low %v421_v15, %v425_v17 }
  0x5f   : > { %v433_v25 = vld [vmem:[%s2200_s28 + $0xe0] sm:$0xff]  ;;  %v434_v27 = vld [vmem:[%s2200_s28 + $0xe8] sm:$0xff]  ;;  %v1705_v29 = vcombine.low %v422_v18, %v426_v19 }
  0x60   : > { %v1712_v30 = vcombine.high %v429_v24, %v433_v25  ;;  %v1714_v31 = vcombine.high %v430_v26, %v434_v27  ;;  %v437_v32 = vld [vmem:[%s2200_s28 + $0x100] sm:$0xff]  ;;  %v438_v34 = vld [vmem:[%s2200_s28 + $0x108] sm:$0xff]  ;;  %v1711_v36 = vcombine.low %v429_v24, %v433_v25  ;;  %v1713_v37 = vcombine.low %v430_v26, %v434_v27 }
  0x61   : > { %1183 = vmatpush1.bf16.msra.mxu0 %v1695_v20  ;;  %1224 = vmatpush1.bf16.msra.mxu1 %v1697_v21  ;;  %v441_v33 = vld [vmem:[%s2200_s28 + $0x120] sm:$0xff]  ;;  %v442_v35 = vld [vmem:[%s2200_s28 + $0x128] sm:$0xff] }
  0x62   : > { %1184 = vmatprep.subr.bf16.mxu0 %v1704_v22  ;;  %1225 = vmatprep.subr.bf16.mxu1 %v1706_v23  ;;  %v1720_v38 = vcombine.high %v437_v32, %v441_v33  ;;  %v1722_v39 = vcombine.high %v438_v34, %v442_v35  ;;  %v445_v40 = vld [vmem:[%s2200_s28 + $0x140] sm:$0xff]  ;;  %v446_v42 = vld [vmem:[%s2200_s28 + $0x148] sm:$0xff]  ;;  %v1719_v44 = vcombine.low %v437_v32, %v441_v33 }
  0x63   : > { %v449_v41 = vld [vmem:[%s2200_s28 + $0x160] sm:$0xff]  ;;  %v450_v43 = vld [vmem:[%s2200_s28 + $0x168] sm:$0xff]  ;;  %v1721_v45 = vcombine.low %v438_v34, %v442_v35 }
  0x64   : > { %v1728_v46 = vcombine.high %v445_v40, %v449_v41  ;;  %v1730_v47 = vcombine.high %v446_v42, %v450_v43  ;;  %v453_v48 = vld [vmem:[%s2200_s28 + $0x180] sm:$0xff]  ;;  %v454_v50 = vld [vmem:[%s2200_s28 + $0x188] sm:$0xff]  ;;  %v1727_v52 = vcombine.low %v445_v40, %v449_v41  ;;  %v1729_v53 = vcombine.low %v446_v42, %v450_v43 }
  0x65   : > { %1185 = vmatpush1.bf16.msra.mxu0 %v1703_v28  ;;  %1226 = vmatpush1.bf16.msra.mxu1 %v1705_v29  ;;  %v457_v49 = vld [vmem:[%s2200_s28 + $0x1a0] sm:$0xff]  ;;  %v458_v51 = vld [vmem:[%s2200_s28 + $0x1a8] sm:$0xff] }
  0x66   : > { %1186 = vmatprep.subr.bf16.mxu0 %v1712_v30  ;;  %1227 = vmatprep.subr.bf16.mxu1 %v1714_v31  ;;  %v1736_v54 = vcombine.high %v453_v48, %v457_v49  ;;  %v1738_v55 = vcombine.high %v454_v50, %v458_v51  ;;  %v461_v56 = vld [vmem:[%s2200_s28 + $0x1c0] sm:$0xff]  ;;  %v462_v58 = vld [vmem:[%s2200_s28 + $0x1c8] sm:$0xff]  ;;  %v1735_v60 = vcombine.low %v453_v48, %v457_v49 }
  0x67   : > { %v465_v57 = vld [vmem:[%s2200_s28 + $0x1e0] sm:$0xff]  ;;  %v466_v59 = vld [vmem:[%s2200_s28 + $0x1e8] sm:$0xff]  ;;  %v1737_v61 = vcombine.low %v454_v50, %v458_v51 }
  0x68   : > { %v1744_v62 = vcombine.high %v461_v56, %v465_v57  ;;  %v1746_v63 = vcombine.high %v462_v58, %v466_v59  ;;  %v469_v2 = vld [vmem:[%s2200_s28 + $0x200] sm:$0xff]  ;;  %v470_v4 = vld [vmem:[%s2200_s28 + $0x208] sm:$0xff]  ;;  %v1743_v6 = vcombine.low %v461_v56, %v465_v57  ;;  %v1745_v7 = vcombine.low %v462_v58, %v466_v59 }
  0x69   : > { %1187 = vmatpush1.bf16.msra.mxu0 %v1711_v36  ;;  %1228 = vmatpush1.bf16.msra.mxu1 %v1713_v37  ;;  %v473_v3 = vld [vmem:[%s2200_s28 + $0x220] sm:$0xff]  ;;  %v474_v5 = vld [vmem:[%s2200_s28 + $0x228] sm:$0xff] }
  0x6a   : > { %1188 = vmatprep.subr.bf16.mxu0 %v1720_v38  ;;  %1229 = vmatprep.subr.bf16.mxu1 %v1722_v39  ;;  %v1752_v8 = vcombine.high %v469_v2, %v473_v3  ;;  %v1754_v9 = vcombine.high %v470_v4, %v474_v5  ;;  %v477_v10 = vld [vmem:[%s2200_s28 + $0x240] sm:$0xff]  ;;  %v478_v12 = vld [vmem:[%s2200_s28 + $0x248] sm:$0xff]  ;;  %v1751_v14 = vcombine.low %v469_v2, %v473_v3 }
  0x6b   : > { %v481_v11 = vld [vmem:[%s2200_s28 + $0x260] sm:$0xff]  ;;  %v482_v13 = vld [vmem:[%s2200_s28 + $0x268] sm:$0xff]  ;;  %v1753_v15 = vcombine.low %v470_v4, %v474_v5  ;;  %v407_v4 = vld [vmem:[%s2200_s28 + $0x10] sm:$0xff] }
  0x6c   : > { %v1760_v16 = vcombine.high %v477_v10, %v481_v11  ;;  %v1762_v17 = vcombine.high %v478_v12, %v482_v13  ;;  %v485_v18 = vld [vmem:[%s2200_s28 + $0x280] sm:$0xff]  ;;  %v486_v20 = vld [vmem:[%s2200_s28 + $0x288] sm:$0xff]  ;;  %v1759_v22 = vcombine.low %v477_v10, %v481_v11  ;;  %v1761_v23 = vcombine.low %v478_v12, %v482_v13  ;;  %v411_v5 = vld [vmem:[%s2200_s28 + $0x30] sm:$0xff] }
  0x6d   : > { %1189 = vmatpush1.bf16.msra.mxu0 %v1719_v44  ;;  %1230 = vmatpush1.bf16.msra.mxu1 %v1721_v45  ;;  %v489_v19 = vld [vmem:[%s2200_s28 + $0x2a0] sm:$0xff]  ;;  %v490_v21 = vld [vmem:[%s2200_s28 + $0x2a8] sm:$0xff]  ;;  %v1692_v10 = vcombine.high %v407_v4, %v411_v5  ;;  %v415_v12 = vld [vmem:[%s2200_s28 + $0x50] sm:$0xff] }
  0x6e   : > { %1190 = vmatprep.subr.bf16.mxu0 %v1728_v46  ;;  %1231 = vmatprep.subr.bf16.mxu1 %v1730_v47  ;;  %v1768_v24 = vcombine.high %v485_v18, %v489_v19  ;;  %v1770_v25 = vcombine.high %v486_v20, %v490_v21  ;;  %v493_v26 = vld [vmem:[%s2200_s28 + $0x2c0] sm:$0xff]  ;;  %v494_v28 = vld [vmem:[%s2200_s28 + $0x2c8] sm:$0xff]  ;;  %v1767_v30 = vcombine.low %v485_v18, %v489_v19  ;;  %v419_v13 = vld [vmem:[%s2200_s28 + $0x70] sm:$0xff] }
  0x6f   : > { %v497_v27 = vld [vmem:[%s2200_s28 + $0x2e0] sm:$0xff]  ;;  %v498_v29 = vld [vmem:[%s2200_s28 + $0x2e8] sm:$0xff]  ;;  %v1769_v31 = vcombine.low %v486_v20, %v490_v21  ;;  %v1700_v19 = vcombine.high %v415_v12, %v419_v13  ;;  %v423_v21 = vld [vmem:[%s2200_s28 + $0x90] sm:$0xff] }
  0x70   : > { %v1776_v32 = vcombine.high %v493_v26, %v497_v27  ;;  %v1778_v33 = vcombine.high %v494_v28, %v498_v29  ;;  %v501_v34 = vld [vmem:[%s2200_s28 + $0x300] sm:$0xff]  ;;  %v502_v36 = vld [vmem:[%s2200_s28 + $0x308] sm:$0xff]  ;;  %v1775_v38 = vcombine.low %v493_v26, %v497_v27  ;;  %v1777_v39 = vcombine.low %v494_v28, %v498_v29  ;;  %v431_v28 = vld [vmem:[%s2200_s28 + $0xd0] sm:$0xff] }
  0x71   : > { %1191 = vmatpush1.bf16.msra.mxu0 %v1727_v52  ;;  %1232 = vmatpush1.bf16.msra.mxu1 %v1729_v53  ;;  %v505_v35 = vld [vmem:[%s2200_s28 + $0x320] sm:$0xff]  ;;  %v506_v37 = vld [vmem:[%s2200_s28 + $0x328] sm:$0xff]  ;;  %v435_v29 = vld [vmem:[%s2200_s28 + $0xf0] sm:$0xff] }
  0x72   : > { %1192 = vmatprep.subr.bf16.mxu0 %v1736_v54  ;;  %1233 = vmatprep.subr.bf16.mxu1 %v1738_v55  ;;  %v1784_v40 = vcombine.high %v501_v34, %v505_v35  ;;  %v1786_v41 = vcombine.high %v502_v36, %v506_v37  ;;  %v509_v42 = vld [vmem:[%s2200_s28 + $0x340] sm:$0xff]  ;;  %v510_v44 = vld [vmem:[%s2200_s28 + $0x348] sm:$0xff]  ;;  %v1783_v46 = vcombine.low %v501_v34, %v505_v35 }
  0x73   : > { %v513_v43 = vld [vmem:[%s2200_s28 + $0x360] sm:$0xff]  ;;  %v514_v45 = vld [vmem:[%s2200_s28 + $0x368] sm:$0xff]  ;;  %v1785_v47 = vcombine.low %v502_v36, %v506_v37  ;;  %v1716_v34 = vcombine.high %v431_v28, %v435_v29  ;;  %v439_v36 = vld [vmem:[%s2200_s28 + $0x110] sm:$0xff] }
  0x74   : > { %v1792_v48 = vcombine.high %v509_v42, %v513_v43  ;;  %v1794_v49 = vcombine.high %v510_v44, %v514_v45  ;;  %v517_v50 = vld [vmem:[%s2200_s28 + $0x380] sm:$0xff]  ;;  %v518_v52 = vld [vmem:[%s2200_s28 + $0x388] sm:$0xff]  ;;  %v1791_v54 = vcombine.low %v509_v42, %v513_v43  ;;  %v1793_v55 = vcombine.low %v510_v44, %v514_v45  ;;  %v443_v37 = vld [vmem:[%s2200_s28 + $0x130] sm:$0xff] }
  0x75   : > { %1193 = vmatpush1.bf16.msra.mxu0 %v1735_v60  ;;  %1234 = vmatpush1.bf16.msra.mxu1 %v1737_v61  ;;  %v521_v51 = vld [vmem:[%s2200_s28 + $0x3a0] sm:$0xff]  ;;  %v522_v53 = vld [vmem:[%s2200_s28 + $0x3a8] sm:$0xff]  ;;  %v447_v43 = vld [vmem:[%s2200_s28 + $0x150] sm:$0xff] }
  0x76   : > { %1194 = vmatprep.subr.bf16.mxu0 %v1744_v62  ;;  %1235 = vmatprep.subr.bf16.mxu1 %v1746_v63  ;;  %v1800_v56 = vcombine.high %v517_v50, %v521_v51  ;;  %v1802_v57 = vcombine.high %v518_v52, %v522_v53  ;;  %v525_v58 = vld [vmem:[%s2200_s28 + $0x3c0] sm:$0xff]  ;;  %v526_v60 = vld [vmem:[%s2200_s28 + $0x3c8] sm:$0xff]  ;;  %v1799_v62 = vcombine.low %v517_v50, %v521_v51  ;;  %v451_v44 = vld [vmem:[%s2200_s28 + $0x170] sm:$0xff] }
  0x77   : > { %v529_v59 = vld [vmem:[%s2200_s28 + $0x3e0] sm:$0xff]  ;;  %v530_v61 = vld [vmem:[%s2200_s28 + $0x3e8] sm:$0xff]  ;;  %v1801_v63 = vcombine.low %v518_v52, %v522_v53  ;;  %v448_v45 = vld [vmem:[%s2200_s28 + $0x158] sm:$0xff] }
  0x78   : > { %v1808_v2 = vcombine.high %v525_v58, %v529_v59  ;;  %v1810_v3 = vcombine.high %v526_v60, %v530_v61  ;;  %v455_v51 = vld [vmem:[%s2200_s28 + $0x190] sm:$0xff]  ;;  %v456_v53 = vld [vmem:[%s2200_s28 + $0x198] sm:$0xff] }
  0x79   : > { %1195 = vmatpush1.bf16.msra.mxu0 %v1743_v6  ;;  %1236 = vmatpush1.bf16.msra.mxu1 %v1745_v7  ;;  %v408_v6 = vld [vmem:[%s2200_s28 + $0x18] sm:$0xff]  ;;  %v459_v52 = vld [vmem:[%s2200_s28 + $0x1b0] sm:$0xff] }
  0x7a   : > { %1196 = vmatprep.subr.bf16.mxu0 %v1752_v8  ;;  %1237 = vmatprep.subr.bf16.mxu1 %v1754_v9  ;;  %v412_v7 = vld [vmem:[%s2200_s28 + $0x38] sm:$0xff]  ;;  %v1807_v8 = vcombine.low %v525_v58, %v529_v59  ;;  %v1809_v9 = vcombine.low %v526_v60, %v530_v61  ;;  %v463_v59 = vld [vmem:[%s2200_s28 + $0x1d0] sm:$0xff] }
  0x7b   : > { %v1694_v11 = vcombine.high %v408_v6, %v412_v7  ;;  %v1693_v18 = vcombine.low %v408_v6, %v412_v7  ;;  %v467_v60 = vld [vmem:[%s2200_s28 + $0x1f0] sm:$0xff]  ;;  %v464_v61 = vld [vmem:[%s2200_s28 + $0x1d8] sm:$0xff] }
  0x7c   : > { %v475_v6 = vld [vmem:[%s2200_s28 + $0x230] sm:$0xff]  ;;  %v472_v7 = vld [vmem:[%s2200_s28 + $0x218] sm:$0xff] }
  0x7d   : > { %1197 = vmatpush1.bf16.msra.mxu0 %v1751_v14  ;;  %1238 = vmatpush1.bf16.msra.mxu1 %v1753_v15  ;;  %v2276_v14 = vcombine.low %v2194_v0, %v2194_v0  ;;  %v416_v15 = vld [vmem:[%s2200_s28 + $0x58] sm:$0xff] }
  0x7e   : > { %1198 = vmatprep.subr.bf16.mxu0 %v1760_v16  ;;  %1239 = vmatprep.subr.bf16.mxu1 %v1762_v17  ;;  %v420_v16 = vld [vmem:[%s2200_s28 + $0x78] sm:$0xff]  ;;  %v1691_v17 = vcombine.low %v407_v4, %v411_v5  ;;  %v471_v5 = vld [vmem:[%s2200_s28 + $0x210] sm:$0xff] }
  0x7f   : > { %v1702_v20 = vcombine.high %v416_v15, %v420_v16  ;;  %v424_v0 = vld [vmem:[%s2200_s28 + $0x98] sm:$0xff] }
  0x81   : > { %1199 = vmatpush1.bf16.msra.mxu0 %v1759_v22  ;;  %1240 = vmatpush1.bf16.msra.mxu1 %v1761_v23  ;;  %v427_v22 = vld [vmem:[%s2200_s28 + $0xb0] sm:$0xff]  ;;  %v428_v23 = vld [vmem:[%s2200_s28 + $0xb8] sm:$0xff] }
  0x82   : > { %1200 = vmatprep.subr.bf16.mxu0 %v1768_v24  ;;  %1241 = vmatprep.subr.bf16.mxu1 %v1770_v25  ;;  %v1699_v24 = vcombine.low %v415_v12, %v419_v13  ;;  %v1701_v25 = vcombine.low %v416_v15, %v420_v16  ;;  %v1708_v26 = vcombine.high %v423_v21, %v427_v22  ;;  %v479_v13 = vld [vmem:[%s2200_s28 + $0x250] sm:$0xff]  ;;  %v480_v16 = vld [vmem:[%s2200_s28 + $0x258] sm:$0xff] }
  0x83   : > { %v1710_v27 = vcombine.high %v424_v0, %v428_v23  ;;  %v483_v15 = vld [vmem:[%s2200_s28 + $0x270] sm:$0xff] }
  0x85   : > { %1201 = vmatpush1.bf16.msra.mxu0 %v1767_v30  ;;  %1242 = vmatpush1.bf16.msra.mxu1 %v1769_v31  ;;  %v432_v30 = vld [vmem:[%s2200_s28 + $0xd8] sm:$0xff] }
  0x86   : > { %1202 = vmatprep.subr.bf16.mxu0 %v1776_v32  ;;  %1243 = vmatprep.subr.bf16.mxu1 %v1778_v33  ;;  %v436_v31 = vld [vmem:[%s2200_s28 + $0xf8] sm:$0xff]  ;;  %v1707_v32 = vcombine.low %v423_v21, %v427_v22  ;;  %v1709_v33 = vcombine.low %v424_v0, %v428_v23  ;;  %v487_v22 = vld [vmem:[%s2200_s28 + $0x290] sm:$0xff] }
  0x87   : > { %v1718_v35 = vcombine.high %v432_v30, %v436_v31  ;;  %v491_v0 = vld [vmem:[%s2200_s28 + $0x2b0] sm:$0xff]  ;;  %v488_v23 = vld [vmem:[%s2200_s28 + $0x298] sm:$0xff] }
  0x89   : > { %1203 = vmatpush1.bf16.msra.mxu0 %v1775_v38  ;;  %1244 = vmatpush1.bf16.msra.mxu1 %v1777_v39  ;;  %v440_v38 = vld [vmem:[%s2200_s28 + $0x118] sm:$0xff] }
  0x8a   : > { %1204 = vmatprep.subr.bf16.mxu0 %v1784_v40  ;;  %1245 = vmatprep.subr.bf16.mxu1 %v1786_v41  ;;  %v444_v39 = vld [vmem:[%s2200_s28 + $0x138] sm:$0xff]  ;;  %v1715_v40 = vcombine.low %v431_v28, %v435_v29  ;;  %v1724_v41 = vcombine.high %v439_v36, %v443_v37  ;;  %v495_v29 = vld [vmem:[%s2200_s28 + $0x2d0] sm:$0xff] }
  0x8b   : > { %v1726_v42 = vcombine.high %v440_v38, %v444_v39 }
  0x8d   : > { %1205 = vmatpush1.bf16.msra.mxu0 %v1783_v46  ;;  %1246 = vmatpush1.bf16.msra.mxu1 %v1785_v47  ;;  %v452_v46 = vld [vmem:[%s2200_s28 + $0x178] sm:$0xff]  ;;  %v1723_v47 = vcombine.low %v439_v36, %v443_v37  ;;  %v503_v37 = vld [vmem:[%s2200_s28 + $0x310] sm:$0xff] }
  0x8e   : > { %1206 = vmatprep.subr.bf16.mxu0 %v1792_v48  ;;  %1247 = vmatprep.subr.bf16.mxu1 %v1794_v49  ;;  %v1725_v48 = vcombine.low %v440_v38, %v444_v39  ;;  %v1732_v49 = vcombine.high %v447_v43, %v451_v44  ;;  %v1734_v50 = vcombine.high %v448_v45, %v452_v46  ;;  %v507_v38 = vld [vmem:[%s2200_s28 + $0x330] sm:$0xff]  ;;  %v504_v39 = vld [vmem:[%s2200_s28 + $0x318] sm:$0xff] }
  0x91   : > { %1207 = vmatpush1.bf16.msra.mxu0 %v1791_v54  ;;  %1248 = vmatpush1.bf16.msra.mxu1 %v1793_v55  ;;  %v460_v54 = vld [vmem:[%s2200_s28 + $0x1b8] sm:$0xff]  ;;  %v1731_v55 = vcombine.low %v447_v43, %v451_v44  ;;  %v511_v44 = vld [vmem:[%s2200_s28 + $0x350] sm:$0xff] }
  0x92   : > { %1208 = vmatprep.subr.bf16.mxu0 %v1800_v56  ;;  %1249 = vmatprep.subr.bf16.mxu1 %v1802_v57  ;;  %v1733_v56 = vcombine.low %v448_v45, %v452_v46  ;;  %v1740_v57 = vcombine.high %v455_v51, %v459_v52  ;;  %v1742_v58 = vcombine.high %v456_v53, %v460_v54  ;;  %v515_v45 = vld [vmem:[%s2200_s28 + $0x370] sm:$0xff]  ;;  %v512_v46 = vld [vmem:[%s2200_s28 + $0x358] sm:$0xff] }
  0x95   : > { %1209 = vmatpush1.bf16.msra.mxu0 %v1799_v62  ;;  %1250 = vmatpush1.bf16.msra.mxu1 %v1801_v63  ;;  %v468_v62 = vld [vmem:[%s2200_s28 + $0x1f8] sm:$0xff]  ;;  %v1739_v63 = vcombine.low %v455_v51, %v459_v52  ;;  %v519_v52 = vld [vmem:[%s2200_s28 + $0x390] sm:$0xff] }
  0x96   : > { %1210 = vmatprep.subr.bf16.mxu0 %v1808_v2  ;;  %1251 = vmatprep.subr.bf16.mxu1 %v1810_v3  ;;  %v1741_v2 = vcombine.low %v456_v53, %v460_v54  ;;  %v1748_v3 = vcombine.high %v463_v59, %v467_v60  ;;  %v1750_v4 = vcombine.high %v464_v61, %v468_v62  ;;  %v523_v53 = vld [vmem:[%s2200_s28 + $0x3b0] sm:$0xff]  ;;  %v520_v54 = vld [vmem:[%s2200_s28 + $0x398] sm:$0xff] }
  0x99   : > { %1211 = vmatpush1.bf16.msra.mxu0 %v1807_v8  ;;  %1252 = vmatpush1.bf16.msra.mxu1 %v1809_v9  ;;  %v476_v8 = vld [vmem:[%s2200_s28 + $0x238] sm:$0xff]  ;;  %v1747_v9 = vcombine.low %v463_v59, %v467_v60  ;;  %v527_v60 = vld [vmem:[%s2200_s28 + $0x3d0] sm:$0xff] }
  0x9a   : > { %1262 = vmatprep.subr.bf16.mxu0 %v1692_v10  ;;  %1303 = vmatprep.subr.bf16.mxu1 %v1694_v11  ;;  %v1749_v10 = vcombine.low %v464_v61, %v468_v62  ;;  %v1756_v11 = vcombine.high %v471_v5, %v475_v6  ;;  %v1758_v12 = vcombine.high %v472_v7, %v476_v8  ;;  %v531_v61 = vld [vmem:[%s2200_s28 + $0x3f0] sm:$0xff]  ;;  %v528_v62 = vld [vmem:[%s2200_s28 + $0x3d8] sm:$0xff] }
  0x9c   : > { %1213 = vmatmul.mubr.bf16.vlgmr.msra.gmra.mrb[0].mxu0 %v2276_v14  ;;  %1254 = vmatmul.mubr.bf16.vlgmr.msra.gmra.mrb[0].mxu1 %v2276_v14 }
  0x9d   : > { %1263 = vmatpush1.bf16.msra.mxu0 %v1691_v17  ;;  %1304 = vmatpush1.bf16.msra.mxu1 %v1693_v18  ;;  %v484_v17 = vld [vmem:[%s2200_s28 + $0x278] sm:$0xff]  ;;  %v1755_v18 = vcombine.low %v471_v5, %v475_v6  ;;  %v1811_v6 = vcombine.low %v527_v60, %v531_v61 }
  0x9e   : > { %1264 = vmatprep.subr.bf16.mxu0 %v1700_v19  ;;  %1305 = vmatprep.subr.bf16.mxu1 %v1702_v20  ;;  %v1757_v19 = vcombine.low %v472_v7, %v476_v8  ;;  %v1764_v20 = vcombine.high %v479_v13, %v483_v15  ;;  %v1766_v21 = vcombine.high %v480_v16, %v484_v17 }
  0x9f   : > { %1294 = vmatprep.mubr.bf16.mxu0 %v2198_v1  ;;  %1335 = vmatprep.mubr.bf16.mxu1 %v2198_v1  ;;  %v1717_v1 = vcombine.low %v432_v30, %v436_v31  ;;  %v499_v30 = vld [vmem:[%s2200_s28 + $0x2f0] sm:$0xff]  ;;  %v496_v31 = vld [vmem:[%s2200_s28 + $0x2d8] sm:$0xff] }
  0xa1   : > { %1265 = vmatpush1.bf16.msra.mxu0 %v1699_v24  ;;  %1306 = vmatpush1.bf16.msra.mxu1 %v1701_v25  ;;  %v492_v24 = vld [vmem:[%s2200_s28 + $0x2b8] sm:$0xff]  ;;  %v1763_v25 = vcombine.low %v479_v13, %v483_v15 }
  0xa2   : > { %1266 = vmatprep.subr.bf16.mxu0 %v1708_v26  ;;  %1307 = vmatprep.subr.bf16.mxu1 %v1710_v27  ;;  %v1765_v26 = vcombine.low %v480_v16, %v484_v17  ;;  %v1772_v27 = vcombine.high %v487_v22, %v491_v0  ;;  %v1774_v28 = vcombine.high %v488_v23, %v492_v24 }
  0xa5   : > { %1267 = vmatpush1.bf16.msra.mxu0 %v1707_v32  ;;  %1308 = vmatpush1.bf16.msra.mxu1 %v1709_v33  ;;  %v500_v32 = vld [vmem:[%s2200_s28 + $0x2f8] sm:$0xff]  ;;  %v1771_v33 = vcombine.low %v487_v22, %v491_v0 }
  0xa6   : > { %1268 = vmatprep.subr.bf16.mxu0 %v1716_v34  ;;  %1309 = vmatprep.subr.bf16.mxu1 %v1718_v35  ;;  %v1773_v34 = vcombine.low %v488_v23, %v492_v24  ;;  %v1780_v35 = vcombine.high %v495_v29, %v499_v30  ;;  %v1782_v36 = vcombine.high %v496_v31, %v500_v32  ;;  %v1876_v23 = vmov (!%p1817_p8), 0.0  }
  0xa7   : > { %1359 = vst [vmem:[#allocation3] sm:$0xff] (!%p1817_p8), %v1876_v23  ;;  %1360 = vst [vmem:[#allocation3 + $0x8] sm:$0xff] (!%p1817_p8), %v1876_v23 }
  0xa8   : > { %1361 = vst [vmem:[#allocation3 + $0x10] sm:$0xff] (!%p1817_p8), %v1876_v23  ;;  %1362 = vst [vmem:[#allocation3 + $0x18] sm:$0xff] (!%p1817_p8), %v1876_v23 }
  0xa9   : > { %1269 = vmatpush1.bf16.msra.mxu0 %v1715_v40  ;;  %1310 = vmatpush1.bf16.msra.mxu1 %v1717_v1  ;;  %v508_v40 = vld [vmem:[%s2200_s28 + $0x338] sm:$0xff]  ;;  %v1779_v1 = vcombine.low %v495_v29, %v499_v30  ;;  %1363 = vst [vmem:[#allocation3 + $0x20] sm:$0xff] (!%p1817_p8), %v1876_v23  ;;  %1364 = vst [vmem:[#allocation3 + $0x28] sm:$0xff] (!%p1817_p8), %v1876_v23 }
  0xaa   : > { %1270 = vmatprep.subr.bf16.mxu0 %v1724_v41  ;;  %1311 = vmatprep.subr.bf16.mxu1 %v1726_v42  ;;  %v1781_v41 = vcombine.low %v496_v31, %v500_v32  ;;  %v1788_v42 = vcombine.high %v503_v37, %v507_v38  ;;  %v1790_v43 = vcombine.high %v504_v39, %v508_v40 }
  0xab   : > { %1365 = vst [vmem:[#allocation3 + $0x30] sm:$0xff] (!%p1817_p8), %v1876_v23  ;;  %1366 = vst [vmem:[#allocation3 + $0x38] sm:$0xff] (!%p1817_p8), %v1876_v23 }
  0xac   : > { %1367 = vst [vmem:[#allocation4] sm:$0xff] (!%p1817_p8), %v1876_v23  ;;  %1368 = vst [vmem:[#allocation4 + $0x8] sm:$0xff] (!%p1817_p8), %v1876_v23 }
  0xad   : > { %1271 = vmatpush1.bf16.msra.mxu0 %v1723_v47  ;;  %1312 = vmatpush1.bf16.msra.mxu1 %v1725_v48  ;;  %v516_v47 = vld [vmem:[%s2200_s28 + $0x378] sm:$0xff]  ;;  %v1787_v48 = vcombine.low %v503_v37, %v507_v38  ;;  %1369 = vst [vmem:[#allocation4 + $0x10] sm:$0xff] (!%p1817_p8), %v1876_v23  ;;  %1370 = vst [vmem:[#allocation4 + $0x18] sm:$0xff] (!%p1817_p8), %v1876_v23 }
  0xae   : > { %1272 = vmatprep.subr.bf16.mxu0 %v1732_v49  ;;  %1313 = vmatprep.subr.bf16.mxu1 %v1734_v50  ;;  %v1789_v49 = vcombine.low %v504_v39, %v508_v40  ;;  %v1796_v50 = vcombine.high %v511_v44, %v515_v45  ;;  %v1798_v51 = vcombine.high %v512_v46, %v516_v47 }
  0xaf   : > { %1371 = vst [vmem:[#allocation4 + $0x20] sm:$0xff] (!%p1817_p8), %v1876_v23  ;;  %1372 = vst [vmem:[#allocation4 + $0x28] sm:$0xff] (!%p1817_p8), %v1876_v23 }
  0xb0   : > { %1373 = vst [vmem:[#allocation4 + $0x30] sm:$0xff] (!%p1817_p8), %v1876_v23  ;;  %1374 = vst [vmem:[#allocation4 + $0x38] sm:$0xff] (!%p1817_p8), %v1876_v23 }
  0xb1   : > { %1273 = vmatpush1.bf16.msra.mxu0 %v1731_v55  ;;  %1314 = vmatpush1.bf16.msra.mxu1 %v1733_v56  ;;  %v524_v55 = vld [vmem:[%s2200_s28 + $0x3b8] sm:$0xff]  ;;  %v1795_v56 = vcombine.low %v511_v44, %v515_v45 }
  0xb2   : > { %1274 = vmatprep.subr.bf16.mxu0 %v1740_v57  ;;  %1315 = vmatprep.subr.bf16.mxu1 %v1742_v58  ;;  %v1797_v57 = vcombine.low %v512_v46, %v516_v47  ;;  %v1804_v58 = vcombine.high %v519_v52, %v523_v53  ;;  %v1806_v59 = vcombine.high %v520_v54, %v524_v55 }
  0xb5   : > { %1275 = vmatpush1.bf16.msra.mxu0 %v1739_v63  ;;  %1316 = vmatpush1.bf16.msra.mxu1 %v1741_v2  ;;  %v532_v63 = vld [vmem:[%s2200_s28 + $0x3f8] sm:$0xff]  ;;  %v1803_v2 = vcombine.low %v519_v52, %v523_v53 }
  0xb6   : > { %1276 = vmatprep.subr.bf16.mxu0 %v1748_v3  ;;  %1317 = vmatprep.subr.bf16.mxu1 %v1750_v4  ;;  %v1805_v3 = vcombine.low %v520_v54, %v524_v55  ;;  %v1812_v4 = vcombine.high %v527_v60, %v531_v61  ;;  %v1814_v5 = vcombine.high %v528_v62, %v532_v63 }
  0xb7   : > { %v1813_v7 = vcombine.low %v528_v62, %v532_v63 }
  0xb9   : > { %1277 = vmatpush1.bf16.msra.mxu0 %v1747_v9  ;;  %1318 = vmatpush1.bf16.msra.mxu1 %v1749_v10 }
  0xba   : > { %1278 = vmatprep.subr.bf16.mxu0 %v1756_v11  ;;  %1319 = vmatprep.subr.bf16.mxu1 %v1758_v12 }
  0xbd   : > { %1279 = vmatpush1.bf16.msra.mxu0 %v1755_v18  ;;  %1320 = vmatpush1.bf16.msra.mxu1 %v1757_v19 }
  0xbe   : > { %1280 = vmatprep.subr.bf16.mxu0 %v1764_v20  ;;  %1321 = vmatprep.subr.bf16.mxu1 %v1766_v21 }
  0xc1   : > { %1281 = vmatpush1.bf16.msra.mxu0 %v1763_v25  ;;  %1322 = vmatpush1.bf16.msra.mxu1 %v1765_v26 }
  0xc2   : > { %1282 = vmatprep.subr.bf16.mxu0 %v1772_v27  ;;  %1323 = vmatprep.subr.bf16.mxu1 %v1774_v28 }
  0xc5   : > { %1283 = vmatpush1.bf16.msra.mxu0 %v1771_v33  ;;  %1324 = vmatpush1.bf16.msra.mxu1 %v1773_v34 }
  0xc6   : > { %1284 = vmatprep.subr.bf16.mxu0 %v1780_v35  ;;  %1325 = vmatprep.subr.bf16.mxu1 %v1782_v36 }
  0xc9   : > { %1285 = vmatpush1.bf16.msra.mxu0 %v1779_v1  ;;  %1326 = vmatpush1.bf16.msra.mxu1 %v1781_v41 }
  0xca   : > { %1286 = vmatprep.subr.bf16.mxu0 %v1788_v42  ;;  %1327 = vmatprep.subr.bf16.mxu1 %v1790_v43 }
  0xcd   : > { %1287 = vmatpush1.bf16.msra.mxu0 %v1787_v48  ;;  %1328 = vmatpush1.bf16.msra.mxu1 %v1789_v49 }
  0xce   : > { %1288 = vmatprep.subr.bf16.mxu0 %v1796_v50  ;;  %1329 = vmatprep.subr.bf16.mxu1 %v1798_v51 }
  0xd1   : > { %1289 = vmatpush1.bf16.msra.mxu0 %v1795_v56  ;;  %1330 = vmatpush1.bf16.msra.mxu1 %v1797_v57 }
  0xd2   : > { %1290 = vmatprep.subr.bf16.mxu0 %v1804_v58  ;;  %1331 = vmatprep.subr.bf16.mxu1 %v1806_v59 }
  0xd5   : > { %1291 = vmatpush1.bf16.msra.mxu0 %v1803_v2  ;;  %1332 = vmatpush1.bf16.msra.mxu1 %v1805_v3 }
  0xd6   : > { %1292 = vmatprep.subr.bf16.mxu0 %v1812_v4  ;;  %1333 = vmatprep.subr.bf16.mxu1 %v1814_v5 }
  0xd9   : > { %1293 = vmatpush1.bf16.msra.mxu0 %v1811_v6  ;;  %1334 = vmatpush1.bf16.msra.mxu1 %v1813_v7 }
  0xdc   : > { %1295 = vmatmul.mubr.bf16.vlgmr.msra.gmra.mrb[4].mxu0 %v2276_v14  ;;  %1336 = vmatmul.mubr.bf16.vlgmr.msra.gmra.mrb[4].mxu1 %v2276_v14 }
 0x16f   : > { %v1214_v8 = vpop.f32.mrb[0].mxu0  ;;  %v1255_v9 = vpop.f32.mrb[0].mxu1 }
 0x170   : > { %1347 = vst [vmem:[%s1346_s30] sm:$0xff] %v1214_v8  ;;  %v1216_v10 = vpop.f32.mrb[1].mxu0  ;;  %1349 = vst [vmem:[%s1346_s30 + $0x10] sm:$0xff] %v1255_v9  ;;  %v1257_v11 = vpop.f32.mrb[1].mxu1 }
 0x171   : > { %1348 = vst [vmem:[%s1346_s30 + $0x8] sm:$0xff] %v1216_v10  ;;  %v1218_v12 = vpop.f32.mrb[2].mxu0  ;;  %1350 = vst [vmem:[%s1346_s30 + $0x18] sm:$0xff] %v1257_v11  ;;  %v1259_v13 = vpop.f32.mrb[2].mxu1 }
 0x172   : > { %v1219_v15 = vpop.f32.mrb[3].mxu0  ;;  %v1260_v16 = vpop.f32.mrb[3].mxu1 }
 0x1ac   : > { %1358 = sbr.rel (%p1817_p8) target bundleno = 435 (0x1b3), region = 55 }
 0x1af   : > { %v1296_v17 = vpop.f32.mrb[4].mxu0  ;;  %v1337_v18 = vpop.f32.mrb[4].mxu1 }
 0x1b0   : > { %1351 = vst [vmem:[%s1346_s30 + $0x20] sm:$0xff] %v1296_v17  ;;  %v1298_v19 = vpop.f32.mrb[5].mxu0  ;;  %1353 = vst [vmem:[%s1346_s30 + $0x30] sm:$0xff] %v1337_v18  ;;  %v2343_v14 = vpop.f32.mrb[5].mxu1 }
 0x1b1   : > { %1352 = vst [vmem:[%s1346_s30 + $0x28] sm:$0xff] %v1298_v19  ;;  %v1300_v20 = vpop.f32.mrb[6].mxu0  ;;  %1354 = vst [vmem:[%s1346_s30 + $0x38] sm:$0xff] %v2343_v14  ;;  %v1341_v21 = vpop.f32.mrb[6].mxu1 }
 0x1b2   : > { %v1301_v22 = vpop.f32.mrb[7].mxu0  ;;  %v1342_v0 = vpop.f32.mrb[7].mxu1 }
 0x1b3 PF: > { %v1375_v24 = vld [vmem:[#allocation3] sm:$0xff]  ;;  %v1376_v25 = vld [vmem:[#allocation3 + $0x8] sm:$0xff]  ;;  %v1377_v26 = vld [vmem:[#allocation3 + $0x10] sm:$0xff]  ;;  %v1407_v27 = vmul.f32 %v1214_v8, %v1214_v8  ;;  %v1408_v28 = vmul.f32 %v1216_v10, %v1216_v10  ;;  %v1409_v29 = vmul.f32 %v1255_v9, %v1255_v9  ;;  %v1410_v30 = vmul.f32 %v1257_v11, %v1257_v11  ;;  %p1818_p9 = scmp.ne.s32.totalorder %s1908_s12, 3 }
 0x1b4   : > { %v1383_v31 = vadd.f32 %v1375_v24, %v1214_v8  ;;  %v1384_v32 = vadd.f32 %v1376_v25, %v1216_v10  ;;  %v1385_v33 = vadd.f32 %v1377_v26, %v1255_v9  ;;  %v1378_v34 = vld [vmem:[#allocation3 + $0x18] sm:$0xff]  ;;  %v1379_v35 = vld [vmem:[#allocation3 + $0x20] sm:$0xff]  ;;  %v1380_v36 = vld [vmem:[#allocation3 + $0x28] sm:$0xff]  ;;  %v1411_v37 = vmul.f32 %v1296_v17, %v1296_v17 }
 0x1b5   : > { %v1386_v38 = vadd.f32 %v1378_v34, %v1257_v11  ;;  %v1387_v39 = vadd.f32 %v1379_v35, %v1296_v17  ;;  %v1388_v40 = vadd.f32 %v1380_v36, %v1298_v19  ;;  %v1381_v1 = vld [vmem:[#allocation3 + $0x30] sm:$0xff]  ;;  %v1382_v41 = vld [vmem:[#allocation3 + $0x38] sm:$0xff]  ;;  %v1399_v42 = vld [vmem:[#allocation4] sm:$0xff]  ;;  %v1412_v43 = vmul.f32 %v1298_v19, %v1298_v19 }
 0x1b6   : > { %1391 = vst [vmem:[#allocation3] sm:$0xff] %v1383_v31  ;;  %1392 = vst [vmem:[#allocation3 + $0x8] sm:$0xff] %v1384_v32  ;;  %v1389_v44 = vadd.f32 %v1381_v1, %v1337_v18  ;;  %v1390_v45 = vadd.f32 %v1382_v41, %v2343_v14  ;;  %v1415_v46 = vadd.f32 %v1407_v27, %v1399_v42  ;;  %v1400_v47 = vld [vmem:[#allocation4 + $0x8] sm:$0xff]  ;;  %v1401_v48 = vld [vmem:[#allocation4 + $0x10] sm:$0xff] }
 0x1b7   : > { %1393 = vst [vmem:[#allocation3 + $0x10] sm:$0xff] %v1385_v33  ;;  %v1402_v49 = vld [vmem:[#allocation4 + $0x18] sm:$0xff]  ;;  %v1413_v50 = vmul.f32 %v1337_v18, %v1337_v18  ;;  %1394 = vst [vmem:[#allocation3 + $0x18] sm:$0xff] %v1386_v38  ;;  %v1416_v51 = vadd.f32 %v1408_v28, %v1400_v47  ;;  %v1417_v52 = vadd.f32 %v1409_v29, %v1401_v48  ;;  %v1403_v54 = vld [vmem:[#allocation4 + $0x20] sm:$0xff]  ;;  %1434 = sbr.rel (%p1818_p9) target bundleno = 656 (0x290), region = 59 }
 0x1b8   : > { %1395 = vst [vmem:[#allocation3 + $0x20] sm:$0xff] %v1387_v39  ;;  %1396 = vst [vmem:[#allocation3 + $0x28] sm:$0xff] %v1388_v40  ;;  %v1418_v53 = vadd.f32 %v1410_v30, %v1402_v49  ;;  %v1404_v55 = vld [vmem:[#allocation4 + $0x28] sm:$0xff]  ;;  %v1405_v56 = vld [vmem:[#allocation4 + $0x30] sm:$0xff]  ;;  %v1414_v57 = vmul.f32 %v2343_v14, %v2343_v14  ;;  %v1419_v58 = vadd.f32 %v1411_v37, %v1403_v54 }
 0x1b9   : > { %1397 = vst [vmem:[#allocation3 + $0x30] sm:$0xff] %v1389_v44  ;;  %1398 = vst [vmem:[#allocation3 + $0x38] sm:$0xff] %v1390_v45  ;;  %v1420_v59 = vadd.f32 %v1412_v43, %v1404_v55  ;;  %v1421_v60 = vadd.f32 %v1413_v50, %v1405_v56  ;;  %v1406_v61 = vld [vmem:[#allocation4 + $0x38] sm:$0xff]  ;;  %v1478_v38 = vld [vmem:[#allocation2] sm:$0xff] (!%p1818_p9) }
 0x1ba   : > { %1423 = vst [vmem:[#allocation4] sm:$0xff] %v1415_v46  ;;  %1424 = vst [vmem:[#allocation4 + $0x8] sm:$0xff] %v1416_v51  ;;  %v1422_v62 = vadd.f32 %v1414_v57, %v1406_v61  ;;  %v1479_v39 = vld [vmem:[#allocation2 + $0x8] sm:$0xff] (!%p1818_p9)  ;;  %v1480_v40 = vld [vmem:[#allocation2 + $0x10] sm:$0xff] (!%p1818_p9) }
 0x1bb   : > { %1425 = vst [vmem:[#allocation4 + $0x10] sm:$0xff] %v1417_v52  ;;  %1426 = vst [vmem:[#allocation4 + $0x18] sm:$0xff] %v1418_v53  ;;  %v1481_v1 = vld [vmem:[#allocation2 + $0x18] sm:$0xff] (!%p1818_p9)  ;;  %v1482_v42 = vld [vmem:[#allocation2 + $0x20] sm:$0xff] (!%p1818_p9) }
 0x1bc   : > { %1427 = vst [vmem:[#allocation4 + $0x20] sm:$0xff] %v1419_v58  ;;  %1428 = vst [vmem:[#allocation4 + $0x28] sm:$0xff] %v1420_v59  ;;  %v1483_v43 = vld [vmem:[#allocation2 + $0x28] sm:$0xff] (!%p1818_p9)  ;;  %v1484_v44 = vld [vmem:[#allocation2 + $0x30] sm:$0xff] (!%p1818_p9) }
 0x1bd   : > { %1429 = vst [vmem:[#allocation4 + $0x30] sm:$0xff] %v1421_v60  ;;  %1430 = vst [vmem:[#allocation4 + $0x38] sm:$0xff] %v1422_v62  ;;  %v1435_v63 = vld [vmem:[#allocation3] sm:$0xff] (!%p1818_p9)  ;;  %v1436_v2 = vld [vmem:[#allocation3 + $0x8] sm:$0xff] (!%p1818_p9) }
 0x1be   : > { %v1437_v3 = vld [vmem:[#allocation3 + $0x10] sm:$0xff]  ;;  %v1443_v4 = vadd.f32 %v1436_v2, %v1435_v63  ;;  %v1438_v5 = vld [vmem:[#allocation3 + $0x18] sm:$0xff]  ;;  %v1519_v55 = vld [vmem:[#allocation2 + $0x40] sm:$0xff] }
 0x1bf   : > { %v1439_v10 = vld [vmem:[#allocation3 + $0x20] sm:$0xff]  ;;  %v1440_v15 = vld [vmem:[#allocation3 + $0x28] sm:$0xff]  ;;  %v1485_v46 = vld [vmem:[#allocation2 + $0x38] sm:$0xff] }
 0x1c0   : > { %v1444_v7 = vadd.f32 %v1443_v4, %v1437_v3  ;;  %v1441_v19 = vld [vmem:[#allocation3 + $0x30] sm:$0xff]  ;;  %v1442_v22 = vld [vmem:[#allocation3 + $0x38] sm:$0xff]  ;;  %v1520_v60 = vld [vmem:[#allocation2 + $0x48] sm:$0xff] }
 0x1c1   : > { %v1452_v6 = vld [vmem:[#allocation4] sm:$0xff]  ;;  %v1453_v8 = vld [vmem:[#allocation4 + $0x8] sm:$0xff]  ;;  %v1521_v61 = vld [vmem:[#allocation2 + $0x50] sm:$0xff] }
 0x1c2   : > { %v1454_v9 = vld [vmem:[#allocation4 + $0x10] sm:$0xff]  ;;  %v1460_v11 = vadd.f32 %v1453_v8, %v1452_v6  ;;  %v1445_v12 = vadd.f32 %v1444_v7, %v1438_v5  ;;  %v1455_v13 = vld [vmem:[#allocation4 + $0x18] sm:$0xff]  ;;  %v1523_v5 = vld [vmem:[#allocation2 + $0x60] sm:$0xff] }
 0x1c3   : > { %v1456_v18 = vld [vmem:[#allocation4 + $0x20] sm:$0xff]  ;;  %v1457_v21 = vld [vmem:[#allocation4 + $0x28] sm:$0xff]  ;;  %v1522_v62 = vld [vmem:[#allocation2 + $0x58] sm:$0xff] }
 0x1c4   : > { %v1461_v16 = vadd.f32 %v1460_v11, %v1454_v9  ;;  %v1446_v17 = vadd.f32 %v1445_v12, %v1439_v10  ;;  %v1458_v24 = vld [vmem:[#allocation4 + $0x30] sm:$0xff]  ;;  %v1459_v27 = vld [vmem:[#allocation4 + $0x38] sm:$0xff]  ;;  %v1524_v6 = vld [vmem:[#allocation2 + $0x68] sm:$0xff] }
 0x1c5   : > { %v1525_v7 = vld [vmem:[#allocation2 + $0x70] sm:$0xff]  ;;  %v1526_v12 = vld [vmem:[#allocation2 + $0x78] sm:$0xff] }
 0x1c6   : > { %v1462_v14 = vadd.f32 %v1461_v16, %v1455_v13  ;;  %v1447_v20 = vadd.f32 %v1446_v17, %v1440_v15 }
 0x1c8   : > { %v1463_v0 = vadd.f32 %v1462_v14, %v1456_v18  ;;  %v1448_v23 = vadd.f32 %v1447_v20, %v1441_v19 }
 0x1ca   : > { %v1464_v25 = vadd.f32 %v1463_v0, %v1457_v21  ;;  %v1449_v26 = vadd.f32 %v1448_v23, %v1442_v22 }
 0x1cc   : > { %v1465_v28 = vadd.f32 %v1464_v25, %v1458_v24  ;;  %1450 = vadd.xlane.f32.xlu0 %v1449_v26  ;;  %v1560_v24 = vld [vmem:[#allocation2 + $0x80] sm:$0xff] }
 0x1ce   : > { %v1466_v29 = vadd.f32 %v1465_v28, %v1459_v27 }
 0x1d0   : > { %1467 = vadd.xlane.f32.xlu0 %v1466_v29  ;;  %v1561_v29 = vld [vmem:[#allocation2 + $0x88] sm:$0xff] }
 0x259   : > { %v1451_v30 = vpop.xlane.xlu0 %1450 }
 0x25a   : > { %v1469_v31 = vmul.f32 0.00024414063, %v1451_v30  ;;  %v1562_v30 = vld [vmem:[#allocation2 + $0x90] sm:$0xff] }
 0x25c   : > { %v1471_v33 = vmul.f32 %v1469_v31, %v1469_v31  ;;  %v1476_v41 = vsub.f32 0.0, %v1469_v31  ;;  %v1563_v31 = vld [vmem:[#allocation2 + $0x98] sm:$0xff] }
 0x25d   : > { %v1468_v32 = vpop.xlane.xlu0 %1467 }
 0x25e   : > { %v1470_v34 = vmul.f32 0.00024414063, %v1468_v32 }
 0x260   : > { %v1472_v35 = vsub.f32 %v1470_v34, %v1471_v33 }
 0x262   : > { %v1473_v36 = vmax.f32 %v1472_v35, 0.0 }
 0x264   : > { %v1474_v37 = vadd.f32 1e-05, %v1473_v36  ;;  %v1564_v36 = vld [vmem:[#allocation2 + $0xa0] sm:$0xff] }
 0x266   : > { %1850 = vrsqrt.f32 %v1474_v37  ;;  %v1565_v37 = vld [vmem:[#allocation2 + $0xa8] sm:$0xff] }
 0x270   : > { %v2351_v45 = vpop.eup %1850 }
 0x271   : > { %v2354_v47 = vmul.f32 %v2351_v45, %v1476_v41  ;;  %v1486_v48 = vmul.f32 %v2351_v45, %v1478_v38  ;;  %v1487_v49 = vmul.f32 %v2351_v45, %v1479_v39  ;;  %v1488_v50 = vmul.f32 %v2351_v45, %v1480_v40  ;;  %v1566_v38 = vld [vmem:[#allocation2 + $0xb0] sm:$0xff] }
 0x272   : > { %v1489_v51 = vmul.f32 %v2351_v45, %v1481_v1  ;;  %v1490_v52 = vmul.f32 %v2351_v45, %v1482_v42  ;;  %v1491_v53 = vmul.f32 %v2351_v45, %v1483_v43  ;;  %v1492_v54 = vmul.f32 %v2351_v45, %v1484_v44  ;;  %v1567_v42 = vld [vmem:[#allocation2 + $0xb8] sm:$0xff] }
 0x273   : > { %v1493_v56 = vmul.f32 %v2351_v45, %v1485_v46  ;;  %v1494_v57 = vadd.f32 %v1486_v48, %v2354_v47  ;;  %v1495_v58 = vadd.f32 %v1487_v49, %v2354_v47  ;;  %v1496_v59 = vadd.f32 %v1488_v50, %v2354_v47 }
 0x274   : > { %v1497_v63 = vadd.f32 %v1489_v51, %v2354_v47  ;;  %v1498_v2 = vadd.f32 %v1490_v52, %v2354_v47  ;;  %v1499_v3 = vadd.f32 %v1491_v53, %v2354_v47  ;;  %v1500_v4 = vadd.f32 %v1492_v54, %v2354_v47 }
 0x275   : > { %v1501_v8 = vadd.f32 %v1493_v56, %v2354_v47  ;;  %v1502_v9 = vmax.f32 %v1494_v57, 0.0  ;;  %v1503_v10 = vmax.f32 %v1495_v58, 0.0  ;;  %v1504_v11 = vmax.f32 %v1496_v59, 0.0  ;;  %v1601_v57 = vld [vmem:[#allocation2 + $0xc0] sm:$0xff] }
 0x276   : > { %v1505_v13 = vmax.f32 %v1497_v63, 0.0  ;;  %v1506_v15 = vmax.f32 %v1498_v2, 0.0  ;;  %v1507_v16 = vmax.f32 %v1499_v3, 0.0  ;;  %v1508_v17 = vmax.f32 %v1500_v4, 0.0  ;;  %v1603_v63 = vld [vmem:[#allocation2 + $0xd0] sm:$0xff]  ;;  %v1604_v2 = vld [vmem:[#allocation2 + $0xd8] sm:$0xff] }
 0x277   : > { %v1509_v18 = vmax.f32 %v1501_v8, 0.0  ;;  %1510 = vst [vmem:[%s2528_s2] sm:$0xff] %v1502_v9  ;;  %1511 = vst [vmem:[%s2528_s2 + $0x8] sm:$0xff] %v1503_v10  ;;  %v1527_v19 = vmul.f32 %v2351_v45, %v1519_v55  ;;  %v1528_v14 = vmul.f32 %v2351_v45, %v1520_v60  ;;  %v1529_v20 = vmul.f32 %v2351_v45, %v1521_v61  ;;  %v1606_v8 = vld [vmem:[#allocation2 + $0xe8] sm:$0xff]  ;;  %v1607_v9 = vld [vmem:[#allocation2 + $0xf0] sm:$0xff] }
 0x278   : > { %1512 = vst [vmem:[%s2528_s2 + $0x10] sm:$0xff] %v1504_v11  ;;  %1513 = vst [vmem:[%s2528_s2 + $0x18] sm:$0xff] %v1505_v13  ;;  %v1530_v21 = vmul.f32 %v2351_v45, %v1522_v62  ;;  %v1531_v22 = vmul.f32 %v2351_v45, %v1523_v5  ;;  %v1532_v0 = vmul.f32 %v2351_v45, %v1524_v6  ;;  %v1602_v62 = vld [vmem:[#allocation2 + $0xc8] sm:$0xff] }
 0x279   : > { %1514 = vst [vmem:[%s2528_s2 + $0x20] sm:$0xff] %v1506_v15  ;;  %1515 = vst [vmem:[%s2528_s2 + $0x28] sm:$0xff] %v1507_v16  ;;  %v1533_v23 = vmul.f32 %v2351_v45, %v1525_v7  ;;  %v1534_v25 = vmul.f32 %v2351_v45, %v1526_v12  ;;  %v1535_v26 = vadd.f32 %v1527_v19, %v2354_v47  ;;  %v1605_v7 = vld [vmem:[#allocation2 + $0xe0] sm:$0xff]  ;;  %v1608_v15 = vld [vmem:[#allocation2 + $0xf8] sm:$0xff] }
 0x27a   : > { %1516 = vst [vmem:[%s2528_s2 + $0x30] sm:$0xff] %v1508_v17  ;;  %1517 = vst [vmem:[%s2528_s2 + $0x38] sm:$0xff] %v1509_v18  ;;  %v1536_v27 = vadd.f32 %v1528_v14, %v2354_v47  ;;  %v1537_v28 = vadd.f32 %v1529_v20, %v2354_v47  ;;  %v1538_v32 = vadd.f32 %v1530_v21, %v2354_v47 }
 0x27b   : > { %v1539_v33 = vadd.f32 %v1531_v22, %v2354_v47  ;;  %v1540_v34 = vadd.f32 %v1532_v0, %v2354_v47  ;;  %v1541_v35 = vadd.f32 %v1533_v23, %v2354_v47  ;;  %v1542_v39 = vadd.f32 %v1534_v25, %v2354_v47 }
 0x27c   : > { %v1543_v40 = vmax.f32 %v1535_v26, 0.0  ;;  %v1544_v1 = vmax.f32 %v1536_v27, 0.0  ;;  %v1545_v41 = vmax.f32 %v1537_v28, 0.0  ;;  %v1546_v43 = vmax.f32 %v1538_v32, 0.0 }
 0x27d   : > { %v1547_v44 = vmax.f32 %v1539_v33, 0.0  ;;  %v1548_v46 = vmax.f32 %v1540_v34, 0.0  ;;  %v1549_v48 = vmax.f32 %v1541_v35, 0.0  ;;  %v1550_v49 = vmax.f32 %v1542_v39, 0.0 }
 0x27e   : > { %1551 = vst [vmem:[%s2528_s2 + $0x40] sm:$0xff] %v1543_v40  ;;  %1552 = vst [vmem:[%s2528_s2 + $0x48] sm:$0xff] %v1544_v1  ;;  %v1568_v50 = vmul.f32 %v2351_v45, %v1560_v24  ;;  %v1569_v51 = vmul.f32 %v2351_v45, %v1561_v29  ;;  %v1570_v52 = vmul.f32 %v2351_v45, %v1562_v30 }
 0x27f   : > { %1553 = vst [vmem:[%s2528_s2 + $0x50] sm:$0xff] %v1545_v41  ;;  %1554 = vst [vmem:[%s2528_s2 + $0x58] sm:$0xff] %v1546_v43  ;;  %v1571_v53 = vmul.f32 %v2351_v45, %v1563_v31  ;;  %v1572_v54 = vmul.f32 %v2351_v45, %v1564_v36  ;;  %v1573_v55 = vmul.f32 %v2351_v45, %v1565_v37 }
 0x280   : > { %1555 = vst [vmem:[%s2528_s2 + $0x60] sm:$0xff] %v1547_v44  ;;  %1556 = vst [vmem:[%s2528_s2 + $0x68] sm:$0xff] %v1548_v46  ;;  %v1574_v56 = vmul.f32 %v2351_v45, %v1566_v38  ;;  %v1575_v58 = vmul.f32 %v2351_v45, %v1567_v42  ;;  %v1576_v59 = vadd.f32 %v1568_v50, %v2354_v47 }
 0x281   : > { %1557 = vst [vmem:[%s2528_s2 + $0x70] sm:$0xff] %v1549_v48  ;;  %1558 = vst [vmem:[%s2528_s2 + $0x78] sm:$0xff] %v1550_v49  ;;  %v1577_v60 = vadd.f32 %v1569_v51, %v2354_v47  ;;  %v1578_v61 = vadd.f32 %v1570_v52, %v2354_v47  ;;  %v1579_v3 = vadd.f32 %v1571_v53, %v2354_v47 }
 0x282   : > { %v1580_v4 = vadd.f32 %v1572_v54, %v2354_v47  ;;  %v1581_v5 = vadd.f32 %v1573_v55, %v2354_v47  ;;  %v1582_v6 = vadd.f32 %v1574_v56, %v2354_v47  ;;  %v1583_v10 = vadd.f32 %v1575_v58, %v2354_v47 }
 0x283   : > { %v1584_v11 = vmax.f32 %v1576_v59, 0.0  ;;  %v1585_v12 = vmax.f32 %v1577_v60, 0.0  ;;  %v1586_v13 = vmax.f32 %v1578_v61, 0.0  ;;  %v1587_v16 = vmax.f32 %v1579_v3, 0.0 }
 0x284   : > { %v1588_v17 = vmax.f32 %v1580_v4, 0.0  ;;  %v1589_v18 = vmax.f32 %v1581_v5, 0.0  ;;  %v1590_v19 = vmax.f32 %v1582_v6, 0.0  ;;  %v1591_v14 = vmax.f32 %v1583_v10, 0.0 }
 0x285   : > { %1592 = vst [vmem:[%s2528_s2 + $0x80] sm:$0xff] %v1584_v11  ;;  %1593 = vst [vmem:[%s2528_s2 + $0x88] sm:$0xff] %v1585_v12  ;;  %v1609_v20 = vmul.f32 %v2351_v45, %v1601_v57  ;;  %v1610_v21 = vmul.f32 %v2351_v45, %v1602_v62  ;;  %v1611_v22 = vmul.f32 %v2351_v45, %v1603_v63 }
 0x286   : > { %1594 = vst [vmem:[%s2528_s2 + $0x90] sm:$0xff] %v1586_v13  ;;  %1595 = vst [vmem:[%s2528_s2 + $0x98] sm:$0xff] %v1587_v16  ;;  %v1612_v0 = vmul.f32 %v2351_v45, %v1604_v2  ;;  %v1613_v23 = vmul.f32 %v2351_v45, %v1605_v7  ;;  %v1614_v24 = vmul.f32 %v2351_v45, %v1606_v8 }
 0x287   : > { %1596 = vst [vmem:[%s2528_s2 + $0xa0] sm:$0xff] %v1588_v17  ;;  %1597 = vst [vmem:[%s2528_s2 + $0xa8] sm:$0xff] %v1589_v18  ;;  %v1615_v25 = vmul.f32 %v2351_v45, %v1607_v9  ;;  %v1616_v26 = vmul.f32 %v2351_v45, %v1608_v15  ;;  %v1617_v27 = vadd.f32 %v1609_v20, %v2354_v47 }
 0x288   : > { %1598 = vst [vmem:[%s2528_s2 + $0xb0] sm:$0xff] %v1590_v19  ;;  %1599 = vst [vmem:[%s2528_s2 + $0xb8] sm:$0xff] %v1591_v14  ;;  %v1618_v28 = vadd.f32 %v1610_v21, %v2354_v47  ;;  %v1619_v29 = vadd.f32 %v1611_v22, %v2354_v47  ;;  %v1620_v30 = vadd.f32 %v1612_v0, %v2354_v47 }
 0x289   : > { %v1621_v31 = vadd.f32 %v1613_v23, %v2354_v47  ;;  %v1622_v32 = vadd.f32 %v1614_v24, %v2354_v47  ;;  %v1623_v33 = vadd.f32 %v1615_v25, %v2354_v47  ;;  %v1624_v34 = vadd.f32 %v1616_v26, %v2354_v47 }
 0x28a   : > { %v1625_v35 = vmax.f32 %v1617_v27, 0.0  ;;  %v1626_v36 = vmax.f32 %v1618_v28, 0.0  ;;  %v1627_v37 = vmax.f32 %v1619_v29, 0.0  ;;  %v1628_v45 = vmax.f32 %v1620_v30, 0.0 }
 0x28b   : > { %v1629_v38 = vmax.f32 %v1621_v31, 0.0  ;;  %v1630_v39 = vmax.f32 %v1622_v32, 0.0  ;;  %v1631_v40 = vmax.f32 %v1623_v33, 0.0  ;;  %v1632_v1 = vmax.f32 %v1624_v34, 0.0 }
 0x28c   : > { %1633 = vst [vmem:[%s2528_s2 + $0xc0] sm:$0xff] %v1625_v35  ;;  %1634 = vst [vmem:[%s2528_s2 + $0xc8] sm:$0xff] %v1626_v36 }
 0x28d   : > { %1635 = vst [vmem:[%s2528_s2 + $0xd0] sm:$0xff] %v1627_v37  ;;  %1636 = vst [vmem:[%s2528_s2 + $0xd8] sm:$0xff] %v1628_v45 }
 0x28e   : > { %1637 = vst [vmem:[%s2528_s2 + $0xe0] sm:$0xff] %v1629_v38  ;;  %1638 = vst [vmem:[%s2528_s2 + $0xe8] sm:$0xff] %v1630_v39 }
 0x28f   : > { %1639 = vst [vmem:[%s2528_s2 + $0xf0] sm:$0xff] %v1631_v40  ;;  %1640 = vst [vmem:[%s2528_s2 + $0xf8] sm:$0xff] %v1632_v1 }
 0x290 PF: > { %p9_p10 = scmp.ge.s32.totalorder %s1911_s13, 6   ;;  %s2529_s9 = smov %s1870_s10 }
 0x291   : > { %s2530_s10 = smov %s1920_s16  ;;  %s2531_s11 = smov %s1911_s13 }
 0x292   :  { %11 = sbr.rel (!%p9_p10) target bundleno = 2 (0x2), region = 94 }

// kernel: costregnet_forward.11
= control target key start
LH: loop header
LB: loop body
LE: loop exit
PB: predicated region body
PF: predicated region fallthrough
CT: control target
= control target key end

     0   :  { %s1099_s1 = inlined_call_operand.vmem [shape: bf16[256,512], index: 1, kind: input, shape index: {}]   ;;  %s1100_s0 = inlined_call_operand.vmem [shape: bf16[16,256], index: 0, kind: input, shape index: {}]   ;;  %s1101_s2 = inlined_call_operand.vmem [shape: f32[16,512], index: 2, kind: output, shape index: {}]  }
   0x1   :  { %v747_v0 = vld [vmem:[%s1099_s1 + $0x4] ss:$16 sps:$4 sm:$0xff]   ;;  %v749_v1 = vld [vmem:[%s1099_s1 + $0xc] ss:$16 sps:$4 sm:$0xff]   ;;  %v751_v2 = vld [vmem:[%s1099_s1] ss:$16 sps:$4 sm:$0xff]  }
   0x2   :  { %407 = vmatprep.subr.bf16.mxu0 %v747_v0  ;;  %v752_v3 = vld [vmem:[%s1099_s1 + $0x8] ss:$16 sps:$4 sm:$0xff]   ;;  %450 = vmatprep.subr.bf16.mxu1 %v749_v1  ;;  %v753_v4 = vld [vmem:[%s1099_s1 + $0x24] ss:$16 sps:$4 sm:$0xff]   ;;  %v755_v5 = vld [vmem:[%s1099_s1 + $0x2c] ss:$16 sps:$4 sm:$0xff]  }
   0x3   :  { %408 = vmatpush1.bf16.msra.mxu0 %v751_v2  ;;  %451 = vmatpush1.bf16.msra.mxu1 %v752_v3  ;;  %v757_v6 = vld [vmem:[%s1099_s1 + $0x20] ss:$16 sps:$4 sm:$0xff]   ;;  %v758_v7 = vld [vmem:[%s1099_s1 + $0x28] ss:$16 sps:$4 sm:$0xff]   ;;  %v759_v8 = vld [vmem:[%s1099_s1 + $0x44] ss:$16 sps:$4 sm:$0xff]  }
   0x4   :  { %409 = vmatprep.subr.bf16.mxu0 %v753_v4  ;;  %452 = vmatprep.subr.bf16.mxu1 %v755_v5  ;;  %v761_v9 = vld [vmem:[%s1099_s1 + $0x4c] ss:$16 sps:$4 sm:$0xff]   ;;  %v763_v10 = vld [vmem:[%s1099_s1 + $0x40] ss:$16 sps:$4 sm:$0xff]   ;;  %v764_v11 = vld [vmem:[%s1099_s1 + $0x48] ss:$16 sps:$4 sm:$0xff]  }
   0x5   :  { %v765_v12 = vld [vmem:[%s1099_s1 + $0x64] ss:$16 sps:$4 sm:$0xff]   ;;  %v767_v13 = vld [vmem:[%s1099_s1 + $0x6c] ss:$16 sps:$4 sm:$0xff]   ;;  %v769_v14 = vld [vmem:[%s1099_s1 + $0x60] ss:$16 sps:$4 sm:$0xff]  }
   0x6   :  { %v770_v15 = vld [vmem:[%s1099_s1 + $0x68] ss:$16 sps:$4 sm:$0xff]   ;;  %v771_v16 = vld [vmem:[%s1099_s1 + $0x84] ss:$16 sps:$4 sm:$0xff]   ;;  %v773_v17 = vld [vmem:[%s1099_s1 + $0x8c] ss:$16 sps:$4 sm:$0xff]  }
   0x7   :  { %410 = vmatpush1.bf16.msra.mxu0 %v757_v6  ;;  %453 = vmatpush1.bf16.msra.mxu1 %v758_v7  ;;  %v775_v18 = vld [vmem:[%s1099_s1 + $0x80] ss:$16 sps:$4 sm:$0xff]   ;;  %v776_v19 = vld [vmem:[%s1099_s1 + $0x88] ss:$16 sps:$4 sm:$0xff]   ;;  %v777_v20 = vld [vmem:[%s1099_s1 + $0xa4] ss:$16 sps:$4 sm:$0xff]  }
   0x8   :  { %411 = vmatprep.subr.bf16.mxu0 %v759_v8  ;;  %454 = vmatprep.subr.bf16.mxu1 %v761_v9  ;;  %v779_v21 = vld [vmem:[%s1099_s1 + $0xac] ss:$16 sps:$4 sm:$0xff]   ;;  %v781_v22 = vld [vmem:[%s1099_s1 + $0xa0] ss:$16 sps:$4 sm:$0xff]   ;;  %v782_v23 = vld [vmem:[%s1099_s1 + $0xa8] ss:$16 sps:$4 sm:$0xff]  }
   0x9   :  { %v783_v24 = vld [vmem:[%s1099_s1 + $0xc4] ss:$16 sps:$4 sm:$0xff]   ;;  %v785_v25 = vld [vmem:[%s1099_s1 + $0xcc] ss:$16 sps:$4 sm:$0xff]   ;;  %v787_v26 = vld [vmem:[%s1099_s1 + $0xc0] ss:$16 sps:$4 sm:$0xff]  }
   0xa   :  { %v788_v27 = vld [vmem:[%s1099_s1 + $0xc8] ss:$16 sps:$4 sm:$0xff]   ;;  %v789_v28 = vld [vmem:[%s1099_s1 + $0xe4] ss:$16 sps:$4 sm:$0xff]   ;;  %v791_v29 = vld [vmem:[%s1099_s1 + $0xec] ss:$16 sps:$4 sm:$0xff]  }
   0xb   :  { %412 = vmatpush1.bf16.msra.mxu0 %v763_v10  ;;  %455 = vmatpush1.bf16.msra.mxu1 %v764_v11  ;;  %v793_v30 = vld [vmem:[%s1099_s1 + $0xe0] ss:$16 sps:$4 sm:$0xff]   ;;  %v794_v31 = vld [vmem:[%s1099_s1 + $0xe8] ss:$16 sps:$4 sm:$0xff]   ;;  %v795_v32 = vld [vmem:[%s1099_s1 + $0x104] ss:$16 sps:$4 sm:$0xff]  }
   0xc   :  { %413 = vmatprep.subr.bf16.mxu0 %v765_v12  ;;  %456 = vmatprep.subr.bf16.mxu1 %v767_v13  ;;  %v797_v33 = vld [vmem:[%s1099_s1 + $0x10c] ss:$16 sps:$4 sm:$0xff]   ;;  %v799_v34 = vld [vmem:[%s1099_s1 + $0x100] ss:$16 sps:$4 sm:$0xff]   ;;  %v800_v35 = vld [vmem:[%s1099_s1 + $0x108] ss:$16 sps:$4 sm:$0xff]  }
   0xd   :  { %v801_v36 = vld [vmem:[%s1099_s1 + $0x124] ss:$16 sps:$4 sm:$0xff]   ;;  %v803_v37 = vld [vmem:[%s1099_s1 + $0x12c] ss:$16 sps:$4 sm:$0xff]   ;;  %v805_v38 = vld [vmem:[%s1099_s1 + $0x120] ss:$16 sps:$4 sm:$0xff]  }
   0xe   :  { %v806_v39 = vld [vmem:[%s1099_s1 + $0x128] ss:$16 sps:$4 sm:$0xff]   ;;  %v807_v40 = vld [vmem:[%s1099_s1 + $0x144] ss:$16 sps:$4 sm:$0xff]   ;;  %v809_v41 = vld [vmem:[%s1099_s1 + $0x14c] ss:$16 sps:$4 sm:$0xff]  }
   0xf   :  { %414 = vmatpush1.bf16.msra.mxu0 %v769_v14  ;;  %457 = vmatpush1.bf16.msra.mxu1 %v770_v15  ;;  %v811_v42 = vld [vmem:[%s1099_s1 + $0x140] ss:$16 sps:$4 sm:$0xff]   ;;  %v812_v43 = vld [vmem:[%s1099_s1 + $0x148] ss:$16 sps:$4 sm:$0xff]   ;;  %v813_v44 = vld [vmem:[%s1099_s1 + $0x164] ss:$16 sps:$4 sm:$0xff]  }
  0x10   :  { %415 = vmatprep.subr.bf16.mxu0 %v771_v16  ;;  %458 = vmatprep.subr.bf16.mxu1 %v773_v17  ;;  %v815_v45 = vld [vmem:[%s1099_s1 + $0x16c] ss:$16 sps:$4 sm:$0xff]   ;;  %v817_v47 = vld [vmem:[%s1099_s1 + $0x160] ss:$16 sps:$4 sm:$0xff]   ;;  %v818_v48 = vld [vmem:[%s1099_s1 + $0x168] ss:$16 sps:$4 sm:$0xff]  }
  0x11   :  { %v845_v46 = vld [vmem:[%s1100_s0 + $0x4] ss:$8 sps:$4 sm:$0xff]   ;;  %v823_v51 = vld [vmem:[%s1099_s1 + $0x180] ss:$16 sps:$4 sm:$0xff]   ;;  %v824_v52 = vld [vmem:[%s1099_s1 + $0x188] ss:$16 sps:$4 sm:$0xff]  }
  0x12   :  { %v819_v49 = vld [vmem:[%s1099_s1 + $0x184] ss:$16 sps:$4 sm:$0xff]   ;;  %v821_v50 = vld [vmem:[%s1099_s1 + $0x18c] ss:$16 sps:$4 sm:$0xff]   ;;  %439 = vmatprep.mubr.bf16.mxu0 %v845_v46  ;;  %482 = vmatprep.mubr.bf16.mxu1 %v845_v46  ;;  %v829_v55 = vld [vmem:[%s1099_s1 + $0x1a0] ss:$16 sps:$4 sm:$0xff]  }
  0x13   :  { %416 = vmatpush1.bf16.msra.mxu0 %v775_v18  ;;  %459 = vmatpush1.bf16.msra.mxu1 %v776_v19  ;;  %v825_v53 = vld [vmem:[%s1099_s1 + $0x1a4] ss:$16 sps:$4 sm:$0xff]   ;;  %v827_v54 = vld [vmem:[%s1099_s1 + $0x1ac] ss:$16 sps:$4 sm:$0xff]   ;;  %v830_v56 = vld [vmem:[%s1099_s1 + $0x1a8] ss:$16 sps:$4 sm:$0xff]  }
  0x14   :  { %417 = vmatprep.subr.bf16.mxu0 %v777_v20  ;;  %460 = vmatprep.subr.bf16.mxu1 %v779_v21  ;;  %v831_v57 = vld [vmem:[%s1099_s1 + $0x1c4] ss:$16 sps:$4 sm:$0xff]   ;;  %v833_v58 = vld [vmem:[%s1099_s1 + $0x1cc] ss:$16 sps:$4 sm:$0xff]   ;;  %v835_v59 = vld [vmem:[%s1099_s1 + $0x1c0] ss:$16 sps:$4 sm:$0xff]  }
  0x15   :  { %v836_v60 = vld [vmem:[%s1099_s1 + $0x1c8] ss:$16 sps:$4 sm:$0xff]   ;;  %v837_v61 = vld [vmem:[%s1099_s1 + $0x1e4] ss:$16 sps:$4 sm:$0xff]   ;;  %v839_v62 = vld [vmem:[%s1099_s1 + $0x1ec] ss:$16 sps:$4 sm:$0xff]  }
  0x16   :  { %v841_v63 = vld [vmem:[%s1099_s1 + $0x1e0] ss:$16 sps:$4 sm:$0xff]   ;;  %v842_v0 = vld [vmem:[%s1099_s1 + $0x1e8] ss:$16 sps:$4 sm:$0xff]  }
  0x17   :  { %418 = vmatpush1.bf16.msra.mxu0 %v781_v22  ;;  %461 = vmatpush1.bf16.msra.mxu1 %v782_v23  ;;  %v843_v1 = vld [vmem:[%s1100_s0] ss:$8 sps:$4 sm:$0xff]  }
  0x18   :  { %419 = vmatprep.subr.bf16.mxu0 %v783_v24  ;;  %462 = vmatprep.subr.bf16.mxu1 %v785_v25 }
  0x1b   :  { %420 = vmatpush1.bf16.msra.mxu0 %v787_v26  ;;  %463 = vmatpush1.bf16.msra.mxu1 %v788_v27 }
  0x1c   :  { %421 = vmatprep.subr.bf16.mxu0 %v789_v28  ;;  %464 = vmatprep.subr.bf16.mxu1 %v791_v29 }
  0x1f   :  { %422 = vmatpush1.bf16.msra.mxu0 %v793_v30  ;;  %465 = vmatpush1.bf16.msra.mxu1 %v794_v31 }
  0x20   :  { %423 = vmatprep.subr.bf16.mxu0 %v795_v32  ;;  %466 = vmatprep.subr.bf16.mxu1 %v797_v33 }
  0x23   :  { %424 = vmatpush1.bf16.msra.mxu0 %v799_v34  ;;  %467 = vmatpush1.bf16.msra.mxu1 %v800_v35 }
  0x24   :  { %425 = vmatprep.subr.bf16.mxu0 %v801_v36  ;;  %468 = vmatprep.subr.bf16.mxu1 %v803_v37 }
  0x27   :  { %426 = vmatpush1.bf16.msra.mxu0 %v805_v38  ;;  %469 = vmatpush1.bf16.msra.mxu1 %v806_v39 }
  0x28   :  { %427 = vmatprep.subr.bf16.mxu0 %v807_v40  ;;  %470 = vmatprep.subr.bf16.mxu1 %v809_v41 }
  0x2b   :  { %428 = vmatpush1.bf16.msra.mxu0 %v811_v42  ;;  %471 = vmatpush1.bf16.msra.mxu1 %v812_v43 }
  0x2c   :  { %429 = vmatprep.subr.bf16.mxu0 %v813_v44  ;;  %472 = vmatprep.subr.bf16.mxu1 %v815_v45 }
  0x2f   :  { %430 = vmatpush1.bf16.msra.mxu0 %v817_v47  ;;  %473 = vmatpush1.bf16.msra.mxu1 %v818_v48 }
  0x30   :  { %431 = vmatprep.subr.bf16.mxu0 %v819_v49  ;;  %474 = vmatprep.subr.bf16.mxu1 %v821_v50 }
  0x33   :  { %432 = vmatpush1.bf16.msra.mxu0 %v823_v51  ;;  %475 = vmatpush1.bf16.msra.mxu1 %v824_v52 }
  0x34   :  { %433 = vmatprep.subr.bf16.mxu0 %v825_v53  ;;  %476 = vmatprep.subr.bf16.mxu1 %v827_v54 }
  0x37   :  { %434 = vmatpush1.bf16.msra.mxu0 %v829_v55  ;;  %477 = vmatpush1.bf16.msra.mxu1 %v830_v56 }
  0x38   :  { %435 = vmatprep.subr.bf16.mxu0 %v831_v57  ;;  %478 = vmatprep.subr.bf16.mxu1 %v833_v58 }
  0x3b   :  { %436 = vmatpush1.bf16.msra.mxu0 %v835_v59  ;;  %479 = vmatpush1.bf16.msra.mxu1 %v836_v60 }
  0x3c   :  { %437 = vmatprep.subr.bf16.mxu0 %v837_v61  ;;  %480 = vmatprep.subr.bf16.mxu1 %v839_v62 }
  0x3f   :  { %438 = vmatpush1.bf16.msra.mxu0 %v841_v63  ;;  %481 = vmatpush1.bf16.msra.mxu1 %v842_v0 }
  0x42   :  { %440 = vmatmul.mubr.bf16.vlgmr.msra.gmra.mrb[0].mxu0 %v843_v1  ;;  %483 = vmatmul.mubr.bf16.vlgmr.msra.gmra.mrb[0].mxu1 %v843_v1 }
 0x115   :  { %v441_v2 = vpop.f32.mrb[0].mxu0  ;;  %v484_v3 = vpop.f32.mrb[0].mxu1 }
 0x116   :  { %v556_v4 = vmul.f32 %v441_v2, %v441_v2  ;;  %v443_v5 = vpop.f32.mrb[1].mxu0  ;;  %v486_v6 = vpop.f32.mrb[1].mxu1  ;;  %v558_v11 = vmul.f32 %v484_v3, %v484_v3 }
 0x117   :  { %v557_v7 = vmul.f32 %v443_v5, %v443_v5  ;;  %v591_v8 = vadd.f32 %v443_v5, %v441_v2  ;;  %v445_v9 = vpop.f32.mrb[2].mxu0  ;;  %v1063_v10 = vpop.f32.mrb[2].mxu1  ;;  %v559_v23 = vmul.f32 %v486_v6, %v486_v6 }
 0x118   :  { %v560_v12 = vmul.f32 %v445_v9, %v445_v9  ;;  %v447_v13 = vpop.f32.mrb[3].mxu0  ;;  %v1065_v14 = vpop.f32.mrb[3].mxu1  ;;  %v562_v19 = vmul.f32 %v1063_v10, %v1063_v10 }
 0x119   :  { %v561_v15 = vmul.f32 %v447_v13, %v447_v13  ;;  %v596_v16 = vadd.f32 %v447_v13, %v445_v9  ;;  %v592_v17 = vadd.f32 %v591_v8, %v484_v3  ;;  %v609_v18 = vadd.f32 %v557_v7, %v556_v4 }
 0x11a   :  { %v563_v25 = vmul.f32 %v1065_v14, %v1065_v14 }
 0x11b   :  { %v614_v20 = vadd.f32 %v561_v15, %v560_v12  ;;  %v593_v21 = vadd.f32 %v592_v17, %v486_v6  ;;  %v597_v22 = vadd.f32 %v596_v16, %v1063_v10  ;;  %v610_v24 = vadd.f32 %v609_v18, %v558_v11 }
 0x11d   :  { %594 = vadd.xlane.f32.xlu0 %v593_v21  ;;  %v598_v26 = vadd.f32 %v597_v22, %v1065_v14  ;;  %v615_v27 = vadd.f32 %v614_v20, %v562_v19  ;;  %v611_v28 = vadd.f32 %v610_v24, %v559_v23 }
 0x11f   :  { %v616_v29 = vadd.f32 %v615_v27, %v563_v25  ;;  %612 = vadd.xlane.f32.xlu1 %v611_v28 }
 0x121   :  { %599 = vadd.xlane.f32.xlu0 %v598_v26 }
 0x123   :  { %617 = vadd.xlane.f32.xlu1 %v616_v29 }
 0x1aa   :  { %v595_v30 = vpop.xlane.xlu0 %594 }
 0x1ab   :  { %v619_v31 = vmul.f32 0.001953125, %v595_v30 }
 0x1ac   :  { %v613_v33 = vpop.xlane.xlu1 %612 }
 0x1ad   :  { %v623_v32 = vmul.f32 %v619_v31, %v619_v31  ;;  %v621_v34 = vmul.f32 0.001953125, %v613_v33  ;;  %v633_v46 = vsub.f32 0.0, %v619_v31 }
 0x1ae   :  { %v600_v35 = vpop.xlane.xlu0 %599 }
 0x1af   :  { %v620_v36 = vmul.f32 0.001953125, %v600_v35  ;;  %v625_v37 = vsub.f32 %v621_v34, %v623_v32 }
 0x1b0   :  { %v618_v39 = vpop.xlane.xlu1 %617 }
 0x1b1   :  { %v624_v38 = vmul.f32 %v620_v36, %v620_v36  ;;  %v627_v40 = vmax.f32 %v625_v37, 0.0  ;;  %v622_v41 = vmul.f32 0.001953125, %v618_v39  ;;  %v634_v56 = vsub.f32 0.0, %v620_v36 }
 0x1b3   :  { %v629_v42 = vadd.f32 1e-05, %v627_v40  ;;  %v626_v43 = vsub.f32 %v622_v41, %v624_v38 }
 0x1b5   :  { %846 = vrsqrt.f32 %v629_v42  ;;  %v628_v44 = vmax.f32 %v626_v43, 0.0 }
 0x1b7   :  { %v630_v45 = vadd.f32 1e-05, %v628_v44 }
 0x1b9   :  { %848 = vrsqrt.f32 %v630_v45 }
 0x1bf   :  { %v847_v47 = vpop.eup %846 }
 0x1c0   :  { %v635_v48 = vmul.f32 %v847_v47, %v633_v46  ;;  %v645_v49 = vmul.f32 %v847_v47, %v441_v2  ;;  %v646_v50 = vmul.f32 %v847_v47, %v443_v5  ;;  %v647_v51 = vmul.f32 %v847_v47, %v484_v3 }
 0x1c1   :  { %v648_v52 = vmul.f32 %v847_v47, %v486_v6 }
 0x1c2   :  { %v653_v53 = vadd.f32 %v645_v49, %v635_v48  ;;  %v654_v54 = vadd.f32 %v646_v50, %v635_v48  ;;  %v655_v55 = vadd.f32 %v647_v51, %v635_v48 }
 0x1c3   :  { %v849_v57 = vpop.eup %848  ;;  %v656_v58 = vadd.f32 %v648_v52, %v635_v48 }
 0x1c4   :  { %v661_v59 = vmax.f32 %v653_v53, 0.0  ;;  %v662_v60 = vmax.f32 %v654_v54, 0.0  ;;  %v663_v61 = vmax.f32 %v655_v55, 0.0  ;;  %v636_v62 = vmul.f32 %v849_v57, %v634_v56 }
 0x1c5   :  { %v664_v63 = vmax.f32 %v656_v58, 0.0  ;;  %v649_v0 = vmul.f32 %v849_v57, %v445_v9  ;;  %v650_v1 = vmul.f32 %v849_v57, %v447_v13  ;;  %v651_v4 = vmul.f32 %v849_v57, %v1063_v10 }
 0x1c6   :  { %669 = vst [vmem:[%s1101_s2] sm:$0xff] %v661_v59  ;;  %670 = vst [vmem:[%s1101_s2 + $0x8] sm:$0xff] %v662_v60  ;;  %v652_v2 = vmul.f32 %v849_v57, %v1065_v14 }
 0x1c7   :  { %671 = vst [vmem:[%s1101_s2 + $0x10] sm:$0xff] %v663_v61  ;;  %672 = vst [vmem:[%s1101_s2 + $0x18] sm:$0xff] %v664_v63  ;;  %v657_v3 = vadd.f32 %v649_v0, %v636_v62  ;;  %v658_v5 = vadd.f32 %v650_v1, %v636_v62  ;;  %v659_v6 = vadd.f32 %v651_v4, %v636_v62 }
 0x1c8   :  { %v660_v7 = vadd.f32 %v652_v2, %v636_v62 }
 0x1c9   :  { %v665_v8 = vmax.f32 %v657_v3, 0.0  ;;  %v666_v9 = vmax.f32 %v658_v5, 0.0  ;;  %v667_v10 = vmax.f32 %v659_v6, 0.0 }
 0x1ca   :  { %v668_v11 = vmax.f32 %v660_v7, 0.0 }
 0x1cb   :  { %673 = vst [vmem:[%s1101_s2 + $0x20] sm:$0xff] %v665_v8  ;;  %674 = vst [vmem:[%s1101_s2 + $0x28] sm:$0xff] %v666_v9 }
 0x1cc   :  { %675 = vst [vmem:[%s1101_s2 + $0x30] sm:$0xff] %v667_v10  ;;  %676 = vst [vmem:[%s1101_s2 + $0x38] sm:$0xff] %v668_v11 }

// kernel: costregnet_forward.12
= control target key start
LH: loop header
LB: loop body
LE: loop exit
PB: predicated region body
PF: predicated region fallthrough
CT: control target
= control target key end

     0   :  { %s1952_s1 = inlined_call_operand.vmem [shape: bf16[512,512], index: 1, kind: input, shape index: {}]   ;;  %s1953_s0 = inlined_call_operand.vmem [shape: bf16[16,512], index: 0, kind: input, shape index: {}]   ;;  %s1954_s2 = inlined_call_operand.vmem [shape: f32[16,512], index: 2, kind: output, shape index: {}]  }
   0x1   :  { %v1303_v0 = vld [vmem:[%s1952_s1 + $0x4] ss:$16 sps:$4 sm:$0xff]   ;;  %v1305_v1 = vld [vmem:[%s1952_s1 + $0xc] ss:$16 sps:$4 sm:$0xff]   ;;  %v1307_v2 = vld [vmem:[%s1952_s1] ss:$16 sps:$4 sm:$0xff]  }
   0x2   :  { %803 = vmatprep.subr.bf16.mxu0 %v1303_v0  ;;  %v1308_v3 = vld [vmem:[%s1952_s1 + $0x8] ss:$16 sps:$4 sm:$0xff]   ;;  %889 = vmatprep.subr.bf16.mxu1 %v1305_v1  ;;  %v1309_v4 = vld [vmem:[%s1952_s1 + $0x24] ss:$16 sps:$4 sm:$0xff]   ;;  %v1311_v5 = vld [vmem:[%s1952_s1 + $0x2c] ss:$16 sps:$4 sm:$0xff]  }
   0x3   :  { %804 = vmatpush1.bf16.msra.mxu0 %v1307_v2  ;;  %890 = vmatpush1.bf16.msra.mxu1 %v1308_v3  ;;  %v1313_v6 = vld [vmem:[%s1952_s1 + $0x20] ss:$16 sps:$4 sm:$0xff]   ;;  %v1314_v7 = vld [vmem:[%s1952_s1 + $0x28] ss:$16 sps:$4 sm:$0xff]   ;;  %v1315_v8 = vld [vmem:[%s1952_s1 + $0x44] ss:$16 sps:$4 sm:$0xff]  }
   0x4   :  { %805 = vmatprep.subr.bf16.mxu0 %v1309_v4  ;;  %891 = vmatprep.subr.bf16.mxu1 %v1311_v5  ;;  %v1317_v9 = vld [vmem:[%s1952_s1 + $0x4c] ss:$16 sps:$4 sm:$0xff]   ;;  %v1319_v10 = vld [vmem:[%s1952_s1 + $0x40] ss:$16 sps:$4 sm:$0xff]   ;;  %v1320_v11 = vld [vmem:[%s1952_s1 + $0x48] ss:$16 sps:$4 sm:$0xff]  }
   0x5   :  { %v1321_v12 = vld [vmem:[%s1952_s1 + $0x64] ss:$16 sps:$4 sm:$0xff]   ;;  %v1323_v13 = vld [vmem:[%s1952_s1 + $0x6c] ss:$16 sps:$4 sm:$0xff]   ;;  %v1325_v14 = vld [vmem:[%s1952_s1 + $0x60] ss:$16 sps:$4 sm:$0xff]  }
   0x6   :  { %v1326_v15 = vld [vmem:[%s1952_s1 + $0x68] ss:$16 sps:$4 sm:$0xff]   ;;  %v1327_v16 = vld [vmem:[%s1952_s1 + $0x84] ss:$16 sps:$4 sm:$0xff]   ;;  %v1329_v17 = vld [vmem:[%s1952_s1 + $0x8c] ss:$16 sps:$4 sm:$0xff]  }
   0x7   :  { %806 = vmatpush1.bf16.msra.mxu0 %v1313_v6  ;;  %892 = vmatpush1.bf16.msra.mxu1 %v1314_v7  ;;  %v1331_v18 = vld [vmem:[%s1952_s1 + $0x80] ss:$16 sps:$4 sm:$0xff]   ;;  %v1332_v19 = vld [vmem:[%s1952_s1 + $0x88] ss:$16 sps:$4 sm:$0xff]   ;;  %v1333_v20 = vld [vmem:[%s1952_s1 + $0xa4] ss:$16 sps:$4 sm:$0xff]  }
   0x8   :  { %807 = vmatprep.subr.bf16.mxu0 %v1315_v8  ;;  %893 = vmatprep.subr.bf16.mxu1 %v1317_v9  ;;  %v1335_v21 = vld [vmem:[%s1952_s1 + $0xac] ss:$16 sps:$4 sm:$0xff]   ;;  %v1337_v22 = vld [vmem:[%s1952_s1 + $0xa0] ss:$16 sps:$4 sm:$0xff]   ;;  %v1338_v23 = vld [vmem:[%s1952_s1 + $0xa8] ss:$16 sps:$4 sm:$0xff]  }
   0x9   :  { %v1339_v24 = vld [vmem:[%s1952_s1 + $0xc4] ss:$16 sps:$4 sm:$0xff]   ;;  %v1341_v25 = vld [vmem:[%s1952_s1 + $0xcc] ss:$16 sps:$4 sm:$0xff]   ;;  %v1343_v26 = vld [vmem:[%s1952_s1 + $0xc0] ss:$16 sps:$4 sm:$0xff]  }
   0xa   :  { %v1344_v27 = vld [vmem:[%s1952_s1 + $0xc8] ss:$16 sps:$4 sm:$0xff]   ;;  %v1345_v28 = vld [vmem:[%s1952_s1 + $0xe4] ss:$16 sps:$4 sm:$0xff]   ;;  %v1347_v29 = vld [vmem:[%s1952_s1 + $0xec] ss:$16 sps:$4 sm:$0xff]  }
   0xb   :  { %808 = vmatpush1.bf16.msra.mxu0 %v1319_v10  ;;  %894 = vmatpush1.bf16.msra.mxu1 %v1320_v11  ;;  %v1349_v30 = vld [vmem:[%s1952_s1 + $0xe0] ss:$16 sps:$4 sm:$0xff]   ;;  %v1350_v31 = vld [vmem:[%s1952_s1 + $0xe8] ss:$16 sps:$4 sm:$0xff]   ;;  %v1351_v32 = vld [vmem:[%s1952_s1 + $0x104] ss:$16 sps:$4 sm:$0xff]  }
   0xc   :  { %809 = vmatprep.subr.bf16.mxu0 %v1321_v12  ;;  %895 = vmatprep.subr.bf16.mxu1 %v1323_v13  ;;  %v1353_v33 = vld [vmem:[%s1952_s1 + $0x10c] ss:$16 sps:$4 sm:$0xff]   ;;  %v1355_v34 = vld [vmem:[%s1952_s1 + $0x100] ss:$16 sps:$4 sm:$0xff]   ;;  %v1356_v35 = vld [vmem:[%s1952_s1 + $0x108] ss:$16 sps:$4 sm:$0xff]  }
   0xd   :  { %v1357_v36 = vld [vmem:[%s1952_s1 + $0x124] ss:$16 sps:$4 sm:$0xff]   ;;  %v1359_v37 = vld [vmem:[%s1952_s1 + $0x12c] ss:$16 sps:$4 sm:$0xff]   ;;  %v1361_v38 = vld [vmem:[%s1952_s1 + $0x120] ss:$16 sps:$4 sm:$0xff]  }
   0xe   :  { %v1362_v39 = vld [vmem:[%s1952_s1 + $0x128] ss:$16 sps:$4 sm:$0xff]   ;;  %v1363_v40 = vld [vmem:[%s1952_s1 + $0x144] ss:$16 sps:$4 sm:$0xff]   ;;  %v1365_v41 = vld [vmem:[%s1952_s1 + $0x14c] ss:$16 sps:$4 sm:$0xff]  }
   0xf   :  { %810 = vmatpush1.bf16.msra.mxu0 %v1325_v14  ;;  %896 = vmatpush1.bf16.msra.mxu1 %v1326_v15  ;;  %v1367_v42 = vld [vmem:[%s1952_s1 + $0x140] ss:$16 sps:$4 sm:$0xff]   ;;  %v1368_v43 = vld [vmem:[%s1952_s1 + $0x148] ss:$16 sps:$4 sm:$0xff]   ;;  %v1369_v44 = vld [vmem:[%s1952_s1 + $0x164] ss:$16 sps:$4 sm:$0xff]  }
  0x10   :  { %811 = vmatprep.subr.bf16.mxu0 %v1327_v16  ;;  %897 = vmatprep.subr.bf16.mxu1 %v1329_v17  ;;  %v1371_v45 = vld [vmem:[%s1952_s1 + $0x16c] ss:$16 sps:$4 sm:$0xff]   ;;  %v1373_v46 = vld [vmem:[%s1952_s1 + $0x160] ss:$16 sps:$4 sm:$0xff]   ;;  %v1374_v47 = vld [vmem:[%s1952_s1 + $0x168] ss:$16 sps:$4 sm:$0xff]  }
  0x11   :  { %v1401_v48 = vld [vmem:[%s1953_s0 + $0x4] ss:$16 sps:$4 sm:$0xff]   ;;  %v1377_v50 = vld [vmem:[%s1952_s1 + $0x18c] ss:$16 sps:$4 sm:$0xff]   ;;  %v1379_v51 = vld [vmem:[%s1952_s1 + $0x180] ss:$16 sps:$4 sm:$0xff]  }
  0x12   :  { %v1375_v49 = vld [vmem:[%s1952_s1 + $0x184] ss:$16 sps:$4 sm:$0xff]   ;;  %835 = vmatprep.mubr.bf16.mxu0 %v1401_v48  ;;  %921 = vmatprep.mubr.bf16.mxu1 %v1401_v48  ;;  %v1380_v52 = vld [vmem:[%s1952_s1 + $0x188] ss:$16 sps:$4 sm:$0xff]   ;;  %v1383_v54 = vld [vmem:[%s1952_s1 + $0x1ac] ss:$16 sps:$4 sm:$0xff]  }
  0x13   :  { %812 = vmatpush1.bf16.msra.mxu0 %v1331_v18  ;;  %898 = vmatpush1.bf16.msra.mxu1 %v1332_v19  ;;  %v1381_v53 = vld [vmem:[%s1952_s1 + $0x1a4] ss:$16 sps:$4 sm:$0xff]   ;;  %v1385_v55 = vld [vmem:[%s1952_s1 + $0x1a0] ss:$16 sps:$4 sm:$0xff]   ;;  %v1386_v56 = vld [vmem:[%s1952_s1 + $0x1a8] ss:$16 sps:$4 sm:$0xff]  }
  0x14   :  { %813 = vmatprep.subr.bf16.mxu0 %v1333_v20  ;;  %899 = vmatprep.subr.bf16.mxu1 %v1335_v21  ;;  %v1387_v57 = vld [vmem:[%s1952_s1 + $0x1c4] ss:$16 sps:$4 sm:$0xff]   ;;  %v1389_v58 = vld [vmem:[%s1952_s1 + $0x1cc] ss:$16 sps:$4 sm:$0xff]   ;;  %v1391_v59 = vld [vmem:[%s1952_s1 + $0x1c0] ss:$16 sps:$4 sm:$0xff]  }
  0x15   :  { %v1392_v60 = vld [vmem:[%s1952_s1 + $0x1c8] ss:$16 sps:$4 sm:$0xff]   ;;  %v1393_v61 = vld [vmem:[%s1952_s1 + $0x1e4] ss:$16 sps:$4 sm:$0xff]   ;;  %v1395_v62 = vld [vmem:[%s1952_s1 + $0x1ec] ss:$16 sps:$4 sm:$0xff]  }
  0x16   :  { %v1397_v63 = vld [vmem:[%s1952_s1 + $0x1e0] ss:$16 sps:$4 sm:$0xff]   ;;  %v1398_v0 = vld [vmem:[%s1952_s1 + $0x1e8] ss:$16 sps:$4 sm:$0xff]   ;;  %v1404_v1 = vld [vmem:[%s1952_s1 + $0x204] ss:$16 sps:$4 sm:$0xff]  }
  0x17   :  { %814 = vmatpush1.bf16.msra.mxu0 %v1337_v22  ;;  %900 = vmatpush1.bf16.msra.mxu1 %v1338_v23  ;;  %v1407_v2 = vld [vmem:[%s1952_s1 + $0x20c] ss:$16 sps:$4 sm:$0xff]   ;;  %v1399_v3 = vld [vmem:[%s1953_s0] ss:$16 sps:$4 sm:$0xff]   ;;  %v1405_v5 = vld [vmem:[%s1952_s1 + $0x208] ss:$16 sps:$4 sm:$0xff]  }
  0x18   :  { %815 = vmatprep.subr.bf16.mxu0 %v1339_v24  ;;  %901 = vmatprep.subr.bf16.mxu1 %v1341_v25  ;;  %v1402_v4 = vld [vmem:[%s1952_s1 + $0x200] ss:$16 sps:$4 sm:$0xff]   ;;  %v1410_v6 = vld [vmem:[%s1952_s1 + $0x224] ss:$16 sps:$4 sm:$0xff]   ;;  %v1413_v7 = vld [vmem:[%s1952_s1 + $0x22c] ss:$16 sps:$4 sm:$0xff]  }
  0x19   :  { %v1408_v8 = vld [vmem:[%s1952_s1 + $0x220] ss:$16 sps:$4 sm:$0xff]   ;;  %v1411_v9 = vld [vmem:[%s1952_s1 + $0x228] ss:$16 sps:$4 sm:$0xff]   ;;  %v1416_v10 = vld [vmem:[%s1952_s1 + $0x244] ss:$16 sps:$4 sm:$0xff]  }
  0x1a   :  { %v1419_v11 = vld [vmem:[%s1952_s1 + $0x24c] ss:$16 sps:$4 sm:$0xff]   ;;  %v1414_v12 = vld [vmem:[%s1952_s1 + $0x240] ss:$16 sps:$4 sm:$0xff]   ;;  %v1417_v13 = vld [vmem:[%s1952_s1 + $0x248] ss:$16 sps:$4 sm:$0xff]  }
  0x1b   :  { %816 = vmatpush1.bf16.msra.mxu0 %v1343_v26  ;;  %902 = vmatpush1.bf16.msra.mxu1 %v1344_v27  ;;  %v1422_v14 = vld [vmem:[%s1952_s1 + $0x264] ss:$16 sps:$4 sm:$0xff]   ;;  %v1425_v15 = vld [vmem:[%s1952_s1 + $0x26c] ss:$16 sps:$4 sm:$0xff]   ;;  %v1420_v16 = vld [vmem:[%s1952_s1 + $0x260] ss:$16 sps:$4 sm:$0xff]  }
  0x1c   :  { %817 = vmatprep.subr.bf16.mxu0 %v1345_v28  ;;  %903 = vmatprep.subr.bf16.mxu1 %v1347_v29  ;;  %v1423_v17 = vld [vmem:[%s1952_s1 + $0x268] ss:$16 sps:$4 sm:$0xff]   ;;  %v1428_v18 = vld [vmem:[%s1952_s1 + $0x284] ss:$16 sps:$4 sm:$0xff]   ;;  %v1431_v19 = vld [vmem:[%s1952_s1 + $0x28c] ss:$16 sps:$4 sm:$0xff]  }
  0x1d   :  { %v1426_v20 = vld [vmem:[%s1952_s1 + $0x280] ss:$16 sps:$4 sm:$0xff]   ;;  %v1429_v21 = vld [vmem:[%s1952_s1 + $0x288] ss:$16 sps:$4 sm:$0xff]   ;;  %v1434_v22 = vld [vmem:[%s1952_s1 + $0x2a4] ss:$16 sps:$4 sm:$0xff]  }
  0x1e   :  { %v1437_v23 = vld [vmem:[%s1952_s1 + $0x2ac] ss:$16 sps:$4 sm:$0xff]   ;;  %v1432_v24 = vld [vmem:[%s1952_s1 + $0x2a0] ss:$16 sps:$4 sm:$0xff]   ;;  %v1435_v25 = vld [vmem:[%s1952_s1 + $0x2a8] ss:$16 sps:$4 sm:$0xff]  }
  0x1f   :  { %818 = vmatpush1.bf16.msra.mxu0 %v1349_v30  ;;  %904 = vmatpush1.bf16.msra.mxu1 %v1350_v31  ;;  %v1440_v26 = vld [vmem:[%s1952_s1 + $0x2c4] ss:$16 sps:$4 sm:$0xff]   ;;  %v1443_v27 = vld [vmem:[%s1952_s1 + $0x2cc] ss:$16 sps:$4 sm:$0xff]   ;;  %v1438_v29 = vld [vmem:[%s1952_s1 + $0x2c0] ss:$16 sps:$4 sm:$0xff]  }
  0x20   :  { %819 = vmatprep.subr.bf16.mxu0 %v1351_v32  ;;  %905 = vmatprep.subr.bf16.mxu1 %v1353_v33  ;;  %v1500_v28 = vld [vmem:[%s1953_s0 + $0xc] ss:$16 sps:$4 sm:$0xff]   ;;  %v1441_v30 = vld [vmem:[%s1952_s1 + $0x2c8] ss:$16 sps:$4 sm:$0xff]   ;;  %v1446_v31 = vld [vmem:[%s1952_s1 + $0x2e4] ss:$16 sps:$4 sm:$0xff]  }
  0x21   :  { %v1449_v32 = vld [vmem:[%s1952_s1 + $0x2ec] ss:$16 sps:$4 sm:$0xff]   ;;  %v1444_v33 = vld [vmem:[%s1952_s1 + $0x2e0] ss:$16 sps:$4 sm:$0xff]  }
  0x22   :  { %v1473_v48 = vld [vmem:[%s1952_s1 + $0x36c] ss:$16 sps:$4 sm:$0xff]  }
  0x23   :  { %820 = vmatpush1.bf16.msra.mxu0 %v1355_v34  ;;  %906 = vmatpush1.bf16.msra.mxu1 %v1356_v35  ;;  %v1447_v34 = vld [vmem:[%s1952_s1 + $0x2e8] ss:$16 sps:$4 sm:$0xff]   ;;  %v1452_v35 = vld [vmem:[%s1952_s1 + $0x304] ss:$16 sps:$4 sm:$0xff]  }
  0x24   :  { %821 = vmatprep.subr.bf16.mxu0 %v1357_v36  ;;  %907 = vmatprep.subr.bf16.mxu1 %v1359_v37  ;;  %v1455_v36 = vld [vmem:[%s1952_s1 + $0x30c] ss:$16 sps:$4 sm:$0xff]   ;;  %v1450_v37 = vld [vmem:[%s1952_s1 + $0x300] ss:$16 sps:$4 sm:$0xff]  }
  0x27   :  { %822 = vmatpush1.bf16.msra.mxu0 %v1361_v38  ;;  %908 = vmatpush1.bf16.msra.mxu1 %v1362_v39  ;;  %v1453_v38 = vld [vmem:[%s1952_s1 + $0x308] ss:$16 sps:$4 sm:$0xff]   ;;  %v1458_v39 = vld [vmem:[%s1952_s1 + $0x324] ss:$16 sps:$4 sm:$0xff]  }
  0x28   :  { %823 = vmatprep.subr.bf16.mxu0 %v1363_v40  ;;  %909 = vmatprep.subr.bf16.mxu1 %v1365_v41  ;;  %v1461_v40 = vld [vmem:[%s1952_s1 + $0x32c] ss:$16 sps:$4 sm:$0xff]   ;;  %v1456_v41 = vld [vmem:[%s1952_s1 + $0x320] ss:$16 sps:$4 sm:$0xff]  }
  0x2b   :  { %824 = vmatpush1.bf16.msra.mxu0 %v1367_v42  ;;  %910 = vmatpush1.bf16.msra.mxu1 %v1368_v43  ;;  %v1459_v42 = vld [vmem:[%s1952_s1 + $0x328] ss:$16 sps:$4 sm:$0xff]   ;;  %v1464_v43 = vld [vmem:[%s1952_s1 + $0x344] ss:$16 sps:$4 sm:$0xff]  }
  0x2c   :  { %825 = vmatprep.subr.bf16.mxu0 %v1369_v44  ;;  %911 = vmatprep.subr.bf16.mxu1 %v1371_v45  ;;  %v1467_v44 = vld [vmem:[%s1952_s1 + $0x34c] ss:$16 sps:$4 sm:$0xff]   ;;  %v1462_v45 = vld [vmem:[%s1952_s1 + $0x340] ss:$16 sps:$4 sm:$0xff]  }
  0x2f   :  { %826 = vmatpush1.bf16.msra.mxu0 %v1373_v46  ;;  %912 = vmatpush1.bf16.msra.mxu1 %v1374_v47  ;;  %v1465_v46 = vld [vmem:[%s1952_s1 + $0x348] ss:$16 sps:$4 sm:$0xff]   ;;  %v1470_v47 = vld [vmem:[%s1952_s1 + $0x364] ss:$16 sps:$4 sm:$0xff]  }
  0x30   :  { %827 = vmatprep.subr.bf16.mxu0 %v1375_v49  ;;  %913 = vmatprep.subr.bf16.mxu1 %v1377_v50  ;;  %v1468_v49 = vld [vmem:[%s1952_s1 + $0x360] ss:$16 sps:$4 sm:$0xff]   ;;  %v1471_v50 = vld [vmem:[%s1952_s1 + $0x368] ss:$16 sps:$4 sm:$0xff]  }
  0x33   :  { %828 = vmatpush1.bf16.msra.mxu0 %v1379_v51  ;;  %914 = vmatpush1.bf16.msra.mxu1 %v1380_v52  ;;  %v1476_v51 = vld [vmem:[%s1952_s1 + $0x384] ss:$16 sps:$4 sm:$0xff]   ;;  %v1479_v52 = vld [vmem:[%s1952_s1 + $0x38c] ss:$16 sps:$4 sm:$0xff]  }
  0x34   :  { %829 = vmatprep.subr.bf16.mxu0 %v1381_v53  ;;  %915 = vmatprep.subr.bf16.mxu1 %v1383_v54  ;;  %v1474_v53 = vld [vmem:[%s1952_s1 + $0x380] ss:$16 sps:$4 sm:$0xff]   ;;  %v1477_v54 = vld [vmem:[%s1952_s1 + $0x388] ss:$16 sps:$4 sm:$0xff]  }
  0x37   :  { %830 = vmatpush1.bf16.msra.mxu0 %v1385_v55  ;;  %916 = vmatpush1.bf16.msra.mxu1 %v1386_v56  ;;  %v1482_v55 = vld [vmem:[%s1952_s1 + $0x3a4] ss:$16 sps:$4 sm:$0xff]   ;;  %v1485_v56 = vld [vmem:[%s1952_s1 + $0x3ac] ss:$16 sps:$4 sm:$0xff]  }
  0x38   :  { %831 = vmatprep.subr.bf16.mxu0 %v1387_v57  ;;  %917 = vmatprep.subr.bf16.mxu1 %v1389_v58  ;;  %v1480_v57 = vld [vmem:[%s1952_s1 + $0x3a0] ss:$16 sps:$4 sm:$0xff]   ;;  %v1483_v58 = vld [vmem:[%s1952_s1 + $0x3a8] ss:$16 sps:$4 sm:$0xff]  }
  0x3b   :  { %832 = vmatpush1.bf16.msra.mxu0 %v1391_v59  ;;  %918 = vmatpush1.bf16.msra.mxu1 %v1392_v60  ;;  %v1488_v59 = vld [vmem:[%s1952_s1 + $0x3c4] ss:$16 sps:$4 sm:$0xff]   ;;  %v1491_v60 = vld [vmem:[%s1952_s1 + $0x3cc] ss:$16 sps:$4 sm:$0xff]  }
  0x3c   :  { %833 = vmatprep.subr.bf16.mxu0 %v1393_v61  ;;  %919 = vmatprep.subr.bf16.mxu1 %v1395_v62  ;;  %v1486_v61 = vld [vmem:[%s1952_s1 + $0x3c0] ss:$16 sps:$4 sm:$0xff]   ;;  %v1489_v62 = vld [vmem:[%s1952_s1 + $0x3c8] ss:$16 sps:$4 sm:$0xff]  }
  0x3f   :  { %834 = vmatpush1.bf16.msra.mxu0 %v1397_v63  ;;  %920 = vmatpush1.bf16.msra.mxu1 %v1398_v0  ;;  %v1494_v63 = vld [vmem:[%s1952_s1 + $0x3e4] ss:$16 sps:$4 sm:$0xff]   ;;  %v1497_v0 = vld [vmem:[%s1952_s1 + $0x3ec] ss:$16 sps:$4 sm:$0xff]  }
  0x40   :  { %846 = vmatprep.subr.bf16.mxu0 %v1404_v1  ;;  %932 = vmatprep.subr.bf16.mxu1 %v1407_v2  ;;  %v1492_v1 = vld [vmem:[%s1952_s1 + $0x3e0] ss:$16 sps:$4 sm:$0xff]   ;;  %v1495_v2 = vld [vmem:[%s1952_s1 + $0x3e8] ss:$16 sps:$4 sm:$0xff]  }
  0x42   :  { %836 = vmatmul.mubr.bf16.vlgmr.msra.gmra.mrb[0].mxu0 %v1399_v3  ;;  %922 = vmatmul.mubr.bf16.vlgmr.msra.gmra.mrb[0].mxu1 %v1399_v3  ;;  %v1498_v3 = vld [vmem:[%s1953_s0 + $0x8] ss:$16 sps:$4 sm:$0xff]  }
  0x43   :  { %847 = vmatpush1.bf16.msra.mxu0 %v1402_v4  ;;  %933 = vmatpush1.bf16.msra.mxu1 %v1405_v5 }
  0x44   :  { %848 = vmatprep.subr.bf16.mxu0 %v1410_v6  ;;  %934 = vmatprep.subr.bf16.mxu1 %v1413_v7 }
  0x45   :  { %878 = vmatprep.mubr.bf16.mxu0 %v1500_v28  ;;  %964 = vmatprep.mubr.bf16.mxu1 %v1500_v28 }
  0x47   :  { %849 = vmatpush1.bf16.msra.mxu0 %v1408_v8  ;;  %935 = vmatpush1.bf16.msra.mxu1 %v1411_v9 }
  0x48   :  { %850 = vmatprep.subr.bf16.mxu0 %v1416_v10  ;;  %936 = vmatprep.subr.bf16.mxu1 %v1419_v11 }
  0x4b   :  { %851 = vmatpush1.bf16.msra.mxu0 %v1414_v12  ;;  %937 = vmatpush1.bf16.msra.mxu1 %v1417_v13 }
  0x4c   :  { %852 = vmatprep.subr.bf16.mxu0 %v1422_v14  ;;  %938 = vmatprep.subr.bf16.mxu1 %v1425_v15 }
  0x4f   :  { %853 = vmatpush1.bf16.msra.mxu0 %v1420_v16  ;;  %939 = vmatpush1.bf16.msra.mxu1 %v1423_v17 }
  0x50   :  { %854 = vmatprep.subr.bf16.mxu0 %v1428_v18  ;;  %940 = vmatprep.subr.bf16.mxu1 %v1431_v19 }
  0x53   :  { %855 = vmatpush1.bf16.msra.mxu0 %v1426_v20  ;;  %941 = vmatpush1.bf16.msra.mxu1 %v1429_v21 }
  0x54   :  { %856 = vmatprep.subr.bf16.mxu0 %v1434_v22  ;;  %942 = vmatprep.subr.bf16.mxu1 %v1437_v23 }
  0x57   :  { %857 = vmatpush1.bf16.msra.mxu0 %v1432_v24  ;;  %943 = vmatpush1.bf16.msra.mxu1 %v1435_v25 }
  0x58   :  { %858 = vmatprep.subr.bf16.mxu0 %v1440_v26  ;;  %944 = vmatprep.subr.bf16.mxu1 %v1443_v27 }
  0x5b   :  { %859 = vmatpush1.bf16.msra.mxu0 %v1438_v29  ;;  %945 = vmatpush1.bf16.msra.mxu1 %v1441_v30 }
  0x5c   :  { %860 = vmatprep.subr.bf16.mxu0 %v1446_v31  ;;  %946 = vmatprep.subr.bf16.mxu1 %v1449_v32 }
  0x5f   :  { %861 = vmatpush1.bf16.msra.mxu0 %v1444_v33  ;;  %947 = vmatpush1.bf16.msra.mxu1 %v1447_v34 }
  0x60   :  { %862 = vmatprep.subr.bf16.mxu0 %v1452_v35  ;;  %948 = vmatprep.subr.bf16.mxu1 %v1455_v36 }
  0x63   :  { %863 = vmatpush1.bf16.msra.mxu0 %v1450_v37  ;;  %949 = vmatpush1.bf16.msra.mxu1 %v1453_v38 }
  0x64   :  { %864 = vmatprep.subr.bf16.mxu0 %v1458_v39  ;;  %950 = vmatprep.subr.bf16.mxu1 %v1461_v40 }
  0x67   :  { %865 = vmatpush1.bf16.msra.mxu0 %v1456_v41  ;;  %951 = vmatpush1.bf16.msra.mxu1 %v1459_v42 }
  0x68   :  { %866 = vmatprep.subr.bf16.mxu0 %v1464_v43  ;;  %952 = vmatprep.subr.bf16.mxu1 %v1467_v44 }
  0x6b   :  { %867 = vmatpush1.bf16.msra.mxu0 %v1462_v45  ;;  %953 = vmatpush1.bf16.msra.mxu1 %v1465_v46 }
  0x6c   :  { %868 = vmatprep.subr.bf16.mxu0 %v1470_v47  ;;  %954 = vmatprep.subr.bf16.mxu1 %v1473_v48 }
  0x6f   :  { %869 = vmatpush1.bf16.msra.mxu0 %v1468_v49  ;;  %955 = vmatpush1.bf16.msra.mxu1 %v1471_v50 }
  0x70   :  { %870 = vmatprep.subr.bf16.mxu0 %v1476_v51  ;;  %956 = vmatprep.subr.bf16.mxu1 %v1479_v52 }
  0x73   :  { %871 = vmatpush1.bf16.msra.mxu0 %v1474_v53  ;;  %957 = vmatpush1.bf16.msra.mxu1 %v1477_v54 }
  0x74   :  { %872 = vmatprep.subr.bf16.mxu0 %v1482_v55  ;;  %958 = vmatprep.subr.bf16.mxu1 %v1485_v56 }
  0x77   :  { %873 = vmatpush1.bf16.msra.mxu0 %v1480_v57  ;;  %959 = vmatpush1.bf16.msra.mxu1 %v1483_v58 }
  0x78   :  { %874 = vmatprep.subr.bf16.mxu0 %v1488_v59  ;;  %960 = vmatprep.subr.bf16.mxu1 %v1491_v60 }
  0x7b   :  { %875 = vmatpush1.bf16.msra.mxu0 %v1486_v61  ;;  %961 = vmatpush1.bf16.msra.mxu1 %v1489_v62 }
  0x7c   :  { %876 = vmatprep.subr.bf16.mxu0 %v1494_v63  ;;  %962 = vmatprep.subr.bf16.mxu1 %v1497_v0 }
  0x7f   :  { %877 = vmatpush1.bf16.msra.mxu0 %v1492_v1  ;;  %963 = vmatpush1.bf16.msra.mxu1 %v1495_v2 }
  0x82   :  { %879 = vmatmul.mubr.bf16.vlgmr.msra.gmra.mrb[0].mxu0 %v1498_v3  ;;  %965 = vmatmul.mubr.bf16.vlgmr.msra.gmra.mrb[0].mxu1 %v1498_v3 }
 0x155   :  { %v880_v4 = vpop.f32.mrb[0].mxu0  ;;  %v966_v5 = vpop.f32.mrb[0].mxu1 }
 0x156   :  { %v1038_v6 = vmul.f32 %v880_v4, %v880_v4  ;;  %v882_v7 = vpop.f32.mrb[1].mxu0  ;;  %v968_v8 = vpop.f32.mrb[1].mxu1  ;;  %v1040_v19 = vmul.f32 %v966_v5, %v966_v5 }
 0x157   :  { %v1039_v9 = vmul.f32 %v882_v7, %v882_v7  ;;  %v1073_v10 = vadd.f32 %v882_v7, %v880_v4  ;;  %v884_v11 = vpop.f32.mrb[2].mxu0  ;;  %v1916_v12 = vpop.f32.mrb[2].mxu1  ;;  %v1041_v25 = vmul.f32 %v968_v8, %v968_v8 }
 0x158   :  { %v1042_v13 = vmul.f32 %v884_v11, %v884_v11  ;;  %v886_v14 = vpop.f32.mrb[3].mxu0  ;;  %v1918_v15 = vpop.f32.mrb[3].mxu1  ;;  %v1044_v21 = vmul.f32 %v1916_v12, %v1916_v12 }
 0x159   :  { %v1043_v16 = vmul.f32 %v886_v14, %v886_v14  ;;  %v1078_v17 = vadd.f32 %v886_v14, %v884_v11  ;;  %v1074_v18 = vadd.f32 %v1073_v10, %v966_v5  ;;  %v1091_v20 = vadd.f32 %v1039_v9, %v1038_v6 }
 0x15a   :  { %v1045_v27 = vmul.f32 %v1918_v15, %v1918_v15 }
 0x15b   :  { %v1096_v22 = vadd.f32 %v1043_v16, %v1042_v13  ;;  %v1075_v23 = vadd.f32 %v1074_v18, %v968_v8  ;;  %v1079_v24 = vadd.f32 %v1078_v17, %v1916_v12  ;;  %v1092_v26 = vadd.f32 %v1091_v20, %v1040_v19 }
 0x15d   :  { %1076 = vadd.xlane.f32.xlu0 %v1075_v23  ;;  %v1080_v28 = vadd.f32 %v1079_v24, %v1918_v15  ;;  %v1097_v29 = vadd.f32 %v1096_v22, %v1044_v21  ;;  %v1093_v30 = vadd.f32 %v1092_v26, %v1041_v25 }
 0x15f   :  { %v1098_v31 = vadd.f32 %v1097_v29, %v1045_v27  ;;  %1094 = vadd.xlane.f32.xlu1 %v1093_v30 }
 0x161   :  { %1081 = vadd.xlane.f32.xlu0 %v1080_v28 }
 0x163   :  { %1099 = vadd.xlane.f32.xlu1 %v1098_v31 }
 0x1ea   :  { %v1077_v32 = vpop.xlane.xlu0 %1076 }
 0x1eb   :  { %v1101_v33 = vmul.f32 0.001953125, %v1077_v32 }
 0x1ec   :  { %v1095_v35 = vpop.xlane.xlu1 %1094 }
 0x1ed   :  { %v1105_v34 = vmul.f32 %v1101_v33, %v1101_v33  ;;  %v1103_v36 = vmul.f32 0.001953125, %v1095_v35  ;;  %v1115_v48 = vsub.f32 0.0, %v1101_v33 }
 0x1ee   :  { %v1082_v37 = vpop.xlane.xlu0 %1081 }
 0x1ef   :  { %v1102_v38 = vmul.f32 0.001953125, %v1082_v37  ;;  %v1107_v39 = vsub.f32 %v1103_v36, %v1105_v34 }
 0x1f0   :  { %v1100_v41 = vpop.xlane.xlu1 %1099 }
 0x1f1   :  { %v1106_v40 = vmul.f32 %v1102_v38, %v1102_v38  ;;  %v1109_v42 = vmax.f32 %v1107_v39, 0.0  ;;  %v1104_v43 = vmul.f32 0.001953125, %v1100_v41  ;;  %v1116_v58 = vsub.f32 0.0, %v1102_v38 }
 0x1f3   :  { %v1111_v44 = vadd.f32 1e-05, %v1109_v42  ;;  %v1108_v45 = vsub.f32 %v1104_v43, %v1106_v40 }
 0x1f5   :  { %1501 = vrsqrt.f32 %v1111_v44  ;;  %v1110_v46 = vmax.f32 %v1108_v45, 0.0 }
 0x1f7   :  { %v1112_v47 = vadd.f32 1e-05, %v1110_v46 }
 0x1f9   :  { %1503 = vrsqrt.f32 %v1112_v47 }
 0x1ff   :  { %v1502_v49 = vpop.eup %1501 }
 0x200   :  { %v1117_v50 = vmul.f32 %v1502_v49, %v1115_v48  ;;  %v1127_v51 = vmul.f32 %v1502_v49, %v880_v4  ;;  %v1128_v52 = vmul.f32 %v1502_v49, %v882_v7  ;;  %v1129_v53 = vmul.f32 %v1502_v49, %v966_v5 }
 0x201   :  { %v1130_v54 = vmul.f32 %v1502_v49, %v968_v8 }
 0x202   :  { %v1135_v55 = vadd.f32 %v1127_v51, %v1117_v50  ;;  %v1136_v56 = vadd.f32 %v1128_v52, %v1117_v50  ;;  %v1137_v57 = vadd.f32 %v1129_v53, %v1117_v50 }
 0x203   :  { %v1504_v59 = vpop.eup %1503  ;;  %v1138_v60 = vadd.f32 %v1130_v54, %v1117_v50 }
 0x204   :  { %v1143_v61 = vmax.f32 %v1135_v55, 0.0  ;;  %v1144_v62 = vmax.f32 %v1136_v56, 0.0  ;;  %v1145_v63 = vmax.f32 %v1137_v57, 0.0  ;;  %v1118_v0 = vmul.f32 %v1504_v59, %v1116_v58 }
 0x205   :  { %v1146_v1 = vmax.f32 %v1138_v60, 0.0  ;;  %v1131_v2 = vmul.f32 %v1504_v59, %v884_v11  ;;  %v1132_v3 = vmul.f32 %v1504_v59, %v886_v14  ;;  %v1133_v6 = vmul.f32 %v1504_v59, %v1916_v12 }
 0x206   :  { %1151 = vst [vmem:[%s1954_s2] sm:$0xff] %v1143_v61  ;;  %1152 = vst [vmem:[%s1954_s2 + $0x8] sm:$0xff] %v1144_v62  ;;  %v1134_v4 = vmul.f32 %v1504_v59, %v1918_v15 }
 0x207   :  { %1153 = vst [vmem:[%s1954_s2 + $0x10] sm:$0xff] %v1145_v63  ;;  %1154 = vst [vmem:[%s1954_s2 + $0x18] sm:$0xff] %v1146_v1  ;;  %v1139_v5 = vadd.f32 %v1131_v2, %v1118_v0  ;;  %v1140_v7 = vadd.f32 %v1132_v3, %v1118_v0  ;;  %v1141_v8 = vadd.f32 %v1133_v6, %v1118_v0 }
 0x208   :  { %v1142_v9 = vadd.f32 %v1134_v4, %v1118_v0 }
 0x209   :  { %v1147_v10 = vmax.f32 %v1139_v5, 0.0  ;;  %v1148_v11 = vmax.f32 %v1140_v7, 0.0  ;;  %v1149_v12 = vmax.f32 %v1141_v8, 0.0 }
 0x20a   :  { %v1150_v13 = vmax.f32 %v1142_v9, 0.0 }
 0x20b   :  { %1155 = vst [vmem:[%s1954_s2 + $0x20] sm:$0xff] %v1147_v10  ;;  %1156 = vst [vmem:[%s1954_s2 + $0x28] sm:$0xff] %v1148_v11 }
 0x20c   :  { %1157 = vst [vmem:[%s1954_s2 + $0x30] sm:$0xff] %v1149_v12  ;;  %1158 = vst [vmem:[%s1954_s2 + $0x38] sm:$0xff] %v1150_v13 }

// kernel: costregnet_forward.13
= control target key start
LH: loop header
LB: loop body
LE: loop exit
PB: predicated region body
PF: predicated region fallthrough
CT: control target
= control target key end

     0   :  { %s866_s1 = inlined_call_operand.vmem [shape: bf16[512,128], index: 1, kind: input, shape index: {}]   ;;  %s867_s0 = inlined_call_operand.vmem [shape: bf16[32,512], index: 0, kind: input, shape index: {}]   ;;  %s868_s2 = inlined_call_operand.vmem [shape: f32[32,128], index: 2, kind: output, shape index: {}]  }
   0x1   :  { %v643_v0 = vld [vmem:[%s866_s1 + $0x40] sm:$0xff]   ;;  %v647_v4 = vld [vmem:[%s866_s1 + $0x48] sm:$0xff]   ;;  %v651_v8 = vld [vmem:[%s866_s1 + $0x50] sm:$0xff]  }
   0x2   :  { %v644_v1 = vld [vmem:[%s866_s1 + $0xc0] sm:$0xff]   ;;  %587 = vmatprep.subr.bf16.mxu0 %v643_v0  ;;  %v648_v5 = vld [vmem:[%s866_s1 + $0xc8] sm:$0xff]   ;;  %v652_v9 = vld [vmem:[%s866_s1 + $0xd0] sm:$0xff]  }
   0x3   :  { %v645_v2 = vld [vmem:[%s866_s1] sm:$0xff]   ;;  %615 = vmatprep.subr.bf16.mxu1 %v644_v1  ;;  %v649_v6 = vld [vmem:[%s866_s1 + $0x8] sm:$0xff]   ;;  %v653_v10 = vld [vmem:[%s866_s1 + $0x10] sm:$0xff]  }
   0x4   :  { %v646_v3 = vld [vmem:[%s866_s1 + $0x80] sm:$0xff]   ;;  %588 = vmatpush3.bf16.msra.mxu0 %v645_v2  ;;  %v650_v7 = vld [vmem:[%s866_s1 + $0x88] sm:$0xff]   ;;  %v654_v11 = vld [vmem:[%s866_s1 + $0x90] sm:$0xff]  }
   0x5   :  { %616 = vmatpush3.bf16.msra.mxu1 %v646_v3  ;;  %589 = vmatprep.subr.bf16.mxu0 %v647_v4  ;;  %v655_v12 = vld [vmem:[%s866_s1 + $0x58] sm:$0xff]   ;;  %v659_v16 = vld [vmem:[%s866_s1 + $0x60] sm:$0xff]   ;;  %v663_v20 = vld [vmem:[%s866_s1 + $0x68] sm:$0xff]  }
   0x6   :  { %617 = vmatprep.subr.bf16.mxu1 %v648_v5  ;;  %v656_v13 = vld [vmem:[%s866_s1 + $0xd8] sm:$0xff]   ;;  %v660_v17 = vld [vmem:[%s866_s1 + $0xe0] sm:$0xff]   ;;  %v664_v21 = vld [vmem:[%s866_s1 + $0xe8] sm:$0xff]  }
   0x7   :  { %v657_v14 = vld [vmem:[%s866_s1 + $0x18] sm:$0xff]   ;;  %v661_v18 = vld [vmem:[%s866_s1 + $0x20] sm:$0xff]   ;;  %v665_v22 = vld [vmem:[%s866_s1 + $0x28] sm:$0xff]  }
   0x8   :  { %590 = vmatpush3.bf16.msra.mxu0 %v649_v6  ;;  %v658_v15 = vld [vmem:[%s866_s1 + $0x98] sm:$0xff]   ;;  %v662_v19 = vld [vmem:[%s866_s1 + $0xa0] sm:$0xff]   ;;  %v666_v23 = vld [vmem:[%s866_s1 + $0xa8] sm:$0xff]  }
   0x9   :  { %618 = vmatpush3.bf16.msra.mxu1 %v650_v7  ;;  %591 = vmatprep.subr.bf16.mxu0 %v651_v8  ;;  %v667_v24 = vld [vmem:[%s866_s1 + $0x70] sm:$0xff]   ;;  %v671_v28 = vld [vmem:[%s866_s1 + $0x78] sm:$0xff]  }
   0xa   :  { %619 = vmatprep.subr.bf16.mxu1 %v652_v9  ;;  %v668_v25 = vld [vmem:[%s866_s1 + $0xf0] sm:$0xff]   ;;  %v672_v29 = vld [vmem:[%s866_s1 + $0xf8] sm:$0xff]  }
   0xb   :  { %v669_v26 = vld [vmem:[%s866_s1 + $0x30] sm:$0xff]   ;;  %v673_v30 = vld [vmem:[%s866_s1 + $0x38] sm:$0xff]  }
   0xc   :  { %592 = vmatpush3.bf16.msra.mxu0 %v653_v10  ;;  %v670_v27 = vld [vmem:[%s866_s1 + $0xb0] sm:$0xff]   ;;  %v674_v31 = vld [vmem:[%s866_s1 + $0xb8] sm:$0xff]  }
   0xd   :  { %620 = vmatpush3.bf16.msra.mxu1 %v654_v11  ;;  %593 = vmatprep.subr.bf16.mxu0 %v655_v12  ;;  %v675_v32 = vld [vmem:[%s867_s0] ss:$16 sps:$4 sm:$0xff]   ;;  %v677_v33 = vld [vmem:[%s867_s0 + $0x4] ss:$16 sps:$4 sm:$0xff]   ;;  %v678_v34 = vld [vmem:[%s867_s0 + $0x8] ss:$16 sps:$4 sm:$0xff]  }
   0xe   :  { %621 = vmatprep.subr.bf16.mxu1 %v656_v13  ;;  %v680_v35 = vld [vmem:[%s867_s0 + $0xc] ss:$16 sps:$4 sm:$0xff]   ;;  %348 = vmatprep.mubr.bf16.mxu0 %v677_v33  ;;  %v681_v36 = vld [vmem:[%s867_s0 + $0x24] ss:$16 sps:$4 sm:$0xff]   ;;  %v685_v38 = vld [vmem:[%s867_s0 + $0x20] ss:$16 sps:$4 sm:$0xff]  }
   0xf   :  { %397 = vmatprep.mubr.bf16.mxu1 %v680_v35  ;;  %v683_v37 = vld [vmem:[%s867_s0 + $0x2c] ss:$16 sps:$4 sm:$0xff]   ;;  %v686_v39 = vld [vmem:[%s867_s0 + $0x28] ss:$16 sps:$4 sm:$0xff]  }
  0x10   :  { %594 = vmatpush3.bf16.msra.mxu0 %v657_v14 }
  0x11   :  { %622 = vmatpush3.bf16.msra.mxu1 %v658_v15  ;;  %595 = vmatprep.subr.bf16.mxu0 %v659_v16 }
  0x12   :  { %623 = vmatprep.subr.bf16.mxu1 %v660_v17 }
  0x14   :  { %596 = vmatpush3.bf16.msra.mxu0 %v661_v18 }
  0x15   :  { %624 = vmatpush3.bf16.msra.mxu1 %v662_v19  ;;  %597 = vmatprep.subr.bf16.mxu0 %v663_v20 }
  0x16   :  { %625 = vmatprep.subr.bf16.mxu1 %v664_v21 }
  0x18   :  { %598 = vmatpush3.bf16.msra.mxu0 %v665_v22 }
  0x19   :  { %626 = vmatpush3.bf16.msra.mxu1 %v666_v23  ;;  %599 = vmatprep.subr.bf16.mxu0 %v667_v24 }
  0x1a   :  { %627 = vmatprep.subr.bf16.mxu1 %v668_v25 }
  0x1c   :  { %600 = vmatpush3.bf16.msra.mxu0 %v669_v26 }
  0x1d   :  { %628 = vmatpush3.bf16.msra.mxu1 %v670_v27  ;;  %601 = vmatprep.subr.bf16.mxu0 %v671_v28 }
  0x1e   :  { %629 = vmatprep.subr.bf16.mxu1 %v672_v29 }
  0x20   :  { %602 = vmatpush3.bf16.msra.mxu0 %v673_v30 }
  0x21   :  { %630 = vmatpush3.bf16.msra.mxu1 %v674_v31 }
  0x23   :  { %349 = vmatmul.mubr.bf16.vlgmr.msra.gmra.mrb[0].mxu0 %v675_v32 }
  0x24   :  { %398 = vmatmul.mubr.bf16.vlgmr.msra.gmra.mrb[0].mxu1 %v678_v34  ;;  %356 = vmatprep.mubr.bf16.mxu0 %v681_v36 }
  0x25   :  { %405 = vmatprep.mubr.bf16.mxu1 %v683_v37 }
  0x2b   :  { %357 = vmatmul.mubr.bf16.gmra.mrb[4].mxu0 %v685_v38 }
  0x2c   :  { %406 = vmatmul.mubr.bf16.gmra.mrb[4].mxu1 %v686_v39 }
  0xf6   :  { %v603_v40 = vpop.f32.mrb[0].mxu0 }
  0xf7   :  { %v631_v41 = vpop.f32.mrb[0].mxu1  ;;  %v604_v42 = vpop.f32.mrb[1].mxu0 }
  0xf8   :  { %v605_v43 = vadd.f32 %v604_v42, %v603_v40  ;;  %v632_v44 = vpop.f32.mrb[1].mxu1  ;;  %v606_v45 = vpop.f32.mrb[2].mxu0 }
  0xf9   :  { %v633_v46 = vadd.f32 %v632_v44, %v631_v41  ;;  %v634_v47 = vpop.f32.mrb[2].mxu1  ;;  %v607_v48 = vpop.f32.mrb[3].mxu0 }
  0xfa   :  { %v608_v49 = vadd.f32 %v607_v48, %v606_v45  ;;  %v635_v50 = vpop.f32.mrb[3].mxu1 }
  0xfb   :  { %v830_v51 = vadd.f32 %v633_v46, %v605_v43  ;;  %v636_v52 = vadd.f32 %v635_v50, %v634_v47 }
  0xfd   :  { %v832_v53 = vadd.f32 %v636_v52, %v608_v49  ;;  %467 = vadd.xlane.f32.xlu0 %v830_v51  ;;  %v448_v4 = vmul.f32 %v830_v51, %v830_v51 }
  0xfe   :  { %v609_v54 = vpop.f32.mrb[4].mxu0 }
  0xff   :  { %v637_v55 = vpop.f32.mrb[4].mxu1  ;;  %v610_v56 = vpop.f32.mrb[5].mxu0  ;;  %v449_v57 = vmul.f32 %v832_v53, %v832_v53 }
 0x100   :  { %v611_v58 = vadd.f32 %v610_v56, %v609_v54  ;;  %v638_v59 = vpop.f32.mrb[5].mxu1  ;;  %v612_v60 = vpop.f32.mrb[6].mxu0 }
 0x101   :  { %v639_v61 = vadd.f32 %v638_v59, %v637_v55  ;;  %v640_v62 = vpop.f32.mrb[6].mxu1  ;;  %481 = vadd.xlane.f32.xlu1 %v449_v57  ;;  %469 = vadd.xlane.f32.xlu0 %v832_v53  ;;  %v613_v63 = vpop.f32.mrb[7].mxu0 }
 0x102   :  { %v614_v0 = vadd.f32 %v613_v63, %v612_v60  ;;  %v641_v1 = vpop.f32.mrb[7].mxu1 }
 0x103   :  { %v838_v2 = vadd.f32 %v639_v61, %v611_v58  ;;  %v642_v3 = vadd.f32 %v641_v1, %v640_v62 }
 0x105   :  { %v842_v5 = vadd.f32 %v642_v3, %v614_v0  ;;  %471 = vadd.xlane.f32.xlu1 %v838_v2  ;;  %479 = vadd.xlane.f32.xlu0 %v448_v4  ;;  %v450_v6 = vmul.f32 %v838_v2, %v838_v2 }
 0x107   :  { %v451_v7 = vmul.f32 %v842_v5, %v842_v5 }
 0x109   :  { %473 = vadd.xlane.f32.xlu1 %v842_v5  ;;  %483 = vadd.xlane.f32.xlu0 %v450_v6 }
 0x10d   :  { %485 = vadd.xlane.f32.xlu1 %v451_v7 }
 0x18a   :  { %v468_v8 = vpop.xlane.xlu0 %467 }
 0x18b   :  { %v487_v11 = vmul.f32 0.015625, %v468_v8 }
 0x18d   :  { %v495_v17 = vmul.f32 %v487_v11, %v487_v11  ;;  %v515_v42 = vsub.f32 0.0, %v487_v11 }
 0x18e   :  { %v482_v9 = vpop.xlane.xlu1 %481  ;;  %v470_v10 = vpop.xlane.xlu0 %469 }
 0x18f   :  { %v488_v12 = vmul.f32 0.015625, %v470_v10  ;;  %v492_v13 = vmul.f32 0.015625, %v482_v9 }
 0x191   :  { %v496_v14 = vmul.f32 %v488_v12, %v488_v12  ;;  %v516_v40 = vsub.f32 0.0, %v488_v12 }
 0x192   :  { %v472_v15 = vpop.xlane.xlu1 %471  ;;  %v480_v16 = vpop.xlane.xlu0 %479 }
 0x193   :  { %v500_v18 = vsub.f32 %v492_v13, %v496_v14  ;;  %v491_v19 = vmul.f32 0.015625, %v480_v16  ;;  %v489_v20 = vmul.f32 0.015625, %v472_v15 }
 0x195   :  { %v504_v21 = vmax.f32 %v500_v18, 0.0  ;;  %v499_v22 = vsub.f32 %v491_v19, %v495_v17  ;;  %v497_v29 = vmul.f32 %v489_v20, %v489_v20  ;;  %v517_v52 = vsub.f32 0.0, %v489_v20 }
 0x196   :  { %v474_v23 = vpop.xlane.xlu1 %473  ;;  %v484_v24 = vpop.xlane.xlu0 %483 }
 0x197   :  { %v508_v25 = vadd.f32 1e-05, %v504_v21  ;;  %v503_v26 = vmax.f32 %v499_v22, 0.0  ;;  %v490_v27 = vmul.f32 0.015625, %v474_v23  ;;  %v493_v28 = vmul.f32 0.015625, %v484_v24 }
 0x199   :  { %687 = vrsqrt.f32 %v508_v25  ;;  %v507_v30 = vadd.f32 1e-05, %v503_v26  ;;  %v501_v31 = vsub.f32 %v493_v28, %v497_v29  ;;  %v498_v33 = vmul.f32 %v490_v27, %v490_v27 }
 0x19a   :  { %v486_v32 = vpop.xlane.xlu1 %485 }
 0x19b   :  { %689 = vrsqrt.f32 %v507_v30  ;;  %v494_v34 = vmul.f32 0.015625, %v486_v32  ;;  %v505_v35 = vmax.f32 %v501_v31, 0.0 }
 0x19d   :  { %v502_v36 = vsub.f32 %v494_v34, %v498_v33  ;;  %v509_v37 = vadd.f32 1e-05, %v505_v35 }
 0x19f   :  { %v506_v38 = vmax.f32 %v502_v36, 0.0  ;;  %691 = vrsqrt.f32 %v509_v37 }
 0x1a1   :  { %v510_v39 = vadd.f32 1e-05, %v506_v38 }
 0x1a3   :  { %v688_v41 = vpop.eup %687  ;;  %693 = vrsqrt.f32 %v510_v39 }
 0x1a4   :  { %v520_v43 = vmul.f32 %v688_v41, %v516_v40  ;;  %v528_v44 = vmul.f32 %v688_v41, %v832_v53  ;;  %v518_v53 = vsub.f32 0.0, %v490_v27 }
 0x1a5   :  { %v690_v45 = vpop.eup %689 }
 0x1a6   :  { %v532_v46 = vadd.f32 %v528_v44, %v520_v43  ;;  %v519_v47 = vmul.f32 %v690_v45, %v515_v42  ;;  %v527_v48 = vmul.f32 %v690_v45, %v830_v51 }
 0x1a8   :  { %v536_v49 = vmax.f32 %v532_v46, 0.0  ;;  %v531_v50 = vadd.f32 %v527_v48, %v519_v47 }
 0x1a9   :  { %v692_v54 = vpop.eup %691 }
 0x1aa   :  { %540 = vst [vmem:[%s868_s2 + $0x8] sm:$0xff] %v536_v49  ;;  %v535_v55 = vmax.f32 %v531_v50, 0.0  ;;  %v521_v56 = vmul.f32 %v692_v54, %v517_v52  ;;  %v529_v57 = vmul.f32 %v692_v54, %v838_v2 }
 0x1ac   :  { %539 = vst [vmem:[%s868_s2] sm:$0xff] %v535_v55  ;;  %v533_v59 = vadd.f32 %v529_v57, %v521_v56 }
 0x1ad   :  { %v694_v58 = vpop.eup %693 }
 0x1ae   :  { %v522_v51 = vmul.f32 %v694_v58, %v518_v53  ;;  %v530_v60 = vmul.f32 %v694_v58, %v842_v5  ;;  %v537_v61 = vmax.f32 %v533_v59, 0.0 }
 0x1b0   :  { %v534_v62 = vadd.f32 %v530_v60, %v522_v51  ;;  %541 = vst [vmem:[%s868_s2 + $0x10] sm:$0xff] %v537_v61 }
 0x1b2   :  { %v538_v63 = vmax.f32 %v534_v62, 0.0 }
 0x1b4   :  { %542 = vst [vmem:[%s868_s2 + $0x18] sm:$0xff] %v538_v63 }

// kernel: costregnet_forward.14
= control target key start
LH: loop header
LB: loop body
LE: loop exit
PB: predicated region body
PF: predicated region fallthrough
CT: control target
= control target key end

     0   :  { %s1406_s1 = inlined_call_operand.vmem [shape: bf16[896,128], index: 1, kind: input, shape index: {}]   ;;  %s1407_s0 = inlined_call_operand.vmem [shape: bf16[32,896], index: 0, kind: input, shape index: {}]   ;;  %s1408_s2 = inlined_call_operand.vmem [shape: f32[32,128], index: 2, kind: output, shape index: {}]  }
   0x1   :  { %v1061_v0 = vld [vmem:[%s1406_s1 + $0x40] sm:$0xff]   ;;  %v1065_v4 = vld [vmem:[%s1406_s1 + $0x48] sm:$0xff]   ;;  %v1069_v8 = vld [vmem:[%s1406_s1 + $0x50] sm:$0xff]  }
   0x2   :  { %v1062_v1 = vld [vmem:[%s1406_s1 + $0xc0] sm:$0xff]   ;;  %947 = vmatprep.subr.bf16.mxu0 %v1061_v0  ;;  %v1066_v5 = vld [vmem:[%s1406_s1 + $0xc8] sm:$0xff]   ;;  %v1070_v9 = vld [vmem:[%s1406_s1 + $0xd0] sm:$0xff]  }
   0x3   :  { %v1063_v2 = vld [vmem:[%s1406_s1] sm:$0xff]   ;;  %975 = vmatprep.subr.bf16.mxu1 %v1062_v1  ;;  %v1067_v6 = vld [vmem:[%s1406_s1 + $0x8] sm:$0xff]   ;;  %v1071_v10 = vld [vmem:[%s1406_s1 + $0x10] sm:$0xff]  }
   0x4   :  { %v1064_v3 = vld [vmem:[%s1406_s1 + $0x80] sm:$0xff]   ;;  %948 = vmatpush3.bf16.msra.mxu0 %v1063_v2  ;;  %v1068_v7 = vld [vmem:[%s1406_s1 + $0x88] sm:$0xff]   ;;  %v1072_v11 = vld [vmem:[%s1406_s1 + $0x90] sm:$0xff]  }
   0x5   :  { %976 = vmatpush3.bf16.msra.mxu1 %v1064_v3  ;;  %949 = vmatprep.subr.bf16.mxu0 %v1065_v4  ;;  %v1073_v12 = vld [vmem:[%s1406_s1 + $0x58] sm:$0xff]   ;;  %v1077_v16 = vld [vmem:[%s1406_s1 + $0x60] sm:$0xff]   ;;  %v1081_v20 = vld [vmem:[%s1406_s1 + $0x68] sm:$0xff]  }
   0x6   :  { %977 = vmatprep.subr.bf16.mxu1 %v1066_v5  ;;  %v1074_v13 = vld [vmem:[%s1406_s1 + $0xd8] sm:$0xff]   ;;  %v1078_v17 = vld [vmem:[%s1406_s1 + $0xe0] sm:$0xff]   ;;  %v1082_v21 = vld [vmem:[%s1406_s1 + $0xe8] sm:$0xff]  }
   0x7   :  { %v1075_v14 = vld [vmem:[%s1406_s1 + $0x18] sm:$0xff]   ;;  %v1079_v18 = vld [vmem:[%s1406_s1 + $0x20] sm:$0xff]   ;;  %v1083_v22 = vld [vmem:[%s1406_s1 + $0x28] sm:$0xff]  }
   0x8   :  { %950 = vmatpush3.bf16.msra.mxu0 %v1067_v6  ;;  %v1076_v15 = vld [vmem:[%s1406_s1 + $0x98] sm:$0xff]   ;;  %v1080_v19 = vld [vmem:[%s1406_s1 + $0xa0] sm:$0xff]   ;;  %v1084_v23 = vld [vmem:[%s1406_s1 + $0xa8] sm:$0xff]  }
   0x9   :  { %978 = vmatpush3.bf16.msra.mxu1 %v1068_v7  ;;  %951 = vmatprep.subr.bf16.mxu0 %v1069_v8  ;;  %v1085_v24 = vld [vmem:[%s1406_s1 + $0x70] sm:$0xff]   ;;  %v1089_v28 = vld [vmem:[%s1406_s1 + $0x78] sm:$0xff]   ;;  %v1095_v33 = vld [vmem:[%s1407_s0 + $0x4] ss:$28 sps:$4 sm:$0xff]  }
   0xa   :  { %979 = vmatprep.subr.bf16.mxu1 %v1070_v9  ;;  %v1086_v25 = vld [vmem:[%s1406_s1 + $0xf0] sm:$0xff]   ;;  %v1090_v29 = vld [vmem:[%s1406_s1 + $0xf8] sm:$0xff]   ;;  %v1096_v34 = vld [vmem:[%s1407_s0 + $0x8] ss:$28 sps:$4 sm:$0xff]   ;;  %580 = vmatprep.mubr.bf16.mxu0 %v1095_v33 }
   0xb   :  { %v1087_v26 = vld [vmem:[%s1406_s1 + $0x30] sm:$0xff]   ;;  %v1091_v30 = vld [vmem:[%s1406_s1 + $0x38] sm:$0xff]   ;;  %v1098_v35 = vld [vmem:[%s1407_s0 + $0xc] ss:$28 sps:$4 sm:$0xff]  }
   0xc   :  { %952 = vmatpush3.bf16.msra.mxu0 %v1071_v10  ;;  %v1088_v27 = vld [vmem:[%s1406_s1 + $0xb0] sm:$0xff]   ;;  %v1092_v31 = vld [vmem:[%s1406_s1 + $0xb8] sm:$0xff]   ;;  %v1099_v36 = vld [vmem:[%s1406_s1 + $0x140] sm:$0xff]   ;;  %629 = vmatprep.mubr.bf16.mxu1 %v1098_v35 }
   0xd   :  { %980 = vmatpush3.bf16.msra.mxu1 %v1072_v11  ;;  %953 = vmatprep.subr.bf16.mxu0 %v1073_v12  ;;  %v1093_v32 = vld [vmem:[%s1407_s0] ss:$28 sps:$4 sm:$0xff]   ;;  %v1102_v39 = vld [vmem:[%s1406_s1 + $0x148] sm:$0xff]   ;;  %v1105_v42 = vld [vmem:[%s1406_s1 + $0x150] sm:$0xff]  }
   0xe   :  { %981 = vmatprep.subr.bf16.mxu1 %v1074_v13  ;;  %v1100_v37 = vld [vmem:[%s1406_s1 + $0x100] sm:$0xff]   ;;  %v1103_v40 = vld [vmem:[%s1406_s1 + $0x108] sm:$0xff]   ;;  %v1106_v43 = vld [vmem:[%s1406_s1 + $0x110] sm:$0xff]  }
   0xf   :  { %v1101_v38 = vld [vmem:[%s1406_s1 + $0x180] sm:$0xff]   ;;  %v1104_v41 = vld [vmem:[%s1406_s1 + $0x188] sm:$0xff]   ;;  %v1107_v44 = vld [vmem:[%s1406_s1 + $0x190] sm:$0xff]  }
  0x10   :  { %954 = vmatpush3.bf16.msra.mxu0 %v1075_v14  ;;  %v1108_v45 = vld [vmem:[%s1406_s1 + $0x158] sm:$0xff]   ;;  %v1111_v48 = vld [vmem:[%s1406_s1 + $0x160] sm:$0xff]   ;;  %v1118_v53 = vld [vmem:[%s1406_s1 + $0x168] sm:$0xff]  }
  0x11   :  { %982 = vmatpush3.bf16.msra.mxu1 %v1076_v15  ;;  %955 = vmatprep.subr.bf16.mxu0 %v1077_v16  ;;  %v1109_v46 = vld [vmem:[%s1406_s1 + $0x118] sm:$0xff]   ;;  %v1112_v49 = vld [vmem:[%s1406_s1 + $0x120] sm:$0xff]   ;;  %v1121_v56 = vld [vmem:[%s1406_s1 + $0x128] sm:$0xff]  }
  0x12   :  { %983 = vmatprep.subr.bf16.mxu1 %v1078_v17  ;;  %v1110_v47 = vld [vmem:[%s1406_s1 + $0x198] sm:$0xff]   ;;  %v1113_v50 = vld [vmem:[%s1406_s1 + $0x1a0] sm:$0xff]   ;;  %v1122_v57 = vld [vmem:[%s1406_s1 + $0x1a8] sm:$0xff]  }
  0x13   :  { %v1114_v51 = vld [vmem:[%s1407_s0 + $0x3c] ss:$28 sps:$4 sm:$0xff]   ;;  %v1116_v52 = vld [vmem:[%s1407_s0 + $0x44] ss:$28 sps:$4 sm:$0xff]   ;;  %v1123_v58 = vld [vmem:[%s1406_s1 + $0x170] sm:$0xff]  }
  0x14   :  { %956 = vmatpush3.bf16.msra.mxu0 %v1079_v18  ;;  %v1119_v54 = vld [vmem:[%s1407_s0 + $0x38] ss:$28 sps:$4 sm:$0xff]   ;;  %v1120_v55 = vld [vmem:[%s1407_s0 + $0x40] ss:$28 sps:$4 sm:$0xff]   ;;  %v1129_v2 = vld [vmem:[%s1407_s0 + $0x10] ss:$28 sps:$4 sm:$0xff]  }
  0x15   :  { %984 = vmatpush3.bf16.msra.mxu1 %v1080_v19  ;;  %957 = vmatprep.subr.bf16.mxu0 %v1081_v20  ;;  %v1124_v59 = vld [vmem:[%s1406_s1 + $0x130] sm:$0xff]   ;;  %v1126_v61 = vld [vmem:[%s1406_s1 + $0x178] sm:$0xff]   ;;  %v1134_v3 = vld [vmem:[%s1407_s0 + $0x4c] ss:$28 sps:$4 sm:$0xff]  }
  0x16   :  { %985 = vmatprep.subr.bf16.mxu1 %v1082_v21  ;;  %v1125_v60 = vld [vmem:[%s1406_s1 + $0x1b0] sm:$0xff]   ;;  %v1128_v62 = vld [vmem:[%s1406_s1 + $0x1b8] sm:$0xff]   ;;  %v1136_v5 = vld [vmem:[%s1407_s0 + $0x48] ss:$28 sps:$4 sm:$0xff]  }
  0x17   :  { %v1127_v63 = vld [vmem:[%s1406_s1 + $0x138] sm:$0xff]   ;;  %v1131_v0 = vld [vmem:[%s1407_s0 + $0x14] ss:$28 sps:$4 sm:$0xff]  }
  0x18   :  { %958 = vmatpush3.bf16.msra.mxu0 %v1083_v22  ;;  %v1132_v1 = vld [vmem:[%s1407_s0 + $0x18] ss:$28 sps:$4 sm:$0xff]   ;;  %v1133_v4 = vld [vmem:[%s1407_s0 + $0x50] ss:$28 sps:$4 sm:$0xff]  }
  0x19   :  { %986 = vmatpush3.bf16.msra.mxu1 %v1084_v23  ;;  %959 = vmatprep.subr.bf16.mxu0 %v1085_v24 }
  0x1a   :  { %987 = vmatprep.subr.bf16.mxu1 %v1086_v25 }
  0x1c   :  { %960 = vmatpush3.bf16.msra.mxu0 %v1087_v26 }
  0x1d   :  { %988 = vmatpush3.bf16.msra.mxu1 %v1088_v27  ;;  %961 = vmatprep.subr.bf16.mxu0 %v1089_v28 }
  0x1e   :  { %989 = vmatprep.subr.bf16.mxu1 %v1090_v29 }
  0x20   :  { %962 = vmatpush3.bf16.msra.mxu0 %v1091_v30 }
  0x21   :  { %990 = vmatpush3.bf16.msra.mxu1 %v1092_v31  ;;  %1003 = vmatprep.subr.bf16.mxu0 %v1099_v36 }
  0x22   :  { %1041 = vmatprep.subr.bf16.mxu1 %v1101_v38 }
  0x23   :  { %581 = vmatmul.mubr.bf16.vlgmr.msra.gmra.mrb[0].mxu0 %v1093_v32 }
  0x24   :  { %630 = vmatmul.mubr.bf16.vlgmr.msra.gmra.mrb[0].mxu1 %v1096_v34  ;;  %1004 = vmatpush3.bf16.msra.mxu0 %v1100_v37 }
  0x25   :  { %1042 = vmatpush3.bf16.msra.mxu1 %v1101_v38  ;;  %1005 = vmatprep.subr.bf16.mxu0 %v1102_v39 }
  0x26   :  { %1043 = vmatprep.subr.bf16.mxu1 %v1104_v41  ;;  %588 = vmatprep.mubr.bf16.mxu0 %v1114_v51 }
  0x27   :  { %637 = vmatprep.mubr.bf16.mxu1 %v1116_v52 }
  0x28   :  { %1006 = vmatpush3.bf16.msra.mxu0 %v1103_v40 }
  0x29   :  { %1007 = vmatprep.subr.bf16.mxu0 %v1105_v42  ;;  %1044 = vmatpush3.bf16.msra.mxu1 %v1104_v41 }
  0x2a   :  { %1045 = vmatprep.subr.bf16.mxu1 %v1107_v44 }
  0x2b   :  { %589 = vmatmul.mubr.bf16.gmra.mrb[4].mxu0 %v1119_v54 }
  0x2c   :  { %1008 = vmatpush3.bf16.msra.mxu0 %v1106_v43  ;;  %638 = vmatmul.mubr.bf16.gmra.mrb[4].mxu1 %v1120_v55 }
  0x2d   :  { %1009 = vmatprep.subr.bf16.mxu0 %v1108_v45  ;;  %1046 = vmatpush3.bf16.msra.mxu1 %v1107_v44 }
  0x2e   :  { %1047 = vmatprep.subr.bf16.mxu1 %v1110_v47  ;;  %678 = vmatprep.mubr.bf16.mxu0 %v1131_v0 }
  0x2f   :  { %1057 = vmatprep.mubr.bf16.mxu1 %v1132_v1 }
  0x30   :  { %1010 = vmatpush3.bf16.msra.mxu0 %v1109_v46 }
  0x31   :  { %1011 = vmatprep.subr.bf16.mxu0 %v1111_v48  ;;  %1048 = vmatpush3.bf16.msra.mxu1 %v1110_v47 }
  0x32   :  { %1049 = vmatprep.subr.bf16.mxu1 %v1113_v50 }
  0x34   :  { %1012 = vmatpush3.bf16.msra.mxu0 %v1112_v49 }
  0x35   :  { %1013 = vmatprep.subr.bf16.mxu0 %v1118_v53  ;;  %1050 = vmatpush3.bf16.msra.mxu1 %v1113_v50 }
  0x36   :  { %1051 = vmatprep.subr.bf16.mxu1 %v1122_v57 }
  0x38   :  { %1014 = vmatpush3.bf16.msra.mxu0 %v1121_v56 }
  0x39   :  { %1015 = vmatprep.subr.bf16.mxu0 %v1123_v58  ;;  %1052 = vmatpush3.bf16.msra.mxu1 %v1122_v57 }
  0x3a   :  { %1053 = vmatprep.subr.bf16.mxu1 %v1125_v60 }
  0x3c   :  { %1016 = vmatpush3.bf16.msra.mxu0 %v1124_v59 }
  0x3d   :  { %1017 = vmatprep.subr.bf16.mxu0 %v1126_v61  ;;  %1054 = vmatpush3.bf16.msra.mxu1 %v1125_v60 }
  0x3e   :  { %1055 = vmatprep.subr.bf16.mxu1 %v1128_v62 }
  0x40   :  { %1018 = vmatpush3.bf16.msra.mxu0 %v1127_v63 }
  0x41   :  { %1056 = vmatpush3.bf16.msra.mxu1 %v1128_v62 }
  0x43   :  { %679 = vmatmul.mubr.bf16.vlgmr.msra.gmra.mrb[8].mxu0 %v1129_v2 }
  0x44   :  { %686 = vmatprep.mubr.bf16.mxu0 %v1134_v3  ;;  %1058 = vmatmul.mubr.bf16.vlgmr.msra.gmra.mrb[8].mxu1 %v1133_v4 }
  0x4b   :  { %687 = vmatmul.mubr.bf16.gmra.mrb[12].mxu0 %v1136_v5 }
  0xf6   :  { %v963_v6 = vpop.f32.mrb[0].mxu0 }
  0xf7   :  { %v991_v7 = vpop.f32.mrb[0].mxu1  ;;  %v964_v8 = vpop.f32.mrb[1].mxu0 }
  0xf8   :  { %v965_v9 = vadd.f32 %v964_v8, %v963_v6  ;;  %v992_v10 = vpop.f32.mrb[1].mxu1  ;;  %v966_v11 = vpop.f32.mrb[2].mxu0 }
  0xf9   :  { %v993_v12 = vadd.f32 %v992_v10, %v991_v7  ;;  %v994_v13 = vpop.f32.mrb[2].mxu1  ;;  %v967_v14 = vpop.f32.mrb[3].mxu0 }
  0xfa   :  { %v968_v15 = vadd.f32 %v967_v14, %v966_v11  ;;  %v995_v16 = vpop.f32.mrb[3].mxu1 }
  0xfb   :  { %v632_v17 = vadd.f32 %v993_v12, %v965_v9  ;;  %v996_v18 = vadd.f32 %v995_v16, %v994_v13 }
  0xfd   :  { %v635_v19 = vadd.f32 %v996_v18, %v968_v15 }
  0xfe   :  { %v969_v20 = vpop.f32.mrb[4].mxu0 }
  0xff   :  { %v970_v21 = vpop.f32.mrb[5].mxu0  ;;  %v997_v22 = vpop.f32.mrb[4].mxu1 }
 0x100   :  { %v971_v23 = vadd.f32 %v970_v21, %v969_v20  ;;  %v972_v24 = vpop.f32.mrb[6].mxu0  ;;  %v998_v25 = vpop.f32.mrb[5].mxu1 }
 0x101   :  { %v973_v26 = vpop.f32.mrb[7].mxu0  ;;  %v999_v27 = vadd.f32 %v998_v25, %v997_v22  ;;  %v1000_v28 = vpop.f32.mrb[6].mxu1 }
 0x102   :  { %v974_v29 = vadd.f32 %v973_v26, %v972_v24  ;;  %v1001_v30 = vpop.f32.mrb[7].mxu1 }
 0x103   :  { %v640_v31 = vadd.f32 %v999_v27, %v971_v23  ;;  %v1002_v32 = vadd.f32 %v1001_v30, %v1000_v28 }
 0x105   :  { %v643_v33 = vadd.f32 %v1002_v32, %v974_v29 }
 0x116   :  { %v1019_v34 = vpop.f32.mrb[8].mxu0 }
 0x117   :  { %v1020_v35 = vpop.f32.mrb[9].mxu0  ;;  %v1059_v37 = vpop.f32.mrb[8].mxu1 }
 0x118   :  { %v1021_v36 = vadd.f32 %v1020_v35, %v1019_v34  ;;  %v1022_v38 = vpop.f32.mrb[10].mxu0  ;;  %v729_v39 = vpop.f32.mrb[9].mxu1 }
 0x119   :  { %v1023_v40 = vpop.f32.mrb[11].mxu0  ;;  %v1060_v43 = vpop.f32.mrb[10].mxu1 }
 0x11a   :  { %v681_v41 = vadd.f32 %v1021_v36, %v632_v17  ;;  %v1024_v42 = vadd.f32 %v1023_v40, %v1022_v38  ;;  %v732_v44 = vpop.f32.mrb[11].mxu1 }
 0x11c   :  { %v1370_v45 = vadd.f32 %v729_v39, %v681_v41  ;;  %v684_v46 = vadd.f32 %v1024_v42, %v635_v19 }
 0x11e   :  { %v1372_v47 = vadd.f32 %v732_v44, %v684_v46  ;;  %v1025_v48 = vpop.f32.mrb[12].mxu0  ;;  %797 = vadd.xlane.f32.xlu0 %v1370_v45  ;;  %v778_v58 = vmul.f32 %v1370_v45, %v1370_v45 }
 0x11f   :  { %v1026_v49 = vpop.f32.mrb[13].mxu0 }
 0x120   :  { %v1027_v50 = vadd.f32 %v1026_v49, %v1025_v48  ;;  %v1028_v51 = vpop.f32.mrb[14].mxu0  ;;  %v779_v52 = vmul.f32 %v1372_v47, %v1372_v47 }
 0x121   :  { %v1029_v53 = vpop.f32.mrb[15].mxu0 }
 0x122   :  { %v689_v54 = vadd.f32 %v1027_v50, %v640_v31  ;;  %v1030_v55 = vadd.f32 %v1029_v53, %v1028_v51  ;;  %811 = vadd.xlane.f32.xlu1 %v779_v52  ;;  %799 = vadd.xlane.f32.xlu0 %v1372_v47 }
 0x124   :  { %v692_v56 = vadd.f32 %v1030_v55, %v643_v33  ;;  %v1378_v57 = vadd.f32 %v1059_v37, %v689_v54 }
 0x126   :  { %801 = vadd.xlane.f32.xlu1 %v1378_v57  ;;  %809 = vadd.xlane.f32.xlu0 %v778_v58  ;;  %v1383_v59 = vadd.f32 %v1060_v43, %v692_v56  ;;  %v780_v60 = vmul.f32 %v1378_v57, %v1378_v57 }
 0x128   :  { %v781_v61 = vmul.f32 %v1383_v59, %v1383_v59 }
 0x12a   :  { %803 = vadd.xlane.f32.xlu1 %v1383_v59  ;;  %813 = vadd.xlane.f32.xlu0 %v780_v60 }
 0x12e   :  { %815 = vadd.xlane.f32.xlu1 %v781_v61 }
 0x1ab   :  { %v798_v62 = vpop.xlane.xlu0 %797 }
 0x1ac   :  { %v817_v1 = vmul.f32 0.015625, %v798_v62 }
 0x1ae   :  { %v825_v7 = vmul.f32 %v817_v1, %v817_v1  ;;  %v845_v32 = vsub.f32 0.0, %v817_v1 }
 0x1af   :  { %v812_v63 = vpop.xlane.xlu1 %811  ;;  %v800_v0 = vpop.xlane.xlu0 %799 }
 0x1b0   :  { %v818_v2 = vmul.f32 0.015625, %v800_v0  ;;  %v822_v3 = vmul.f32 0.015625, %v812_v63 }
 0x1b2   :  { %v826_v4 = vmul.f32 %v818_v2, %v818_v2  ;;  %v846_v30 = vsub.f32 0.0, %v818_v2 }
 0x1b3   :  { %v802_v5 = vpop.xlane.xlu1 %801  ;;  %v810_v6 = vpop.xlane.xlu0 %809 }
 0x1b4   :  { %v830_v8 = vsub.f32 %v822_v3, %v826_v4  ;;  %v821_v9 = vmul.f32 0.015625, %v810_v6  ;;  %v819_v10 = vmul.f32 0.015625, %v802_v5 }
 0x1b6   :  { %v834_v11 = vmax.f32 %v830_v8, 0.0  ;;  %v829_v12 = vsub.f32 %v821_v9, %v825_v7  ;;  %v827_v19 = vmul.f32 %v819_v10, %v819_v10  ;;  %v847_v41 = vsub.f32 0.0, %v819_v10 }
 0x1b7   :  { %v804_v13 = vpop.xlane.xlu1 %803  ;;  %v814_v14 = vpop.xlane.xlu0 %813 }
 0x1b8   :  { %v838_v15 = vadd.f32 1e-05, %v834_v11  ;;  %v833_v16 = vmax.f32 %v829_v12, 0.0  ;;  %v820_v17 = vmul.f32 0.015625, %v804_v13  ;;  %v823_v18 = vmul.f32 0.015625, %v814_v14 }
 0x1ba   :  { %1137 = vrsqrt.f32 %v838_v15  ;;  %v837_v20 = vadd.f32 1e-05, %v833_v16  ;;  %v831_v21 = vsub.f32 %v823_v18, %v827_v19  ;;  %v828_v23 = vmul.f32 %v820_v17, %v820_v17 }
 0x1bb   :  { %v816_v22 = vpop.xlane.xlu1 %815 }
 0x1bc   :  { %1139 = vrsqrt.f32 %v837_v20  ;;  %v824_v24 = vmul.f32 0.015625, %v816_v22  ;;  %v835_v25 = vmax.f32 %v831_v21, 0.0 }
 0x1be   :  { %v832_v26 = vsub.f32 %v824_v24, %v828_v23  ;;  %v839_v27 = vadd.f32 1e-05, %v835_v25 }
 0x1c0   :  { %v836_v28 = vmax.f32 %v832_v26, 0.0  ;;  %1141 = vrsqrt.f32 %v839_v27 }
 0x1c2   :  { %v840_v29 = vadd.f32 1e-05, %v836_v28 }
 0x1c4   :  { %v1138_v31 = vpop.eup %1137  ;;  %1143 = vrsqrt.f32 %v840_v29 }
 0x1c5   :  { %v850_v33 = vmul.f32 %v1138_v31, %v846_v30  ;;  %v858_v34 = vmul.f32 %v1138_v31, %v1372_v47  ;;  %v848_v47 = vsub.f32 0.0, %v820_v17 }
 0x1c6   :  { %v1140_v35 = vpop.eup %1139 }
 0x1c7   :  { %v862_v36 = vadd.f32 %v858_v34, %v850_v33  ;;  %v849_v37 = vmul.f32 %v1140_v35, %v845_v32  ;;  %v857_v38 = vmul.f32 %v1140_v35, %v1370_v45 }
 0x1c9   :  { %v866_v39 = vmax.f32 %v862_v36, 0.0  ;;  %v861_v40 = vadd.f32 %v857_v38, %v849_v37 }
 0x1ca   :  { %v1142_v42 = vpop.eup %1141 }
 0x1cb   :  { %870 = vst [vmem:[%s1408_s2 + $0x8] sm:$0xff] %v866_v39  ;;  %v865_v43 = vmax.f32 %v861_v40, 0.0  ;;  %v851_v44 = vmul.f32 %v1142_v42, %v847_v41  ;;  %v859_v46 = vmul.f32 %v1142_v42, %v1378_v57 }
 0x1cd   :  { %869 = vst [vmem:[%s1408_s2] sm:$0xff] %v865_v43  ;;  %v863_v49 = vadd.f32 %v859_v46, %v851_v44 }
 0x1ce   :  { %v1144_v48 = vpop.eup %1143 }
 0x1cf   :  { %v852_v45 = vmul.f32 %v1144_v48, %v848_v47  ;;  %v860_v50 = vmul.f32 %v1144_v48, %v1383_v59  ;;  %v867_v51 = vmax.f32 %v863_v49, 0.0 }
 0x1d1   :  { %v864_v52 = vadd.f32 %v860_v50, %v852_v45  ;;  %871 = vst [vmem:[%s1408_s2 + $0x10] sm:$0xff] %v867_v51 }
 0x1d3   :  { %v868_v53 = vmax.f32 %v864_v52, 0.0 }
 0x1d5   :  { %872 = vst [vmem:[%s1408_s2 + $0x18] sm:$0xff] %v868_v53 }

// kernel: costregnet_forward.15
= control target key start
LH: loop header
LB: loop body
LE: loop exit
PB: predicated region body
PF: predicated region fallthrough
CT: control target
= control target key end

     0   :  { %s3343_s1 = inlined_call_operand.vmem [shape: bf16[896,512], index: 1, kind: input, shape index: {}]   ;;  %s3344_s0 = inlined_call_operand.vmem [shape: bf16[16,896], index: 0, kind: input, shape index: {}]   ;;  %s3345_s2 = inlined_call_operand.vmem [shape: f32[16,512], index: 2, kind: input, shape index: {}]   ;;  %s3346_s3 = inlined_call_operand.vmem [shape: f32[16,512], index: 3, kind: output, shape index: {}]  }
   0x1   :  { %v2207_v0 = vld [vmem:[%s3343_s1 + $0x4] ss:$16 sps:$4 sm:$0xff]   ;;  %v2209_v1 = vld [vmem:[%s3343_s1 + $0xc] ss:$16 sps:$4 sm:$0xff]   ;;  %v2211_v2 = vld [vmem:[%s3343_s1] ss:$16 sps:$4 sm:$0xff]  }
   0x2   :  { %1403 = vmatprep.subr.bf16.mxu0 %v2207_v0  ;;  %v2212_v3 = vld [vmem:[%s3343_s1 + $0x8] ss:$16 sps:$4 sm:$0xff]   ;;  %1575 = vmatprep.subr.bf16.mxu1 %v2209_v1  ;;  %v2213_v4 = vld [vmem:[%s3343_s1 + $0x24] ss:$16 sps:$4 sm:$0xff]   ;;  %v2215_v5 = vld [vmem:[%s3343_s1 + $0x2c] ss:$16 sps:$4 sm:$0xff]  }
   0x3   :  { %1404 = vmatpush1.bf16.msra.mxu0 %v2211_v2  ;;  %1576 = vmatpush1.bf16.msra.mxu1 %v2212_v3  ;;  %v2217_v6 = vld [vmem:[%s3343_s1 + $0x20] ss:$16 sps:$4 sm:$0xff]   ;;  %v2218_v7 = vld [vmem:[%s3343_s1 + $0x28] ss:$16 sps:$4 sm:$0xff]   ;;  %v2219_v8 = vld [vmem:[%s3343_s1 + $0x44] ss:$16 sps:$4 sm:$0xff]  }
   0x4   :  { %1405 = vmatprep.subr.bf16.mxu0 %v2213_v4  ;;  %1577 = vmatprep.subr.bf16.mxu1 %v2215_v5  ;;  %v2221_v9 = vld [vmem:[%s3343_s1 + $0x4c] ss:$16 sps:$4 sm:$0xff]   ;;  %v2223_v10 = vld [vmem:[%s3343_s1 + $0x40] ss:$16 sps:$4 sm:$0xff]   ;;  %v2224_v11 = vld [vmem:[%s3343_s1 + $0x48] ss:$16 sps:$4 sm:$0xff]  }
   0x5   :  { %v2225_v12 = vld [vmem:[%s3343_s1 + $0x64] ss:$16 sps:$4 sm:$0xff]   ;;  %v2227_v13 = vld [vmem:[%s3343_s1 + $0x6c] ss:$16 sps:$4 sm:$0xff]   ;;  %v2229_v14 = vld [vmem:[%s3343_s1 + $0x60] ss:$16 sps:$4 sm:$0xff]  }
   0x6   :  { %v2230_v15 = vld [vmem:[%s3343_s1 + $0x68] ss:$16 sps:$4 sm:$0xff]   ;;  %v2231_v16 = vld [vmem:[%s3343_s1 + $0x84] ss:$16 sps:$4 sm:$0xff]   ;;  %v2233_v17 = vld [vmem:[%s3343_s1 + $0x8c] ss:$16 sps:$4 sm:$0xff]  }
   0x7   :  { %1406 = vmatpush1.bf16.msra.mxu0 %v2217_v6  ;;  %1578 = vmatpush1.bf16.msra.mxu1 %v2218_v7  ;;  %v2235_v18 = vld [vmem:[%s3343_s1 + $0x80] ss:$16 sps:$4 sm:$0xff]   ;;  %v2236_v19 = vld [vmem:[%s3343_s1 + $0x88] ss:$16 sps:$4 sm:$0xff]   ;;  %v2237_v20 = vld [vmem:[%s3343_s1 + $0xa4] ss:$16 sps:$4 sm:$0xff]  }
   0x8   :  { %1407 = vmatprep.subr.bf16.mxu0 %v2219_v8  ;;  %1579 = vmatprep.subr.bf16.mxu1 %v2221_v9  ;;  %v2239_v21 = vld [vmem:[%s3343_s1 + $0xac] ss:$16 sps:$4 sm:$0xff]   ;;  %v2241_v22 = vld [vmem:[%s3343_s1 + $0xa0] ss:$16 sps:$4 sm:$0xff]   ;;  %v2242_v23 = vld [vmem:[%s3343_s1 + $0xa8] ss:$16 sps:$4 sm:$0xff]  }
   0x9   :  { %v2243_v24 = vld [vmem:[%s3343_s1 + $0xc4] ss:$16 sps:$4 sm:$0xff]   ;;  %v2245_v25 = vld [vmem:[%s3343_s1 + $0xcc] ss:$16 sps:$4 sm:$0xff]   ;;  %v2247_v26 = vld [vmem:[%s3343_s1 + $0xc0] ss:$16 sps:$4 sm:$0xff]  }
   0xa   :  { %v2248_v27 = vld [vmem:[%s3343_s1 + $0xc8] ss:$16 sps:$4 sm:$0xff]   ;;  %v2249_v28 = vld [vmem:[%s3343_s1 + $0xe4] ss:$16 sps:$4 sm:$0xff]   ;;  %v2251_v29 = vld [vmem:[%s3343_s1 + $0xec] ss:$16 sps:$4 sm:$0xff]  }
   0xb   :  { %1408 = vmatpush1.bf16.msra.mxu0 %v2223_v10  ;;  %1580 = vmatpush1.bf16.msra.mxu1 %v2224_v11  ;;  %v2253_v30 = vld [vmem:[%s3343_s1 + $0xe0] ss:$16 sps:$4 sm:$0xff]   ;;  %v2254_v31 = vld [vmem:[%s3343_s1 + $0xe8] ss:$16 sps:$4 sm:$0xff]   ;;  %v2255_v32 = vld [vmem:[%s3343_s1 + $0x104] ss:$16 sps:$4 sm:$0xff]  }
   0xc   :  { %1409 = vmatprep.subr.bf16.mxu0 %v2225_v12  ;;  %1581 = vmatprep.subr.bf16.mxu1 %v2227_v13  ;;  %v2257_v33 = vld [vmem:[%s3343_s1 + $0x10c] ss:$16 sps:$4 sm:$0xff]   ;;  %v2259_v34 = vld [vmem:[%s3343_s1 + $0x100] ss:$16 sps:$4 sm:$0xff]   ;;  %v2260_v35 = vld [vmem:[%s3343_s1 + $0x108] ss:$16 sps:$4 sm:$0xff]  }
   0xd   :  { %v2261_v36 = vld [vmem:[%s3343_s1 + $0x124] ss:$16 sps:$4 sm:$0xff]   ;;  %v2263_v37 = vld [vmem:[%s3343_s1 + $0x12c] ss:$16 sps:$4 sm:$0xff]   ;;  %v2265_v38 = vld [vmem:[%s3343_s1 + $0x120] ss:$16 sps:$4 sm:$0xff]  }
   0xe   :  { %v2266_v39 = vld [vmem:[%s3343_s1 + $0x128] ss:$16 sps:$4 sm:$0xff]   ;;  %v2267_v40 = vld [vmem:[%s3343_s1 + $0x144] ss:$16 sps:$4 sm:$0xff]   ;;  %v2269_v41 = vld [vmem:[%s3343_s1 + $0x14c] ss:$16 sps:$4 sm:$0xff]  }
   0xf   :  { %1410 = vmatpush1.bf16.msra.mxu0 %v2229_v14  ;;  %1582 = vmatpush1.bf16.msra.mxu1 %v2230_v15  ;;  %v2271_v42 = vld [vmem:[%s3343_s1 + $0x140] ss:$16 sps:$4 sm:$0xff]   ;;  %v2272_v43 = vld [vmem:[%s3343_s1 + $0x148] ss:$16 sps:$4 sm:$0xff]   ;;  %v2273_v44 = vld [vmem:[%s3343_s1 + $0x164] ss:$16 sps:$4 sm:$0xff]  }
  0x10   :  { %1411 = vmatprep.subr.bf16.mxu0 %v2231_v16  ;;  %1583 = vmatprep.subr.bf16.mxu1 %v2233_v17  ;;  %v2275_v45 = vld [vmem:[%s3343_s1 + $0x16c] ss:$16 sps:$4 sm:$0xff]   ;;  %v2277_v46 = vld [vmem:[%s3343_s1 + $0x160] ss:$16 sps:$4 sm:$0xff]   ;;  %v2278_v47 = vld [vmem:[%s3343_s1 + $0x168] ss:$16 sps:$4 sm:$0xff]  }
  0x11   :  { %v2305_v48 = vld [vmem:[%s3344_s0 + $0x4] ss:$28 sps:$4 sm:$0xff]   ;;  %v2281_v50 = vld [vmem:[%s3343_s1 + $0x18c] ss:$16 sps:$4 sm:$0xff]   ;;  %v2284_v52 = vld [vmem:[%s3343_s1 + $0x188] ss:$16 sps:$4 sm:$0xff]  }
  0x12   :  { %v2279_v49 = vld [vmem:[%s3343_s1 + $0x184] ss:$16 sps:$4 sm:$0xff]   ;;  %1435 = vmatprep.mubr.bf16.mxu0 %v2305_v48  ;;  %1607 = vmatprep.mubr.bf16.mxu1 %v2305_v48  ;;  %v2283_v51 = vld [vmem:[%s3343_s1 + $0x180] ss:$16 sps:$4 sm:$0xff]   ;;  %v2287_v54 = vld [vmem:[%s3343_s1 + $0x1ac] ss:$16 sps:$4 sm:$0xff]  }
  0x13   :  { %1412 = vmatpush1.bf16.msra.mxu0 %v2235_v18  ;;  %1584 = vmatpush1.bf16.msra.mxu1 %v2236_v19  ;;  %v2285_v53 = vld [vmem:[%s3343_s1 + $0x1a4] ss:$16 sps:$4 sm:$0xff]   ;;  %v2289_v55 = vld [vmem:[%s3343_s1 + $0x1a0] ss:$16 sps:$4 sm:$0xff]   ;;  %v2290_v56 = vld [vmem:[%s3343_s1 + $0x1a8] ss:$16 sps:$4 sm:$0xff]  }
  0x14   :  { %1413 = vmatprep.subr.bf16.mxu0 %v2237_v20  ;;  %1585 = vmatprep.subr.bf16.mxu1 %v2239_v21  ;;  %v2291_v57 = vld [vmem:[%s3343_s1 + $0x1c4] ss:$16 sps:$4 sm:$0xff]   ;;  %v2293_v58 = vld [vmem:[%s3343_s1 + $0x1cc] ss:$16 sps:$4 sm:$0xff]   ;;  %v2295_v59 = vld [vmem:[%s3343_s1 + $0x1c0] ss:$16 sps:$4 sm:$0xff]  }
  0x15   :  { %v2296_v60 = vld [vmem:[%s3343_s1 + $0x1c8] ss:$16 sps:$4 sm:$0xff]   ;;  %v2297_v61 = vld [vmem:[%s3343_s1 + $0x1e4] ss:$16 sps:$4 sm:$0xff]   ;;  %v2299_v62 = vld [vmem:[%s3343_s1 + $0x1ec] ss:$16 sps:$4 sm:$0xff]  }
  0x16   :  { %v2301_v63 = vld [vmem:[%s3343_s1 + $0x1e0] ss:$16 sps:$4 sm:$0xff]   ;;  %v2302_v0 = vld [vmem:[%s3343_s1 + $0x1e8] ss:$16 sps:$4 sm:$0xff]   ;;  %v2308_v1 = vld [vmem:[%s3343_s1 + $0x204] ss:$16 sps:$4 sm:$0xff]  }
  0x17   :  { %1414 = vmatpush1.bf16.msra.mxu0 %v2241_v22  ;;  %1586 = vmatpush1.bf16.msra.mxu1 %v2242_v23  ;;  %v2311_v2 = vld [vmem:[%s3343_s1 + $0x20c] ss:$16 sps:$4 sm:$0xff]   ;;  %v2306_v4 = vld [vmem:[%s3343_s1 + $0x200] ss:$16 sps:$4 sm:$0xff]   ;;  %v2309_v5 = vld [vmem:[%s3343_s1 + $0x208] ss:$16 sps:$4 sm:$0xff]  }
  0x18   :  { %1415 = vmatprep.subr.bf16.mxu0 %v2243_v24  ;;  %1587 = vmatprep.subr.bf16.mxu1 %v2245_v25  ;;  %v2303_v3 = vld [vmem:[%s3344_s0] ss:$28 sps:$4 sm:$0xff]   ;;  %v2314_v6 = vld [vmem:[%s3343_s1 + $0x224] ss:$16 sps:$4 sm:$0xff]   ;;  %v2315_v9 = vld [vmem:[%s3343_s1 + $0x228] ss:$16 sps:$4 sm:$0xff]  }
  0x19   :  { %v2317_v7 = vld [vmem:[%s3343_s1 + $0x22c] ss:$16 sps:$4 sm:$0xff]   ;;  %v2312_v8 = vld [vmem:[%s3343_s1 + $0x220] ss:$16 sps:$4 sm:$0xff]   ;;  %v2320_v10 = vld [vmem:[%s3343_s1 + $0x244] ss:$16 sps:$4 sm:$0xff]  }
  0x1a   :  { %v2323_v11 = vld [vmem:[%s3343_s1 + $0x24c] ss:$16 sps:$4 sm:$0xff]   ;;  %v2318_v12 = vld [vmem:[%s3343_s1 + $0x240] ss:$16 sps:$4 sm:$0xff]   ;;  %v2321_v13 = vld [vmem:[%s3343_s1 + $0x248] ss:$16 sps:$4 sm:$0xff]  }
  0x1b   :  { %1416 = vmatpush1.bf16.msra.mxu0 %v2247_v26  ;;  %1588 = vmatpush1.bf16.msra.mxu1 %v2248_v27  ;;  %v2326_v14 = vld [vmem:[%s3343_s1 + $0x264] ss:$16 sps:$4 sm:$0xff]   ;;  %v2329_v15 = vld [vmem:[%s3343_s1 + $0x26c] ss:$16 sps:$4 sm:$0xff]   ;;  %v2324_v16 = vld [vmem:[%s3343_s1 + $0x260] ss:$16 sps:$4 sm:$0xff]  }
  0x1c   :  { %1417 = vmatprep.subr.bf16.mxu0 %v2249_v28  ;;  %1589 = vmatprep.subr.bf16.mxu1 %v2251_v29  ;;  %v2327_v17 = vld [vmem:[%s3343_s1 + $0x268] ss:$16 sps:$4 sm:$0xff]   ;;  %v2332_v18 = vld [vmem:[%s3343_s1 + $0x284] ss:$16 sps:$4 sm:$0xff]   ;;  %v2335_v19 = vld [vmem:[%s3343_s1 + $0x28c] ss:$16 sps:$4 sm:$0xff]  }
  0x1d   :  { %v2330_v20 = vld [vmem:[%s3343_s1 + $0x280] ss:$16 sps:$4 sm:$0xff]   ;;  %v2333_v21 = vld [vmem:[%s3343_s1 + $0x288] ss:$16 sps:$4 sm:$0xff]   ;;  %v2338_v22 = vld [vmem:[%s3343_s1 + $0x2a4] ss:$16 sps:$4 sm:$0xff]  }
  0x1e   :  { %v2341_v23 = vld [vmem:[%s3343_s1 + $0x2ac] ss:$16 sps:$4 sm:$0xff]   ;;  %v2336_v24 = vld [vmem:[%s3343_s1 + $0x2a0] ss:$16 sps:$4 sm:$0xff]   ;;  %v2339_v25 = vld [vmem:[%s3343_s1 + $0x2a8] ss:$16 sps:$4 sm:$0xff]  }
  0x1f   :  { %1418 = vmatpush1.bf16.msra.mxu0 %v2253_v30  ;;  %1590 = vmatpush1.bf16.msra.mxu1 %v2254_v31  ;;  %v2344_v26 = vld [vmem:[%s3343_s1 + $0x2c4] ss:$16 sps:$4 sm:$0xff]   ;;  %v2347_v27 = vld [vmem:[%s3343_s1 + $0x2cc] ss:$16 sps:$4 sm:$0xff]   ;;  %v2342_v28 = vld [vmem:[%s3343_s1 + $0x2c0] ss:$16 sps:$4 sm:$0xff]  }
  0x20   :  { %1419 = vmatprep.subr.bf16.mxu0 %v2255_v32  ;;  %1591 = vmatprep.subr.bf16.mxu1 %v2257_v33  ;;  %v2345_v29 = vld [vmem:[%s3343_s1 + $0x2c8] ss:$16 sps:$4 sm:$0xff]   ;;  %v2350_v31 = vld [vmem:[%s3343_s1 + $0x2e4] ss:$16 sps:$4 sm:$0xff]   ;;  %v2353_v32 = vld [vmem:[%s3343_s1 + $0x2ec] ss:$16 sps:$4 sm:$0xff]  }
  0x21   :  { %v2404_v30 = vld [vmem:[%s3344_s0 + $0xc] ss:$28 sps:$4 sm:$0xff]   ;;  %v2348_v33 = vld [vmem:[%s3343_s1 + $0x2e0] ss:$16 sps:$4 sm:$0xff]  }
  0x22   :  { %v2377_v48 = vld [vmem:[%s3343_s1 + $0x36c] ss:$16 sps:$4 sm:$0xff]  }
  0x23   :  { %1420 = vmatpush1.bf16.msra.mxu0 %v2259_v34  ;;  %1592 = vmatpush1.bf16.msra.mxu1 %v2260_v35  ;;  %v2351_v34 = vld [vmem:[%s3343_s1 + $0x2e8] ss:$16 sps:$4 sm:$0xff]   ;;  %v2356_v35 = vld [vmem:[%s3343_s1 + $0x304] ss:$16 sps:$4 sm:$0xff]  }
  0x24   :  { %1421 = vmatprep.subr.bf16.mxu0 %v2261_v36  ;;  %1593 = vmatprep.subr.bf16.mxu1 %v2263_v37  ;;  %v2359_v36 = vld [vmem:[%s3343_s1 + $0x30c] ss:$16 sps:$4 sm:$0xff]   ;;  %v2354_v37 = vld [vmem:[%s3343_s1 + $0x300] ss:$16 sps:$4 sm:$0xff]  }
  0x27   :  { %1422 = vmatpush1.bf16.msra.mxu0 %v2265_v38  ;;  %1594 = vmatpush1.bf16.msra.mxu1 %v2266_v39  ;;  %v2357_v38 = vld [vmem:[%s3343_s1 + $0x308] ss:$16 sps:$4 sm:$0xff]   ;;  %v2362_v39 = vld [vmem:[%s3343_s1 + $0x324] ss:$16 sps:$4 sm:$0xff]  }
  0x28   :  { %1423 = vmatprep.subr.bf16.mxu0 %v2267_v40  ;;  %1595 = vmatprep.subr.bf16.mxu1 %v2269_v41  ;;  %v2365_v40 = vld [vmem:[%s3343_s1 + $0x32c] ss:$16 sps:$4 sm:$0xff]   ;;  %v2360_v41 = vld [vmem:[%s3343_s1 + $0x320] ss:$16 sps:$4 sm:$0xff]  }
  0x2b   :  { %1424 = vmatpush1.bf16.msra.mxu0 %v2271_v42  ;;  %1596 = vmatpush1.bf16.msra.mxu1 %v2272_v43  ;;  %v2363_v42 = vld [vmem:[%s3343_s1 + $0x328] ss:$16 sps:$4 sm:$0xff]   ;;  %v2368_v43 = vld [vmem:[%s3343_s1 + $0x344] ss:$16 sps:$4 sm:$0xff]  }
  0x2c   :  { %1425 = vmatprep.subr.bf16.mxu0 %v2273_v44  ;;  %1597 = vmatprep.subr.bf16.mxu1 %v2275_v45  ;;  %v2371_v44 = vld [vmem:[%s3343_s1 + $0x34c] ss:$16 sps:$4 sm:$0xff]   ;;  %v2366_v45 = vld [vmem:[%s3343_s1 + $0x340] ss:$16 sps:$4 sm:$0xff]  }
  0x2f   :  { %1426 = vmatpush1.bf16.msra.mxu0 %v2277_v46  ;;  %1598 = vmatpush1.bf16.msra.mxu1 %v2278_v47  ;;  %v2369_v46 = vld [vmem:[%s3343_s1 + $0x348] ss:$16 sps:$4 sm:$0xff]   ;;  %v2374_v47 = vld [vmem:[%s3343_s1 + $0x364] ss:$16 sps:$4 sm:$0xff]  }
  0x30   :  { %1427 = vmatprep.subr.bf16.mxu0 %v2279_v49  ;;  %1599 = vmatprep.subr.bf16.mxu1 %v2281_v50  ;;  %v2372_v49 = vld [vmem:[%s3343_s1 + $0x360] ss:$16 sps:$4 sm:$0xff]   ;;  %v2375_v50 = vld [vmem:[%s3343_s1 + $0x368] ss:$16 sps:$4 sm:$0xff]  }
  0x33   :  { %1428 = vmatpush1.bf16.msra.mxu0 %v2283_v51  ;;  %1600 = vmatpush1.bf16.msra.mxu1 %v2284_v52  ;;  %v2380_v51 = vld [vmem:[%s3343_s1 + $0x384] ss:$16 sps:$4 sm:$0xff]   ;;  %v2383_v52 = vld [vmem:[%s3343_s1 + $0x38c] ss:$16 sps:$4 sm:$0xff]  }
  0x34   :  { %1429 = vmatprep.subr.bf16.mxu0 %v2285_v53  ;;  %1601 = vmatprep.subr.bf16.mxu1 %v2287_v54  ;;  %v2378_v53 = vld [vmem:[%s3343_s1 + $0x380] ss:$16 sps:$4 sm:$0xff]   ;;  %v2381_v54 = vld [vmem:[%s3343_s1 + $0x388] ss:$16 sps:$4 sm:$0xff]  }
  0x37   :  { %1430 = vmatpush1.bf16.msra.mxu0 %v2289_v55  ;;  %1602 = vmatpush1.bf16.msra.mxu1 %v2290_v56  ;;  %v2386_v55 = vld [vmem:[%s3343_s1 + $0x3a4] ss:$16 sps:$4 sm:$0xff]   ;;  %v2389_v56 = vld [vmem:[%s3343_s1 + $0x3ac] ss:$16 sps:$4 sm:$0xff]  }
  0x38   :  { %1431 = vmatprep.subr.bf16.mxu0 %v2291_v57  ;;  %1603 = vmatprep.subr.bf16.mxu1 %v2293_v58  ;;  %v2384_v57 = vld [vmem:[%s3343_s1 + $0x3a0] ss:$16 sps:$4 sm:$0xff]   ;;  %v2387_v58 = vld [vmem:[%s3343_s1 + $0x3a8] ss:$16 sps:$4 sm:$0xff]  }
  0x3b   :  { %1432 = vmatpush1.bf16.msra.mxu0 %v2295_v59  ;;  %1604 = vmatpush1.bf16.msra.mxu1 %v2296_v60  ;;  %v2392_v59 = vld [vmem:[%s3343_s1 + $0x3c4] ss:$16 sps:$4 sm:$0xff]   ;;  %v2395_v60 = vld [vmem:[%s3343_s1 + $0x3cc] ss:$16 sps:$4 sm:$0xff]  }
  0x3c   :  { %1433 = vmatprep.subr.bf16.mxu0 %v2297_v61  ;;  %1605 = vmatprep.subr.bf16.mxu1 %v2299_v62  ;;  %v2390_v61 = vld [vmem:[%s3343_s1 + $0x3c0] ss:$16 sps:$4 sm:$0xff]   ;;  %v2393_v62 = vld [vmem:[%s3343_s1 + $0x3c8] ss:$16 sps:$4 sm:$0xff]  }
  0x3f   :  { %1434 = vmatpush1.bf16.msra.mxu0 %v2301_v63  ;;  %1606 = vmatpush1.bf16.msra.mxu1 %v2302_v0  ;;  %v2398_v63 = vld [vmem:[%s3343_s1 + $0x3e4] ss:$16 sps:$4 sm:$0xff]   ;;  %v2401_v0 = vld [vmem:[%s3343_s1 + $0x3ec] ss:$16 sps:$4 sm:$0xff]  }
  0x40   :  { %1446 = vmatprep.subr.bf16.mxu0 %v2308_v1  ;;  %1618 = vmatprep.subr.bf16.mxu1 %v2311_v2  ;;  %v2396_v1 = vld [vmem:[%s3343_s1 + $0x3e0] ss:$16 sps:$4 sm:$0xff]   ;;  %v2399_v2 = vld [vmem:[%s3343_s1 + $0x3e8] ss:$16 sps:$4 sm:$0xff]  }
  0x42   :  { %1436 = vmatmul.mubr.bf16.vlgmr.msra.gmra.mrb[0].mxu0 %v2303_v3  ;;  %1608 = vmatmul.mubr.bf16.vlgmr.msra.gmra.mrb[0].mxu1 %v2303_v3  ;;  %v2407_v3 = vld [vmem:[%s3343_s1 + $0x404] ss:$16 sps:$4 sm:$0xff]  }
  0x43   :  { %1447 = vmatpush1.bf16.msra.mxu0 %v2306_v4  ;;  %1619 = vmatpush1.bf16.msra.mxu1 %v2309_v5  ;;  %v2410_v4 = vld [vmem:[%s3343_s1 + $0x40c] ss:$16 sps:$4 sm:$0xff]   ;;  %v2402_v5 = vld [vmem:[%s3344_s0 + $0x8] ss:$28 sps:$4 sm:$0xff]  }
  0x44   :  { %1448 = vmatprep.subr.bf16.mxu0 %v2314_v6  ;;  %1620 = vmatprep.subr.bf16.mxu1 %v2317_v7  ;;  %v2405_v6 = vld [vmem:[%s3343_s1 + $0x400] ss:$16 sps:$4 sm:$0xff]   ;;  %v2408_v7 = vld [vmem:[%s3343_s1 + $0x408] ss:$16 sps:$4 sm:$0xff]  }
  0x45   :  { %1478 = vmatprep.mubr.bf16.mxu0 %v2404_v30  ;;  %1650 = vmatprep.mubr.bf16.mxu1 %v2404_v30  ;;  %v2446_v30 = vld [vmem:[%s3343_s1 + $0x4cc] ss:$16 sps:$4 sm:$0xff]  }
  0x47   :  { %1449 = vmatpush1.bf16.msra.mxu0 %v2312_v8  ;;  %1621 = vmatpush1.bf16.msra.mxu1 %v2315_v9  ;;  %v2413_v8 = vld [vmem:[%s3343_s1 + $0x424] ss:$16 sps:$4 sm:$0xff]   ;;  %v2416_v9 = vld [vmem:[%s3343_s1 + $0x42c] ss:$16 sps:$4 sm:$0xff]  }
  0x48   :  { %1450 = vmatprep.subr.bf16.mxu0 %v2320_v10  ;;  %1622 = vmatprep.subr.bf16.mxu1 %v2323_v11  ;;  %v2411_v10 = vld [vmem:[%s3343_s1 + $0x420] ss:$16 sps:$4 sm:$0xff]   ;;  %v2414_v11 = vld [vmem:[%s3343_s1 + $0x428] ss:$16 sps:$4 sm:$0xff]  }
  0x4b   :  { %1451 = vmatpush1.bf16.msra.mxu0 %v2318_v12  ;;  %1623 = vmatpush1.bf16.msra.mxu1 %v2321_v13  ;;  %v2503_v12 = vld [vmem:[%s3344_s0 + $0x14] ss:$28 sps:$4 sm:$0xff]  }
  0x4c   :  { %1452 = vmatprep.subr.bf16.mxu0 %v2326_v14  ;;  %1624 = vmatprep.subr.bf16.mxu1 %v2329_v15  ;;  %v2419_v13 = vld [vmem:[%s3343_s1 + $0x444] ss:$16 sps:$4 sm:$0xff]   ;;  %v2422_v14 = vld [vmem:[%s3343_s1 + $0x44c] ss:$16 sps:$4 sm:$0xff]   ;;  %v2417_v15 = vld [vmem:[%s3343_s1 + $0x440] ss:$16 sps:$4 sm:$0xff]  }
  0x4f   :  { %1453 = vmatpush1.bf16.msra.mxu0 %v2324_v16  ;;  %1625 = vmatpush1.bf16.msra.mxu1 %v2327_v17  ;;  %v2420_v16 = vld [vmem:[%s3343_s1 + $0x448] ss:$16 sps:$4 sm:$0xff]   ;;  %v2425_v17 = vld [vmem:[%s3343_s1 + $0x464] ss:$16 sps:$4 sm:$0xff]  }
  0x50   :  { %1454 = vmatprep.subr.bf16.mxu0 %v2332_v18  ;;  %1626 = vmatprep.subr.bf16.mxu1 %v2335_v19  ;;  %v2428_v18 = vld [vmem:[%s3343_s1 + $0x46c] ss:$16 sps:$4 sm:$0xff]   ;;  %v2423_v19 = vld [vmem:[%s3343_s1 + $0x460] ss:$16 sps:$4 sm:$0xff]  }
  0x53   :  { %1455 = vmatpush1.bf16.msra.mxu0 %v2330_v20  ;;  %1627 = vmatpush1.bf16.msra.mxu1 %v2333_v21  ;;  %v2426_v20 = vld [vmem:[%s3343_s1 + $0x468] ss:$16 sps:$4 sm:$0xff]   ;;  %v2431_v21 = vld [vmem:[%s3343_s1 + $0x484] ss:$16 sps:$4 sm:$0xff]  }
  0x54   :  { %1456 = vmatprep.subr.bf16.mxu0 %v2338_v22  ;;  %1628 = vmatprep.subr.bf16.mxu1 %v2341_v23  ;;  %v2434_v22 = vld [vmem:[%s3343_s1 + $0x48c] ss:$16 sps:$4 sm:$0xff]   ;;  %v2429_v23 = vld [vmem:[%s3343_s1 + $0x480] ss:$16 sps:$4 sm:$0xff]  }
  0x57   :  { %1457 = vmatpush1.bf16.msra.mxu0 %v2336_v24  ;;  %1629 = vmatpush1.bf16.msra.mxu1 %v2339_v25  ;;  %v2432_v24 = vld [vmem:[%s3343_s1 + $0x488] ss:$16 sps:$4 sm:$0xff]   ;;  %v2437_v25 = vld [vmem:[%s3343_s1 + $0x4a4] ss:$16 sps:$4 sm:$0xff]  }
  0x58   :  { %1458 = vmatprep.subr.bf16.mxu0 %v2344_v26  ;;  %1630 = vmatprep.subr.bf16.mxu1 %v2347_v27  ;;  %v2440_v26 = vld [vmem:[%s3343_s1 + $0x4ac] ss:$16 sps:$4 sm:$0xff]   ;;  %v2435_v27 = vld [vmem:[%s3343_s1 + $0x4a0] ss:$16 sps:$4 sm:$0xff]  }
  0x5b   :  { %1459 = vmatpush1.bf16.msra.mxu0 %v2342_v28  ;;  %1631 = vmatpush1.bf16.msra.mxu1 %v2345_v29  ;;  %v2438_v28 = vld [vmem:[%s3343_s1 + $0x4a8] ss:$16 sps:$4 sm:$0xff]   ;;  %v2443_v29 = vld [vmem:[%s3343_s1 + $0x4c4] ss:$16 sps:$4 sm:$0xff]  }
  0x5c   :  { %1460 = vmatprep.subr.bf16.mxu0 %v2350_v31  ;;  %1632 = vmatprep.subr.bf16.mxu1 %v2353_v32  ;;  %v2441_v31 = vld [vmem:[%s3343_s1 + $0x4c0] ss:$16 sps:$4 sm:$0xff]   ;;  %v2444_v32 = vld [vmem:[%s3343_s1 + $0x4c8] ss:$16 sps:$4 sm:$0xff]  }
  0x5f   :  { %1461 = vmatpush1.bf16.msra.mxu0 %v2348_v33  ;;  %1633 = vmatpush1.bf16.msra.mxu1 %v2351_v34  ;;  %v2449_v33 = vld [vmem:[%s3343_s1 + $0x4e4] ss:$16 sps:$4 sm:$0xff]   ;;  %v2452_v34 = vld [vmem:[%s3343_s1 + $0x4ec] ss:$16 sps:$4 sm:$0xff]  }
  0x60   :  { %1462 = vmatprep.subr.bf16.mxu0 %v2356_v35  ;;  %1634 = vmatprep.subr.bf16.mxu1 %v2359_v36  ;;  %v2447_v35 = vld [vmem:[%s3343_s1 + $0x4e0] ss:$16 sps:$4 sm:$0xff]   ;;  %v2450_v36 = vld [vmem:[%s3343_s1 + $0x4e8] ss:$16 sps:$4 sm:$0xff]  }
  0x63   :  { %1463 = vmatpush1.bf16.msra.mxu0 %v2354_v37  ;;  %1635 = vmatpush1.bf16.msra.mxu1 %v2357_v38  ;;  %v2455_v37 = vld [vmem:[%s3343_s1 + $0x504] ss:$16 sps:$4 sm:$0xff]   ;;  %v2458_v38 = vld [vmem:[%s3343_s1 + $0x50c] ss:$16 sps:$4 sm:$0xff]  }
  0x64   :  { %1464 = vmatprep.subr.bf16.mxu0 %v2362_v39  ;;  %1636 = vmatprep.subr.bf16.mxu1 %v2365_v40  ;;  %v2453_v39 = vld [vmem:[%s3343_s1 + $0x500] ss:$16 sps:$4 sm:$0xff]   ;;  %v2456_v40 = vld [vmem:[%s3343_s1 + $0x508] ss:$16 sps:$4 sm:$0xff]  }
  0x67   :  { %1465 = vmatpush1.bf16.msra.mxu0 %v2360_v41  ;;  %1637 = vmatpush1.bf16.msra.mxu1 %v2363_v42  ;;  %v2461_v41 = vld [vmem:[%s3343_s1 + $0x524] ss:$16 sps:$4 sm:$0xff]   ;;  %v2464_v42 = vld [vmem:[%s3343_s1 + $0x52c] ss:$16 sps:$4 sm:$0xff]  }
  0x68   :  { %1466 = vmatprep.subr.bf16.mxu0 %v2368_v43  ;;  %1638 = vmatprep.subr.bf16.mxu1 %v2371_v44  ;;  %v2459_v43 = vld [vmem:[%s3343_s1 + $0x520] ss:$16 sps:$4 sm:$0xff]   ;;  %v2462_v44 = vld [vmem:[%s3343_s1 + $0x528] ss:$16 sps:$4 sm:$0xff]  }
  0x6b   :  { %1467 = vmatpush1.bf16.msra.mxu0 %v2366_v45  ;;  %1639 = vmatpush1.bf16.msra.mxu1 %v2369_v46  ;;  %v2467_v45 = vld [vmem:[%s3343_s1 + $0x544] ss:$16 sps:$4 sm:$0xff]   ;;  %v2470_v46 = vld [vmem:[%s3343_s1 + $0x54c] ss:$16 sps:$4 sm:$0xff]  }
  0x6c   :  { %1468 = vmatprep.subr.bf16.mxu0 %v2374_v47  ;;  %1640 = vmatprep.subr.bf16.mxu1 %v2377_v48  ;;  %v2465_v47 = vld [vmem:[%s3343_s1 + $0x540] ss:$16 sps:$4 sm:$0xff]   ;;  %v2468_v48 = vld [vmem:[%s3343_s1 + $0x548] ss:$16 sps:$4 sm:$0xff]  }
  0x6f   :  { %1469 = vmatpush1.bf16.msra.mxu0 %v2372_v49  ;;  %1641 = vmatpush1.bf16.msra.mxu1 %v2375_v50  ;;  %v2473_v49 = vld [vmem:[%s3343_s1 + $0x564] ss:$16 sps:$4 sm:$0xff]   ;;  %v2476_v50 = vld [vmem:[%s3343_s1 + $0x56c] ss:$16 sps:$4 sm:$0xff]  }
  0x70   :  { %1470 = vmatprep.subr.bf16.mxu0 %v2380_v51  ;;  %1642 = vmatprep.subr.bf16.mxu1 %v2383_v52  ;;  %v2471_v51 = vld [vmem:[%s3343_s1 + $0x560] ss:$16 sps:$4 sm:$0xff]   ;;  %v2474_v52 = vld [vmem:[%s3343_s1 + $0x568] ss:$16 sps:$4 sm:$0xff]  }
  0x73   :  { %1471 = vmatpush1.bf16.msra.mxu0 %v2378_v53  ;;  %1643 = vmatpush1.bf16.msra.mxu1 %v2381_v54  ;;  %v2479_v53 = vld [vmem:[%s3343_s1 + $0x584] ss:$16 sps:$4 sm:$0xff]   ;;  %v2482_v54 = vld [vmem:[%s3343_s1 + $0x58c] ss:$16 sps:$4 sm:$0xff]  }
  0x74   :  { %1472 = vmatprep.subr.bf16.mxu0 %v2386_v55  ;;  %1644 = vmatprep.subr.bf16.mxu1 %v2389_v56  ;;  %v2477_v55 = vld [vmem:[%s3343_s1 + $0x580] ss:$16 sps:$4 sm:$0xff]   ;;  %v2480_v56 = vld [vmem:[%s3343_s1 + $0x588] ss:$16 sps:$4 sm:$0xff]  }
  0x77   :  { %1473 = vmatpush1.bf16.msra.mxu0 %v2384_v57  ;;  %1645 = vmatpush1.bf16.msra.mxu1 %v2387_v58  ;;  %v2485_v57 = vld [vmem:[%s3343_s1 + $0x5a4] ss:$16 sps:$4 sm:$0xff]   ;;  %v2488_v58 = vld [vmem:[%s3343_s1 + $0x5ac] ss:$16 sps:$4 sm:$0xff]  }
  0x78   :  { %1474 = vmatprep.subr.bf16.mxu0 %v2392_v59  ;;  %1646 = vmatprep.subr.bf16.mxu1 %v2395_v60  ;;  %v2483_v59 = vld [vmem:[%s3343_s1 + $0x5a0] ss:$16 sps:$4 sm:$0xff]   ;;  %v2486_v60 = vld [vmem:[%s3343_s1 + $0x5a8] ss:$16 sps:$4 sm:$0xff]  }
  0x7b   :  { %1475 = vmatpush1.bf16.msra.mxu0 %v2390_v61  ;;  %1647 = vmatpush1.bf16.msra.mxu1 %v2393_v62  ;;  %v2491_v61 = vld [vmem:[%s3343_s1 + $0x5c4] ss:$16 sps:$4 sm:$0xff]   ;;  %v2494_v62 = vld [vmem:[%s3343_s1 + $0x5cc] ss:$16 sps:$4 sm:$0xff]  }
  0x7c   :  { %1476 = vmatprep.subr.bf16.mxu0 %v2398_v63  ;;  %1648 = vmatprep.subr.bf16.mxu1 %v2401_v0  ;;  %v2489_v63 = vld [vmem:[%s3343_s1 + $0x5c0] ss:$16 sps:$4 sm:$0xff]   ;;  %v2492_v0 = vld [vmem:[%s3343_s1 + $0x5c8] ss:$16 sps:$4 sm:$0xff]  }
  0x7f   :  { %1477 = vmatpush1.bf16.msra.mxu0 %v2396_v1  ;;  %1649 = vmatpush1.bf16.msra.mxu1 %v2399_v2  ;;  %v2497_v1 = vld [vmem:[%s3343_s1 + $0x5e4] ss:$16 sps:$4 sm:$0xff]   ;;  %v2500_v2 = vld [vmem:[%s3343_s1 + $0x5ec] ss:$16 sps:$4 sm:$0xff]  }
  0x80   :  { %1489 = vmatprep.subr.bf16.mxu0 %v2407_v3  ;;  %1661 = vmatprep.subr.bf16.mxu1 %v2410_v4  ;;  %v2495_v3 = vld [vmem:[%s3343_s1 + $0x5e0] ss:$16 sps:$4 sm:$0xff]   ;;  %v2498_v4 = vld [vmem:[%s3343_s1 + $0x5e8] ss:$16 sps:$4 sm:$0xff]  }
  0x82   :  { %1479 = vmatmul.mubr.bf16.vlgmr.msra.gmra.mrb[0].mxu0 %v2402_v5  ;;  %1651 = vmatmul.mubr.bf16.vlgmr.msra.gmra.mrb[0].mxu1 %v2402_v5  ;;  %v2506_v5 = vld [vmem:[%s3343_s1 + $0x604] ss:$16 sps:$4 sm:$0xff]  }
  0x83   :  { %1490 = vmatpush1.bf16.msra.mxu0 %v2405_v6  ;;  %1662 = vmatpush1.bf16.msra.mxu1 %v2408_v7  ;;  %v2509_v6 = vld [vmem:[%s3343_s1 + $0x60c] ss:$16 sps:$4 sm:$0xff]  }
  0x84   :  { %1491 = vmatprep.subr.bf16.mxu0 %v2413_v8  ;;  %1663 = vmatprep.subr.bf16.mxu1 %v2416_v9  ;;  %v2501_v7 = vld [vmem:[%s3344_s0 + $0x10] ss:$28 sps:$4 sm:$0xff]   ;;  %v2507_v9 = vld [vmem:[%s3343_s1 + $0x608] ss:$16 sps:$4 sm:$0xff]  }
  0x85   :  { %1521 = vmatprep.mubr.bf16.mxu0 %v2503_v12  ;;  %1693 = vmatprep.mubr.bf16.mxu1 %v2503_v12  ;;  %v2504_v8 = vld [vmem:[%s3343_s1 + $0x600] ss:$16 sps:$4 sm:$0xff]  }
  0x86   :  { %v2510_v12 = vld [vmem:[%s3343_s1 + $0x620] ss:$16 sps:$4 sm:$0xff]  }
  0x87   :  { %1492 = vmatpush1.bf16.msra.mxu0 %v2411_v10  ;;  %1664 = vmatpush1.bf16.msra.mxu1 %v2414_v11  ;;  %v2512_v10 = vld [vmem:[%s3343_s1 + $0x624] ss:$16 sps:$4 sm:$0xff]   ;;  %v2515_v11 = vld [vmem:[%s3343_s1 + $0x62c] ss:$16 sps:$4 sm:$0xff]  }
  0x88   :  { %1493 = vmatprep.subr.bf16.mxu0 %v2419_v13  ;;  %1665 = vmatprep.subr.bf16.mxu1 %v2422_v14  ;;  %v2513_v13 = vld [vmem:[%s3343_s1 + $0x628] ss:$16 sps:$4 sm:$0xff]   ;;  %v2518_v14 = vld [vmem:[%s3343_s1 + $0x644] ss:$16 sps:$4 sm:$0xff]  }
  0x8b   :  { %1494 = vmatpush1.bf16.msra.mxu0 %v2417_v15  ;;  %1666 = vmatpush1.bf16.msra.mxu1 %v2420_v16  ;;  %v2521_v15 = vld [vmem:[%s3343_s1 + $0x64c] ss:$16 sps:$4 sm:$0xff]   ;;  %v2557_v16 = vmov 0  }
  0x8c   :  { %1495 = vmatprep.subr.bf16.mxu0 %v2425_v17  ;;  %1667 = vmatprep.subr.bf16.mxu1 %v2428_v18  ;;  %v2516_v17 = vld [vmem:[%s3343_s1 + $0x640] ss:$16 sps:$4 sm:$0xff]   ;;  %v2519_v18 = vld [vmem:[%s3343_s1 + $0x648] ss:$16 sps:$4 sm:$0xff]  }
  0x8f   :  { %1496 = vmatpush1.bf16.msra.mxu0 %v2423_v19  ;;  %1668 = vmatpush1.bf16.msra.mxu1 %v2426_v20  ;;  %v2524_v19 = vld [vmem:[%s3343_s1 + $0x664] ss:$16 sps:$4 sm:$0xff]   ;;  %v2527_v20 = vld [vmem:[%s3343_s1 + $0x66c] ss:$16 sps:$4 sm:$0xff]  }
  0x90   :  { %1497 = vmatprep.subr.bf16.mxu0 %v2431_v21  ;;  %1669 = vmatprep.subr.bf16.mxu1 %v2434_v22  ;;  %v2522_v21 = vld [vmem:[%s3343_s1 + $0x660] ss:$16 sps:$4 sm:$0xff]   ;;  %v2525_v22 = vld [vmem:[%s3343_s1 + $0x668] ss:$16 sps:$4 sm:$0xff]  }
  0x93   :  { %1498 = vmatpush1.bf16.msra.mxu0 %v2429_v23  ;;  %1670 = vmatpush1.bf16.msra.mxu1 %v2432_v24  ;;  %v2530_v23 = vld [vmem:[%s3343_s1 + $0x684] ss:$16 sps:$4 sm:$0xff]   ;;  %v2533_v24 = vld [vmem:[%s3343_s1 + $0x68c] ss:$16 sps:$4 sm:$0xff]  }
  0x94   :  { %1499 = vmatprep.subr.bf16.mxu0 %v2437_v25  ;;  %1671 = vmatprep.subr.bf16.mxu1 %v2440_v26  ;;  %v2528_v25 = vld [vmem:[%s3343_s1 + $0x680] ss:$16 sps:$4 sm:$0xff]   ;;  %v2531_v26 = vld [vmem:[%s3343_s1 + $0x688] ss:$16 sps:$4 sm:$0xff]  }
  0x97   :  { %1500 = vmatpush1.bf16.msra.mxu0 %v2435_v27  ;;  %1672 = vmatpush1.bf16.msra.mxu1 %v2438_v28  ;;  %v2536_v27 = vld [vmem:[%s3343_s1 + $0x6a4] ss:$16 sps:$4 sm:$0xff]   ;;  %v2539_v28 = vld [vmem:[%s3343_s1 + $0x6ac] ss:$16 sps:$4 sm:$0xff]  }
  0x98   :  { %1501 = vmatprep.subr.bf16.mxu0 %v2443_v29  ;;  %1673 = vmatprep.subr.bf16.mxu1 %v2446_v30  ;;  %v2534_v29 = vld [vmem:[%s3343_s1 + $0x6a0] ss:$16 sps:$4 sm:$0xff]   ;;  %v2537_v30 = vld [vmem:[%s3343_s1 + $0x6a8] ss:$16 sps:$4 sm:$0xff]  }
  0x9b   :  { %1502 = vmatpush1.bf16.msra.mxu0 %v2441_v31  ;;  %1674 = vmatpush1.bf16.msra.mxu1 %v2444_v32  ;;  %v2542_v31 = vld [vmem:[%s3343_s1 + $0x6c4] ss:$16 sps:$4 sm:$0xff]   ;;  %v2545_v32 = vld [vmem:[%s3343_s1 + $0x6cc] ss:$16 sps:$4 sm:$0xff]  }
  0x9c   :  { %1503 = vmatprep.subr.bf16.mxu0 %v2449_v33  ;;  %1675 = vmatprep.subr.bf16.mxu1 %v2452_v34  ;;  %v2540_v33 = vld [vmem:[%s3343_s1 + $0x6c0] ss:$16 sps:$4 sm:$0xff]   ;;  %v2543_v34 = vld [vmem:[%s3343_s1 + $0x6c8] ss:$16 sps:$4 sm:$0xff]  }
  0x9f   :  { %1504 = vmatpush1.bf16.msra.mxu0 %v2447_v35  ;;  %1676 = vmatpush1.bf16.msra.mxu1 %v2450_v36  ;;  %v2548_v35 = vld [vmem:[%s3343_s1 + $0x6e4] ss:$16 sps:$4 sm:$0xff]   ;;  %v2551_v36 = vld [vmem:[%s3343_s1 + $0x6ec] ss:$16 sps:$4 sm:$0xff]  }
  0xa0   :  { %1505 = vmatprep.subr.bf16.mxu0 %v2455_v37  ;;  %1677 = vmatprep.subr.bf16.mxu1 %v2458_v38  ;;  %v2546_v37 = vld [vmem:[%s3343_s1 + $0x6e0] ss:$16 sps:$4 sm:$0xff]   ;;  %v2549_v38 = vld [vmem:[%s3343_s1 + $0x6e8] ss:$16 sps:$4 sm:$0xff]  }
  0xa3   :  { %1506 = vmatpush1.bf16.msra.mxu0 %v2453_v39  ;;  %1678 = vmatpush1.bf16.msra.mxu1 %v2456_v40  ;;  %v2552_v39 = vld [vmem:[%s3344_s0 + $0x18] ss:$28 sps:$4 sm:$0xff]  }
  0xa4   :  { %1507 = vmatprep.subr.bf16.mxu0 %v2461_v41  ;;  %1679 = vmatprep.subr.bf16.mxu1 %v2464_v42 }
  0xa7   :  { %1508 = vmatpush1.bf16.msra.mxu0 %v2459_v43  ;;  %1680 = vmatpush1.bf16.msra.mxu1 %v2462_v44 }
  0xa8   :  { %1509 = vmatprep.subr.bf16.mxu0 %v2467_v45  ;;  %1681 = vmatprep.subr.bf16.mxu1 %v2470_v46 }
  0xab   :  { %1510 = vmatpush1.bf16.msra.mxu0 %v2465_v47  ;;  %1682 = vmatpush1.bf16.msra.mxu1 %v2468_v48 }
  0xac   :  { %1511 = vmatprep.subr.bf16.mxu0 %v2473_v49  ;;  %1683 = vmatprep.subr.bf16.mxu1 %v2476_v50 }
  0xaf   :  { %1512 = vmatpush1.bf16.msra.mxu0 %v2471_v51  ;;  %1684 = vmatpush1.bf16.msra.mxu1 %v2474_v52 }
  0xb0   :  { %1513 = vmatprep.subr.bf16.mxu0 %v2479_v53  ;;  %1685 = vmatprep.subr.bf16.mxu1 %v2482_v54 }
  0xb3   :  { %1514 = vmatpush1.bf16.msra.mxu0 %v2477_v55  ;;  %1686 = vmatpush1.bf16.msra.mxu1 %v2480_v56 }
  0xb4   :  { %1515 = vmatprep.subr.bf16.mxu0 %v2485_v57  ;;  %1687 = vmatprep.subr.bf16.mxu1 %v2488_v58 }
  0xb7   :  { %1516 = vmatpush1.bf16.msra.mxu0 %v2483_v59  ;;  %1688 = vmatpush1.bf16.msra.mxu1 %v2486_v60 }
  0xb8   :  { %1517 = vmatprep.subr.bf16.mxu0 %v2491_v61  ;;  %1689 = vmatprep.subr.bf16.mxu1 %v2494_v62 }
  0xbb   :  { %1518 = vmatpush1.bf16.msra.mxu0 %v2489_v63  ;;  %1690 = vmatpush1.bf16.msra.mxu1 %v2492_v0 }
  0xbc   :  { %1519 = vmatprep.subr.bf16.mxu0 %v2497_v1  ;;  %1691 = vmatprep.subr.bf16.mxu1 %v2500_v2 }
  0xbf   :  { %1520 = vmatpush1.bf16.msra.mxu0 %v2495_v3  ;;  %1692 = vmatpush1.bf16.msra.mxu1 %v2498_v4 }
  0xc0   :  { %1532 = vmatprep.subr.bf16.mxu0 %v2506_v5  ;;  %1704 = vmatprep.subr.bf16.mxu1 %v2509_v6 }
  0xc2   :  { %1522 = vmatmul.mubr.bf16.vlgmr.msra.gmra.mrb[0].mxu0 %v2501_v7  ;;  %1694 = vmatmul.mubr.bf16.vlgmr.msra.gmra.mrb[0].mxu1 %v2501_v7 }
  0xc3   :  { %1533 = vmatpush1.bf16.msra.mxu0 %v2504_v8  ;;  %1705 = vmatpush1.bf16.msra.mxu1 %v2507_v9 }
  0xc4   :  { %1534 = vmatprep.subr.bf16.mxu0 %v2512_v10  ;;  %1706 = vmatprep.subr.bf16.mxu1 %v2515_v11 }
  0xc5   :  { %1564 = vmatprep.mubr.bf16.mxu0 %v2557_v16  ;;  %1736 = vmatprep.mubr.bf16.mxu1 %v2557_v16 }
  0xc7   :  { %1535 = vmatpush1.bf16.msra.mxu0 %v2510_v12  ;;  %1707 = vmatpush1.bf16.msra.mxu1 %v2513_v13 }
  0xc8   :  { %1536 = vmatprep.subr.bf16.mxu0 %v2518_v14  ;;  %1708 = vmatprep.subr.bf16.mxu1 %v2521_v15 }
  0xcb   :  { %1537 = vmatpush1.bf16.msra.mxu0 %v2516_v17  ;;  %1709 = vmatpush1.bf16.msra.mxu1 %v2519_v18 }
  0xcc   :  { %1538 = vmatprep.subr.bf16.mxu0 %v2524_v19  ;;  %1710 = vmatprep.subr.bf16.mxu1 %v2527_v20 }
  0xcf   :  { %1539 = vmatpush1.bf16.msra.mxu0 %v2522_v21  ;;  %1711 = vmatpush1.bf16.msra.mxu1 %v2525_v22 }
  0xd0   :  { %1540 = vmatprep.subr.bf16.mxu0 %v2530_v23  ;;  %1712 = vmatprep.subr.bf16.mxu1 %v2533_v24 }
  0xd3   :  { %1541 = vmatpush1.bf16.msra.mxu0 %v2528_v25  ;;  %1713 = vmatpush1.bf16.msra.mxu1 %v2531_v26 }
  0xd4   :  { %1542 = vmatprep.subr.bf16.mxu0 %v2536_v27  ;;  %1714 = vmatprep.subr.bf16.mxu1 %v2539_v28 }
  0xd7   :  { %1543 = vmatpush1.bf16.msra.mxu0 %v2534_v29  ;;  %1715 = vmatpush1.bf16.msra.mxu1 %v2537_v30 }
  0xd8   :  { %1544 = vmatprep.subr.bf16.mxu0 %v2542_v31  ;;  %1716 = vmatprep.subr.bf16.mxu1 %v2545_v32  ;;  %v1923_v32 = vld [vmem:[%s3345_s2] sm:$0xff] }
  0xdb   :  { %1545 = vmatpush1.bf16.msra.mxu0 %v2540_v33  ;;  %1717 = vmatpush1.bf16.msra.mxu1 %v2543_v34  ;;  %v1924_v33 = vld [vmem:[%s3345_s2 + $0x8] sm:$0xff]  ;;  %v1925_v34 = vld [vmem:[%s3345_s2 + $0x10] sm:$0xff] }
  0xdc   :  { %1546 = vmatprep.subr.bf16.mxu0 %v2548_v35  ;;  %1718 = vmatprep.subr.bf16.mxu1 %v2551_v36  ;;  %v1926_v36 = vld [vmem:[%s3345_s2 + $0x18] sm:$0xff] }
  0xdf   :  { %1547 = vmatpush1.bf16.msra.mxu0 %v2546_v37  ;;  %1719 = vmatpush1.bf16.msra.mxu1 %v2549_v38 }
  0xe2   :  { %1565 = vmatmul.mubr.bf16.vlgmr.msra.gmra.mrb[0].mxu0 %v2552_v39  ;;  %1737 = vmatmul.mubr.bf16.vlgmr.msra.gmra.mrb[0].mxu1 %v2552_v39 }
 0x1b5   :  { %v1566_v40 = vpop.f32.mrb[0].mxu0  ;;  %v1738_v41 = vpop.f32.mrb[0].mxu1 }
 0x1b6   :  { %v1810_v42 = vmul.f32 %v1566_v40, %v1566_v40  ;;  %v1568_v43 = vpop.f32.mrb[1].mxu0  ;;  %v1740_v44 = vpop.f32.mrb[1].mxu1  ;;  %v1812_v55 = vmul.f32 %v1738_v41, %v1738_v41 }
 0x1b7   :  { %v1811_v45 = vmul.f32 %v1568_v43, %v1568_v43  ;;  %v1845_v46 = vadd.f32 %v1568_v43, %v1566_v40  ;;  %v3271_v47 = vpop.f32.mrb[2].mxu0  ;;  %v3273_v48 = vpop.f32.mrb[2].mxu1  ;;  %v1813_v61 = vmul.f32 %v1740_v44, %v1740_v44 }
 0x1b8   :  { %v1814_v49 = vmul.f32 %v3271_v47, %v3271_v47  ;;  %v3277_v50 = vpop.f32.mrb[3].mxu0  ;;  %v3279_v51 = vpop.f32.mrb[3].mxu1  ;;  %v1816_v57 = vmul.f32 %v3273_v48, %v3273_v48 }
 0x1b9   :  { %v1815_v52 = vmul.f32 %v3277_v50, %v3277_v50  ;;  %v1850_v53 = vadd.f32 %v3277_v50, %v3271_v47  ;;  %v1846_v54 = vadd.f32 %v1845_v46, %v1738_v41  ;;  %v1863_v56 = vadd.f32 %v1811_v45, %v1810_v42 }
 0x1ba   :  { %v1817_v63 = vmul.f32 %v3279_v51, %v3279_v51 }
 0x1bb   :  { %v1868_v58 = vadd.f32 %v1815_v52, %v1814_v49  ;;  %v1847_v59 = vadd.f32 %v1846_v54, %v1740_v44  ;;  %v1851_v60 = vadd.f32 %v1850_v53, %v3273_v48  ;;  %v1864_v62 = vadd.f32 %v1863_v56, %v1812_v55 }
 0x1bd   :  { %1848 = vadd.xlane.f32.xlu0 %v1847_v59  ;;  %v1852_v0 = vadd.f32 %v1851_v60, %v3279_v51  ;;  %v1869_v1 = vadd.f32 %v1868_v58, %v1816_v57  ;;  %v1865_v2 = vadd.f32 %v1864_v62, %v1813_v61  ;;  %v1930_v57 = vld [vmem:[%s3345_s2 + $0x38] sm:$0xff] }
 0x1bf   :  { %v1870_v3 = vadd.f32 %v1869_v1, %v1817_v63  ;;  %1866 = vadd.xlane.f32.xlu1 %v1865_v2 }
 0x1c1   :  { %1853 = vadd.xlane.f32.xlu0 %v1852_v0 }
 0x1c3   :  { %1871 = vadd.xlane.f32.xlu1 %v1870_v3 }
 0x24a   :  { %v1849_v4 = vpop.xlane.xlu0 %1848 }
 0x24b   :  { %v1873_v5 = vmul.f32 0.001953125, %v1849_v4 }
 0x24c   :  { %v1867_v7 = vpop.xlane.xlu1 %1866 }
 0x24d   :  { %v1877_v6 = vmul.f32 %v1873_v5, %v1873_v5  ;;  %v1875_v8 = vmul.f32 0.001953125, %v1867_v7  ;;  %v1887_v20 = vsub.f32 0.0, %v1873_v5 }
 0x24e   :  { %v1854_v9 = vpop.xlane.xlu0 %1853 }
 0x24f   :  { %v1874_v10 = vmul.f32 0.001953125, %v1854_v9  ;;  %v1879_v11 = vsub.f32 %v1875_v8, %v1877_v6 }
 0x250   :  { %v1872_v13 = vpop.xlane.xlu1 %1871 }
 0x251   :  { %v1878_v12 = vmul.f32 %v1874_v10, %v1874_v10  ;;  %v1881_v14 = vmax.f32 %v1879_v11, 0.0  ;;  %v1876_v15 = vmul.f32 0.001953125, %v1872_v13  ;;  %v1888_v30 = vsub.f32 0.0, %v1874_v10 }
 0x253   :  { %v1883_v16 = vadd.f32 1e-05, %v1881_v14  ;;  %v1880_v17 = vsub.f32 %v1876_v15, %v1878_v12 }
 0x255   :  { %2553 = vrsqrt.f32 %v1883_v16  ;;  %v1882_v18 = vmax.f32 %v1880_v17, 0.0 }
 0x257   :  { %v1884_v19 = vadd.f32 1e-05, %v1882_v18 }
 0x259   :  { %2555 = vrsqrt.f32 %v1884_v19 }
 0x25f   :  { %v2554_v21 = vpop.eup %2553 }
 0x260   :  { %v1889_v22 = vmul.f32 %v2554_v21, %v1887_v20  ;;  %v1899_v23 = vmul.f32 %v2554_v21, %v1566_v40  ;;  %v1900_v24 = vmul.f32 %v2554_v21, %v1568_v43  ;;  %v1901_v25 = vmul.f32 %v2554_v21, %v1738_v41 }
 0x261   :  { %v1902_v26 = vmul.f32 %v2554_v21, %v1740_v44 }
 0x262   :  { %v1907_v27 = vadd.f32 %v1899_v23, %v1889_v22  ;;  %v1908_v28 = vadd.f32 %v1900_v24, %v1889_v22  ;;  %v1909_v29 = vadd.f32 %v1901_v25, %v1889_v22 }
 0x263   :  { %v2556_v31 = vpop.eup %2555  ;;  %v1910_v35 = vadd.f32 %v1902_v26, %v1889_v22 }
 0x264   :  { %v1915_v37 = vmax.f32 %v1907_v27, 0.0  ;;  %v1916_v38 = vmax.f32 %v1908_v28, 0.0  ;;  %v1917_v39 = vmax.f32 %v1909_v29, 0.0  ;;  %v1890_v40 = vmul.f32 %v2556_v31, %v1888_v30 }
 0x265   :  { %v1918_v41 = vmax.f32 %v1910_v35, 0.0  ;;  %v1903_v42 = vmul.f32 %v2556_v31, %v3271_v47  ;;  %v1904_v43 = vmul.f32 %v2556_v31, %v3277_v50  ;;  %v1905_v44 = vmul.f32 %v2556_v31, %v3273_v48  ;;  %v1927_v47 = vld [vmem:[%s3345_s2 + $0x20] sm:$0xff]  ;;  %v1928_v48 = vld [vmem:[%s3345_s2 + $0x28] sm:$0xff]  ;;  %v1929_v50 = vld [vmem:[%s3345_s2 + $0x30] sm:$0xff] }
 0x266   :  { %v1931_v45 = vadd.f32 %v1923_v32, %v1915_v37  ;;  %v1932_v46 = vadd.f32 %v1924_v33, %v1916_v38  ;;  %v1933_v49 = vadd.f32 %v1925_v34, %v1917_v39  ;;  %v1906_v52 = vmul.f32 %v2556_v31, %v3279_v51 }
 0x267   :  { %v1934_v53 = vadd.f32 %v1926_v36, %v1918_v41  ;;  %v1911_v54 = vadd.f32 %v1903_v42, %v1890_v40  ;;  %v1912_v55 = vadd.f32 %v1904_v43, %v1890_v40  ;;  %v1913_v56 = vadd.f32 %v1905_v44, %v1890_v40 }
 0x268   :  { %1939 = vst [vmem:[%s3346_s3] sm:$0xff] %v1931_v45  ;;  %1940 = vst [vmem:[%s3346_s3 + $0x8] sm:$0xff] %v1932_v46  ;;  %v1914_v51 = vadd.f32 %v1906_v52, %v1890_v40 }
 0x269   :  { %1941 = vst [vmem:[%s3346_s3 + $0x10] sm:$0xff] %v1933_v49  ;;  %1942 = vst [vmem:[%s3346_s3 + $0x18] sm:$0xff] %v1934_v53  ;;  %v1919_v58 = vmax.f32 %v1911_v54, 0.0  ;;  %v1920_v59 = vmax.f32 %v1912_v55, 0.0  ;;  %v1921_v60 = vmax.f32 %v1913_v56, 0.0 }
 0x26a   :  { %v1922_v61 = vmax.f32 %v1914_v51, 0.0 }
 0x26b   :  { %v1935_v62 = vadd.f32 %v1927_v47, %v1919_v58  ;;  %v1936_v63 = vadd.f32 %v1928_v48, %v1920_v59  ;;  %v1937_v0 = vadd.f32 %v1929_v50, %v1921_v60 }
 0x26c   :  { %v1938_v1 = vadd.f32 %v1930_v57, %v1922_v61 }
 0x26d   :  { %1943 = vst [vmem:[%s3346_s3 + $0x20] sm:$0xff] %v1935_v62  ;;  %1944 = vst [vmem:[%s3346_s3 + $0x28] sm:$0xff] %v1936_v63 }
 0x26e   :  { %1945 = vst [vmem:[%s3346_s3 + $0x30] sm:$0xff] %v1937_v0  ;;  %1946 = vst [vmem:[%s3346_s3 + $0x38] sm:$0xff] %v1938_v1 }

// kernel: costregnet_forward.16
= control target key start
LH: loop header
LB: loop body
LE: loop exit
PB: predicated region body
PF: predicated region fallthrough
CT: control target
= control target key end

     0   :  { %s3332_s12 = smov 0   ;;  %s3334_s13 = smov 0   ;;  %s4467_s0 = inlined_call_operand.vmem [shape: bf16[8,512], index: 0, kind: input, shape index: {}]   ;;  %s4468_s1 = inlined_call_operand.vmem [shape: bf16[512,4096], index: 1, kind: input, shape index: {}]   ;;  %s4469_s2 = inlined_call_operand.vmem [shape: f32[8,4096], index: 2, kind: input, shape index: {}]   ;;  %s4470_s3 = inlined_call_operand.vmem [shape: f32[8,4096], index: 3, kind: output, shape index: {}]  }
   0x1   :  { %s3336_s14 = smov 0  }
   0x2 LB: > { %s3348_s15 = sadd.s32 4294967295, %s3309_s14   ;;  %s3351_s16 = sadd.s32 1, %s3309_s14   ;;  %s3309_s14 = sphi %s3336_s14, %s4473_s14   ;;  %s3305_s13 = sphi %s3334_s13, %s4472_s13   ;;  %s3301_s12 = sphi %s3332_s12, %s4471_s12  }
   0x3   : > { %s38_s17 = ssub.s32 %s3309_s14, %s3351_s16  ;;  %s41_s18 = sadd.s32 1, %s3305_s13 }
   0x4   : > { %p39_p0 = scmp.eq.s32.totalorder %s38_s17, 0  ;;  %p48_p1 = scmp.ne.s32.totalorder %s3305_s13, %s3301_s12 }
   0x5   : > { %p49_p2 = scmp.eq.s32.totalorder %s3309_s14, 0  ;;  %p2966_p4 = scmp.ge.s32.totalorder %s3309_s14, 4 }
   0x6   : > { %s3360_s19 = scalar_select %p39_p0, %s3305_s13, %s41_s18  }
   0x7   : > { %p50_p3 = por %p49_p2, %p48_p1  ;;  %122 = sbr.rel (%p2966_p4) target bundleno = 146 (0x92), region = 24 }
   0xe   : > { %125 = sbr.rel (!%p50_p3) target bundleno = 146 (0x92), region = 28  ;;  %s127_s20 = sand.u32 (%p50_p3), 1, %s3305_s13  }
   0xf   : > { %s3238_s21 = sshll.u32 (%p50_p3), %s3309_s14, 5  ;;  %s2967_s22 = sshll.u32 (%p50_p3), %s127_s20, 11 }
  0x10   : > { %s3368_s25 = scalar_lea.vmem (%p50_p3), %s4468_s1, %s3238_s21  ;;  %s3373_s26 = scalar_lea.vmem (%p50_p3), [#allocation5], %s2967_s22 }
  0x11   : > { %v145_v0 = vld [vmem:[%s3368_s25] sm:$0xff] (%p50_p3)  ;;  %v147_v1 = vld [vmem:[%s3368_s25 + $0x8] sm:$0xff] (%p50_p3)  ;;  %v149_v2 = vld [vmem:[%s3368_s25 + $0x10] sm:$0xff] (%p50_p3) }
  0x12   : > { %146 = vst [vmem:[%s3373_s26] sm:$0xff] (%p50_p3), %v145_v0  ;;  %148 = vst [vmem:[%s3373_s26 + $0x8] sm:$0xff] (%p50_p3), %v147_v1  ;;  %v151_v3 = vld [vmem:[%s3368_s25 + $0x18] sm:$0xff] (%p50_p3)  ;;  %v153_v4 = vld [vmem:[%s3368_s25 + $0x80] sm:$0xff] (%p50_p3) }
  0x13   : > { %150 = vst [vmem:[%s3373_s26 + $0x10] sm:$0xff] (%p50_p3), %v149_v2  ;;  %v155_v5 = vld [vmem:[%s3368_s25 + $0x88] sm:$0xff] (%p50_p3)  ;;  %152 = vst [vmem:[%s3373_s26 + $0x18] sm:$0xff] (%p50_p3), %v151_v3  ;;  %v157_v6 = vld [vmem:[%s3368_s25 + $0x90] sm:$0xff] (%p50_p3) }
  0x14   : > { %154 = vst [vmem:[%s3373_s26 + $0x20] sm:$0xff] (%p50_p3), %v153_v4  ;;  %156 = vst [vmem:[%s3373_s26 + $0x28] sm:$0xff] (%p50_p3), %v155_v5  ;;  %v159_v7 = vld [vmem:[%s3368_s25 + $0x98] sm:$0xff] (%p50_p3)  ;;  %v161_v8 = vld [vmem:[%s3368_s25 + $0x100] sm:$0xff] (%p50_p3) }
  0x15   : > { %158 = vst [vmem:[%s3373_s26 + $0x30] sm:$0xff] %v157_v6  ;;  %160 = vst [vmem:[%s3373_s26 + $0x38] sm:$0xff] %v159_v7  ;;  %v163_v9 = vld [vmem:[%s3368_s25 + $0x108] sm:$0xff]  ;;  %v165_v10 = vld [vmem:[%s3368_s25 + $0x110] sm:$0xff] }
  0x16   : > { %162 = vst [vmem:[%s3373_s26 + $0x40] sm:$0xff] %v161_v8  ;;  %v167_v11 = vld [vmem:[%s3368_s25 + $0x118] sm:$0xff]  ;;  %164 = vst [vmem:[%s3373_s26 + $0x48] sm:$0xff] %v163_v9  ;;  %v169_v12 = vld [vmem:[%s3368_s25 + $0x180] sm:$0xff] }
  0x17   : > { %166 = vst [vmem:[%s3373_s26 + $0x50] sm:$0xff] %v165_v10  ;;  %168 = vst [vmem:[%s3373_s26 + $0x58] sm:$0xff] %v167_v11  ;;  %v171_v13 = vld [vmem:[%s3368_s25 + $0x188] sm:$0xff]  ;;  %v173_v14 = vld [vmem:[%s3368_s25 + $0x190] sm:$0xff] }
  0x18   : > { %170 = vst [vmem:[%s3373_s26 + $0x60] sm:$0xff] %v169_v12  ;;  %172 = vst [vmem:[%s3373_s26 + $0x68] sm:$0xff] %v171_v13  ;;  %v175_v15 = vld [vmem:[%s3368_s25 + $0x198] sm:$0xff]  ;;  %v177_v16 = vld [vmem:[%s3368_s25 + $0x200] sm:$0xff] }
  0x19   : > { %174 = vst [vmem:[%s3373_s26 + $0x70] sm:$0xff] %v173_v14  ;;  %v179_v17 = vld [vmem:[%s3368_s25 + $0x208] sm:$0xff]  ;;  %176 = vst [vmem:[%s3373_s26 + $0x78] sm:$0xff] %v175_v15  ;;  %v181_v18 = vld [vmem:[%s3368_s25 + $0x210] sm:$0xff] }
  0x1a   : > { %178 = vst [vmem:[%s3373_s26 + $0x80] sm:$0xff] %v177_v16  ;;  %180 = vst [vmem:[%s3373_s26 + $0x88] sm:$0xff] %v179_v17  ;;  %v183_v19 = vld [vmem:[%s3368_s25 + $0x218] sm:$0xff]  ;;  %v185_v20 = vld [vmem:[%s3368_s25 + $0x280] sm:$0xff] }
  0x1b   : > { %182 = vst [vmem:[%s3373_s26 + $0x90] sm:$0xff] %v181_v18  ;;  %184 = vst [vmem:[%s3373_s26 + $0x98] sm:$0xff] %v183_v19  ;;  %v187_v21 = vld [vmem:[%s3368_s25 + $0x288] sm:$0xff]  ;;  %v189_v22 = vld [vmem:[%s3368_s25 + $0x290] sm:$0xff] }
  0x1c   : > { %186 = vst [vmem:[%s3373_s26 + $0xa0] sm:$0xff] %v185_v20  ;;  %v191_v23 = vld [vmem:[%s3368_s25 + $0x298] sm:$0xff]  ;;  %188 = vst [vmem:[%s3373_s26 + $0xa8] sm:$0xff] %v187_v21  ;;  %v193_v24 = vld [vmem:[%s3368_s25 + $0x300] sm:$0xff] }
  0x1d   : > { %190 = vst [vmem:[%s3373_s26 + $0xb0] sm:$0xff] %v189_v22  ;;  %192 = vst [vmem:[%s3373_s26 + $0xb8] sm:$0xff] %v191_v23  ;;  %v195_v25 = vld [vmem:[%s3368_s25 + $0x308] sm:$0xff]  ;;  %v197_v26 = vld [vmem:[%s3368_s25 + $0x310] sm:$0xff] }
  0x1e   : > { %194 = vst [vmem:[%s3373_s26 + $0xc0] sm:$0xff] %v193_v24  ;;  %196 = vst [vmem:[%s3373_s26 + $0xc8] sm:$0xff] %v195_v25  ;;  %v199_v27 = vld [vmem:[%s3368_s25 + $0x318] sm:$0xff]  ;;  %v201_v28 = vld [vmem:[%s3368_s25 + $0x380] sm:$0xff] }
  0x1f   : > { %198 = vst [vmem:[%s3373_s26 + $0xd0] sm:$0xff] %v197_v26  ;;  %v203_v29 = vld [vmem:[%s3368_s25 + $0x388] sm:$0xff]  ;;  %200 = vst [vmem:[%s3373_s26 + $0xd8] sm:$0xff] %v199_v27  ;;  %v205_v30 = vld [vmem:[%s3368_s25 + $0x390] sm:$0xff] }
  0x20   : > { %202 = vst [vmem:[%s3373_s26 + $0xe0] sm:$0xff] %v201_v28  ;;  %204 = vst [vmem:[%s3373_s26 + $0xe8] sm:$0xff] %v203_v29  ;;  %v207_v31 = vld [vmem:[%s3368_s25 + $0x398] sm:$0xff]  ;;  %v209_v32 = vld [vmem:[%s3368_s25 + $0x400] sm:$0xff] }
  0x21   : > { %206 = vst [vmem:[%s3373_s26 + $0xf0] sm:$0xff] %v205_v30  ;;  %208 = vst [vmem:[%s3373_s26 + $0xf8] sm:$0xff] %v207_v31  ;;  %v211_v33 = vld [vmem:[%s3368_s25 + $0x408] sm:$0xff]  ;;  %v213_v34 = vld [vmem:[%s3368_s25 + $0x410] sm:$0xff] }
  0x22   : > { %210 = vst [vmem:[%s3373_s26 + $0x100] sm:$0xff] %v209_v32  ;;  %v215_v35 = vld [vmem:[%s3368_s25 + $0x418] sm:$0xff]  ;;  %212 = vst [vmem:[%s3373_s26 + $0x108] sm:$0xff] %v211_v33  ;;  %v217_v36 = vld [vmem:[%s3368_s25 + $0x480] sm:$0xff] }
  0x23   : > { %214 = vst [vmem:[%s3373_s26 + $0x110] sm:$0xff] %v213_v34  ;;  %216 = vst [vmem:[%s3373_s26 + $0x118] sm:$0xff] %v215_v35  ;;  %v219_v37 = vld [vmem:[%s3368_s25 + $0x488] sm:$0xff]  ;;  %v221_v38 = vld [vmem:[%s3368_s25 + $0x490] sm:$0xff] }
  0x24   : > { %218 = vst [vmem:[%s3373_s26 + $0x120] sm:$0xff] %v217_v36  ;;  %220 = vst [vmem:[%s3373_s26 + $0x128] sm:$0xff] %v219_v37  ;;  %v223_v39 = vld [vmem:[%s3368_s25 + $0x498] sm:$0xff]  ;;  %v225_v40 = vld [vmem:[%s3368_s25 + $0x500] sm:$0xff] }
  0x25   : > { %222 = vst [vmem:[%s3373_s26 + $0x130] sm:$0xff] %v221_v38  ;;  %v227_v41 = vld [vmem:[%s3368_s25 + $0x508] sm:$0xff]  ;;  %224 = vst [vmem:[%s3373_s26 + $0x138] sm:$0xff] %v223_v39  ;;  %v229_v42 = vld [vmem:[%s3368_s25 + $0x510] sm:$0xff] }
  0x26   : > { %226 = vst [vmem:[%s3373_s26 + $0x140] sm:$0xff] %v225_v40  ;;  %228 = vst [vmem:[%s3373_s26 + $0x148] sm:$0xff] %v227_v41  ;;  %v231_v43 = vld [vmem:[%s3368_s25 + $0x518] sm:$0xff]  ;;  %v233_v44 = vld [vmem:[%s3368_s25 + $0x580] sm:$0xff] }
  0x27   : > { %230 = vst [vmem:[%s3373_s26 + $0x150] sm:$0xff] %v229_v42  ;;  %232 = vst [vmem:[%s3373_s26 + $0x158] sm:$0xff] %v231_v43  ;;  %v235_v45 = vld [vmem:[%s3368_s25 + $0x588] sm:$0xff]  ;;  %v237_v46 = vld [vmem:[%s3368_s25 + $0x590] sm:$0xff] }
  0x28   : > { %234 = vst [vmem:[%s3373_s26 + $0x160] sm:$0xff] %v233_v44  ;;  %v239_v47 = vld [vmem:[%s3368_s25 + $0x598] sm:$0xff]  ;;  %236 = vst [vmem:[%s3373_s26 + $0x168] sm:$0xff] %v235_v45  ;;  %v241_v48 = vld [vmem:[%s3368_s25 + $0x600] sm:$0xff] }
  0x29   : > { %238 = vst [vmem:[%s3373_s26 + $0x170] sm:$0xff] %v237_v46  ;;  %240 = vst [vmem:[%s3373_s26 + $0x178] sm:$0xff] %v239_v47  ;;  %v243_v49 = vld [vmem:[%s3368_s25 + $0x608] sm:$0xff]  ;;  %v245_v50 = vld [vmem:[%s3368_s25 + $0x610] sm:$0xff] }
  0x2a   : > { %242 = vst [vmem:[%s3373_s26 + $0x180] sm:$0xff] %v241_v48  ;;  %244 = vst [vmem:[%s3373_s26 + $0x188] sm:$0xff] %v243_v49  ;;  %v247_v51 = vld [vmem:[%s3368_s25 + $0x618] sm:$0xff]  ;;  %v249_v52 = vld [vmem:[%s3368_s25 + $0x680] sm:$0xff] }
  0x2b   : > { %246 = vst [vmem:[%s3373_s26 + $0x190] sm:$0xff] %v245_v50  ;;  %v251_v53 = vld [vmem:[%s3368_s25 + $0x688] sm:$0xff]  ;;  %248 = vst [vmem:[%s3373_s26 + $0x198] sm:$0xff] %v247_v51  ;;  %v253_v54 = vld [vmem:[%s3368_s25 + $0x690] sm:$0xff] }
  0x2c   : > { %250 = vst [vmem:[%s3373_s26 + $0x1a0] sm:$0xff] %v249_v52  ;;  %252 = vst [vmem:[%s3373_s26 + $0x1a8] sm:$0xff] %v251_v53  ;;  %v255_v55 = vld [vmem:[%s3368_s25 + $0x698] sm:$0xff]  ;;  %v257_v56 = vld [vmem:[%s3368_s25 + $0x700] sm:$0xff] }
  0x2d   : > { %254 = vst [vmem:[%s3373_s26 + $0x1b0] sm:$0xff] %v253_v54  ;;  %256 = vst [vmem:[%s3373_s26 + $0x1b8] sm:$0xff] %v255_v55  ;;  %v259_v57 = vld [vmem:[%s3368_s25 + $0x708] sm:$0xff]  ;;  %v261_v58 = vld [vmem:[%s3368_s25 + $0x710] sm:$0xff] }
  0x2e   : > { %258 = vst [vmem:[%s3373_s26 + $0x1c0] sm:$0xff] %v257_v56  ;;  %v263_v59 = vld [vmem:[%s3368_s25 + $0x718] sm:$0xff]  ;;  %260 = vst [vmem:[%s3373_s26 + $0x1c8] sm:$0xff] %v259_v57  ;;  %v265_v60 = vld [vmem:[%s3368_s25 + $0x780] sm:$0xff] }
  0x2f   : > { %262 = vst [vmem:[%s3373_s26 + $0x1d0] sm:$0xff] %v261_v58  ;;  %264 = vst [vmem:[%s3373_s26 + $0x1d8] sm:$0xff] %v263_v59  ;;  %v267_v61 = vld [vmem:[%s3368_s25 + $0x788] sm:$0xff]  ;;  %v269_v62 = vld [vmem:[%s3368_s25 + $0x790] sm:$0xff] }
  0x30   : > { %266 = vst [vmem:[%s3373_s26 + $0x1e0] sm:$0xff] %v265_v60  ;;  %268 = vst [vmem:[%s3373_s26 + $0x1e8] sm:$0xff] %v267_v61  ;;  %v271_v63 = vld [vmem:[%s3368_s25 + $0x798] sm:$0xff]  ;;  %v273_v0 = vld [vmem:[%s3368_s25 + $0x800] sm:$0xff] }
  0x31   : > { %270 = vst [vmem:[%s3373_s26 + $0x1f0] sm:$0xff] %v269_v62  ;;  %v275_v1 = vld [vmem:[%s3368_s25 + $0x808] sm:$0xff]  ;;  %272 = vst [vmem:[%s3373_s26 + $0x1f8] sm:$0xff] %v271_v63  ;;  %v277_v2 = vld [vmem:[%s3368_s25 + $0x810] sm:$0xff] }
  0x32   : > { %274 = vst [vmem:[%s3373_s26 + $0x200] sm:$0xff] %v273_v0  ;;  %276 = vst [vmem:[%s3373_s26 + $0x208] sm:$0xff] %v275_v1  ;;  %v279_v3 = vld [vmem:[%s3368_s25 + $0x818] sm:$0xff]  ;;  %v281_v4 = vld [vmem:[%s3368_s25 + $0x880] sm:$0xff] }
  0x33   : > { %278 = vst [vmem:[%s3373_s26 + $0x210] sm:$0xff] %v277_v2  ;;  %280 = vst [vmem:[%s3373_s26 + $0x218] sm:$0xff] %v279_v3  ;;  %v283_v5 = vld [vmem:[%s3368_s25 + $0x888] sm:$0xff]  ;;  %v285_v6 = vld [vmem:[%s3368_s25 + $0x890] sm:$0xff] }
  0x34   : > { %282 = vst [vmem:[%s3373_s26 + $0x220] sm:$0xff] %v281_v4  ;;  %v287_v7 = vld [vmem:[%s3368_s25 + $0x898] sm:$0xff]  ;;  %284 = vst [vmem:[%s3373_s26 + $0x228] sm:$0xff] %v283_v5  ;;  %v289_v8 = vld [vmem:[%s3368_s25 + $0x900] sm:$0xff] }
  0x35   : > { %286 = vst [vmem:[%s3373_s26 + $0x230] sm:$0xff] %v285_v6  ;;  %288 = vst [vmem:[%s3373_s26 + $0x238] sm:$0xff] %v287_v7  ;;  %v291_v9 = vld [vmem:[%s3368_s25 + $0x908] sm:$0xff]  ;;  %v293_v10 = vld [vmem:[%s3368_s25 + $0x910] sm:$0xff] }
  0x36   : > { %290 = vst [vmem:[%s3373_s26 + $0x240] sm:$0xff] %v289_v8  ;;  %292 = vst [vmem:[%s3373_s26 + $0x248] sm:$0xff] %v291_v9  ;;  %v295_v11 = vld [vmem:[%s3368_s25 + $0x918] sm:$0xff]  ;;  %v297_v12 = vld [vmem:[%s3368_s25 + $0x980] sm:$0xff] }
  0x37   : > { %294 = vst [vmem:[%s3373_s26 + $0x250] sm:$0xff] %v293_v10  ;;  %v299_v13 = vld [vmem:[%s3368_s25 + $0x988] sm:$0xff]  ;;  %296 = vst [vmem:[%s3373_s26 + $0x258] sm:$0xff] %v295_v11  ;;  %v301_v14 = vld [vmem:[%s3368_s25 + $0x990] sm:$0xff] }
  0x38   : > { %298 = vst [vmem:[%s3373_s26 + $0x260] sm:$0xff] %v297_v12  ;;  %300 = vst [vmem:[%s3373_s26 + $0x268] sm:$0xff] %v299_v13  ;;  %v303_v15 = vld [vmem:[%s3368_s25 + $0x998] sm:$0xff]  ;;  %v305_v16 = vld [vmem:[%s3368_s25 + $0xa00] sm:$0xff] }
  0x39   : > { %302 = vst [vmem:[%s3373_s26 + $0x270] sm:$0xff] %v301_v14  ;;  %304 = vst [vmem:[%s3373_s26 + $0x278] sm:$0xff] %v303_v15  ;;  %v307_v17 = vld [vmem:[%s3368_s25 + $0xa08] sm:$0xff]  ;;  %v309_v18 = vld [vmem:[%s3368_s25 + $0xa10] sm:$0xff] }
  0x3a   : > { %306 = vst [vmem:[%s3373_s26 + $0x280] sm:$0xff] %v305_v16  ;;  %v311_v19 = vld [vmem:[%s3368_s25 + $0xa18] sm:$0xff]  ;;  %308 = vst [vmem:[%s3373_s26 + $0x288] sm:$0xff] %v307_v17  ;;  %v313_v20 = vld [vmem:[%s3368_s25 + $0xa80] sm:$0xff] }
  0x3b   : > { %310 = vst [vmem:[%s3373_s26 + $0x290] sm:$0xff] %v309_v18  ;;  %312 = vst [vmem:[%s3373_s26 + $0x298] sm:$0xff] %v311_v19  ;;  %v315_v21 = vld [vmem:[%s3368_s25 + $0xa88] sm:$0xff]  ;;  %v317_v22 = vld [vmem:[%s3368_s25 + $0xa90] sm:$0xff] }
  0x3c   : > { %314 = vst [vmem:[%s3373_s26 + $0x2a0] sm:$0xff] %v313_v20  ;;  %316 = vst [vmem:[%s3373_s26 + $0x2a8] sm:$0xff] %v315_v21  ;;  %v319_v23 = vld [vmem:[%s3368_s25 + $0xa98] sm:$0xff]  ;;  %v321_v24 = vld [vmem:[%s3368_s25 + $0xb00] sm:$0xff] }
  0x3d   : > { %318 = vst [vmem:[%s3373_s26 + $0x2b0] sm:$0xff] %v317_v22  ;;  %v323_v25 = vld [vmem:[%s3368_s25 + $0xb08] sm:$0xff]  ;;  %320 = vst [vmem:[%s3373_s26 + $0x2b8] sm:$0xff] %v319_v23  ;;  %v325_v26 = vld [vmem:[%s3368_s25 + $0xb10] sm:$0xff] }
  0x3e   : > { %322 = vst [vmem:[%s3373_s26 + $0x2c0] sm:$0xff] %v321_v24  ;;  %324 = vst [vmem:[%s3373_s26 + $0x2c8] sm:$0xff] %v323_v25  ;;  %v327_v27 = vld [vmem:[%s3368_s25 + $0xb18] sm:$0xff]  ;;  %v329_v28 = vld [vmem:[%s3368_s25 + $0xb80] sm:$0xff] }
  0x3f   : > { %326 = vst [vmem:[%s3373_s26 + $0x2d0] sm:$0xff] %v325_v26  ;;  %328 = vst [vmem:[%s3373_s26 + $0x2d8] sm:$0xff] %v327_v27  ;;  %v331_v29 = vld [vmem:[%s3368_s25 + $0xb88] sm:$0xff]  ;;  %v333_v30 = vld [vmem:[%s3368_s25 + $0xb90] sm:$0xff] }
  0x40   : > { %330 = vst [vmem:[%s3373_s26 + $0x2e0] sm:$0xff] %v329_v28  ;;  %v335_v31 = vld [vmem:[%s3368_s25 + $0xb98] sm:$0xff]  ;;  %332 = vst [vmem:[%s3373_s26 + $0x2e8] sm:$0xff] %v331_v29  ;;  %v337_v32 = vld [vmem:[%s3368_s25 + $0xc00] sm:$0xff] }
  0x41   : > { %334 = vst [vmem:[%s3373_s26 + $0x2f0] sm:$0xff] %v333_v30  ;;  %336 = vst [vmem:[%s3373_s26 + $0x2f8] sm:$0xff] %v335_v31  ;;  %v339_v33 = vld [vmem:[%s3368_s25 + $0xc08] sm:$0xff]  ;;  %v341_v34 = vld [vmem:[%s3368_s25 + $0xc10] sm:$0xff] }
  0x42   : > { %338 = vst [vmem:[%s3373_s26 + $0x300] sm:$0xff] %v337_v32  ;;  %340 = vst [vmem:[%s3373_s26 + $0x308] sm:$0xff] %v339_v33  ;;  %v343_v35 = vld [vmem:[%s3368_s25 + $0xc18] sm:$0xff]  ;;  %v345_v36 = vld [vmem:[%s3368_s25 + $0xc80] sm:$0xff] }
  0x43   : > { %342 = vst [vmem:[%s3373_s26 + $0x310] sm:$0xff] %v341_v34  ;;  %v347_v37 = vld [vmem:[%s3368_s25 + $0xc88] sm:$0xff]  ;;  %344 = vst [vmem:[%s3373_s26 + $0x318] sm:$0xff] %v343_v35  ;;  %v349_v38 = vld [vmem:[%s3368_s25 + $0xc90] sm:$0xff] }
  0x44   : > { %346 = vst [vmem:[%s3373_s26 + $0x320] sm:$0xff] %v345_v36  ;;  %348 = vst [vmem:[%s3373_s26 + $0x328] sm:$0xff] %v347_v37  ;;  %v351_v39 = vld [vmem:[%s3368_s25 + $0xc98] sm:$0xff]  ;;  %v353_v40 = vld [vmem:[%s3368_s25 + $0xd00] sm:$0xff] }
  0x45   : > { %350 = vst [vmem:[%s3373_s26 + $0x330] sm:$0xff] %v349_v38  ;;  %352 = vst [vmem:[%s3373_s26 + $0x338] sm:$0xff] %v351_v39  ;;  %v355_v41 = vld [vmem:[%s3368_s25 + $0xd08] sm:$0xff]  ;;  %v357_v42 = vld [vmem:[%s3368_s25 + $0xd10] sm:$0xff] }
  0x46   : > { %354 = vst [vmem:[%s3373_s26 + $0x340] sm:$0xff] %v353_v40  ;;  %v359_v43 = vld [vmem:[%s3368_s25 + $0xd18] sm:$0xff]  ;;  %356 = vst [vmem:[%s3373_s26 + $0x348] sm:$0xff] %v355_v41  ;;  %v361_v44 = vld [vmem:[%s3368_s25 + $0xd80] sm:$0xff] }
  0x47   : > { %358 = vst [vmem:[%s3373_s26 + $0x350] sm:$0xff] %v357_v42  ;;  %360 = vst [vmem:[%s3373_s26 + $0x358] sm:$0xff] %v359_v43  ;;  %v363_v45 = vld [vmem:[%s3368_s25 + $0xd88] sm:$0xff]  ;;  %v365_v46 = vld [vmem:[%s3368_s25 + $0xd90] sm:$0xff] }
  0x48   : > { %362 = vst [vmem:[%s3373_s26 + $0x360] sm:$0xff] %v361_v44  ;;  %364 = vst [vmem:[%s3373_s26 + $0x368] sm:$0xff] %v363_v45  ;;  %v367_v47 = vld [vmem:[%s3368_s25 + $0xd98] sm:$0xff]  ;;  %v369_v48 = vld [vmem:[%s3368_s25 + $0xe00] sm:$0xff] }
  0x49   : > { %366 = vst [vmem:[%s3373_s26 + $0x370] sm:$0xff] %v365_v46  ;;  %v371_v49 = vld [vmem:[%s3368_s25 + $0xe08] sm:$0xff]  ;;  %368 = vst [vmem:[%s3373_s26 + $0x378] sm:$0xff] %v367_v47  ;;  %v373_v50 = vld [vmem:[%s3368_s25 + $0xe10] sm:$0xff] }
  0x4a   : > { %370 = vst [vmem:[%s3373_s26 + $0x380] sm:$0xff] %v369_v48  ;;  %372 = vst [vmem:[%s3373_s26 + $0x388] sm:$0xff] %v371_v49  ;;  %v375_v51 = vld [vmem:[%s3368_s25 + $0xe18] sm:$0xff]  ;;  %v377_v52 = vld [vmem:[%s3368_s25 + $0xe80] sm:$0xff] }
  0x4b   : > { %374 = vst [vmem:[%s3373_s26 + $0x390] sm:$0xff] %v373_v50  ;;  %376 = vst [vmem:[%s3373_s26 + $0x398] sm:$0xff] %v375_v51  ;;  %v379_v53 = vld [vmem:[%s3368_s25 + $0xe88] sm:$0xff]  ;;  %v381_v54 = vld [vmem:[%s3368_s25 + $0xe90] sm:$0xff] }
  0x4c   : > { %378 = vst [vmem:[%s3373_s26 + $0x3a0] sm:$0xff] %v377_v52  ;;  %v383_v55 = vld [vmem:[%s3368_s25 + $0xe98] sm:$0xff]  ;;  %380 = vst [vmem:[%s3373_s26 + $0x3a8] sm:$0xff] %v379_v53  ;;  %v385_v56 = vld [vmem:[%s3368_s25 + $0xf00] sm:$0xff] }
  0x4d   : > { %382 = vst [vmem:[%s3373_s26 + $0x3b0] sm:$0xff] %v381_v54  ;;  %384 = vst [vmem:[%s3373_s26 + $0x3b8] sm:$0xff] %v383_v55  ;;  %v387_v57 = vld [vmem:[%s3368_s25 + $0xf08] sm:$0xff]  ;;  %v389_v58 = vld [vmem:[%s3368_s25 + $0xf10] sm:$0xff] }
  0x4e   : > { %386 = vst [vmem:[%s3373_s26 + $0x3c0] sm:$0xff] %v385_v56  ;;  %388 = vst [vmem:[%s3373_s26 + $0x3c8] sm:$0xff] %v387_v57  ;;  %v391_v59 = vld [vmem:[%s3368_s25 + $0xf18] sm:$0xff]  ;;  %v393_v60 = vld [vmem:[%s3368_s25 + $0xf80] sm:$0xff] }
  0x4f   : > { %390 = vst [vmem:[%s3373_s26 + $0x3d0] sm:$0xff] %v389_v58  ;;  %v395_v61 = vld [vmem:[%s3368_s25 + $0xf88] sm:$0xff]  ;;  %392 = vst [vmem:[%s3373_s26 + $0x3d8] sm:$0xff] %v391_v59  ;;  %v397_v62 = vld [vmem:[%s3368_s25 + $0xf90] sm:$0xff] }
  0x50   : > { %394 = vst [vmem:[%s3373_s26 + $0x3e0] sm:$0xff] %v393_v60  ;;  %396 = vst [vmem:[%s3373_s26 + $0x3e8] sm:$0xff] %v395_v61  ;;  %v399_v63 = vld [vmem:[%s3368_s25 + $0xf98] sm:$0xff]  ;;  %v401_v0 = vld [vmem:[%s3368_s25 + $0x1000] sm:$0xff] }
  0x51   : > { %398 = vst [vmem:[%s3373_s26 + $0x3f0] sm:$0xff] %v397_v62  ;;  %400 = vst [vmem:[%s3373_s26 + $0x3f8] sm:$0xff] %v399_v63  ;;  %v403_v1 = vld [vmem:[%s3368_s25 + $0x1008] sm:$0xff]  ;;  %v405_v2 = vld [vmem:[%s3368_s25 + $0x1010] sm:$0xff] }
  0x52   : > { %402 = vst [vmem:[%s3373_s26 + $0x400] sm:$0xff] %v401_v0  ;;  %v407_v3 = vld [vmem:[%s3368_s25 + $0x1018] sm:$0xff]  ;;  %404 = vst [vmem:[%s3373_s26 + $0x408] sm:$0xff] %v403_v1  ;;  %v409_v4 = vld [vmem:[%s3368_s25 + $0x1080] sm:$0xff] }
  0x53   : > { %406 = vst [vmem:[%s3373_s26 + $0x410] sm:$0xff] %v405_v2  ;;  %408 = vst [vmem:[%s3373_s26 + $0x418] sm:$0xff] %v407_v3  ;;  %v411_v5 = vld [vmem:[%s3368_s25 + $0x1088] sm:$0xff]  ;;  %v413_v6 = vld [vmem:[%s3368_s25 + $0x1090] sm:$0xff] }
  0x54   : > { %410 = vst [vmem:[%s3373_s26 + $0x420] sm:$0xff] %v409_v4  ;;  %412 = vst [vmem:[%s3373_s26 + $0x428] sm:$0xff] %v411_v5  ;;  %v415_v7 = vld [vmem:[%s3368_s25 + $0x1098] sm:$0xff]  ;;  %v417_v8 = vld [vmem:[%s3368_s25 + $0x1100] sm:$0xff] }
  0x55   : > { %414 = vst [vmem:[%s3373_s26 + $0x430] sm:$0xff] %v413_v6  ;;  %v419_v9 = vld [vmem:[%s3368_s25 + $0x1108] sm:$0xff]  ;;  %416 = vst [vmem:[%s3373_s26 + $0x438] sm:$0xff] %v415_v7  ;;  %v421_v10 = vld [vmem:[%s3368_s25 + $0x1110] sm:$0xff] }
  0x56   : > { %418 = vst [vmem:[%s3373_s26 + $0x440] sm:$0xff] %v417_v8  ;;  %420 = vst [vmem:[%s3373_s26 + $0x448] sm:$0xff] %v419_v9  ;;  %v423_v11 = vld [vmem:[%s3368_s25 + $0x1118] sm:$0xff]  ;;  %v425_v12 = vld [vmem:[%s3368_s25 + $0x1180] sm:$0xff] }
  0x57   : > { %422 = vst [vmem:[%s3373_s26 + $0x450] sm:$0xff] %v421_v10  ;;  %424 = vst [vmem:[%s3373_s26 + $0x458] sm:$0xff] %v423_v11  ;;  %v427_v13 = vld [vmem:[%s3368_s25 + $0x1188] sm:$0xff]  ;;  %v429_v14 = vld [vmem:[%s3368_s25 + $0x1190] sm:$0xff] }
  0x58   : > { %426 = vst [vmem:[%s3373_s26 + $0x460] sm:$0xff] %v425_v12  ;;  %v431_v15 = vld [vmem:[%s3368_s25 + $0x1198] sm:$0xff]  ;;  %428 = vst [vmem:[%s3373_s26 + $0x468] sm:$0xff] %v427_v13  ;;  %v433_v16 = vld [vmem:[%s3368_s25 + $0x1200] sm:$0xff] }
  0x59   : > { %430 = vst [vmem:[%s3373_s26 + $0x470] sm:$0xff] %v429_v14  ;;  %432 = vst [vmem:[%s3373_s26 + $0x478] sm:$0xff] %v431_v15  ;;  %v435_v17 = vld [vmem:[%s3368_s25 + $0x1208] sm:$0xff]  ;;  %v437_v18 = vld [vmem:[%s3368_s25 + $0x1210] sm:$0xff] }
  0x5a   : > { %434 = vst [vmem:[%s3373_s26 + $0x480] sm:$0xff] %v433_v16  ;;  %436 = vst [vmem:[%s3373_s26 + $0x488] sm:$0xff] %v435_v17  ;;  %v439_v19 = vld [vmem:[%s3368_s25 + $0x1218] sm:$0xff]  ;;  %v441_v20 = vld [vmem:[%s3368_s25 + $0x1280] sm:$0xff] }
  0x5b   : > { %438 = vst [vmem:[%s3373_s26 + $0x490] sm:$0xff] %v437_v18  ;;  %v443_v21 = vld [vmem:[%s3368_s25 + $0x1288] sm:$0xff]  ;;  %440 = vst [vmem:[%s3373_s26 + $0x498] sm:$0xff] %v439_v19  ;;  %v445_v22 = vld [vmem:[%s3368_s25 + $0x1290] sm:$0xff] }
  0x5c   : > { %442 = vst [vmem:[%s3373_s26 + $0x4a0] sm:$0xff] %v441_v20  ;;  %444 = vst [vmem:[%s3373_s26 + $0x4a8] sm:$0xff] %v443_v21  ;;  %v447_v23 = vld [vmem:[%s3368_s25 + $0x1298] sm:$0xff]  ;;  %v449_v24 = vld [vmem:[%s3368_s25 + $0x1300] sm:$0xff] }
  0x5d   : > { %446 = vst [vmem:[%s3373_s26 + $0x4b0] sm:$0xff] %v445_v22  ;;  %448 = vst [vmem:[%s3373_s26 + $0x4b8] sm:$0xff] %v447_v23  ;;  %v451_v25 = vld [vmem:[%s3368_s25 + $0x1308] sm:$0xff]  ;;  %v453_v26 = vld [vmem:[%s3368_s25 + $0x1310] sm:$0xff] }
  0x5e   : > { %450 = vst [vmem:[%s3373_s26 + $0x4c0] sm:$0xff] %v449_v24  ;;  %v455_v27 = vld [vmem:[%s3368_s25 + $0x1318] sm:$0xff]  ;;  %452 = vst [vmem:[%s3373_s26 + $0x4c8] sm:$0xff] %v451_v25  ;;  %v457_v28 = vld [vmem:[%s3368_s25 + $0x1380] sm:$0xff] }
  0x5f   : > { %454 = vst [vmem:[%s3373_s26 + $0x4d0] sm:$0xff] %v453_v26  ;;  %456 = vst [vmem:[%s3373_s26 + $0x4d8] sm:$0xff] %v455_v27  ;;  %v459_v29 = vld [vmem:[%s3368_s25 + $0x1388] sm:$0xff]  ;;  %v461_v30 = vld [vmem:[%s3368_s25 + $0x1390] sm:$0xff] }
  0x60   : > { %458 = vst [vmem:[%s3373_s26 + $0x4e0] sm:$0xff] %v457_v28  ;;  %460 = vst [vmem:[%s3373_s26 + $0x4e8] sm:$0xff] %v459_v29  ;;  %v463_v31 = vld [vmem:[%s3368_s25 + $0x1398] sm:$0xff]  ;;  %v465_v32 = vld [vmem:[%s3368_s25 + $0x1400] sm:$0xff] }
  0x61   : > { %462 = vst [vmem:[%s3373_s26 + $0x4f0] sm:$0xff] %v461_v30  ;;  %v467_v33 = vld [vmem:[%s3368_s25 + $0x1408] sm:$0xff]  ;;  %464 = vst [vmem:[%s3373_s26 + $0x4f8] sm:$0xff] %v463_v31  ;;  %v469_v34 = vld [vmem:[%s3368_s25 + $0x1410] sm:$0xff] }
  0x62   : > { %466 = vst [vmem:[%s3373_s26 + $0x500] sm:$0xff] %v465_v32  ;;  %468 = vst [vmem:[%s3373_s26 + $0x508] sm:$0xff] %v467_v33  ;;  %v471_v35 = vld [vmem:[%s3368_s25 + $0x1418] sm:$0xff]  ;;  %v473_v36 = vld [vmem:[%s3368_s25 + $0x1480] sm:$0xff] }
  0x63   : > { %470 = vst [vmem:[%s3373_s26 + $0x510] sm:$0xff] %v469_v34  ;;  %472 = vst [vmem:[%s3373_s26 + $0x518] sm:$0xff] %v471_v35  ;;  %v475_v37 = vld [vmem:[%s3368_s25 + $0x1488] sm:$0xff]  ;;  %v477_v38 = vld [vmem:[%s3368_s25 + $0x1490] sm:$0xff] }
  0x64   : > { %474 = vst [vmem:[%s3373_s26 + $0x520] sm:$0xff] %v473_v36  ;;  %v479_v39 = vld [vmem:[%s3368_s25 + $0x1498] sm:$0xff]  ;;  %476 = vst [vmem:[%s3373_s26 + $0x528] sm:$0xff] %v475_v37  ;;  %v481_v40 = vld [vmem:[%s3368_s25 + $0x1500] sm:$0xff] }
  0x65   : > { %478 = vst [vmem:[%s3373_s26 + $0x530] sm:$0xff] %v477_v38  ;;  %480 = vst [vmem:[%s3373_s26 + $0x538] sm:$0xff] %v479_v39  ;;  %v483_v41 = vld [vmem:[%s3368_s25 + $0x1508] sm:$0xff]  ;;  %v485_v42 = vld [vmem:[%s3368_s25 + $0x1510] sm:$0xff] }
  0x66   : > { %482 = vst [vmem:[%s3373_s26 + $0x540] sm:$0xff] %v481_v40  ;;  %484 = vst [vmem:[%s3373_s26 + $0x548] sm:$0xff] %v483_v41  ;;  %v487_v43 = vld [vmem:[%s3368_s25 + $0x1518] sm:$0xff]  ;;  %v489_v44 = vld [vmem:[%s3368_s25 + $0x1580] sm:$0xff] }
  0x67   : > { %486 = vst [vmem:[%s3373_s26 + $0x550] sm:$0xff] %v485_v42  ;;  %v491_v45 = vld [vmem:[%s3368_s25 + $0x1588] sm:$0xff]  ;;  %488 = vst [vmem:[%s3373_s26 + $0x558] sm:$0xff] %v487_v43  ;;  %v493_v46 = vld [vmem:[%s3368_s25 + $0x1590] sm:$0xff] }
  0x68   : > { %490 = vst [vmem:[%s3373_s26 + $0x560] sm:$0xff] %v489_v44  ;;  %492 = vst [vmem:[%s3373_s26 + $0x568] sm:$0xff] %v491_v45  ;;  %v495_v47 = vld [vmem:[%s3368_s25 + $0x1598] sm:$0xff]  ;;  %v497_v48 = vld [vmem:[%s3368_s25 + $0x1600] sm:$0xff] }
  0x69   : > { %494 = vst [vmem:[%s3373_s26 + $0x570] sm:$0xff] %v493_v46  ;;  %496 = vst [vmem:[%s3373_s26 + $0x578] sm:$0xff] %v495_v47  ;;  %v499_v49 = vld [vmem:[%s3368_s25 + $0x1608] sm:$0xff]  ;;  %v501_v50 = vld [vmem:[%s3368_s25 + $0x1610] sm:$0xff] }
  0x6a   : > { %498 = vst [vmem:[%s3373_s26 + $0x580] sm:$0xff] %v497_v48  ;;  %v503_v51 = vld [vmem:[%s3368_s25 + $0x1618] sm:$0xff]  ;;  %500 = vst [vmem:[%s3373_s26 + $0x588] sm:$0xff] %v499_v49  ;;  %v505_v52 = vld [vmem:[%s3368_s25 + $0x1680] sm:$0xff] }
  0x6b   : > { %502 = vst [vmem:[%s3373_s26 + $0x590] sm:$0xff] %v501_v50  ;;  %504 = vst [vmem:[%s3373_s26 + $0x598] sm:$0xff] %v503_v51  ;;  %v507_v53 = vld [vmem:[%s3368_s25 + $0x1688] sm:$0xff]  ;;  %v509_v54 = vld [vmem:[%s3368_s25 + $0x1690] sm:$0xff] }
  0x6c   : > { %506 = vst [vmem:[%s3373_s26 + $0x5a0] sm:$0xff] %v505_v52  ;;  %508 = vst [vmem:[%s3373_s26 + $0x5a8] sm:$0xff] %v507_v53  ;;  %v511_v55 = vld [vmem:[%s3368_s25 + $0x1698] sm:$0xff]  ;;  %v513_v56 = vld [vmem:[%s3368_s25 + $0x1700] sm:$0xff] }
  0x6d   : > { %510 = vst [vmem:[%s3373_s26 + $0x5b0] sm:$0xff] %v509_v54  ;;  %v515_v57 = vld [vmem:[%s3368_s25 + $0x1708] sm:$0xff]  ;;  %512 = vst [vmem:[%s3373_s26 + $0x5b8] sm:$0xff] %v511_v55  ;;  %v517_v58 = vld [vmem:[%s3368_s25 + $0x1710] sm:$0xff] }
  0x6e   : > { %514 = vst [vmem:[%s3373_s26 + $0x5c0] sm:$0xff] %v513_v56  ;;  %516 = vst [vmem:[%s3373_s26 + $0x5c8] sm:$0xff] %v515_v57  ;;  %v519_v59 = vld [vmem:[%s3368_s25 + $0x1718] sm:$0xff]  ;;  %v521_v60 = vld [vmem:[%s3368_s25 + $0x1780] sm:$0xff] }
  0x6f   : > { %518 = vst [vmem:[%s3373_s26 + $0x5d0] sm:$0xff] %v517_v58  ;;  %520 = vst [vmem:[%s3373_s26 + $0x5d8] sm:$0xff] %v519_v59  ;;  %v523_v61 = vld [vmem:[%s3368_s25 + $0x1788] sm:$0xff]  ;;  %v525_v62 = vld [vmem:[%s3368_s25 + $0x1790] sm:$0xff] }
  0x70   : > { %522 = vst [vmem:[%s3373_s26 + $0x5e0] sm:$0xff] %v521_v60  ;;  %v527_v63 = vld [vmem:[%s3368_s25 + $0x1798] sm:$0xff]  ;;  %524 = vst [vmem:[%s3373_s26 + $0x5e8] sm:$0xff] %v523_v61  ;;  %v529_v0 = vld [vmem:[%s3368_s25 + $0x1800] sm:$0xff] }
  0x71   : > { %526 = vst [vmem:[%s3373_s26 + $0x5f0] sm:$0xff] %v525_v62  ;;  %528 = vst [vmem:[%s3373_s26 + $0x5f8] sm:$0xff] %v527_v63  ;;  %v531_v1 = vld [vmem:[%s3368_s25 + $0x1808] sm:$0xff]  ;;  %v533_v2 = vld [vmem:[%s3368_s25 + $0x1810] sm:$0xff] }
  0x72   : > { %530 = vst [vmem:[%s3373_s26 + $0x600] sm:$0xff] %v529_v0  ;;  %532 = vst [vmem:[%s3373_s26 + $0x608] sm:$0xff] %v531_v1  ;;  %v535_v3 = vld [vmem:[%s3368_s25 + $0x1818] sm:$0xff]  ;;  %v537_v4 = vld [vmem:[%s3368_s25 + $0x1880] sm:$0xff] }
  0x73   : > { %534 = vst [vmem:[%s3373_s26 + $0x610] sm:$0xff] %v533_v2  ;;  %v539_v5 = vld [vmem:[%s3368_s25 + $0x1888] sm:$0xff]  ;;  %536 = vst [vmem:[%s3373_s26 + $0x618] sm:$0xff] %v535_v3  ;;  %v541_v6 = vld [vmem:[%s3368_s25 + $0x1890] sm:$0xff] }
  0x74   : > { %538 = vst [vmem:[%s3373_s26 + $0x620] sm:$0xff] %v537_v4  ;;  %540 = vst [vmem:[%s3373_s26 + $0x628] sm:$0xff] %v539_v5  ;;  %v543_v7 = vld [vmem:[%s3368_s25 + $0x1898] sm:$0xff]  ;;  %v545_v8 = vld [vmem:[%s3368_s25 + $0x1900] sm:$0xff] }
  0x75   : > { %542 = vst [vmem:[%s3373_s26 + $0x630] sm:$0xff] %v541_v6  ;;  %544 = vst [vmem:[%s3373_s26 + $0x638] sm:$0xff] %v543_v7  ;;  %v547_v9 = vld [vmem:[%s3368_s25 + $0x1908] sm:$0xff]  ;;  %v549_v10 = vld [vmem:[%s3368_s25 + $0x1910] sm:$0xff] }
  0x76   : > { %546 = vst [vmem:[%s3373_s26 + $0x640] sm:$0xff] %v545_v8  ;;  %v551_v11 = vld [vmem:[%s3368_s25 + $0x1918] sm:$0xff]  ;;  %548 = vst [vmem:[%s3373_s26 + $0x648] sm:$0xff] %v547_v9  ;;  %v553_v12 = vld [vmem:[%s3368_s25 + $0x1980] sm:$0xff] }
  0x77   : > { %550 = vst [vmem:[%s3373_s26 + $0x650] sm:$0xff] %v549_v10  ;;  %552 = vst [vmem:[%s3373_s26 + $0x658] sm:$0xff] %v551_v11  ;;  %v555_v13 = vld [vmem:[%s3368_s25 + $0x1988] sm:$0xff]  ;;  %v557_v14 = vld [vmem:[%s3368_s25 + $0x1990] sm:$0xff] }
  0x78   : > { %554 = vst [vmem:[%s3373_s26 + $0x660] sm:$0xff] %v553_v12  ;;  %556 = vst [vmem:[%s3373_s26 + $0x668] sm:$0xff] %v555_v13  ;;  %v559_v15 = vld [vmem:[%s3368_s25 + $0x1998] sm:$0xff]  ;;  %v561_v16 = vld [vmem:[%s3368_s25 + $0x1a00] sm:$0xff] }
  0x79   : > { %558 = vst [vmem:[%s3373_s26 + $0x670] sm:$0xff] %v557_v14  ;;  %v563_v17 = vld [vmem:[%s3368_s25 + $0x1a08] sm:$0xff]  ;;  %560 = vst [vmem:[%s3373_s26 + $0x678] sm:$0xff] %v559_v15  ;;  %v565_v18 = vld [vmem:[%s3368_s25 + $0x1a10] sm:$0xff] }
  0x7a   : > { %562 = vst [vmem:[%s3373_s26 + $0x680] sm:$0xff] %v561_v16  ;;  %564 = vst [vmem:[%s3373_s26 + $0x688] sm:$0xff] %v563_v17  ;;  %v567_v19 = vld [vmem:[%s3368_s25 + $0x1a18] sm:$0xff]  ;;  %v569_v20 = vld [vmem:[%s3368_s25 + $0x1a80] sm:$0xff] }
  0x7b   : > { %566 = vst [vmem:[%s3373_s26 + $0x690] sm:$0xff] %v565_v18  ;;  %568 = vst [vmem:[%s3373_s26 + $0x698] sm:$0xff] %v567_v19  ;;  %v571_v21 = vld [vmem:[%s3368_s25 + $0x1a88] sm:$0xff]  ;;  %v573_v22 = vld [vmem:[%s3368_s25 + $0x1a90] sm:$0xff] }
  0x7c   : > { %570 = vst [vmem:[%s3373_s26 + $0x6a0] sm:$0xff] %v569_v20  ;;  %v575_v23 = vld [vmem:[%s3368_s25 + $0x1a98] sm:$0xff]  ;;  %572 = vst [vmem:[%s3373_s26 + $0x6a8] sm:$0xff] %v571_v21  ;;  %v577_v24 = vld [vmem:[%s3368_s25 + $0x1b00] sm:$0xff] }
  0x7d   : > { %574 = vst [vmem:[%s3373_s26 + $0x6b0] sm:$0xff] %v573_v22  ;;  %576 = vst [vmem:[%s3373_s26 + $0x6b8] sm:$0xff] %v575_v23  ;;  %v579_v25 = vld [vmem:[%s3368_s25 + $0x1b08] sm:$0xff]  ;;  %v581_v26 = vld [vmem:[%s3368_s25 + $0x1b10] sm:$0xff] }
  0x7e   : > { %578 = vst [vmem:[%s3373_s26 + $0x6c0] sm:$0xff] %v577_v24  ;;  %580 = vst [vmem:[%s3373_s26 + $0x6c8] sm:$0xff] %v579_v25  ;;  %v583_v27 = vld [vmem:[%s3368_s25 + $0x1b18] sm:$0xff]  ;;  %v585_v28 = vld [vmem:[%s3368_s25 + $0x1b80] sm:$0xff] }
  0x7f   : > { %582 = vst [vmem:[%s3373_s26 + $0x6d0] sm:$0xff] %v581_v26  ;;  %v587_v29 = vld [vmem:[%s3368_s25 + $0x1b88] sm:$0xff]  ;;  %584 = vst [vmem:[%s3373_s26 + $0x6d8] sm:$0xff] %v583_v27  ;;  %v589_v30 = vld [vmem:[%s3368_s25 + $0x1b90] sm:$0xff] }
  0x80   : > { %586 = vst [vmem:[%s3373_s26 + $0x6e0] sm:$0xff] %v585_v28  ;;  %588 = vst [vmem:[%s3373_s26 + $0x6e8] sm:$0xff] %v587_v29  ;;  %v591_v31 = vld [vmem:[%s3368_s25 + $0x1b98] sm:$0xff]  ;;  %v593_v32 = vld [vmem:[%s3368_s25 + $0x1c00] sm:$0xff] }
  0x81   : > { %590 = vst [vmem:[%s3373_s26 + $0x6f0] sm:$0xff] %v589_v30  ;;  %592 = vst [vmem:[%s3373_s26 + $0x6f8] sm:$0xff] %v591_v31  ;;  %v595_v33 = vld [vmem:[%s3368_s25 + $0x1c08] sm:$0xff]  ;;  %v597_v34 = vld [vmem:[%s3368_s25 + $0x1c10] sm:$0xff] }
  0x82   : > { %594 = vst [vmem:[%s3373_s26 + $0x700] sm:$0xff] %v593_v32  ;;  %v599_v35 = vld [vmem:[%s3368_s25 + $0x1c18] sm:$0xff]  ;;  %596 = vst [vmem:[%s3373_s26 + $0x708] sm:$0xff] %v595_v33  ;;  %v601_v36 = vld [vmem:[%s3368_s25 + $0x1c80] sm:$0xff] }
  0x83   : > { %598 = vst [vmem:[%s3373_s26 + $0x710] sm:$0xff] %v597_v34  ;;  %600 = vst [vmem:[%s3373_s26 + $0x718] sm:$0xff] %v599_v35  ;;  %v603_v37 = vld [vmem:[%s3368_s25 + $0x1c88] sm:$0xff]  ;;  %v605_v38 = vld [vmem:[%s3368_s25 + $0x1c90] sm:$0xff] }
  0x84   : > { %602 = vst [vmem:[%s3373_s26 + $0x720] sm:$0xff] %v601_v36  ;;  %604 = vst [vmem:[%s3373_s26 + $0x728] sm:$0xff] %v603_v37  ;;  %v607_v39 = vld [vmem:[%s3368_s25 + $0x1c98] sm:$0xff]  ;;  %v609_v40 = vld [vmem:[%s3368_s25 + $0x1d00] sm:$0xff] }
  0x85   : > { %606 = vst [vmem:[%s3373_s26 + $0x730] sm:$0xff] %v605_v38  ;;  %v611_v41 = vld [vmem:[%s3368_s25 + $0x1d08] sm:$0xff]  ;;  %608 = vst [vmem:[%s3373_s26 + $0x738] sm:$0xff] %v607_v39  ;;  %v613_v42 = vld [vmem:[%s3368_s25 + $0x1d10] sm:$0xff] }
  0x86   : > { %610 = vst [vmem:[%s3373_s26 + $0x740] sm:$0xff] %v609_v40  ;;  %612 = vst [vmem:[%s3373_s26 + $0x748] sm:$0xff] %v611_v41  ;;  %v615_v43 = vld [vmem:[%s3368_s25 + $0x1d18] sm:$0xff]  ;;  %v617_v44 = vld [vmem:[%s3368_s25 + $0x1d80] sm:$0xff] }
  0x87   : > { %614 = vst [vmem:[%s3373_s26 + $0x750] sm:$0xff] %v613_v42  ;;  %616 = vst [vmem:[%s3373_s26 + $0x758] sm:$0xff] %v615_v43  ;;  %v619_v45 = vld [vmem:[%s3368_s25 + $0x1d88] sm:$0xff]  ;;  %v621_v46 = vld [vmem:[%s3368_s25 + $0x1d90] sm:$0xff] }
  0x88   : > { %618 = vst [vmem:[%s3373_s26 + $0x760] sm:$0xff] %v617_v44  ;;  %v623_v47 = vld [vmem:[%s3368_s25 + $0x1d98] sm:$0xff]  ;;  %620 = vst [vmem:[%s3373_s26 + $0x768] sm:$0xff] %v619_v45  ;;  %v625_v48 = vld [vmem:[%s3368_s25 + $0x1e00] sm:$0xff] }
  0x89   : > { %622 = vst [vmem:[%s3373_s26 + $0x770] sm:$0xff] %v621_v46  ;;  %624 = vst [vmem:[%s3373_s26 + $0x778] sm:$0xff] %v623_v47  ;;  %v627_v49 = vld [vmem:[%s3368_s25 + $0x1e08] sm:$0xff]  ;;  %v629_v50 = vld [vmem:[%s3368_s25 + $0x1e10] sm:$0xff] }
  0x8a   : > { %626 = vst [vmem:[%s3373_s26 + $0x780] sm:$0xff] %v625_v48  ;;  %628 = vst [vmem:[%s3373_s26 + $0x788] sm:$0xff] %v627_v49  ;;  %v631_v51 = vld [vmem:[%s3368_s25 + $0x1e18] sm:$0xff]  ;;  %v633_v52 = vld [vmem:[%s3368_s25 + $0x1e80] sm:$0xff] }
  0x8b   : > { %630 = vst [vmem:[%s3373_s26 + $0x790] sm:$0xff] %v629_v50  ;;  %v635_v53 = vld [vmem:[%s3368_s25 + $0x1e88] sm:$0xff]  ;;  %632 = vst [vmem:[%s3373_s26 + $0x798] sm:$0xff] %v631_v51  ;;  %v637_v54 = vld [vmem:[%s3368_s25 + $0x1e90] sm:$0xff] }
  0x8c   : > { %634 = vst [vmem:[%s3373_s26 + $0x7a0] sm:$0xff] %v633_v52  ;;  %636 = vst [vmem:[%s3373_s26 + $0x7a8] sm:$0xff] %v635_v53  ;;  %v639_v55 = vld [vmem:[%s3368_s25 + $0x1e98] sm:$0xff]  ;;  %v641_v56 = vld [vmem:[%s3368_s25 + $0x1f00] sm:$0xff] }
  0x8d   : > { %638 = vst [vmem:[%s3373_s26 + $0x7b0] sm:$0xff] %v637_v54  ;;  %640 = vst [vmem:[%s3373_s26 + $0x7b8] sm:$0xff] %v639_v55  ;;  %v643_v57 = vld [vmem:[%s3368_s25 + $0x1f08] sm:$0xff]  ;;  %v645_v58 = vld [vmem:[%s3368_s25 + $0x1f10] sm:$0xff] }
  0x8e   : > { %642 = vst [vmem:[%s3373_s26 + $0x7c0] sm:$0xff] %v641_v56  ;;  %v647_v59 = vld [vmem:[%s3368_s25 + $0x1f18] sm:$0xff]  ;;  %644 = vst [vmem:[%s3373_s26 + $0x7c8] sm:$0xff] %v643_v57  ;;  %v649_v60 = vld [vmem:[%s3368_s25 + $0x1f80] sm:$0xff] }
  0x8f   : > { %646 = vst [vmem:[%s3373_s26 + $0x7d0] sm:$0xff] %v645_v58  ;;  %648 = vst [vmem:[%s3373_s26 + $0x7d8] sm:$0xff] %v647_v59  ;;  %v651_v61 = vld [vmem:[%s3368_s25 + $0x1f88] sm:$0xff]  ;;  %v653_v62 = vld [vmem:[%s3368_s25 + $0x1f90] sm:$0xff] }
  0x90   : > { %650 = vst [vmem:[%s3373_s26 + $0x7e0] sm:$0xff] %v649_v60  ;;  %652 = vst [vmem:[%s3373_s26 + $0x7e8] sm:$0xff] %v651_v61  ;;  %v655_v63 = vld [vmem:[%s3368_s25 + $0x1f98] sm:$0xff] }
  0x91   : > { %654 = vst [vmem:[%s3373_s26 + $0x7f0] sm:$0xff] %v653_v62  ;;  %656 = vst [vmem:[%s3373_s26 + $0x7f8] sm:$0xff] %v655_v63 }
  0x92 PF: > { %p2970_p5 = scmp.ge.s32.totalorder %s3309_s14, 1  ;;  %p661_p6 = scmp.lt.s32.totalorder %s3309_s14, 5 }
  0x94   : > { %p662_p7 = pnand %p2970_p5, %p661_p6 }
  0x95   : > { %s668_s27 = sand.u32 (!%p662_p7), 1, %s3301_s12   ;;  %v3890_v0 = vld [vmem:[%s4467_s0] sm:$0xff] (!%p662_p7)  ;;  %s3239_s7 = sshll.u32 (!%p662_p7), %s3348_s15, 6 }
  0x96   : > { %665 = sbr.rel (%p662_p7) target bundleno = 856 (0x358), region = 51  ;;  %s2971_s30 = sshll.u32 (!%p662_p7), %s668_s27, 11  ;;  %v3894_v1 = vcombine.high (!%p662_p7), %v3890_v0, %v3890_v0 }
  0x97   : > { %s3896_s4 = scalar_lea.vmem (!%p662_p7), [#allocation5], %s2971_s30  ;;  %s2569_s8 = scalar_lea.vmem (!%p662_p7), [#allocation2], %s3239_s7 }
  0x98   : > { %v689_v2 = vld [vmem:[%s3896_s4] sm:$0xff] (!%p662_p7)  ;;  %v690_v4 = vld [vmem:[%s3896_s4 + $0x8] sm:$0xff] (!%p662_p7)  ;;  %2271 = vmatprep.mubr.bf16.mxu0 (!%p662_p7), %v3894_v1  ;;  %2353 = vmatprep.mubr.bf16.mxu1 (!%p662_p7), %v3894_v1  ;;  %p3234_p8 = scmp.ne.s32.totalorder (!%p662_p7), %s3348_s15, 0 }
  0x99   : > { %v693_v3 = vld [vmem:[%s3896_s4 + $0x20] sm:$0xff] (!%p662_p7)  ;;  %v694_v6 = vld [vmem:[%s3896_s4 + $0x28] sm:$0xff] (!%p662_p7) }
  0x9a   : > { %v2977_v5 = vcombine.high (!%p662_p7), %v689_v2, %v693_v3  ;;  %v2976_v7 = vcombine.low (!%p662_p7), %v689_v2, %v693_v3  ;;  %v697_v8 = vld [vmem:[%s3896_s4 + $0x40] sm:$0xff] (!%p662_p7)  ;;  %v2979_v10 = vcombine.high (!%p662_p7), %v690_v4, %v694_v6  ;;  %v2978_v11 = vcombine.low (!%p662_p7), %v690_v4, %v694_v6  ;;  %v698_v13 = vld [vmem:[%s3896_s4 + $0x48] sm:$0xff] (!%p662_p7) }
  0x9b   : > { %v701_v9 = vld [vmem:[%s3896_s4 + $0x60] sm:$0xff] (!%p662_p7)  ;;  %v702_v14 = vld [vmem:[%s3896_s4 + $0x68] sm:$0xff] (!%p662_p7) }
  0x9c   : > { %v2985_v12 = vcombine.high (!%p662_p7), %v697_v8, %v701_v9  ;;  %v705_v15 = vld [vmem:[%s3896_s4 + $0x80] sm:$0xff] (!%p662_p7)  ;;  %2239 = vmatprep.subr.bf16.mxu0 (!%p662_p7), %v2977_v5  ;;  %v2987_v16 = vcombine.high (!%p662_p7), %v698_v13, %v702_v14  ;;  %v706_v18 = vld [vmem:[%s3896_s4 + $0x88] sm:$0xff] (!%p662_p7)  ;;  %2321 = vmatprep.subr.bf16.mxu1 (!%p662_p7), %v2979_v10  ;;  %v2984_v20 = vcombine.low (!%p662_p7), %v697_v8, %v701_v9 }
  0x9d   : > { %v709_v17 = vld [vmem:[%s3896_s4 + $0xa0] sm:$0xff]  ;;  %v710_v19 = vld [vmem:[%s3896_s4 + $0xa8] sm:$0xff]  ;;  %2240 = vmatpush1.bf16.msra.mxu0 %v2976_v7  ;;  %2322 = vmatpush1.bf16.msra.mxu1 %v2978_v11  ;;  %v2986_v21 = vcombine.low %v698_v13, %v702_v14 }
  0x9e   : > { %2241 = vmatprep.subr.bf16.mxu0 %v2985_v12  ;;  %v2993_v22 = vcombine.high %v705_v15, %v709_v17  ;;  %2323 = vmatprep.subr.bf16.mxu1 %v2987_v16  ;;  %v2995_v23 = vcombine.high %v706_v18, %v710_v19  ;;  %v713_v24 = vld [vmem:[%s3896_s4 + $0xc0] sm:$0xff]  ;;  %v714_v26 = vld [vmem:[%s3896_s4 + $0xc8] sm:$0xff]  ;;  %v2992_v28 = vcombine.low %v705_v15, %v709_v17 }
  0x9f   : > { %v717_v25 = vld [vmem:[%s3896_s4 + $0xe0] sm:$0xff]  ;;  %v718_v27 = vld [vmem:[%s3896_s4 + $0xe8] sm:$0xff]  ;;  %v2994_v29 = vcombine.low %v706_v18, %v710_v19 }
  0xa0   : > { %v3001_v30 = vcombine.high %v713_v24, %v717_v25  ;;  %v3003_v31 = vcombine.high %v714_v26, %v718_v27  ;;  %v721_v32 = vld [vmem:[%s3896_s4 + $0x100] sm:$0xff]  ;;  %v722_v34 = vld [vmem:[%s3896_s4 + $0x108] sm:$0xff]  ;;  %v3000_v36 = vcombine.low %v713_v24, %v717_v25  ;;  %v3002_v37 = vcombine.low %v714_v26, %v718_v27 }
  0xa1   : > { %2242 = vmatpush1.bf16.msra.mxu0 %v2984_v20  ;;  %2324 = vmatpush1.bf16.msra.mxu1 %v2986_v21  ;;  %v725_v33 = vld [vmem:[%s3896_s4 + $0x120] sm:$0xff]  ;;  %v726_v35 = vld [vmem:[%s3896_s4 + $0x128] sm:$0xff] }
  0xa2   : > { %2243 = vmatprep.subr.bf16.mxu0 %v2993_v22  ;;  %2325 = vmatprep.subr.bf16.mxu1 %v2995_v23  ;;  %v3009_v38 = vcombine.high %v721_v32, %v725_v33  ;;  %v3011_v39 = vcombine.high %v722_v34, %v726_v35  ;;  %v729_v40 = vld [vmem:[%s3896_s4 + $0x140] sm:$0xff]  ;;  %v730_v42 = vld [vmem:[%s3896_s4 + $0x148] sm:$0xff]  ;;  %v3008_v44 = vcombine.low %v721_v32, %v725_v33 }
  0xa3   : > { %v733_v41 = vld [vmem:[%s3896_s4 + $0x160] sm:$0xff]  ;;  %v734_v43 = vld [vmem:[%s3896_s4 + $0x168] sm:$0xff]  ;;  %v3010_v45 = vcombine.low %v722_v34, %v726_v35 }
  0xa4   : > { %v3017_v46 = vcombine.high %v729_v40, %v733_v41  ;;  %v3019_v47 = vcombine.high %v730_v42, %v734_v43  ;;  %v737_v48 = vld [vmem:[%s3896_s4 + $0x180] sm:$0xff]  ;;  %v738_v50 = vld [vmem:[%s3896_s4 + $0x188] sm:$0xff]  ;;  %v3016_v52 = vcombine.low %v729_v40, %v733_v41  ;;  %v3018_v53 = vcombine.low %v730_v42, %v734_v43 }
  0xa5   : > { %2244 = vmatpush1.bf16.msra.mxu0 %v2992_v28  ;;  %2326 = vmatpush1.bf16.msra.mxu1 %v2994_v29  ;;  %v741_v49 = vld [vmem:[%s3896_s4 + $0x1a0] sm:$0xff]  ;;  %v742_v51 = vld [vmem:[%s3896_s4 + $0x1a8] sm:$0xff] }
  0xa6   : > { %2245 = vmatprep.subr.bf16.mxu0 %v3001_v30  ;;  %2327 = vmatprep.subr.bf16.mxu1 %v3003_v31  ;;  %v3025_v54 = vcombine.high %v737_v48, %v741_v49  ;;  %v3027_v55 = vcombine.high %v738_v50, %v742_v51  ;;  %v745_v56 = vld [vmem:[%s3896_s4 + $0x1c0] sm:$0xff]  ;;  %v746_v58 = vld [vmem:[%s3896_s4 + $0x1c8] sm:$0xff]  ;;  %v3024_v60 = vcombine.low %v737_v48, %v741_v49 }
  0xa7   : > { %v749_v57 = vld [vmem:[%s3896_s4 + $0x1e0] sm:$0xff]  ;;  %v750_v59 = vld [vmem:[%s3896_s4 + $0x1e8] sm:$0xff]  ;;  %v3026_v61 = vcombine.low %v738_v50, %v742_v51 }
  0xa8   : > { %v3033_v62 = vcombine.high %v745_v56, %v749_v57  ;;  %v3035_v63 = vcombine.high %v746_v58, %v750_v59  ;;  %v753_v2 = vld [vmem:[%s3896_s4 + $0x200] sm:$0xff]  ;;  %v754_v4 = vld [vmem:[%s3896_s4 + $0x208] sm:$0xff]  ;;  %v3032_v6 = vcombine.low %v745_v56, %v749_v57  ;;  %v3034_v7 = vcombine.low %v746_v58, %v750_v59 }
  0xa9   : > { %2246 = vmatpush1.bf16.msra.mxu0 %v3000_v36  ;;  %2328 = vmatpush1.bf16.msra.mxu1 %v3002_v37  ;;  %v757_v3 = vld [vmem:[%s3896_s4 + $0x220] sm:$0xff]  ;;  %v758_v5 = vld [vmem:[%s3896_s4 + $0x228] sm:$0xff] }
  0xaa   : > { %2247 = vmatprep.subr.bf16.mxu0 %v3009_v38  ;;  %2329 = vmatprep.subr.bf16.mxu1 %v3011_v39  ;;  %v3041_v8 = vcombine.high %v753_v2, %v757_v3  ;;  %v3043_v9 = vcombine.high %v754_v4, %v758_v5  ;;  %v761_v10 = vld [vmem:[%s3896_s4 + $0x240] sm:$0xff]  ;;  %v762_v12 = vld [vmem:[%s3896_s4 + $0x248] sm:$0xff]  ;;  %v3040_v14 = vcombine.low %v753_v2, %v757_v3 }
  0xab   : > { %v765_v11 = vld [vmem:[%s3896_s4 + $0x260] sm:$0xff]  ;;  %v766_v13 = vld [vmem:[%s3896_s4 + $0x268] sm:$0xff]  ;;  %v3042_v15 = vcombine.low %v754_v4, %v758_v5 }
  0xac   : > { %v3049_v16 = vcombine.high %v761_v10, %v765_v11  ;;  %v3051_v17 = vcombine.high %v762_v12, %v766_v13  ;;  %v769_v18 = vld [vmem:[%s3896_s4 + $0x280] sm:$0xff]  ;;  %v770_v20 = vld [vmem:[%s3896_s4 + $0x288] sm:$0xff]  ;;  %v3048_v22 = vcombine.low %v761_v10, %v765_v11  ;;  %v3050_v23 = vcombine.low %v762_v12, %v766_v13 }
  0xad   : > { %2248 = vmatpush1.bf16.msra.mxu0 %v3008_v44  ;;  %2330 = vmatpush1.bf16.msra.mxu1 %v3010_v45  ;;  %v773_v19 = vld [vmem:[%s3896_s4 + $0x2a0] sm:$0xff]  ;;  %v774_v21 = vld [vmem:[%s3896_s4 + $0x2a8] sm:$0xff] }
  0xae   : > { %2249 = vmatprep.subr.bf16.mxu0 %v3017_v46  ;;  %2331 = vmatprep.subr.bf16.mxu1 %v3019_v47  ;;  %v3057_v24 = vcombine.high %v769_v18, %v773_v19  ;;  %v3059_v25 = vcombine.high %v770_v20, %v774_v21  ;;  %v777_v26 = vld [vmem:[%s3896_s4 + $0x2c0] sm:$0xff]  ;;  %v778_v28 = vld [vmem:[%s3896_s4 + $0x2c8] sm:$0xff]  ;;  %v3056_v30 = vcombine.low %v769_v18, %v773_v19 }
  0xaf   : > { %v781_v27 = vld [vmem:[%s3896_s4 + $0x2e0] sm:$0xff]  ;;  %v782_v29 = vld [vmem:[%s3896_s4 + $0x2e8] sm:$0xff]  ;;  %v3058_v31 = vcombine.low %v770_v20, %v774_v21 }
  0xb0   : > { %v3065_v32 = vcombine.high %v777_v26, %v781_v27  ;;  %v3067_v33 = vcombine.high %v778_v28, %v782_v29  ;;  %v785_v34 = vld [vmem:[%s3896_s4 + $0x300] sm:$0xff]  ;;  %v786_v36 = vld [vmem:[%s3896_s4 + $0x308] sm:$0xff]  ;;  %v3064_v38 = vcombine.low %v777_v26, %v781_v27  ;;  %v3066_v39 = vcombine.low %v778_v28, %v782_v29 }
  0xb1   : > { %2250 = vmatpush1.bf16.msra.mxu0 %v3016_v52  ;;  %2332 = vmatpush1.bf16.msra.mxu1 %v3018_v53  ;;  %v789_v35 = vld [vmem:[%s3896_s4 + $0x320] sm:$0xff]  ;;  %v790_v37 = vld [vmem:[%s3896_s4 + $0x328] sm:$0xff] }
  0xb2   : > { %2251 = vmatprep.subr.bf16.mxu0 %v3025_v54  ;;  %2333 = vmatprep.subr.bf16.mxu1 %v3027_v55  ;;  %v3073_v40 = vcombine.high %v785_v34, %v789_v35  ;;  %v3075_v41 = vcombine.high %v786_v36, %v790_v37  ;;  %v793_v42 = vld [vmem:[%s3896_s4 + $0x340] sm:$0xff]  ;;  %v794_v44 = vld [vmem:[%s3896_s4 + $0x348] sm:$0xff]  ;;  %v3072_v46 = vcombine.low %v785_v34, %v789_v35 }
  0xb3   : > { %v797_v43 = vld [vmem:[%s3896_s4 + $0x360] sm:$0xff]  ;;  %v798_v45 = vld [vmem:[%s3896_s4 + $0x368] sm:$0xff]  ;;  %v3074_v47 = vcombine.low %v786_v36, %v790_v37 }
  0xb4   : > { %v3081_v48 = vcombine.high %v793_v42, %v797_v43  ;;  %v3083_v49 = vcombine.high %v794_v44, %v798_v45  ;;  %v801_v50 = vld [vmem:[%s3896_s4 + $0x380] sm:$0xff]  ;;  %v802_v52 = vld [vmem:[%s3896_s4 + $0x388] sm:$0xff]  ;;  %v3080_v54 = vcombine.low %v793_v42, %v797_v43  ;;  %v3082_v55 = vcombine.low %v794_v44, %v798_v45 }
  0xb5   : > { %2252 = vmatpush1.bf16.msra.mxu0 %v3024_v60  ;;  %2334 = vmatpush1.bf16.msra.mxu1 %v3026_v61  ;;  %v805_v51 = vld [vmem:[%s3896_s4 + $0x3a0] sm:$0xff]  ;;  %v806_v53 = vld [vmem:[%s3896_s4 + $0x3a8] sm:$0xff] }
  0xb6   : > { %2253 = vmatprep.subr.bf16.mxu0 %v3033_v62  ;;  %2335 = vmatprep.subr.bf16.mxu1 %v3035_v63  ;;  %v3089_v56 = vcombine.high %v801_v50, %v805_v51  ;;  %v3091_v57 = vcombine.high %v802_v52, %v806_v53  ;;  %v809_v58 = vld [vmem:[%s3896_s4 + $0x3c0] sm:$0xff]  ;;  %v810_v60 = vld [vmem:[%s3896_s4 + $0x3c8] sm:$0xff]  ;;  %v3088_v62 = vcombine.low %v801_v50, %v805_v51 }
  0xb7   : > { %v813_v59 = vld [vmem:[%s3896_s4 + $0x3e0] sm:$0xff]  ;;  %v814_v61 = vld [vmem:[%s3896_s4 + $0x3e8] sm:$0xff]  ;;  %v3090_v63 = vcombine.low %v802_v52, %v806_v53 }
  0xb8   : > { %v3097_v2 = vcombine.high %v809_v58, %v813_v59  ;;  %v3099_v3 = vcombine.high %v810_v60, %v814_v61  ;;  %v817_v4 = vld [vmem:[%s3896_s4 + $0x400] sm:$0xff] }
  0xb9   : > { %2254 = vmatpush1.bf16.msra.mxu0 %v3032_v6  ;;  %2336 = vmatpush1.bf16.msra.mxu1 %v3034_v7  ;;  %v821_v5 = vld [vmem:[%s3896_s4 + $0x420] sm:$0xff]  ;;  %v818_v6 = vld [vmem:[%s3896_s4 + $0x408] sm:$0xff] }
  0xba   : > { %2255 = vmatprep.subr.bf16.mxu0 %v3041_v8  ;;  %2337 = vmatprep.subr.bf16.mxu1 %v3043_v9  ;;  %v822_v7 = vld [vmem:[%s3896_s4 + $0x428] sm:$0xff]  ;;  %v3096_v8 = vcombine.low %v809_v58, %v813_v59  ;;  %v3098_v9 = vcombine.low %v810_v60, %v814_v61  ;;  %v3105_v10 = vcombine.high %v817_v4, %v821_v5  ;;  %v825_v12 = vld [vmem:[%s3896_s4 + $0x440] sm:$0xff] }
  0xbb   : > { %v3107_v11 = vcombine.high %v818_v6, %v822_v7  ;;  %v829_v13 = vld [vmem:[%s3896_s4 + $0x460] sm:$0xff]  ;;  %v3104_v18 = vcombine.low %v817_v4, %v821_v5  ;;  %v3106_v19 = vcombine.low %v818_v6, %v822_v7 }
  0xbc   : > { %v3113_v20 = vcombine.high %v825_v12, %v829_v13  ;;  %v3112_v26 = vcombine.low %v825_v12, %v829_v13 }
  0xbd   : > { %2256 = vmatpush1.bf16.msra.mxu0 %v3040_v14  ;;  %2338 = vmatpush1.bf16.msra.mxu1 %v3042_v15  ;;  %v3972_v14 = vcombine.low %v3890_v0, %v3890_v0  ;;  %v826_v15 = vld [vmem:[%s3896_s4 + $0x448] sm:$0xff]  ;;  %v833_v0 = vld [vmem:[%s3896_s4 + $0x480] sm:$0xff] }
  0xbe   : > { %2257 = vmatprep.subr.bf16.mxu0 %v3049_v16  ;;  %2339 = vmatprep.subr.bf16.mxu1 %v3051_v17  ;;  %v830_v16 = vld [vmem:[%s3896_s4 + $0x468] sm:$0xff] }
  0xbf   : > { %v3979_v17 = vld [vmem:[%s4467_s0 + $0x8] sm:$0xff]  ;;  %v3115_v21 = vcombine.high %v826_v15, %v830_v16  ;;  %v3114_v27 = vcombine.low %v826_v15, %v830_v16 }
  0xc1   : > { %2258 = vmatpush1.bf16.msra.mxu0 %v3048_v22  ;;  %2340 = vmatpush1.bf16.msra.mxu1 %v3050_v23  ;;  %v837_v22 = vld [vmem:[%s3896_s4 + $0x4a0] sm:$0xff]  ;;  %v3985_v23 = vcombine.high %v3979_v17, %v3979_v17 }
  0xc2   : > { %2259 = vmatprep.subr.bf16.mxu0 %v3057_v24  ;;  %2341 = vmatprep.subr.bf16.mxu1 %v3059_v25  ;;  %v834_v24 = vld [vmem:[%s3896_s4 + $0x488] sm:$0xff]  ;;  %v3121_v28 = vcombine.high %v833_v0, %v837_v22  ;;  %v3120_v34 = vcombine.low %v833_v0, %v837_v22 }
  0xc3   : > { %v838_v25 = vld [vmem:[%s3896_s4 + $0x4a8] sm:$0xff] }
  0xc4   : > { %v3123_v29 = vcombine.high %v834_v24, %v838_v25  ;;  %v3122_v35 = vcombine.low %v834_v24, %v838_v25 }
  0xc5   : > { %2260 = vmatpush1.bf16.msra.mxu0 %v3056_v30  ;;  %2342 = vmatpush1.bf16.msra.mxu1 %v3058_v31  ;;  %v841_v30 = vld [vmem:[%s3896_s4 + $0x4c0] sm:$0xff] }
  0xc6   : > { %2261 = vmatprep.subr.bf16.mxu0 %v3065_v32  ;;  %2343 = vmatprep.subr.bf16.mxu1 %v3067_v33  ;;  %v845_v31 = vld [vmem:[%s3896_s4 + $0x4e0] sm:$0xff]  ;;  %v842_v32 = vld [vmem:[%s3896_s4 + $0x4c8] sm:$0xff] }
  0xc7   : > { %v846_v33 = vld [vmem:[%s3896_s4 + $0x4e8] sm:$0xff]  ;;  %v3129_v36 = vcombine.high %v841_v30, %v845_v31  ;;  %v3128_v42 = vcombine.low %v841_v30, %v845_v31 }
  0xc8   : > { %v3131_v37 = vcombine.high %v842_v32, %v846_v33  ;;  %v3130_v43 = vcombine.low %v842_v32, %v846_v33 }
  0xc9   : > { %2262 = vmatpush1.bf16.msra.mxu0 %v3064_v38  ;;  %2344 = vmatpush1.bf16.msra.mxu1 %v3066_v39  ;;  %v849_v38 = vld [vmem:[%s3896_s4 + $0x500] sm:$0xff] }
  0xca   : > { %2263 = vmatprep.subr.bf16.mxu0 %v3073_v40  ;;  %2345 = vmatprep.subr.bf16.mxu1 %v3075_v41  ;;  %v853_v39 = vld [vmem:[%s3896_s4 + $0x520] sm:$0xff]  ;;  %v850_v40 = vld [vmem:[%s3896_s4 + $0x508] sm:$0xff] }
  0xcb   : > { %v854_v41 = vld [vmem:[%s3896_s4 + $0x528] sm:$0xff]  ;;  %v3137_v44 = vcombine.high %v849_v38, %v853_v39  ;;  %v3136_v50 = vcombine.low %v849_v38, %v853_v39 }
  0xcc   : > { %v3139_v45 = vcombine.high %v850_v40, %v854_v41  ;;  %v3138_v51 = vcombine.low %v850_v40, %v854_v41 }
  0xcd   : > { %2264 = vmatpush1.bf16.msra.mxu0 %v3072_v46  ;;  %2346 = vmatpush1.bf16.msra.mxu1 %v3074_v47  ;;  %v857_v46 = vld [vmem:[%s3896_s4 + $0x540] sm:$0xff] }
  0xce   : > { %2265 = vmatprep.subr.bf16.mxu0 %v3081_v48  ;;  %2347 = vmatprep.subr.bf16.mxu1 %v3083_v49  ;;  %v861_v47 = vld [vmem:[%s3896_s4 + $0x560] sm:$0xff]  ;;  %v858_v48 = vld [vmem:[%s3896_s4 + $0x548] sm:$0xff] }
  0xcf   : > { %v862_v49 = vld [vmem:[%s3896_s4 + $0x568] sm:$0xff]  ;;  %v3145_v52 = vcombine.high %v857_v46, %v861_v47  ;;  %v3144_v58 = vcombine.low %v857_v46, %v861_v47 }
  0xd0   : > { %v3147_v53 = vcombine.high %v858_v48, %v862_v49  ;;  %v3146_v59 = vcombine.low %v858_v48, %v862_v49 }
  0xd1   : > { %2266 = vmatpush1.bf16.msra.mxu0 %v3080_v54  ;;  %2348 = vmatpush1.bf16.msra.mxu1 %v3082_v55  ;;  %v865_v54 = vld [vmem:[%s3896_s4 + $0x580] sm:$0xff] }
  0xd2   : > { %2267 = vmatprep.subr.bf16.mxu0 %v3089_v56  ;;  %2349 = vmatprep.subr.bf16.mxu1 %v3091_v57  ;;  %v869_v55 = vld [vmem:[%s3896_s4 + $0x5a0] sm:$0xff]  ;;  %v866_v56 = vld [vmem:[%s3896_s4 + $0x588] sm:$0xff] }
  0xd3   : > { %v870_v57 = vld [vmem:[%s3896_s4 + $0x5a8] sm:$0xff]  ;;  %v3153_v60 = vcombine.high %v865_v54, %v869_v55  ;;  %v3152_v4 = vcombine.low %v865_v54, %v869_v55 }
  0xd4   : > { %v3155_v61 = vcombine.high %v866_v56, %v870_v57  ;;  %v3154_v5 = vcombine.low %v866_v56, %v870_v57 }
  0xd5   : > { %2268 = vmatpush1.bf16.msra.mxu0 %v3088_v62  ;;  %2350 = vmatpush1.bf16.msra.mxu1 %v3090_v63  ;;  %v873_v62 = vld [vmem:[%s3896_s4 + $0x5c0] sm:$0xff] }
  0xd6   : > { %2269 = vmatprep.subr.bf16.mxu0 %v3097_v2  ;;  %2351 = vmatprep.subr.bf16.mxu1 %v3099_v3  ;;  %v877_v63 = vld [vmem:[%s3896_s4 + $0x5e0] sm:$0xff]  ;;  %v874_v2 = vld [vmem:[%s3896_s4 + $0x5c8] sm:$0xff] }
  0xd7   : > { %v878_v3 = vld [vmem:[%s3896_s4 + $0x5e8] sm:$0xff]  ;;  %v3161_v6 = vcombine.high %v873_v62, %v877_v63  ;;  %v3160_v12 = vcombine.low %v873_v62, %v877_v63 }
  0xd8   : > { %v3163_v7 = vcombine.high %v874_v2, %v878_v3  ;;  %v3162_v13 = vcombine.low %v874_v2, %v878_v3 }
  0xd9   : > { %2270 = vmatpush1.bf16.msra.mxu0 %v3096_v8  ;;  %2352 = vmatpush1.bf16.msra.mxu1 %v3098_v9  ;;  %v881_v8 = vld [vmem:[%s3896_s4 + $0x600] sm:$0xff] }
  0xda   : > { %2280 = vmatprep.subr.bf16.mxu0 %v3105_v10  ;;  %2362 = vmatprep.subr.bf16.mxu1 %v3107_v11  ;;  %v885_v9 = vld [vmem:[%s3896_s4 + $0x620] sm:$0xff]  ;;  %v882_v10 = vld [vmem:[%s3896_s4 + $0x608] sm:$0xff] }
  0xdb   : > { %v886_v11 = vld [vmem:[%s3896_s4 + $0x628] sm:$0xff]  ;;  %v3169_v15 = vcombine.high %v881_v8, %v885_v9  ;;  %v3168_v0 = vcombine.low %v881_v8, %v885_v9 }
  0xdc   : > { %2272 = vmatmul.mubr.bf16.vlgmr.msra.gmra.mrb[0].mxu0 %v3972_v14  ;;  %2354 = vmatmul.mubr.bf16.vlgmr.msra.gmra.mrb[0].mxu1 %v3972_v14  ;;  %v3171_v16 = vcombine.high %v882_v10, %v886_v11  ;;  %v3170_v22 = vcombine.low %v882_v10, %v886_v11 }
  0xdd   : > { %2281 = vmatpush1.bf16.msra.mxu0 %v3104_v18  ;;  %2363 = vmatpush1.bf16.msra.mxu1 %v3106_v19  ;;  %v889_v18 = vld [vmem:[%s3896_s4 + $0x640] sm:$0xff] }
  0xde   : > { %2282 = vmatprep.subr.bf16.mxu0 %v3113_v20  ;;  %2364 = vmatprep.subr.bf16.mxu1 %v3115_v21  ;;  %v893_v19 = vld [vmem:[%s3896_s4 + $0x660] sm:$0xff]  ;;  %v890_v20 = vld [vmem:[%s3896_s4 + $0x648] sm:$0xff] }
  0xdf   : > { %2312 = vmatprep.mubr.bf16.mxu0 %v3985_v23  ;;  %2394 = vmatprep.mubr.bf16.mxu1 %v3985_v23  ;;  %v894_v21 = vld [vmem:[%s3896_s4 + $0x668] sm:$0xff]  ;;  %v3177_v24 = vcombine.high %v889_v18, %v893_v19  ;;  %v3176_v30 = vcombine.low %v889_v18, %v893_v19 }
  0xe0   : > { %v3179_v25 = vcombine.high %v890_v20, %v894_v21  ;;  %v3178_v31 = vcombine.low %v890_v20, %v894_v21 }
  0xe1   : > { %2283 = vmatpush1.bf16.msra.mxu0 %v3112_v26  ;;  %2365 = vmatpush1.bf16.msra.mxu1 %v3114_v27  ;;  %v897_v26 = vld [vmem:[%s3896_s4 + $0x680] sm:$0xff] }
  0xe2   : > { %2284 = vmatprep.subr.bf16.mxu0 %v3121_v28  ;;  %2366 = vmatprep.subr.bf16.mxu1 %v3123_v29  ;;  %v901_v27 = vld [vmem:[%s3896_s4 + $0x6a0] sm:$0xff]  ;;  %v898_v28 = vld [vmem:[%s3896_s4 + $0x688] sm:$0xff] }
  0xe3   : > { %v902_v29 = vld [vmem:[%s3896_s4 + $0x6a8] sm:$0xff]  ;;  %v3185_v32 = vcombine.high %v897_v26, %v901_v27  ;;  %v3184_v38 = vcombine.low %v897_v26, %v901_v27  ;;  %v704_v26 = vld [vmem:[%s3896_s4 + $0x78] sm:$0xff] }
  0xe4   : > { %v3187_v33 = vcombine.high %v898_v28, %v902_v29  ;;  %v3186_v39 = vcombine.low %v898_v28, %v902_v29 }
  0xe5   : > { %2285 = vmatpush1.bf16.msra.mxu0 %v3120_v34  ;;  %2367 = vmatpush1.bf16.msra.mxu1 %v3122_v35  ;;  %v905_v34 = vld [vmem:[%s3896_s4 + $0x6c0] sm:$0xff] }
  0xe6   : > { %2286 = vmatprep.subr.bf16.mxu0 %v3129_v36  ;;  %2368 = vmatprep.subr.bf16.mxu1 %v3131_v37  ;;  %v909_v35 = vld [vmem:[%s3896_s4 + $0x6e0] sm:$0xff]  ;;  %v906_v36 = vld [vmem:[%s3896_s4 + $0x6c8] sm:$0xff] }
  0xe7   : > { %v910_v37 = vld [vmem:[%s3896_s4 + $0x6e8] sm:$0xff]  ;;  %v3193_v40 = vcombine.high %v905_v34, %v909_v35  ;;  %v3192_v46 = vcombine.low %v905_v34, %v909_v35 }
  0xe8   : > { %v3195_v41 = vcombine.high %v906_v36, %v910_v37  ;;  %v3194_v47 = vcombine.low %v906_v36, %v910_v37 }
  0xe9   : > { %2287 = vmatpush1.bf16.msra.mxu0 %v3128_v42  ;;  %2369 = vmatpush1.bf16.msra.mxu1 %v3130_v43  ;;  %v913_v42 = vld [vmem:[%s3896_s4 + $0x700] sm:$0xff] }
  0xea   : > { %2288 = vmatprep.subr.bf16.mxu0 %v3137_v44  ;;  %2370 = vmatprep.subr.bf16.mxu1 %v3139_v45  ;;  %v917_v43 = vld [vmem:[%s3896_s4 + $0x720] sm:$0xff]  ;;  %v914_v44 = vld [vmem:[%s3896_s4 + $0x708] sm:$0xff] }
  0xeb   : > { %v918_v45 = vld [vmem:[%s3896_s4 + $0x728] sm:$0xff]  ;;  %v3201_v48 = vcombine.high %v913_v42, %v917_v43  ;;  %v3200_v54 = vcombine.low %v913_v42, %v917_v43 }
  0xec   : > { %v3203_v49 = vcombine.high %v914_v44, %v918_v45  ;;  %v3202_v55 = vcombine.low %v914_v44, %v918_v45 }
  0xed   : > { %2289 = vmatpush1.bf16.msra.mxu0 %v3136_v50  ;;  %2371 = vmatpush1.bf16.msra.mxu1 %v3138_v51  ;;  %v921_v50 = vld [vmem:[%s3896_s4 + $0x740] sm:$0xff] }
  0xee   : > { %2290 = vmatprep.subr.bf16.mxu0 %v3145_v52  ;;  %2372 = vmatprep.subr.bf16.mxu1 %v3147_v53  ;;  %v925_v51 = vld [vmem:[%s3896_s4 + $0x760] sm:$0xff]  ;;  %v922_v52 = vld [vmem:[%s3896_s4 + $0x748] sm:$0xff] }
  0xef   : > { %v926_v53 = vld [vmem:[%s3896_s4 + $0x768] sm:$0xff]  ;;  %v3209_v56 = vcombine.high %v921_v50, %v925_v51  ;;  %v3208_v62 = vcombine.low %v921_v50, %v925_v51 }
  0xf0   : > { %v3211_v57 = vcombine.high %v922_v52, %v926_v53  ;;  %v3210_v63 = vcombine.low %v922_v52, %v926_v53  ;;  %v731_v53 = vld [vmem:[%s3896_s4 + $0x150] sm:$0xff] }
  0xf1   : > { %2291 = vmatpush1.bf16.msra.mxu0 %v3144_v58  ;;  %2373 = vmatpush1.bf16.msra.mxu1 %v3146_v59  ;;  %v929_v58 = vld [vmem:[%s3896_s4 + $0x780] sm:$0xff] }
  0xf2   : > { %2292 = vmatprep.subr.bf16.mxu0 %v3153_v60  ;;  %2374 = vmatprep.subr.bf16.mxu1 %v3155_v61  ;;  %v933_v59 = vld [vmem:[%s3896_s4 + $0x7a0] sm:$0xff]  ;;  %v930_v60 = vld [vmem:[%s3896_s4 + $0x788] sm:$0xff] }
  0xf3   : > { %v934_v61 = vld [vmem:[%s3896_s4 + $0x7a8] sm:$0xff]  ;;  %v3217_v2 = vcombine.high %v929_v58, %v933_v59  ;;  %v3216_v8 = vcombine.low %v929_v58, %v933_v59 }
  0xf4   : > { %v3219_v3 = vcombine.high %v930_v60, %v934_v61  ;;  %v3218_v9 = vcombine.low %v930_v60, %v934_v61  ;;  %v739_v61 = vld [vmem:[%s3896_s4 + $0x190] sm:$0xff] }
  0xf5   : > { %2293 = vmatpush1.bf16.msra.mxu0 %v3152_v4  ;;  %2375 = vmatpush1.bf16.msra.mxu1 %v3154_v5  ;;  %v937_v4 = vld [vmem:[%s3896_s4 + $0x7c0] sm:$0xff] }
  0xf6   : > { %2294 = vmatprep.subr.bf16.mxu0 %v3161_v6  ;;  %2376 = vmatprep.subr.bf16.mxu1 %v3163_v7  ;;  %v941_v5 = vld [vmem:[%s3896_s4 + $0x7e0] sm:$0xff]  ;;  %v938_v6 = vld [vmem:[%s3896_s4 + $0x7c8] sm:$0xff] }
  0xf7   : > { %v942_v7 = vld [vmem:[%s3896_s4 + $0x7e8] sm:$0xff]  ;;  %v3225_v10 = vcombine.high %v937_v4, %v941_v5  ;;  %v3224_v18 = vcombine.low %v937_v4, %v941_v5 }
  0xf8   : > { %v3227_v11 = vcombine.high %v938_v6, %v942_v7  ;;  %v3226_v19 = vcombine.low %v938_v6, %v942_v7  ;;  %v747_v7 = vld [vmem:[%s3896_s4 + $0x1d0] sm:$0xff] }
  0xf9   : > { %2295 = vmatpush1.bf16.msra.mxu0 %v3160_v12  ;;  %2377 = vmatpush1.bf16.msra.mxu1 %v3162_v13  ;;  %v691_v12 = vld [vmem:[%s3896_s4 + $0x10] sm:$0xff] }
  0xfa   : > { %2296 = vmatprep.subr.bf16.mxu0 %v3169_v15  ;;  %2378 = vmatprep.subr.bf16.mxu1 %v3171_v16  ;;  %v695_v13 = vld [vmem:[%s3896_s4 + $0x30] sm:$0xff]  ;;  %v692_v15 = vld [vmem:[%s3896_s4 + $0x18] sm:$0xff] }
  0xfb   : > { %v696_v16 = vld [vmem:[%s3896_s4 + $0x38] sm:$0xff]  ;;  %v2981_v20 = vcombine.high %v691_v12, %v695_v13  ;;  %v2980_v27 = vcombine.low %v691_v12, %v695_v13 }
  0xfc   : > { %v2983_v21 = vcombine.high %v692_v15, %v696_v16  ;;  %v2982_v28 = vcombine.low %v692_v15, %v696_v16  ;;  %v755_v16 = vld [vmem:[%s3896_s4 + $0x210] sm:$0xff] }
  0xfd   : > { %2297 = vmatpush1.bf16.msra.mxu0 %v3168_v0  ;;  %2379 = vmatpush1.bf16.msra.mxu1 %v3170_v22  ;;  %v699_v0 = vld [vmem:[%s3896_s4 + $0x50] sm:$0xff] }
  0xfe   : > { %2298 = vmatprep.subr.bf16.mxu0 %v3177_v24  ;;  %2380 = vmatprep.subr.bf16.mxu1 %v3179_v25  ;;  %v703_v22 = vld [vmem:[%s3896_s4 + $0x70] sm:$0xff]  ;;  %v4053_v24 = vcombine.low %v3979_v17, %v3979_v17  ;;  %v700_v25 = vld [vmem:[%s3896_s4 + $0x58] sm:$0xff] }
  0xff   : > { %v2989_v29 = vcombine.high %v699_v0, %v703_v22  ;;  %v708_v17 = vld [vmem:[%s3896_s4 + $0x98] sm:$0xff]  ;;  %v2988_v34 = vcombine.low %v699_v0, %v703_v22  ;;  %v2990_v35 = vcombine.low %v700_v25, %v704_v26 }
 0x101   : > { %2299 = vmatpush1.bf16.msra.mxu0 %v3176_v30  ;;  %2381 = vmatpush1.bf16.msra.mxu1 %v3178_v31  ;;  %v2991_v30 = vcombine.high %v700_v25, %v704_v26  ;;  %v707_v31 = vld [vmem:[%s3896_s4 + $0x90] sm:$0xff] }
 0x102   : > { %2300 = vmatprep.subr.bf16.mxu0 %v3185_v32  ;;  %2382 = vmatprep.subr.bf16.mxu1 %v3187_v33  ;;  %v711_v32 = vld [vmem:[%s3896_s4 + $0xb0] sm:$0xff]  ;;  %v712_v33 = vld [vmem:[%s3896_s4 + $0xb8] sm:$0xff] }
 0x103   : > { %v2997_v36 = vcombine.high %v707_v31, %v711_v32  ;;  %v2999_v37 = vcombine.high %v708_v17, %v712_v33  ;;  %v2996_v42 = vcombine.low %v707_v31, %v711_v32  ;;  %v2998_v43 = vcombine.low %v708_v17, %v712_v33  ;;  %v763_v26 = vld [vmem:[%s3896_s4 + $0x250] sm:$0xff] }
 0x104   : > { %v771_v33 = vld [vmem:[%s3896_s4 + $0x290] sm:$0xff] }
 0x105   : > { %2301 = vmatpush1.bf16.msra.mxu0 %v3184_v38  ;;  %2383 = vmatpush1.bf16.msra.mxu1 %v3186_v39  ;;  %v715_v38 = vld [vmem:[%s3896_s4 + $0xd0] sm:$0xff] }
 0x106   : > { %2302 = vmatprep.subr.bf16.mxu0 %v3193_v40  ;;  %2384 = vmatprep.subr.bf16.mxu1 %v3195_v41  ;;  %v719_v39 = vld [vmem:[%s3896_s4 + $0xf0] sm:$0xff]  ;;  %v716_v40 = vld [vmem:[%s3896_s4 + $0xd8] sm:$0xff] }
 0x107   : > { %v720_v41 = vld [vmem:[%s3896_s4 + $0xf8] sm:$0xff]  ;;  %v3005_v44 = vcombine.high %v715_v38, %v719_v39  ;;  %v3004_v50 = vcombine.low %v715_v38, %v719_v39 }
 0x108   : > { %v3007_v45 = vcombine.high %v716_v40, %v720_v41 }
 0x109   : > { %2303 = vmatpush1.bf16.msra.mxu0 %v3192_v46  ;;  %2385 = vmatpush1.bf16.msra.mxu1 %v3194_v47  ;;  %v723_v46 = vld [vmem:[%s3896_s4 + $0x110] sm:$0xff] }
 0x10a   : > { %2304 = vmatprep.subr.bf16.mxu0 %v3201_v48  ;;  %2386 = vmatprep.subr.bf16.mxu1 %v3203_v49  ;;  %v727_v47 = vld [vmem:[%s3896_s4 + $0x130] sm:$0xff]  ;;  %v724_v48 = vld [vmem:[%s3896_s4 + $0x118] sm:$0xff] }
 0x10b   : > { %v728_v49 = vld [vmem:[%s3896_s4 + $0x138] sm:$0xff]  ;;  %v3013_v51 = vcombine.high %v723_v46, %v727_v47 }
 0x10c   : > { %v3015_v52 = vcombine.high %v724_v48, %v728_v49  ;;  %v3014_v58 = vcombine.low %v724_v48, %v728_v49  ;;  %v787_v49 = vld [vmem:[%s3896_s4 + $0x310] sm:$0xff] }
 0x10d   : > { %2305 = vmatpush1.bf16.msra.mxu0 %v3200_v54  ;;  %2387 = vmatpush1.bf16.msra.mxu1 %v3202_v55  ;;  %v735_v54 = vld [vmem:[%s3896_s4 + $0x170] sm:$0xff]  ;;  %v732_v55 = vld [vmem:[%s3896_s4 + $0x158] sm:$0xff] }
 0x10e   : > { %2306 = vmatprep.subr.bf16.mxu0 %v3209_v56  ;;  %2388 = vmatprep.subr.bf16.mxu1 %v3211_v57  ;;  %v736_v56 = vld [vmem:[%s3896_s4 + $0x178] sm:$0xff]  ;;  %v3012_v57 = vcombine.low %v723_v46, %v727_v47  ;;  %v3021_v59 = vcombine.high %v731_v53, %v735_v54 }
 0x10f   : > { %v3023_v60 = vcombine.high %v732_v55, %v736_v56  ;;  %v3022_v4 = vcombine.low %v732_v55, %v736_v56  ;;  %v795_v56 = vld [vmem:[%s3896_s4 + $0x350] sm:$0xff] }
 0x111   : > { %2307 = vmatpush1.bf16.msra.mxu0 %v3208_v62  ;;  %2389 = vmatpush1.bf16.msra.mxu1 %v3210_v63  ;;  %v743_v62 = vld [vmem:[%s3896_s4 + $0x1b0] sm:$0xff]  ;;  %v740_v63 = vld [vmem:[%s3896_s4 + $0x198] sm:$0xff] }
 0x112   : > { %2308 = vmatprep.subr.bf16.mxu0 %v3217_v2  ;;  %2390 = vmatprep.subr.bf16.mxu1 %v3219_v3  ;;  %v744_v2 = vld [vmem:[%s3896_s4 + $0x1b8] sm:$0xff]  ;;  %v3020_v3 = vcombine.low %v731_v53, %v735_v54  ;;  %v3029_v5 = vcombine.high %v739_v61, %v743_v62 }
 0x113   : > { %v3031_v6 = vcombine.high %v740_v63, %v744_v2  ;;  %v3030_v12 = vcombine.low %v740_v63, %v744_v2  ;;  %v803_v2 = vld [vmem:[%s3896_s4 + $0x390] sm:$0xff] }
 0x115   : > { %2309 = vmatpush1.bf16.msra.mxu0 %v3216_v8  ;;  %2391 = vmatpush1.bf16.msra.mxu1 %v3218_v9  ;;  %v751_v8 = vld [vmem:[%s3896_s4 + $0x1f0] sm:$0xff]  ;;  %v748_v9 = vld [vmem:[%s3896_s4 + $0x1d8] sm:$0xff] }
 0x116   : > { %2310 = vmatprep.subr.bf16.mxu0 %v3225_v10  ;;  %2392 = vmatprep.subr.bf16.mxu1 %v3227_v11  ;;  %v752_v10 = vld [vmem:[%s3896_s4 + $0x1f8] sm:$0xff]  ;;  %v3028_v11 = vcombine.low %v739_v61, %v743_v62  ;;  %v3037_v13 = vcombine.high %v747_v7, %v751_v8 }
 0x117   : > { %v3039_v15 = vcombine.high %v748_v9, %v752_v10  ;;  %v3038_v0 = vcombine.low %v748_v9, %v752_v10  ;;  %v811_v10 = vld [vmem:[%s3896_s4 + $0x3d0] sm:$0xff] }
 0x119   : > { %2311 = vmatpush1.bf16.msra.mxu0 %v3224_v18  ;;  %2393 = vmatpush1.bf16.msra.mxu1 %v3226_v19  ;;  %v759_v18 = vld [vmem:[%s3896_s4 + $0x230] sm:$0xff]  ;;  %v756_v19 = vld [vmem:[%s3896_s4 + $0x218] sm:$0xff] }
 0x11a   : > { %2403 = vmatprep.subr.bf16.mxu0 %v2981_v20  ;;  %2485 = vmatprep.subr.bf16.mxu1 %v2983_v21  ;;  %v760_v20 = vld [vmem:[%s3896_s4 + $0x238] sm:$0xff]  ;;  %v3036_v21 = vcombine.low %v747_v7, %v751_v8  ;;  %v3045_v22 = vcombine.high %v755_v16, %v759_v18 }
 0x11b   : > { %v3047_v25 = vcombine.high %v756_v19, %v760_v20  ;;  %v3046_v31 = vcombine.low %v756_v19, %v760_v20  ;;  %v819_v20 = vld [vmem:[%s3896_s4 + $0x410] sm:$0xff] }
 0x11c   : > { %2313 = vmatmul.mubr.bf16.vlgmr.msra.gmra.mrb[0].mxu0 %v4053_v24  ;;  %2395 = vmatmul.mubr.bf16.vlgmr.msra.gmra.mrb[0].mxu1 %v4053_v24 }
 0x11d   : > { %2404 = vmatpush1.bf16.msra.mxu0 %v2980_v27  ;;  %2486 = vmatpush1.bf16.msra.mxu1 %v2982_v28  ;;  %v767_v27 = vld [vmem:[%s3896_s4 + $0x270] sm:$0xff]  ;;  %v764_v28 = vld [vmem:[%s3896_s4 + $0x258] sm:$0xff] }
 0x11e   : > { %2405 = vmatprep.subr.bf16.mxu0 %v2989_v29  ;;  %2487 = vmatprep.subr.bf16.mxu1 %v2991_v30  ;;  %v768_v29 = vld [vmem:[%s3896_s4 + $0x278] sm:$0xff]  ;;  %v3044_v30 = vcombine.low %v755_v16, %v759_v18  ;;  %v3053_v32 = vcombine.high %v763_v26, %v767_v27 }
 0x11f   : > { %2435 = vmatprep.mubr.bf16.mxu0 %v3894_v1  ;;  %2517 = vmatprep.mubr.bf16.mxu1 %v3894_v1  ;;  %v3006_v1 = vcombine.low %v716_v40, %v720_v41  ;;  %v3055_v17 = vcombine.high %v764_v28, %v768_v29  ;;  %v3054_v38 = vcombine.low %v764_v28, %v768_v29  ;;  %v779_v41 = vld [vmem:[%s3896_s4 + $0x2d0] sm:$0xff] }
 0x120   : > { %v827_v29 = vld [vmem:[%s3896_s4 + $0x450] sm:$0xff] }
 0x121   : > { %2406 = vmatpush1.bf16.msra.mxu0 %v2988_v34  ;;  %2488 = vmatpush1.bf16.msra.mxu1 %v2990_v35  ;;  %v775_v34 = vld [vmem:[%s3896_s4 + $0x2b0] sm:$0xff]  ;;  %v772_v35 = vld [vmem:[%s3896_s4 + $0x298] sm:$0xff] }
 0x122   : > { %2407 = vmatprep.subr.bf16.mxu0 %v2997_v36  ;;  %2489 = vmatprep.subr.bf16.mxu1 %v2999_v37  ;;  %v776_v36 = vld [vmem:[%s3896_s4 + $0x2b8] sm:$0xff]  ;;  %v3052_v37 = vcombine.low %v763_v26, %v767_v27  ;;  %v3061_v39 = vcombine.high %v771_v33, %v775_v34 }
 0x123   : > { %v3063_v40 = vcombine.high %v772_v35, %v776_v36  ;;  %v3062_v46 = vcombine.low %v772_v35, %v776_v36  ;;  %v835_v36 = vld [vmem:[%s3896_s4 + $0x490] sm:$0xff] }
 0x125   : > { %2408 = vmatpush1.bf16.msra.mxu0 %v2996_v42  ;;  %2490 = vmatpush1.bf16.msra.mxu1 %v2998_v43  ;;  %v783_v42 = vld [vmem:[%s3896_s4 + $0x2f0] sm:$0xff]  ;;  %v780_v43 = vld [vmem:[%s3896_s4 + $0x2d8] sm:$0xff] }
 0x126   : > { %2409 = vmatprep.subr.bf16.mxu0 %v3005_v44  ;;  %2491 = vmatprep.subr.bf16.mxu1 %v3007_v45  ;;  %v784_v44 = vld [vmem:[%s3896_s4 + $0x2f8] sm:$0xff]  ;;  %v3060_v45 = vcombine.low %v771_v33, %v775_v34  ;;  %v3069_v47 = vcombine.high %v779_v41, %v783_v42 }
 0x127   : > { %v3071_v48 = vcombine.high %v780_v43, %v784_v44  ;;  %v3070_v53 = vcombine.low %v780_v43, %v784_v44  ;;  %v843_v44 = vld [vmem:[%s3896_s4 + $0x4d0] sm:$0xff] }
 0x129   : > { %2410 = vmatpush1.bf16.msra.mxu0 %v3004_v50  ;;  %2492 = vmatpush1.bf16.msra.mxu1 %v3006_v1  ;;  %v791_v50 = vld [vmem:[%s3896_s4 + $0x330] sm:$0xff]  ;;  %v788_v1 = vld [vmem:[%s3896_s4 + $0x318] sm:$0xff] }
 0x12a   : > { %2411 = vmatprep.subr.bf16.mxu0 %v3013_v51  ;;  %2493 = vmatprep.subr.bf16.mxu1 %v3015_v52  ;;  %v792_v51 = vld [vmem:[%s3896_s4 + $0x338] sm:$0xff]  ;;  %v3068_v52 = vcombine.low %v779_v41, %v783_v42  ;;  %v3077_v54 = vcombine.high %v787_v49, %v791_v50 }
 0x12b   : > { %v3079_v55 = vcombine.high %v788_v1, %v792_v51  ;;  %v3078_v61 = vcombine.low %v788_v1, %v792_v51  ;;  %v851_v1 = vld [vmem:[%s3896_s4 + $0x510] sm:$0xff] }
 0x12c   : > { %v855_v51 = vld [vmem:[%s3896_s4 + $0x530] sm:$0xff] }
 0x12d   : > { %2412 = vmatpush1.bf16.msra.mxu0 %v3012_v57  ;;  %2494 = vmatpush1.bf16.msra.mxu1 %v3014_v58  ;;  %v799_v57 = vld [vmem:[%s3896_s4 + $0x370] sm:$0xff]  ;;  %v796_v58 = vld [vmem:[%s3896_s4 + $0x358] sm:$0xff] }
 0x12e   : > { %2413 = vmatprep.subr.bf16.mxu0 %v3021_v59  ;;  %2495 = vmatprep.subr.bf16.mxu1 %v3023_v60  ;;  %v800_v59 = vld [vmem:[%s3896_s4 + $0x378] sm:$0xff]  ;;  %v3076_v60 = vcombine.low %v787_v49, %v791_v50  ;;  %v3085_v62 = vcombine.high %v795_v56, %v799_v57 }
 0x12f   : > { %v3087_v63 = vcombine.high %v796_v58, %v800_v59  ;;  %v3086_v7 = vcombine.low %v796_v58, %v800_v59  ;;  %v863_v58 = vld [vmem:[%s3896_s4 + $0x570] sm:$0xff]  ;;  %v860_v59 = vld [vmem:[%s3896_s4 + $0x558] sm:$0xff] }
 0x131   : > { %2414 = vmatpush1.bf16.msra.mxu0 %v3020_v3  ;;  %2496 = vmatpush1.bf16.msra.mxu1 %v3022_v4  ;;  %v807_v3 = vld [vmem:[%s3896_s4 + $0x3b0] sm:$0xff]  ;;  %v804_v4 = vld [vmem:[%s3896_s4 + $0x398] sm:$0xff] }
 0x132   : > { %2415 = vmatprep.subr.bf16.mxu0 %v3029_v5  ;;  %2497 = vmatprep.subr.bf16.mxu1 %v3031_v6  ;;  %v808_v5 = vld [vmem:[%s3896_s4 + $0x3b8] sm:$0xff]  ;;  %v3084_v6 = vcombine.low %v795_v56, %v799_v57  ;;  %v3093_v8 = vcombine.high %v803_v2, %v807_v3  ;;  %v859_v57 = vld [vmem:[%s3896_s4 + $0x550] sm:$0xff] }
 0x133   : > { %v3095_v9 = vcombine.high %v804_v4, %v808_v5  ;;  %v3094_v16 = vcombine.low %v804_v4, %v808_v5  ;;  %v871_v4 = vld [vmem:[%s3896_s4 + $0x5b0] sm:$0xff]  ;;  %v868_v5 = vld [vmem:[%s3896_s4 + $0x598] sm:$0xff] }
 0x135   : > { %2416 = vmatpush1.bf16.msra.mxu0 %v3028_v11  ;;  %2498 = vmatpush1.bf16.msra.mxu1 %v3030_v12  ;;  %v815_v11 = vld [vmem:[%s3896_s4 + $0x3f0] sm:$0xff]  ;;  %v812_v12 = vld [vmem:[%s3896_s4 + $0x3d8] sm:$0xff] }
 0x136   : > { %2417 = vmatprep.subr.bf16.mxu0 %v3037_v13  ;;  %2499 = vmatprep.subr.bf16.mxu1 %v3039_v15  ;;  %v816_v13 = vld [vmem:[%s3896_s4 + $0x3f8] sm:$0xff]  ;;  %v3092_v15 = vcombine.low %v803_v2, %v807_v3  ;;  %v3101_v18 = vcombine.high %v811_v10, %v815_v11  ;;  %v867_v3 = vld [vmem:[%s3896_s4 + $0x590] sm:$0xff] }
 0x137   : > { %v3103_v19 = vcombine.high %v812_v12, %v816_v13  ;;  %v3102_v26 = vcombine.low %v812_v12, %v816_v13  ;;  %v879_v12 = vld [vmem:[%s3896_s4 + $0x5f0] sm:$0xff]  ;;  %v876_v13 = vld [vmem:[%s3896_s4 + $0x5d8] sm:$0xff] }
 0x139   : > { %2418 = vmatpush1.bf16.msra.mxu0 %v3036_v21  ;;  %2500 = vmatpush1.bf16.msra.mxu1 %v3038_v0  ;;  %v823_v21 = vld [vmem:[%s3896_s4 + $0x430] sm:$0xff]  ;;  %v820_v0 = vld [vmem:[%s3896_s4 + $0x418] sm:$0xff] }
 0x13a   : > { %2419 = vmatprep.subr.bf16.mxu0 %v3045_v22  ;;  %2501 = vmatprep.subr.bf16.mxu1 %v3047_v25  ;;  %v824_v22 = vld [vmem:[%s3896_s4 + $0x438] sm:$0xff]  ;;  %v3100_v25 = vcombine.low %v811_v10, %v815_v11  ;;  %v3109_v27 = vcombine.high %v819_v20, %v823_v21  ;;  %v875_v11 = vld [vmem:[%s3896_s4 + $0x5d0] sm:$0xff] }
 0x13b   : > { %v3111_v28 = vcombine.high %v820_v0, %v824_v22  ;;  %v3110_v33 = vcombine.low %v820_v0, %v824_v22  ;;  %v887_v0 = vld [vmem:[%s3896_s4 + $0x630] sm:$0xff]  ;;  %v884_v22 = vld [vmem:[%s3896_s4 + $0x618] sm:$0xff] }
 0x13d   : > { %2420 = vmatpush1.bf16.msra.mxu0 %v3044_v30  ;;  %2502 = vmatpush1.bf16.msra.mxu1 %v3046_v31  ;;  %v831_v30 = vld [vmem:[%s3896_s4 + $0x470] sm:$0xff]  ;;  %v828_v31 = vld [vmem:[%s3896_s4 + $0x458] sm:$0xff] }
 0x13e   : > { %2421 = vmatprep.subr.bf16.mxu0 %v3053_v32  ;;  %2503 = vmatprep.subr.bf16.mxu1 %v3055_v17  ;;  %v832_v32 = vld [vmem:[%s3896_s4 + $0x478] sm:$0xff]  ;;  %v3108_v17 = vcombine.low %v819_v20, %v823_v21  ;;  %v3117_v34 = vcombine.high %v827_v29, %v831_v30  ;;  %v883_v21 = vld [vmem:[%s3896_s4 + $0x610] sm:$0xff] }
 0x13f   : > { %v3119_v35 = vcombine.high %v828_v31, %v832_v32  ;;  %v3118_v41 = vcombine.low %v828_v31, %v832_v32  ;;  %v895_v31 = vld [vmem:[%s3896_s4 + $0x670] sm:$0xff]  ;;  %v892_v32 = vld [vmem:[%s3896_s4 + $0x658] sm:$0xff] }
 0x141   : > { %2422 = vmatpush1.bf16.msra.mxu0 %v3052_v37  ;;  %2504 = vmatpush1.bf16.msra.mxu1 %v3054_v38  ;;  %v839_v37 = vld [vmem:[%s3896_s4 + $0x4b0] sm:$0xff]  ;;  %v836_v38 = vld [vmem:[%s3896_s4 + $0x498] sm:$0xff] }
 0x142   : > { %2423 = vmatprep.subr.bf16.mxu0 %v3061_v39  ;;  %2505 = vmatprep.subr.bf16.mxu1 %v3063_v40  ;;  %v840_v39 = vld [vmem:[%s3896_s4 + $0x4b8] sm:$0xff]  ;;  %v3116_v40 = vcombine.low %v827_v29, %v831_v30  ;;  %v3125_v42 = vcombine.high %v835_v36, %v839_v37  ;;  %v891_v30 = vld [vmem:[%s3896_s4 + $0x650] sm:$0xff] }
 0x143   : > { %v3127_v43 = vcombine.high %v836_v38, %v840_v39 }
 0x145   : > { %2424 = vmatpush1.bf16.msra.mxu0 %v3060_v45  ;;  %2506 = vmatpush1.bf16.msra.mxu1 %v3062_v46  ;;  %v847_v45 = vld [vmem:[%s3896_s4 + $0x4f0] sm:$0xff]  ;;  %v844_v46 = vld [vmem:[%s3896_s4 + $0x4d8] sm:$0xff] }
 0x146   : > { %2425 = vmatprep.subr.bf16.mxu0 %v3069_v47  ;;  %2507 = vmatprep.subr.bf16.mxu1 %v3071_v48  ;;  %v848_v47 = vld [vmem:[%s3896_s4 + $0x4f8] sm:$0xff]  ;;  %v3126_v48 = vcombine.low %v836_v38, %v840_v39  ;;  %v3133_v49 = vcombine.high %v843_v44, %v847_v45  ;;  %v903_v38 = vld [vmem:[%s3896_s4 + $0x6b0] sm:$0xff] }
 0x147   : > { %v3135_v50 = vcombine.high %v844_v46, %v848_v47  ;;  %v900_v39 = vld [vmem:[%s3896_s4 + $0x698] sm:$0xff] }
 0x149   : > { %2426 = vmatpush1.bf16.msra.mxu0 %v3068_v52  ;;  %2508 = vmatpush1.bf16.msra.mxu1 %v3070_v53  ;;  %v852_v52 = vld [vmem:[%s3896_s4 + $0x518] sm:$0xff] }
 0x14a   : > { %2427 = vmatprep.subr.bf16.mxu0 %v3077_v54  ;;  %2509 = vmatprep.subr.bf16.mxu1 %v3079_v55  ;;  %v856_v53 = vld [vmem:[%s3896_s4 + $0x538] sm:$0xff]  ;;  %v3132_v54 = vcombine.low %v843_v44, %v847_v45  ;;  %v3141_v55 = vcombine.high %v851_v1, %v855_v51  ;;  %v907_v45 = vld [vmem:[%s3896_s4 + $0x6d0] sm:$0xff] }
 0x14b   : > { %v3143_v56 = vcombine.high %v852_v52, %v856_v53 }
 0x14d   : > { %2428 = vmatpush1.bf16.msra.mxu0 %v3076_v60  ;;  %2510 = vmatpush1.bf16.msra.mxu1 %v3078_v61  ;;  %v864_v60 = vld [vmem:[%s3896_s4 + $0x578] sm:$0xff]  ;;  %v3140_v61 = vcombine.low %v851_v1, %v855_v51  ;;  %v915_v51 = vld [vmem:[%s3896_s4 + $0x710] sm:$0xff] }
 0x14e   : > { %2429 = vmatprep.subr.bf16.mxu0 %v3085_v62  ;;  %2511 = vmatprep.subr.bf16.mxu1 %v3087_v63  ;;  %v3142_v62 = vcombine.low %v852_v52, %v856_v53  ;;  %v3149_v63 = vcombine.high %v859_v57, %v863_v58  ;;  %v3151_v2 = vcombine.high %v860_v59, %v864_v60  ;;  %v919_v52 = vld [vmem:[%s3896_s4 + $0x730] sm:$0xff]  ;;  %v916_v53 = vld [vmem:[%s3896_s4 + $0x718] sm:$0xff] }
 0x151   : > { %2430 = vmatpush1.bf16.msra.mxu0 %v3084_v6  ;;  %2512 = vmatpush1.bf16.msra.mxu1 %v3086_v7  ;;  %v872_v6 = vld [vmem:[%s3896_s4 + $0x5b8] sm:$0xff]  ;;  %v3148_v7 = vcombine.low %v859_v57, %v863_v58  ;;  %v923_v58 = vld [vmem:[%s3896_s4 + $0x750] sm:$0xff] }
 0x152   : > { %2431 = vmatprep.subr.bf16.mxu0 %v3093_v8  ;;  %2513 = vmatprep.subr.bf16.mxu1 %v3095_v9  ;;  %v3150_v8 = vcombine.low %v860_v59, %v864_v60  ;;  %v3157_v9 = vcombine.high %v867_v3, %v871_v4  ;;  %v3159_v10 = vcombine.high %v868_v5, %v872_v6  ;;  %v927_v59 = vld [vmem:[%s3896_s4 + $0x770] sm:$0xff]  ;;  %v924_v60 = vld [vmem:[%s3896_s4 + $0x758] sm:$0xff] }
 0x155   : > { %2432 = vmatpush1.bf16.msra.mxu0 %v3092_v15  ;;  %2514 = vmatpush1.bf16.msra.mxu1 %v3094_v16  ;;  %v880_v15 = vld [vmem:[%s3896_s4 + $0x5f8] sm:$0xff]  ;;  %v3156_v16 = vcombine.low %v867_v3, %v871_v4  ;;  %v931_v4 = vld [vmem:[%s3896_s4 + $0x790] sm:$0xff] }
 0x156   : > { %2433 = vmatprep.subr.bf16.mxu0 %v3101_v18  ;;  %2515 = vmatprep.subr.bf16.mxu1 %v3103_v19  ;;  %v3158_v18 = vcombine.low %v868_v5, %v872_v6  ;;  %v3165_v19 = vcombine.high %v875_v11, %v879_v12  ;;  %v3167_v20 = vcombine.high %v876_v13, %v880_v15  ;;  %v935_v5 = vld [vmem:[%s3896_s4 + $0x7b0] sm:$0xff]  ;;  %v932_v6 = vld [vmem:[%s3896_s4 + $0x798] sm:$0xff] }
 0x159   : > { %2434 = vmatpush1.bf16.msra.mxu0 %v3100_v25  ;;  %2516 = vmatpush1.bf16.msra.mxu1 %v3102_v26  ;;  %v888_v25 = vld [vmem:[%s3896_s4 + $0x638] sm:$0xff]  ;;  %v3164_v26 = vcombine.low %v875_v11, %v879_v12  ;;  %v939_v12 = vld [vmem:[%s3896_s4 + $0x7d0] sm:$0xff] }
 0x15a   : > { %2444 = vmatprep.subr.bf16.mxu0 %v3109_v27  ;;  %2526 = vmatprep.subr.bf16.mxu1 %v3111_v28  ;;  %v3166_v27 = vcombine.low %v876_v13, %v880_v15  ;;  %v3173_v28 = vcombine.high %v883_v21, %v887_v0  ;;  %v3175_v29 = vcombine.high %v884_v22, %v888_v25  ;;  %v943_v13 = vld [vmem:[%s3896_s4 + $0x7f0] sm:$0xff]  ;;  %v940_v15 = vld [vmem:[%s3896_s4 + $0x7d8] sm:$0xff] }
 0x15c   : > { %2436 = vmatmul.mubr.bf16.vlgmr.msra.gmra.mrb[4].mxu0 %v3972_v14  ;;  %2518 = vmatmul.mubr.bf16.vlgmr.msra.gmra.mrb[4].mxu1 %v3972_v14  ;;  %v3124_v14 = vcombine.low %v835_v36, %v839_v37  ;;  %v899_v37 = vld [vmem:[%s3896_s4 + $0x690] sm:$0xff] }
 0x15d   : > { %2445 = vmatpush1.bf16.msra.mxu0 %v3108_v17  ;;  %2527 = vmatpush1.bf16.msra.mxu1 %v3110_v33  ;;  %v896_v17 = vld [vmem:[%s3896_s4 + $0x678] sm:$0xff]  ;;  %v3172_v33 = vcombine.low %v883_v21, %v887_v0  ;;  %v3228_v0 = vcombine.low %v939_v12, %v943_v13 }
 0x15e   : > { %2446 = vmatprep.subr.bf16.mxu0 %v3117_v34  ;;  %2528 = vmatprep.subr.bf16.mxu1 %v3119_v35  ;;  %v3174_v34 = vcombine.low %v884_v22, %v888_v25  ;;  %v3181_v35 = vcombine.high %v891_v30, %v895_v31  ;;  %v3183_v36 = vcombine.high %v892_v32, %v896_v17 }
 0x15f   : > { %2476 = vmatprep.mubr.bf16.mxu0 %v3985_v23  ;;  %2558 = vmatprep.mubr.bf16.mxu1 %v3985_v23  ;;  %v3134_v23 = vcombine.low %v844_v46, %v848_v47  ;;  %v911_v46 = vld [vmem:[%s3896_s4 + $0x6f0] sm:$0xff]  ;;  %v908_v47 = vld [vmem:[%s3896_s4 + $0x6d8] sm:$0xff] }
 0x161   : > { %2447 = vmatpush1.bf16.msra.mxu0 %v3116_v40  ;;  %2529 = vmatpush1.bf16.msra.mxu1 %v3118_v41  ;;  %v904_v40 = vld [vmem:[%s3896_s4 + $0x6b8] sm:$0xff]  ;;  %v3180_v41 = vcombine.low %v891_v30, %v895_v31 }
 0x162   : > { %2448 = vmatprep.subr.bf16.mxu0 %v3125_v42  ;;  %2530 = vmatprep.subr.bf16.mxu1 %v3127_v43  ;;  %v3182_v42 = vcombine.low %v892_v32, %v896_v17  ;;  %v3189_v43 = vcombine.high %v899_v37, %v903_v38  ;;  %v3191_v44 = vcombine.high %v900_v39, %v904_v40 }
 0x165   : > { %2449 = vmatpush1.bf16.msra.mxu0 %v3124_v14  ;;  %2531 = vmatpush1.bf16.msra.mxu1 %v3126_v48  ;;  %v912_v14 = vld [vmem:[%s3896_s4 + $0x6f8] sm:$0xff]  ;;  %v3188_v48 = vcombine.low %v899_v37, %v903_v38 }
 0x166   : > { %2450 = vmatprep.subr.bf16.mxu0 %v3133_v49  ;;  %2532 = vmatprep.subr.bf16.mxu1 %v3135_v50  ;;  %v3190_v49 = vcombine.low %v900_v39, %v904_v40  ;;  %v3197_v50 = vcombine.high %v907_v45, %v911_v46  ;;  %v3199_v1 = vcombine.high %v908_v47, %v912_v14  ;;  %v3311_v39 = vmov (!%p3234_p8), 0.0  }
 0x167   : > { %2582 = vst [vmem:[#allocation3] sm:$0xff] (!%p3234_p8), %v3311_v39  ;;  %2583 = vst [vmem:[#allocation3 + $0x8] sm:$0xff] (!%p3234_p8), %v3311_v39 }
 0x168   : > { %2584 = vst [vmem:[#allocation3 + $0x10] sm:$0xff] (!%p3234_p8), %v3311_v39  ;;  %2585 = vst [vmem:[#allocation3 + $0x18] sm:$0xff] (!%p3234_p8), %v3311_v39 }
 0x169   : > { %2451 = vmatpush1.bf16.msra.mxu0 %v3132_v54  ;;  %2533 = vmatpush1.bf16.msra.mxu1 %v3134_v23  ;;  %v920_v54 = vld [vmem:[%s3896_s4 + $0x738] sm:$0xff]  ;;  %v3196_v23 = vcombine.low %v907_v45, %v911_v46  ;;  %2586 = vst [vmem:[#allocation3 + $0x20] sm:$0xff] (!%p3234_p8), %v3311_v39  ;;  %2587 = vst [vmem:[#allocation3 + $0x28] sm:$0xff] (!%p3234_p8), %v3311_v39 }
 0x16a   : > { %2452 = vmatprep.subr.bf16.mxu0 %v3141_v55  ;;  %2534 = vmatprep.subr.bf16.mxu1 %v3143_v56  ;;  %v3198_v55 = vcombine.low %v908_v47, %v912_v14  ;;  %v3205_v56 = vcombine.high %v915_v51, %v919_v52  ;;  %v3207_v57 = vcombine.high %v916_v53, %v920_v54 }
 0x16b   : > { %2588 = vst [vmem:[#allocation3 + $0x30] sm:$0xff] (!%p3234_p8), %v3311_v39  ;;  %2589 = vst [vmem:[#allocation3 + $0x38] sm:$0xff] (!%p3234_p8), %v3311_v39 }
 0x16c   : > { %2590 = vst [vmem:[#allocation4] sm:$0xff] (!%p3234_p8), %v3311_v39  ;;  %2591 = vst [vmem:[#allocation4 + $0x8] sm:$0xff] (!%p3234_p8), %v3311_v39 }
 0x16d   : > { %2453 = vmatpush1.bf16.msra.mxu0 %v3140_v61  ;;  %2535 = vmatpush1.bf16.msra.mxu1 %v3142_v62  ;;  %v928_v61 = vld [vmem:[%s3896_s4 + $0x778] sm:$0xff]  ;;  %v3204_v62 = vcombine.low %v915_v51, %v919_v52  ;;  %2592 = vst [vmem:[#allocation4 + $0x10] sm:$0xff] (!%p3234_p8), %v3311_v39  ;;  %2593 = vst [vmem:[#allocation4 + $0x18] sm:$0xff] (!%p3234_p8), %v3311_v39 }
 0x16e   : > { %2454 = vmatprep.subr.bf16.mxu0 %v3149_v63  ;;  %2536 = vmatprep.subr.bf16.mxu1 %v3151_v2  ;;  %v3206_v63 = vcombine.low %v916_v53, %v920_v54  ;;  %v3213_v2 = vcombine.high %v923_v58, %v927_v59  ;;  %v3215_v3 = vcombine.high %v924_v60, %v928_v61 }
 0x16f   : > { %2594 = vst [vmem:[#allocation4 + $0x20] sm:$0xff] (!%p3234_p8), %v3311_v39  ;;  %2595 = vst [vmem:[#allocation4 + $0x28] sm:$0xff] (!%p3234_p8), %v3311_v39 }
 0x170   : > { %2596 = vst [vmem:[#allocation4 + $0x30] sm:$0xff] (!%p3234_p8), %v3311_v39  ;;  %2597 = vst [vmem:[#allocation4 + $0x38] sm:$0xff] (!%p3234_p8), %v3311_v39 }
 0x171   : > { %2455 = vmatpush1.bf16.msra.mxu0 %v3148_v7  ;;  %2537 = vmatpush1.bf16.msra.mxu1 %v3150_v8  ;;  %v936_v7 = vld [vmem:[%s3896_s4 + $0x7b8] sm:$0xff]  ;;  %v3212_v8 = vcombine.low %v923_v58, %v927_v59 }
 0x172   : > { %2456 = vmatprep.subr.bf16.mxu0 %v3157_v9  ;;  %2538 = vmatprep.subr.bf16.mxu1 %v3159_v10  ;;  %v3214_v9 = vcombine.low %v924_v60, %v928_v61  ;;  %v3221_v10 = vcombine.high %v931_v4, %v935_v5  ;;  %v3223_v11 = vcombine.high %v932_v6, %v936_v7 }
 0x175   : > { %2457 = vmatpush1.bf16.msra.mxu0 %v3156_v16  ;;  %2539 = vmatpush1.bf16.msra.mxu1 %v3158_v18  ;;  %v944_v16 = vld [vmem:[%s3896_s4 + $0x7f8] sm:$0xff]  ;;  %v3220_v18 = vcombine.low %v931_v4, %v935_v5 }
 0x176   : > { %2458 = vmatprep.subr.bf16.mxu0 %v3165_v19  ;;  %2540 = vmatprep.subr.bf16.mxu1 %v3167_v20  ;;  %v3222_v19 = vcombine.low %v932_v6, %v936_v7  ;;  %v3229_v20 = vcombine.high %v939_v12, %v943_v13  ;;  %v3231_v21 = vcombine.high %v940_v15, %v944_v16 }
 0x177   : > { %v3230_v22 = vcombine.low %v940_v15, %v944_v16 }
 0x179   : > { %2459 = vmatpush1.bf16.msra.mxu0 %v3164_v26  ;;  %2541 = vmatpush1.bf16.msra.mxu1 %v3166_v27 }
 0x17a   : > { %2460 = vmatprep.subr.bf16.mxu0 %v3173_v28  ;;  %2542 = vmatprep.subr.bf16.mxu1 %v3175_v29 }
 0x17d   : > { %2461 = vmatpush1.bf16.msra.mxu0 %v3172_v33  ;;  %2543 = vmatpush1.bf16.msra.mxu1 %v3174_v34 }
 0x17e   : > { %2462 = vmatprep.subr.bf16.mxu0 %v3181_v35  ;;  %2544 = vmatprep.subr.bf16.mxu1 %v3183_v36 }
 0x181   : > { %2463 = vmatpush1.bf16.msra.mxu0 %v3180_v41  ;;  %2545 = vmatpush1.bf16.msra.mxu1 %v3182_v42 }
 0x182   : > { %2464 = vmatprep.subr.bf16.mxu0 %v3189_v43  ;;  %2546 = vmatprep.subr.bf16.mxu1 %v3191_v44 }
 0x185   : > { %2465 = vmatpush1.bf16.msra.mxu0 %v3188_v48  ;;  %2547 = vmatpush1.bf16.msra.mxu1 %v3190_v49 }
 0x186   : > { %2466 = vmatprep.subr.bf16.mxu0 %v3197_v50  ;;  %2548 = vmatprep.subr.bf16.mxu1 %v3199_v1 }
 0x189   : > { %2467 = vmatpush1.bf16.msra.mxu0 %v3196_v23  ;;  %2549 = vmatpush1.bf16.msra.mxu1 %v3198_v55 }
 0x18a   : > { %2468 = vmatprep.subr.bf16.mxu0 %v3205_v56  ;;  %2550 = vmatprep.subr.bf16.mxu1 %v3207_v57 }
 0x18d   : > { %2469 = vmatpush1.bf16.msra.mxu0 %v3204_v62  ;;  %2551 = vmatpush1.bf16.msra.mxu1 %v3206_v63 }
 0x18e   : > { %2470 = vmatprep.subr.bf16.mxu0 %v3213_v2  ;;  %2552 = vmatprep.subr.bf16.mxu1 %v3215_v3 }
 0x191   : > { %2471 = vmatpush1.bf16.msra.mxu0 %v3212_v8  ;;  %2553 = vmatpush1.bf16.msra.mxu1 %v3214_v9 }
 0x192   : > { %2472 = vmatprep.subr.bf16.mxu0 %v3221_v10  ;;  %2554 = vmatprep.subr.bf16.mxu1 %v3223_v11 }
 0x195   : > { %2473 = vmatpush1.bf16.msra.mxu0 %v3220_v18  ;;  %2555 = vmatpush1.bf16.msra.mxu1 %v3222_v19 }
 0x196   : > { %2474 = vmatprep.subr.bf16.mxu0 %v3229_v20  ;;  %2556 = vmatprep.subr.bf16.mxu1 %v3231_v21 }
 0x199   : > { %2475 = vmatpush1.bf16.msra.mxu0 %v3228_v0  ;;  %2557 = vmatpush1.bf16.msra.mxu1 %v3230_v22 }
 0x19c   : > { %2477 = vmatmul.mubr.bf16.vlgmr.msra.gmra.mrb[4].mxu0 %v4053_v24  ;;  %2559 = vmatmul.mubr.bf16.vlgmr.msra.gmra.mrb[4].mxu1 %v4053_v24 }
 0x1ef   : > { %v2314_v25 = vpop.f32.mrb[0].mxu0  ;;  %v2396_v26 = vpop.f32.mrb[0].mxu1 }
 0x1f0   : > { %2570 = vst [vmem:[%s2569_s8] sm:$0xff] %v2314_v25  ;;  %v2316_v27 = vpop.f32.mrb[1].mxu0  ;;  %2572 = vst [vmem:[%s2569_s8 + $0x10] sm:$0xff] %v2396_v26  ;;  %v2398_v28 = vpop.f32.mrb[1].mxu1 }
 0x1f1   : > { %2571 = vst [vmem:[%s2569_s8 + $0x8] sm:$0xff] %v2316_v27  ;;  %v2318_v29 = vpop.f32.mrb[2].mxu0  ;;  %2573 = vst [vmem:[%s2569_s8 + $0x18] sm:$0xff] %v2398_v28  ;;  %v2400_v30 = vpop.f32.mrb[2].mxu1 }
 0x1f2   : > { %v2319_v31 = vpop.f32.mrb[3].mxu0  ;;  %v2401_v32 = vpop.f32.mrb[3].mxu1 }
 0x26c   : > { %2581 = sbr.rel (%p3234_p8) target bundleno = 627 (0x273), region = 59 }
 0x26f   : > { %v2478_v17 = vpop.f32.mrb[4].mxu0  ;;  %v2560_v33 = vpop.f32.mrb[4].mxu1 }
 0x270   : > { %2574 = vst [vmem:[%s2569_s8 + $0x20] sm:$0xff] %v2478_v17  ;;  %v2480_v34 = vpop.f32.mrb[5].mxu0  ;;  %2576 = vst [vmem:[%s2569_s8 + $0x30] sm:$0xff] %v2560_v33  ;;  %v4188_v24 = vpop.f32.mrb[5].mxu1 }
 0x271   : > { %2575 = vst [vmem:[%s2569_s8 + $0x28] sm:$0xff] %v2480_v34  ;;  %v2482_v35 = vpop.f32.mrb[6].mxu0  ;;  %2577 = vst [vmem:[%s2569_s8 + $0x38] sm:$0xff] %v4188_v24  ;;  %v2564_v36 = vpop.f32.mrb[6].mxu1 }
 0x272   : > { %v2483_v37 = vpop.f32.mrb[7].mxu0  ;;  %v2565_v38 = vpop.f32.mrb[7].mxu1 }
 0x273 PF: > { %v2598_v40 = vld [vmem:[#allocation3] sm:$0xff]  ;;  %v2599_v41 = vld [vmem:[#allocation3 + $0x8] sm:$0xff]  ;;  %v2600_v42 = vld [vmem:[#allocation3 + $0x10] sm:$0xff]  ;;  %v2630_v43 = vmul.f32 %v2314_v25, %v2314_v25  ;;  %v2631_v44 = vmul.f32 %v2316_v27, %v2316_v27  ;;  %v2632_v45 = vmul.f32 %v2396_v26, %v2396_v26  ;;  %v2633_v46 = vmul.f32 %v2398_v28, %v2398_v28  ;;  %p3235_p9 = scmp.ne.s32.totalorder %s3348_s15, 3 }
 0x274   : > { %v2606_v47 = vadd.f32 %v2598_v40, %v2314_v25  ;;  %v2607_v14 = vadd.f32 %v2599_v41, %v2316_v27  ;;  %v2608_v48 = vadd.f32 %v2600_v42, %v2396_v26  ;;  %v2601_v49 = vld [vmem:[#allocation3 + $0x18] sm:$0xff]  ;;  %v2602_v50 = vld [vmem:[#allocation3 + $0x20] sm:$0xff]  ;;  %v2603_v1 = vld [vmem:[#allocation3 + $0x28] sm:$0xff]  ;;  %v2634_v51 = vmul.f32 %v2478_v17, %v2478_v17 }
 0x275   : > { %v2609_v52 = vadd.f32 %v2601_v49, %v2398_v28  ;;  %v2610_v53 = vadd.f32 %v2602_v50, %v2478_v17  ;;  %v2611_v54 = vadd.f32 %v2603_v1, %v2480_v34  ;;  %v2604_v23 = vld [vmem:[#allocation3 + $0x30] sm:$0xff]  ;;  %v2605_v55 = vld [vmem:[#allocation3 + $0x38] sm:$0xff]  ;;  %v2622_v56 = vld [vmem:[#allocation4] sm:$0xff]  ;;  %v2635_v57 = vmul.f32 %v2480_v34, %v2480_v34 }
 0x276   : > { %2614 = vst [vmem:[#allocation3] sm:$0xff] %v2606_v47  ;;  %2615 = vst [vmem:[#allocation3 + $0x8] sm:$0xff] %v2607_v14  ;;  %v2612_v58 = vadd.f32 %v2604_v23, %v2560_v33  ;;  %v2613_v59 = vadd.f32 %v2605_v55, %v4188_v24  ;;  %v2638_v60 = vadd.f32 %v2630_v43, %v2622_v56  ;;  %v2623_v61 = vld [vmem:[#allocation4 + $0x8] sm:$0xff]  ;;  %v2624_v62 = vld [vmem:[#allocation4 + $0x10] sm:$0xff] }
 0x277   : > { %2616 = vst [vmem:[#allocation3 + $0x10] sm:$0xff] %v2608_v48  ;;  %v2625_v63 = vld [vmem:[#allocation4 + $0x18] sm:$0xff]  ;;  %v2636_v2 = vmul.f32 %v2560_v33, %v2560_v33  ;;  %2617 = vst [vmem:[#allocation3 + $0x18] sm:$0xff] %v2609_v52  ;;  %v2639_v3 = vadd.f32 %v2631_v44, %v2623_v61  ;;  %v2640_v4 = vadd.f32 %v2632_v45, %v2624_v62  ;;  %v2626_v6 = vld [vmem:[#allocation4 + $0x20] sm:$0xff]  ;;  %2657 = sbr.rel (%p3235_p9) target bundleno = 856 (0x358), region = 63 }
 0x278   : > { %2618 = vst [vmem:[#allocation3 + $0x20] sm:$0xff] %v2610_v53  ;;  %2619 = vst [vmem:[#allocation3 + $0x28] sm:$0xff] %v2611_v54  ;;  %v2641_v5 = vadd.f32 %v2633_v46, %v2625_v63  ;;  %v2627_v7 = vld [vmem:[#allocation4 + $0x28] sm:$0xff]  ;;  %v2628_v8 = vld [vmem:[#allocation4 + $0x30] sm:$0xff]  ;;  %v2637_v9 = vmul.f32 %v4188_v24, %v4188_v24  ;;  %v2642_v10 = vadd.f32 %v2634_v51, %v2626_v6 }
 0x279   : > { %2620 = vst [vmem:[#allocation3 + $0x30] sm:$0xff] %v2612_v58  ;;  %2621 = vst [vmem:[#allocation3 + $0x38] sm:$0xff] %v2613_v59  ;;  %v2643_v11 = vadd.f32 %v2635_v57, %v2627_v7  ;;  %v2644_v12 = vadd.f32 %v2636_v2, %v2628_v8  ;;  %v2629_v13 = vld [vmem:[#allocation4 + $0x38] sm:$0xff]  ;;  %v2701_v52 = vld [vmem:[#allocation2] sm:$0xff] (!%p3235_p9) }
 0x27a   : > { %2646 = vst [vmem:[#allocation4] sm:$0xff] %v2638_v60  ;;  %2647 = vst [vmem:[#allocation4 + $0x8] sm:$0xff] %v2639_v3  ;;  %v2645_v15 = vadd.f32 %v2637_v9, %v2629_v13  ;;  %v2702_v53 = vld [vmem:[#allocation2 + $0x8] sm:$0xff] (!%p3235_p9)  ;;  %v2703_v54 = vld [vmem:[#allocation2 + $0x10] sm:$0xff] (!%p3235_p9) }
 0x27b   : > { %2648 = vst [vmem:[#allocation4 + $0x10] sm:$0xff] %v2640_v4  ;;  %2649 = vst [vmem:[#allocation4 + $0x18] sm:$0xff] %v2641_v5  ;;  %v2704_v23 = vld [vmem:[#allocation2 + $0x18] sm:$0xff] (!%p3235_p9)  ;;  %v2705_v56 = vld [vmem:[#allocation2 + $0x20] sm:$0xff] (!%p3235_p9) }
 0x27c   : > { %2650 = vst [vmem:[#allocation4 + $0x20] sm:$0xff] %v2642_v10  ;;  %2651 = vst [vmem:[#allocation4 + $0x28] sm:$0xff] %v2643_v11  ;;  %v2706_v57 = vld [vmem:[#allocation2 + $0x28] sm:$0xff] (!%p3235_p9)  ;;  %v2707_v58 = vld [vmem:[#allocation2 + $0x30] sm:$0xff] (!%p3235_p9) }
 0x27d   : > { %2652 = vst [vmem:[#allocation4 + $0x30] sm:$0xff] %v2644_v12  ;;  %2653 = vst [vmem:[#allocation4 + $0x38] sm:$0xff] %v2645_v15  ;;  %v2658_v16 = vld [vmem:[#allocation3] sm:$0xff] (!%p3235_p9)  ;;  %v2659_v18 = vld [vmem:[#allocation3 + $0x8] sm:$0xff] (!%p3235_p9) }
 0x27e   : > { %v2660_v19 = vld [vmem:[#allocation3 + $0x10] sm:$0xff]  ;;  %v2666_v20 = vadd.f32 %v2659_v18, %v2658_v16  ;;  %v2661_v21 = vld [vmem:[#allocation3 + $0x18] sm:$0xff]  ;;  %v2733_v11 = vld [vmem:[%s4469_s2] sm:$0xff] }
 0x27f   : > { %v2662_v27 = vld [vmem:[#allocation3 + $0x20] sm:$0xff]  ;;  %v2663_v31 = vld [vmem:[#allocation3 + $0x28] sm:$0xff]  ;;  %v2708_v60 = vld [vmem:[#allocation2 + $0x38] sm:$0xff] }
 0x280   : > { %v2667_v22 = vadd.f32 %v2666_v20, %v2660_v19  ;;  %v2664_v34 = vld [vmem:[#allocation3 + $0x30] sm:$0xff]  ;;  %v2665_v37 = vld [vmem:[#allocation3 + $0x38] sm:$0xff]  ;;  %v2734_v18 = vld [vmem:[%s4469_s2 + $0x8] sm:$0xff] }
 0x281   : > { %v2675_v0 = vld [vmem:[#allocation4] sm:$0xff]  ;;  %v2676_v25 = vld [vmem:[#allocation4 + $0x8] sm:$0xff]  ;;  %v2735_v19 = vld [vmem:[%s4469_s2 + $0x10] sm:$0xff] }
 0x282   : > { %v2677_v26 = vld [vmem:[#allocation4 + $0x10] sm:$0xff]  ;;  %v2683_v28 = vadd.f32 %v2676_v25, %v2675_v0  ;;  %v2668_v29 = vadd.f32 %v2667_v22, %v2661_v21  ;;  %v2678_v30 = vld [vmem:[#allocation4 + $0x18] sm:$0xff]  ;;  %v2758_v21 = vld [vmem:[#allocation2 + $0x40] sm:$0xff] }
 0x283   : > { %v2679_v33 = vld [vmem:[#allocation4 + $0x20] sm:$0xff]  ;;  %v2680_v36 = vld [vmem:[#allocation4 + $0x28] sm:$0xff]  ;;  %v2736_v20 = vld [vmem:[%s4469_s2 + $0x18] sm:$0xff] }
 0x284   : > { %v2684_v32 = vadd.f32 %v2683_v28, %v2677_v26  ;;  %v2669_v17 = vadd.f32 %v2668_v29, %v2662_v27  ;;  %v2681_v40 = vld [vmem:[#allocation4 + $0x30] sm:$0xff]  ;;  %v2682_v43 = vld [vmem:[#allocation4 + $0x38] sm:$0xff]  ;;  %v2759_v0 = vld [vmem:[#allocation2 + $0x48] sm:$0xff] }
 0x285   : > { %v2760_v22 = vld [vmem:[#allocation2 + $0x50] sm:$0xff]  ;;  %v2737_v29 = vld [vmem:[%s4469_s2 + $0x20] sm:$0xff] }
 0x286   : > { %v2685_v24 = vadd.f32 %v2684_v32, %v2678_v30  ;;  %v2670_v35 = vadd.f32 %v2669_v17, %v2663_v31  ;;  %v2738_v30 = vld [vmem:[%s4469_s2 + $0x28] sm:$0xff]  ;;  %v2739_v31 = vld [vmem:[%s4469_s2 + $0x30] sm:$0xff] }
 0x288   : > { %v2686_v38 = vadd.f32 %v2685_v24, %v2679_v33  ;;  %v2671_v39 = vadd.f32 %v2670_v35, %v2664_v34  ;;  %v2740_v24 = vld [vmem:[%s4469_s2 + $0x38] sm:$0xff] }
 0x289   : > { %v2761_v35 = vld [vmem:[#allocation2 + $0x58] sm:$0xff] }
 0x28a   : > { %v2687_v41 = vadd.f32 %v2686_v38, %v2680_v36  ;;  %v2672_v42 = vadd.f32 %v2671_v39, %v2665_v37 }
 0x28c   : > { %v2688_v44 = vadd.f32 %v2687_v41, %v2681_v40  ;;  %2673 = vadd.xlane.f32.xlu0 %v2672_v42  ;;  %v2762_v40 = vld [vmem:[#allocation2 + $0x60] sm:$0xff]  ;;  %v2763_v41 = vld [vmem:[#allocation2 + $0x68] sm:$0xff]  ;;  %v2764_v42 = vld [vmem:[#allocation2 + $0x70] sm:$0xff] }
 0x28e   : > { %v2689_v45 = vadd.f32 %v2688_v44, %v2682_v43 }
 0x290   : > { %2690 = vadd.xlane.f32.xlu0 %v2689_v45 }
 0x319   : > { %v2674_v46 = vpop.xlane.xlu0 %2673 }
 0x31a   : > { %v2692_v47 = vmul.f32 0.00024414063, %v2674_v46 }
 0x31c   : > { %v2694_v49 = vmul.f32 %v2692_v47, %v2692_v47  ;;  %v2699_v55 = vsub.f32 0.0, %v2692_v47  ;;  %v2765_v47 = vld [vmem:[#allocation2 + $0x78] sm:$0xff] }
 0x31d   : > { %v2691_v14 = vpop.xlane.xlu0 %2690 }
 0x31e   : > { %v2693_v48 = vmul.f32 0.00024414063, %v2691_v14 }
 0x320   : > { %v2695_v50 = vsub.f32 %v2693_v48, %v2694_v49 }
 0x322   : > { %v2696_v1 = vmax.f32 %v2695_v50, 0.0 }
 0x324   : > { %v2697_v51 = vadd.f32 1e-05, %v2696_v1 }
 0x326   : > { %3285 = vrsqrt.f32 %v2697_v51 }
 0x330   : > { %v4196_v59 = vpop.eup %3285 }
 0x331   : > { %v4199_v61 = vmul.f32 %v4196_v59, %v2699_v55  ;;  %v2709_v62 = vmul.f32 %v4196_v59, %v2701_v52  ;;  %v2710_v63 = vmul.f32 %v4196_v59, %v2702_v53  ;;  %v2711_v2 = vmul.f32 %v4196_v59, %v2703_v54 }
 0x332   : > { %v2712_v3 = vmul.f32 %v4196_v59, %v2704_v23  ;;  %v2713_v4 = vmul.f32 %v4196_v59, %v2705_v56  ;;  %v2714_v5 = vmul.f32 %v4196_v59, %v2706_v57  ;;  %v2715_v6 = vmul.f32 %v4196_v59, %v2707_v58  ;;  %v2790_v57 = vld [vmem:[%s4469_s2 + $0x40] sm:$0xff] }
 0x333   : > { %v2716_v7 = vmul.f32 %v4196_v59, %v2708_v60  ;;  %v2717_v8 = vadd.f32 %v2709_v62, %v4199_v61  ;;  %v2718_v9 = vadd.f32 %v2710_v63, %v4199_v61  ;;  %v2719_v10 = vadd.f32 %v2711_v2, %v4199_v61  ;;  %v2791_v2 = vld [vmem:[%s4469_s2 + $0x48] sm:$0xff] }
 0x334   : > { %v2720_v12 = vadd.f32 %v2712_v3, %v4199_v61  ;;  %v2721_v13 = vadd.f32 %v2713_v4, %v4199_v61  ;;  %v2722_v15 = vadd.f32 %v2714_v5, %v4199_v61  ;;  %v2723_v16 = vadd.f32 %v2715_v6, %v4199_v61  ;;  %v2792_v3 = vld [vmem:[%s4469_s2 + $0x50] sm:$0xff]  ;;  %v2793_v4 = vld [vmem:[%s4469_s2 + $0x58] sm:$0xff]  ;;  %v2815_v5 = vld [vmem:[#allocation2 + $0x80] sm:$0xff] }
 0x335   : > { %v2724_v25 = vadd.f32 %v2716_v7, %v4199_v61  ;;  %v2725_v26 = vmax.f32 %v2717_v8, 0.0  ;;  %v2726_v27 = vmax.f32 %v2718_v9, 0.0  ;;  %v2727_v28 = vmax.f32 %v2719_v10, 0.0  ;;  %v2816_v6 = vld [vmem:[#allocation2 + $0x88] sm:$0xff]  ;;  %v2817_v7 = vld [vmem:[#allocation2 + $0x90] sm:$0xff] }
 0x336   : > { %v2728_v32 = vmax.f32 %v2720_v12, 0.0  ;;  %v2729_v17 = vmax.f32 %v2721_v13, 0.0  ;;  %v2730_v33 = vmax.f32 %v2722_v15, 0.0  ;;  %v2731_v34 = vmax.f32 %v2723_v16, 0.0  ;;  %v2794_v12 = vld [vmem:[%s4469_s2 + $0x60] sm:$0xff]  ;;  %v2795_v13 = vld [vmem:[%s4469_s2 + $0x68] sm:$0xff] }
 0x337   : > { %v2732_v36 = vmax.f32 %v2724_v25, 0.0  ;;  %v2741_v37 = vadd.f32 %v2733_v11, %v2725_v26  ;;  %v2742_v38 = vadd.f32 %v2734_v18, %v2726_v27  ;;  %v2743_v39 = vadd.f32 %v2735_v19, %v2727_v28  ;;  %v2796_v15 = vld [vmem:[%s4469_s2 + $0x70] sm:$0xff]  ;;  %v2819_v28 = vld [vmem:[#allocation2 + $0xa0] sm:$0xff] }
 0x338   : > { %v2744_v43 = vadd.f32 %v2736_v20, %v2728_v32  ;;  %v2745_v44 = vadd.f32 %v2737_v29, %v2729_v17  ;;  %v2746_v45 = vadd.f32 %v2738_v30, %v2730_v33  ;;  %v2747_v46 = vadd.f32 %v2739_v31, %v2731_v34  ;;  %v2820_v29 = vld [vmem:[#allocation2 + $0xa8] sm:$0xff]  ;;  %v2821_v30 = vld [vmem:[#allocation2 + $0xb0] sm:$0xff]  ;;  %v2822_v34 = vld [vmem:[#allocation2 + $0xb8] sm:$0xff] }
 0x339   : > { %v2748_v14 = vadd.f32 %v2740_v24, %v2732_v36  ;;  %2749 = vst [vmem:[%s4470_s3] sm:$0xff] %v2741_v37  ;;  %2750 = vst [vmem:[%s4470_s3 + $0x8] sm:$0xff] %v2742_v38  ;;  %v2766_v48 = vmul.f32 %v4196_v59, %v2758_v21  ;;  %v2767_v49 = vmul.f32 %v4196_v59, %v2759_v0  ;;  %v2797_v21 = vld [vmem:[%s4469_s2 + $0x78] sm:$0xff] }
 0x33a   : > { %2751 = vst [vmem:[%s4470_s3 + $0x10] sm:$0xff] %v2743_v39  ;;  %v2768_v50 = vmul.f32 %v4196_v59, %v2760_v22  ;;  %2752 = vst [vmem:[%s4470_s3 + $0x18] sm:$0xff] %v2744_v43  ;;  %v2769_v1 = vmul.f32 %v4196_v59, %v2761_v35  ;;  %v2770_v51 = vmul.f32 %v4196_v59, %v2762_v40  ;;  %v2818_v0 = vld [vmem:[#allocation2 + $0x98] sm:$0xff] }
 0x33b   : > { %2753 = vst [vmem:[%s4470_s3 + $0x20] sm:$0xff] %v2745_v44  ;;  %2754 = vst [vmem:[%s4470_s3 + $0x28] sm:$0xff] %v2746_v45  ;;  %v2771_v52 = vmul.f32 %v4196_v59, %v2763_v41  ;;  %v2772_v53 = vmul.f32 %v4196_v59, %v2764_v42  ;;  %v2773_v54 = vmul.f32 %v4196_v59, %v2765_v47 }
 0x33c   : > { %2755 = vst [vmem:[%s4470_s3 + $0x30] sm:$0xff] %v2747_v46  ;;  %2756 = vst [vmem:[%s4470_s3 + $0x38] sm:$0xff] %v2748_v14  ;;  %v2774_v23 = vadd.f32 %v2766_v48, %v4199_v61  ;;  %v2775_v55 = vadd.f32 %v2767_v49, %v4199_v61  ;;  %v2776_v56 = vadd.f32 %v2768_v50, %v4199_v61  ;;  %v2847_v46 = vld [vmem:[%s4469_s2 + $0x80] sm:$0xff]  ;;  %v2848_v50 = vld [vmem:[%s4469_s2 + $0x88] sm:$0xff] }
 0x33d   : > { %v2777_v58 = vadd.f32 %v2769_v1, %v4199_v61  ;;  %v2778_v60 = vadd.f32 %v2770_v51, %v4199_v61  ;;  %v2779_v62 = vadd.f32 %v2771_v52, %v4199_v61  ;;  %v2780_v63 = vadd.f32 %v2772_v53, %v4199_v61  ;;  %v2849_v1 = vld [vmem:[%s4469_s2 + $0x90] sm:$0xff]  ;;  %v2850_v51 = vld [vmem:[%s4469_s2 + $0x98] sm:$0xff]  ;;  %v2872_v52 = vld [vmem:[#allocation2 + $0xc0] sm:$0xff] }
 0x33e   : > { %v2781_v8 = vadd.f32 %v2773_v54, %v4199_v61  ;;  %v2782_v9 = vmax.f32 %v2774_v23, 0.0  ;;  %v2783_v10 = vmax.f32 %v2775_v55, 0.0  ;;  %v2784_v11 = vmax.f32 %v2776_v56, 0.0  ;;  %v2873_v53 = vld [vmem:[#allocation2 + $0xc8] sm:$0xff]  ;;  %v2874_v54 = vld [vmem:[#allocation2 + $0xd0] sm:$0xff] }
 0x33f   : > { %v2785_v16 = vmax.f32 %v2777_v58, 0.0  ;;  %v2786_v18 = vmax.f32 %v2778_v60, 0.0  ;;  %v2787_v19 = vmax.f32 %v2779_v62, 0.0  ;;  %v2788_v20 = vmax.f32 %v2780_v63, 0.0  ;;  %v2851_v58 = vld [vmem:[%s4469_s2 + $0xa0] sm:$0xff]  ;;  %v2852_v60 = vld [vmem:[%s4469_s2 + $0xa8] sm:$0xff] }
 0x340   : > { %v2789_v22 = vmax.f32 %v2781_v8, 0.0  ;;  %v2798_v25 = vadd.f32 %v2790_v57, %v2782_v9  ;;  %v2799_v26 = vadd.f32 %v2791_v2, %v2783_v10  ;;  %v2800_v27 = vadd.f32 %v2792_v3, %v2784_v11  ;;  %v2853_v62 = vld [vmem:[%s4469_s2 + $0xb0] sm:$0xff]  ;;  %v2876_v11 = vld [vmem:[#allocation2 + $0xe0] sm:$0xff] }
 0x341   : > { %v2801_v31 = vadd.f32 %v2793_v4, %v2785_v16  ;;  %v2802_v32 = vadd.f32 %v2794_v12, %v2786_v18  ;;  %v2803_v17 = vadd.f32 %v2795_v13, %v2787_v19  ;;  %v2804_v33 = vadd.f32 %v2796_v15, %v2788_v20  ;;  %v2877_v12 = vld [vmem:[#allocation2 + $0xe8] sm:$0xff]  ;;  %v2878_v13 = vld [vmem:[#allocation2 + $0xf0] sm:$0xff]  ;;  %v2879_v20 = vld [vmem:[#allocation2 + $0xf8] sm:$0xff] }
 0x342   : > { %v2805_v24 = vadd.f32 %v2797_v21, %v2789_v22  ;;  %2806 = vst [vmem:[%s4470_s3 + $0x40] sm:$0xff] %v2798_v25  ;;  %2807 = vst [vmem:[%s4470_s3 + $0x48] sm:$0xff] %v2799_v26  ;;  %v2823_v35 = vmul.f32 %v4196_v59, %v2815_v5  ;;  %v2824_v36 = vmul.f32 %v4196_v59, %v2816_v6  ;;  %v2854_v5 = vld [vmem:[%s4469_s2 + $0xb8] sm:$0xff] }
 0x343   : > { %2808 = vst [vmem:[%s4470_s3 + $0x50] sm:$0xff] %v2800_v27  ;;  %v2825_v37 = vmul.f32 %v4196_v59, %v2817_v7  ;;  %2809 = vst [vmem:[%s4470_s3 + $0x58] sm:$0xff] %v2801_v31  ;;  %v2826_v38 = vmul.f32 %v4196_v59, %v2818_v0  ;;  %v2827_v39 = vmul.f32 %v4196_v59, %v2819_v28  ;;  %v2875_v6 = vld [vmem:[#allocation2 + $0xd8] sm:$0xff] }
 0x344   : > { %2810 = vst [vmem:[%s4470_s3 + $0x60] sm:$0xff] %v2802_v32  ;;  %2811 = vst [vmem:[%s4470_s3 + $0x68] sm:$0xff] %v2803_v17  ;;  %v2828_v40 = vmul.f32 %v4196_v59, %v2820_v29  ;;  %v2829_v41 = vmul.f32 %v4196_v59, %v2821_v30  ;;  %v2830_v42 = vmul.f32 %v4196_v59, %v2822_v34 }
 0x345   : > { %2812 = vst [vmem:[%s4470_s3 + $0x70] sm:$0xff] %v2804_v33  ;;  %2813 = vst [vmem:[%s4470_s3 + $0x78] sm:$0xff] %v2805_v24  ;;  %v2831_v43 = vadd.f32 %v2823_v35, %v4199_v61  ;;  %v2832_v44 = vadd.f32 %v2824_v36, %v4199_v61  ;;  %v2833_v45 = vadd.f32 %v2825_v37, %v4199_v61  ;;  %v2904_v33 = vld [vmem:[%s4469_s2 + $0xc0] sm:$0xff]  ;;  %v2906_v37 = vld [vmem:[%s4469_s2 + $0xd0] sm:$0xff] }
 0x346   : > { %v2834_v47 = vadd.f32 %v2826_v38, %v4199_v61  ;;  %v2835_v14 = vadd.f32 %v2827_v39, %v4199_v61  ;;  %v2836_v48 = vadd.f32 %v2828_v40, %v4199_v61  ;;  %v2837_v49 = vadd.f32 %v2829_v41, %v4199_v61  ;;  %v2907_v38 = vld [vmem:[%s4469_s2 + $0xd8] sm:$0xff] }
 0x347   : > { %v2838_v23 = vadd.f32 %v2830_v42, %v4199_v61  ;;  %v2839_v55 = vmax.f32 %v2831_v43, 0.0  ;;  %v2840_v56 = vmax.f32 %v2832_v44, 0.0  ;;  %v2841_v57 = vmax.f32 %v2833_v45, 0.0  ;;  %v2908_v43 = vld [vmem:[%s4469_s2 + $0xe0] sm:$0xff]  ;;  %v2909_v44 = vld [vmem:[%s4469_s2 + $0xe8] sm:$0xff]  ;;  %v2910_v45 = vld [vmem:[%s4469_s2 + $0xf0] sm:$0xff] }
 0x348   : > { %v2842_v63 = vmax.f32 %v2834_v47, 0.0  ;;  %v2843_v2 = vmax.f32 %v2835_v14, 0.0  ;;  %v2844_v3 = vmax.f32 %v2836_v48, 0.0  ;;  %v2845_v4 = vmax.f32 %v2837_v49, 0.0 }
 0x349   : > { %v2846_v7 = vmax.f32 %v2838_v23, 0.0  ;;  %v2855_v8 = vadd.f32 %v2847_v46, %v2839_v55  ;;  %v2856_v9 = vadd.f32 %v2848_v50, %v2840_v56  ;;  %v2857_v10 = vadd.f32 %v2849_v1, %v2841_v57 }
 0x34a   : > { %v2858_v15 = vadd.f32 %v2850_v51, %v2842_v63  ;;  %v2859_v16 = vadd.f32 %v2851_v58, %v2843_v2  ;;  %v2860_v18 = vadd.f32 %v2852_v60, %v2844_v3  ;;  %v2861_v19 = vadd.f32 %v2853_v62, %v2845_v4 }
 0x34b   : > { %v2862_v21 = vadd.f32 %v2854_v5, %v2846_v7  ;;  %2863 = vst [vmem:[%s4470_s3 + $0x80] sm:$0xff] %v2855_v8  ;;  %2864 = vst [vmem:[%s4470_s3 + $0x88] sm:$0xff] %v2856_v9  ;;  %v2880_v0 = vmul.f32 %v4196_v59, %v2872_v52  ;;  %v2881_v22 = vmul.f32 %v4196_v59, %v2873_v53 }
 0x34c   : > { %2865 = vst [vmem:[%s4470_s3 + $0x90] sm:$0xff] %v2857_v10  ;;  %v2882_v25 = vmul.f32 %v4196_v59, %v2874_v54  ;;  %2866 = vst [vmem:[%s4470_s3 + $0x98] sm:$0xff] %v2858_v15  ;;  %v2883_v26 = vmul.f32 %v4196_v59, %v2875_v6  ;;  %v2884_v27 = vmul.f32 %v4196_v59, %v2876_v11 }
 0x34d   : > { %2867 = vst [vmem:[%s4470_s3 + $0xa0] sm:$0xff] %v2859_v16  ;;  %2868 = vst [vmem:[%s4470_s3 + $0xa8] sm:$0xff] %v2860_v18  ;;  %v2885_v28 = vmul.f32 %v4196_v59, %v2877_v12  ;;  %v2886_v29 = vmul.f32 %v4196_v59, %v2878_v13  ;;  %v2887_v30 = vmul.f32 %v4196_v59, %v2879_v20  ;;  %v2905_v59 = vld [vmem:[%s4469_s2 + $0xc8] sm:$0xff] }
 0x34e   : > { %2869 = vst [vmem:[%s4470_s3 + $0xb0] sm:$0xff] %v2861_v19  ;;  %2870 = vst [vmem:[%s4470_s3 + $0xb8] sm:$0xff] %v2862_v21  ;;  %v2888_v31 = vadd.f32 %v2880_v0, %v4199_v61  ;;  %v2889_v32 = vadd.f32 %v2881_v22, %v4199_v61  ;;  %v2890_v17 = vadd.f32 %v2882_v25, %v4199_v61 }
 0x34f   : > { %v2891_v34 = vadd.f32 %v2883_v26, %v4199_v61  ;;  %v2892_v24 = vadd.f32 %v2884_v27, %v4199_v61  ;;  %v2893_v35 = vadd.f32 %v2885_v28, %v4199_v61  ;;  %v2894_v36 = vadd.f32 %v2886_v29, %v4199_v61 }
 0x350   : > { %v2895_v39 = vadd.f32 %v2887_v30, %v4199_v61  ;;  %v2896_v40 = vmax.f32 %v2888_v31, 0.0  ;;  %v2897_v41 = vmax.f32 %v2889_v32, 0.0  ;;  %v2898_v42 = vmax.f32 %v2890_v17, 0.0  ;;  %v2911_v61 = vld [vmem:[%s4469_s2 + $0xf8] sm:$0xff] }
 0x351   : > { %v2899_v46 = vmax.f32 %v2891_v34, 0.0  ;;  %v2900_v47 = vmax.f32 %v2892_v24, 0.0  ;;  %v2901_v14 = vmax.f32 %v2893_v35, 0.0  ;;  %v2902_v48 = vmax.f32 %v2894_v36, 0.0 }
 0x352   : > { %v2903_v49 = vmax.f32 %v2895_v39, 0.0  ;;  %v2912_v50 = vadd.f32 %v2904_v33, %v2896_v40  ;;  %v2913_v1 = vadd.f32 %v2905_v59, %v2897_v41  ;;  %v2914_v51 = vadd.f32 %v2906_v37, %v2898_v42 }
 0x353   : > { %v2915_v52 = vadd.f32 %v2907_v38, %v2899_v46  ;;  %v2916_v53 = vadd.f32 %v2908_v43, %v2900_v47  ;;  %v2917_v54 = vadd.f32 %v2909_v44, %v2901_v14  ;;  %v2918_v23 = vadd.f32 %v2910_v45, %v2902_v48 }
 0x354   : > { %v2919_v55 = vadd.f32 %v2911_v61, %v2903_v49  ;;  %2920 = vst [vmem:[%s4470_s3 + $0xc0] sm:$0xff] %v2912_v50  ;;  %2921 = vst [vmem:[%s4470_s3 + $0xc8] sm:$0xff] %v2913_v1 }
 0x355   : > { %2922 = vst [vmem:[%s4470_s3 + $0xd0] sm:$0xff] %v2914_v51  ;;  %2923 = vst [vmem:[%s4470_s3 + $0xd8] sm:$0xff] %v2915_v52 }
 0x356   : > { %2924 = vst [vmem:[%s4470_s3 + $0xe0] sm:$0xff] %v2916_v53  ;;  %2925 = vst [vmem:[%s4470_s3 + $0xe8] sm:$0xff] %v2917_v54 }
 0x357   : > { %2926 = vst [vmem:[%s4470_s3 + $0xf0] sm:$0xff] %v2918_v23  ;;  %2927 = vst [vmem:[%s4470_s3 + $0xf8] sm:$0xff] %v2919_v55 }
 0x358 PF: > { %p10_p10 = scmp.ge.s32.totalorder %s3351_s16, 6   ;;  %s4471_s12 = smov %s3305_s13 }
 0x359   : > { %s4472_s13 = smov %s3360_s19  ;;  %s4473_s14 = smov %s3351_s16 }
 0x35a   :  { %12 = sbr.rel (!%p10_p10) target bundleno = 2 (0x2), region = 98 }

// kernel: costregnet_forward.17
= control target key start
LH: loop header
LB: loop body
LE: loop exit
PB: predicated region body
PF: predicated region fallthrough
CT: control target
= control target key end

     0   :  { %s1639_s9 = smov 0   ;;  %s1641_s10 = smov 0   ;;  %s2102_s0 = inlined_call_operand.vmem [shape: bf16[8,256], index: 0, kind: input, shape index: {}]   ;;  %s2103_s1 = inlined_call_operand.vmem [shape: bf16[256,4096], index: 1, kind: input, shape index: {}]   ;;  %s2104_s2 = inlined_call_operand.vmem [shape: f32[8,4096], index: 2, kind: output, shape index: {}]  }
   0x1   :  { %s1643_s11 = smov 0  }
   0x2 LB: > { %s1430_s12 = sadd.s32 4294967295, %s1622_s11   ;;  %s1656_s13 = sadd.s32 1, %s1622_s11   ;;  %s1622_s11 = sphi %s1643_s11, %s2107_s11   ;;  %s1618_s10 = sphi %s1641_s10, %s2106_s10   ;;  %s1614_s9 = sphi %s1639_s9, %s2105_s9  }
   0x3   : > { %s37_s14 = ssub.s32 %s1622_s11, %s1656_s13  ;;  %s40_s15 = sadd.s32 1, %s1618_s10 }
   0x4   : > { %p38_p0 = scmp.eq.s32.totalorder %s37_s14, 0  ;;  %p47_p1 = scmp.ne.s32.totalorder %s1618_s10, %s1614_s9 }
   0x5   : > { %p48_p2 = scmp.eq.s32.totalorder %s1622_s11, 0  ;;  %p1433_p4 = scmp.ge.s32.totalorder %s1622_s11, 4 }
   0x6   : > { %s1665_s16 = scalar_select %p38_p0, %s1618_s10, %s40_s15  }
   0x7   : > { %p49_p3 = por %p48_p2, %p47_p1  ;;  %102 = sbr.rel (%p1433_p4) target bundleno = 82 (0x52), region = 20 }
   0xe   : > { %105 = sbr.rel (!%p49_p3) target bundleno = 82 (0x52), region = 24  ;;  %s107_s17 = sand.u32 (%p49_p3), 1, %s1618_s10  }
   0xf   : > { %s1573_s18 = sshll.u32 (%p49_p3), %s1622_s11, 5  ;;  %s1434_s19 = sshll.u32 (%p49_p3), %s107_s17, 10 }
  0x10   : > { %s1673_s22 = scalar_lea.vmem (%p49_p3), %s2103_s1, %s1573_s18  ;;  %s1678_s23 = scalar_lea.vmem (%p49_p3), [#allocation2], %s1434_s19 }
  0x11   : > { %v125_v0 = vld [vmem:[%s1673_s22] sm:$0xff] (%p49_p3)  ;;  %v127_v1 = vld [vmem:[%s1673_s22 + $0x8] sm:$0xff] (%p49_p3)  ;;  %v129_v2 = vld [vmem:[%s1673_s22 + $0x10] sm:$0xff] (%p49_p3) }
  0x12   : > { %126 = vst [vmem:[%s1678_s23] sm:$0xff] (%p49_p3), %v125_v0  ;;  %128 = vst [vmem:[%s1678_s23 + $0x8] sm:$0xff] (%p49_p3), %v127_v1  ;;  %v131_v3 = vld [vmem:[%s1673_s22 + $0x18] sm:$0xff] (%p49_p3)  ;;  %v133_v4 = vld [vmem:[%s1673_s22 + $0x80] sm:$0xff] (%p49_p3) }
  0x13   : > { %130 = vst [vmem:[%s1678_s23 + $0x10] sm:$0xff] (%p49_p3), %v129_v2  ;;  %v135_v5 = vld [vmem:[%s1673_s22 + $0x88] sm:$0xff] (%p49_p3)  ;;  %132 = vst [vmem:[%s1678_s23 + $0x18] sm:$0xff] (%p49_p3), %v131_v3  ;;  %v137_v6 = vld [vmem:[%s1673_s22 + $0x90] sm:$0xff] (%p49_p3) }
  0x14   : > { %134 = vst [vmem:[%s1678_s23 + $0x20] sm:$0xff] (%p49_p3), %v133_v4  ;;  %136 = vst [vmem:[%s1678_s23 + $0x28] sm:$0xff] (%p49_p3), %v135_v5  ;;  %v139_v7 = vld [vmem:[%s1673_s22 + $0x98] sm:$0xff] (%p49_p3)  ;;  %v141_v8 = vld [vmem:[%s1673_s22 + $0x100] sm:$0xff] (%p49_p3) }
  0x15   : > { %138 = vst [vmem:[%s1678_s23 + $0x30] sm:$0xff] %v137_v6  ;;  %140 = vst [vmem:[%s1678_s23 + $0x38] sm:$0xff] %v139_v7  ;;  %v143_v9 = vld [vmem:[%s1673_s22 + $0x108] sm:$0xff]  ;;  %v145_v10 = vld [vmem:[%s1673_s22 + $0x110] sm:$0xff] }
  0x16   : > { %142 = vst [vmem:[%s1678_s23 + $0x40] sm:$0xff] %v141_v8  ;;  %v147_v11 = vld [vmem:[%s1673_s22 + $0x118] sm:$0xff]  ;;  %144 = vst [vmem:[%s1678_s23 + $0x48] sm:$0xff] %v143_v9  ;;  %v149_v12 = vld [vmem:[%s1673_s22 + $0x180] sm:$0xff] }
  0x17   : > { %146 = vst [vmem:[%s1678_s23 + $0x50] sm:$0xff] %v145_v10  ;;  %148 = vst [vmem:[%s1678_s23 + $0x58] sm:$0xff] %v147_v11  ;;  %v151_v13 = vld [vmem:[%s1673_s22 + $0x188] sm:$0xff]  ;;  %v153_v14 = vld [vmem:[%s1673_s22 + $0x190] sm:$0xff] }
  0x18   : > { %150 = vst [vmem:[%s1678_s23 + $0x60] sm:$0xff] %v149_v12  ;;  %152 = vst [vmem:[%s1678_s23 + $0x68] sm:$0xff] %v151_v13  ;;  %v155_v15 = vld [vmem:[%s1673_s22 + $0x198] sm:$0xff]  ;;  %v157_v16 = vld [vmem:[%s1673_s22 + $0x200] sm:$0xff] }
  0x19   : > { %154 = vst [vmem:[%s1678_s23 + $0x70] sm:$0xff] %v153_v14  ;;  %v159_v17 = vld [vmem:[%s1673_s22 + $0x208] sm:$0xff]  ;;  %156 = vst [vmem:[%s1678_s23 + $0x78] sm:$0xff] %v155_v15  ;;  %v161_v18 = vld [vmem:[%s1673_s22 + $0x210] sm:$0xff] }
  0x1a   : > { %158 = vst [vmem:[%s1678_s23 + $0x80] sm:$0xff] %v157_v16  ;;  %160 = vst [vmem:[%s1678_s23 + $0x88] sm:$0xff] %v159_v17  ;;  %v163_v19 = vld [vmem:[%s1673_s22 + $0x218] sm:$0xff]  ;;  %v165_v20 = vld [vmem:[%s1673_s22 + $0x280] sm:$0xff] }
  0x1b   : > { %162 = vst [vmem:[%s1678_s23 + $0x90] sm:$0xff] %v161_v18  ;;  %164 = vst [vmem:[%s1678_s23 + $0x98] sm:$0xff] %v163_v19  ;;  %v167_v21 = vld [vmem:[%s1673_s22 + $0x288] sm:$0xff]  ;;  %v169_v22 = vld [vmem:[%s1673_s22 + $0x290] sm:$0xff] }
  0x1c   : > { %166 = vst [vmem:[%s1678_s23 + $0xa0] sm:$0xff] %v165_v20  ;;  %v171_v23 = vld [vmem:[%s1673_s22 + $0x298] sm:$0xff]  ;;  %168 = vst [vmem:[%s1678_s23 + $0xa8] sm:$0xff] %v167_v21  ;;  %v173_v24 = vld [vmem:[%s1673_s22 + $0x300] sm:$0xff] }
  0x1d   : > { %170 = vst [vmem:[%s1678_s23 + $0xb0] sm:$0xff] %v169_v22  ;;  %172 = vst [vmem:[%s1678_s23 + $0xb8] sm:$0xff] %v171_v23  ;;  %v175_v25 = vld [vmem:[%s1673_s22 + $0x308] sm:$0xff]  ;;  %v177_v26 = vld [vmem:[%s1673_s22 + $0x310] sm:$0xff] }
  0x1e   : > { %174 = vst [vmem:[%s1678_s23 + $0xc0] sm:$0xff] %v173_v24  ;;  %176 = vst [vmem:[%s1678_s23 + $0xc8] sm:$0xff] %v175_v25  ;;  %v179_v27 = vld [vmem:[%s1673_s22 + $0x318] sm:$0xff]  ;;  %v181_v28 = vld [vmem:[%s1673_s22 + $0x380] sm:$0xff] }
  0x1f   : > { %178 = vst [vmem:[%s1678_s23 + $0xd0] sm:$0xff] %v177_v26  ;;  %v183_v29 = vld [vmem:[%s1673_s22 + $0x388] sm:$0xff]  ;;  %180 = vst [vmem:[%s1678_s23 + $0xd8] sm:$0xff] %v179_v27  ;;  %v185_v30 = vld [vmem:[%s1673_s22 + $0x390] sm:$0xff] }
  0x20   : > { %182 = vst [vmem:[%s1678_s23 + $0xe0] sm:$0xff] %v181_v28  ;;  %184 = vst [vmem:[%s1678_s23 + $0xe8] sm:$0xff] %v183_v29  ;;  %v187_v31 = vld [vmem:[%s1673_s22 + $0x398] sm:$0xff]  ;;  %v189_v32 = vld [vmem:[%s1673_s22 + $0x400] sm:$0xff] }
  0x21   : > { %186 = vst [vmem:[%s1678_s23 + $0xf0] sm:$0xff] %v185_v30  ;;  %188 = vst [vmem:[%s1678_s23 + $0xf8] sm:$0xff] %v187_v31  ;;  %v191_v33 = vld [vmem:[%s1673_s22 + $0x408] sm:$0xff]  ;;  %v193_v34 = vld [vmem:[%s1673_s22 + $0x410] sm:$0xff] }
  0x22   : > { %190 = vst [vmem:[%s1678_s23 + $0x100] sm:$0xff] %v189_v32  ;;  %v195_v35 = vld [vmem:[%s1673_s22 + $0x418] sm:$0xff]  ;;  %192 = vst [vmem:[%s1678_s23 + $0x108] sm:$0xff] %v191_v33  ;;  %v197_v36 = vld [vmem:[%s1673_s22 + $0x480] sm:$0xff] }
  0x23   : > { %194 = vst [vmem:[%s1678_s23 + $0x110] sm:$0xff] %v193_v34  ;;  %196 = vst [vmem:[%s1678_s23 + $0x118] sm:$0xff] %v195_v35  ;;  %v199_v37 = vld [vmem:[%s1673_s22 + $0x488] sm:$0xff]  ;;  %v201_v38 = vld [vmem:[%s1673_s22 + $0x490] sm:$0xff] }
  0x24   : > { %198 = vst [vmem:[%s1678_s23 + $0x120] sm:$0xff] %v197_v36  ;;  %200 = vst [vmem:[%s1678_s23 + $0x128] sm:$0xff] %v199_v37  ;;  %v203_v39 = vld [vmem:[%s1673_s22 + $0x498] sm:$0xff]  ;;  %v205_v40 = vld [vmem:[%s1673_s22 + $0x500] sm:$0xff] }
  0x25   : > { %202 = vst [vmem:[%s1678_s23 + $0x130] sm:$0xff] %v201_v38  ;;  %v207_v41 = vld [vmem:[%s1673_s22 + $0x508] sm:$0xff]  ;;  %204 = vst [vmem:[%s1678_s23 + $0x138] sm:$0xff] %v203_v39  ;;  %v209_v42 = vld [vmem:[%s1673_s22 + $0x510] sm:$0xff] }
  0x26   : > { %206 = vst [vmem:[%s1678_s23 + $0x140] sm:$0xff] %v205_v40  ;;  %208 = vst [vmem:[%s1678_s23 + $0x148] sm:$0xff] %v207_v41  ;;  %v211_v43 = vld [vmem:[%s1673_s22 + $0x518] sm:$0xff]  ;;  %v213_v44 = vld [vmem:[%s1673_s22 + $0x580] sm:$0xff] }
  0x27   : > { %210 = vst [vmem:[%s1678_s23 + $0x150] sm:$0xff] %v209_v42  ;;  %212 = vst [vmem:[%s1678_s23 + $0x158] sm:$0xff] %v211_v43  ;;  %v215_v45 = vld [vmem:[%s1673_s22 + $0x588] sm:$0xff]  ;;  %v217_v46 = vld [vmem:[%s1673_s22 + $0x590] sm:$0xff] }
  0x28   : > { %214 = vst [vmem:[%s1678_s23 + $0x160] sm:$0xff] %v213_v44  ;;  %v219_v47 = vld [vmem:[%s1673_s22 + $0x598] sm:$0xff]  ;;  %216 = vst [vmem:[%s1678_s23 + $0x168] sm:$0xff] %v215_v45  ;;  %v221_v48 = vld [vmem:[%s1673_s22 + $0x600] sm:$0xff] }
  0x29   : > { %218 = vst [vmem:[%s1678_s23 + $0x170] sm:$0xff] %v217_v46  ;;  %220 = vst [vmem:[%s1678_s23 + $0x178] sm:$0xff] %v219_v47  ;;  %v223_v49 = vld [vmem:[%s1673_s22 + $0x608] sm:$0xff]  ;;  %v225_v50 = vld [vmem:[%s1673_s22 + $0x610] sm:$0xff] }
  0x2a   : > { %222 = vst [vmem:[%s1678_s23 + $0x180] sm:$0xff] %v221_v48  ;;  %224 = vst [vmem:[%s1678_s23 + $0x188] sm:$0xff] %v223_v49  ;;  %v227_v51 = vld [vmem:[%s1673_s22 + $0x618] sm:$0xff]  ;;  %v229_v52 = vld [vmem:[%s1673_s22 + $0x680] sm:$0xff] }
  0x2b   : > { %226 = vst [vmem:[%s1678_s23 + $0x190] sm:$0xff] %v225_v50  ;;  %v231_v53 = vld [vmem:[%s1673_s22 + $0x688] sm:$0xff]  ;;  %228 = vst [vmem:[%s1678_s23 + $0x198] sm:$0xff] %v227_v51  ;;  %v233_v54 = vld [vmem:[%s1673_s22 + $0x690] sm:$0xff] }
  0x2c   : > { %230 = vst [vmem:[%s1678_s23 + $0x1a0] sm:$0xff] %v229_v52  ;;  %232 = vst [vmem:[%s1678_s23 + $0x1a8] sm:$0xff] %v231_v53  ;;  %v235_v55 = vld [vmem:[%s1673_s22 + $0x698] sm:$0xff]  ;;  %v237_v56 = vld [vmem:[%s1673_s22 + $0x700] sm:$0xff] }
  0x2d   : > { %234 = vst [vmem:[%s1678_s23 + $0x1b0] sm:$0xff] %v233_v54  ;;  %236 = vst [vmem:[%s1678_s23 + $0x1b8] sm:$0xff] %v235_v55  ;;  %v239_v57 = vld [vmem:[%s1673_s22 + $0x708] sm:$0xff]  ;;  %v241_v58 = vld [vmem:[%s1673_s22 + $0x710] sm:$0xff] }
  0x2e   : > { %238 = vst [vmem:[%s1678_s23 + $0x1c0] sm:$0xff] %v237_v56  ;;  %v243_v59 = vld [vmem:[%s1673_s22 + $0x718] sm:$0xff]  ;;  %240 = vst [vmem:[%s1678_s23 + $0x1c8] sm:$0xff] %v239_v57  ;;  %v245_v60 = vld [vmem:[%s1673_s22 + $0x780] sm:$0xff] }
  0x2f   : > { %242 = vst [vmem:[%s1678_s23 + $0x1d0] sm:$0xff] %v241_v58  ;;  %244 = vst [vmem:[%s1678_s23 + $0x1d8] sm:$0xff] %v243_v59  ;;  %v247_v61 = vld [vmem:[%s1673_s22 + $0x788] sm:$0xff]  ;;  %v249_v62 = vld [vmem:[%s1673_s22 + $0x790] sm:$0xff] }
  0x30   : > { %246 = vst [vmem:[%s1678_s23 + $0x1e0] sm:$0xff] %v245_v60  ;;  %248 = vst [vmem:[%s1678_s23 + $0x1e8] sm:$0xff] %v247_v61  ;;  %v251_v63 = vld [vmem:[%s1673_s22 + $0x798] sm:$0xff]  ;;  %v253_v0 = vld [vmem:[%s1673_s22 + $0x800] sm:$0xff] }
  0x31   : > { %250 = vst [vmem:[%s1678_s23 + $0x1f0] sm:$0xff] %v249_v62  ;;  %v255_v1 = vld [vmem:[%s1673_s22 + $0x808] sm:$0xff]  ;;  %252 = vst [vmem:[%s1678_s23 + $0x1f8] sm:$0xff] %v251_v63  ;;  %v257_v2 = vld [vmem:[%s1673_s22 + $0x810] sm:$0xff] }
  0x32   : > { %254 = vst [vmem:[%s1678_s23 + $0x200] sm:$0xff] %v253_v0  ;;  %256 = vst [vmem:[%s1678_s23 + $0x208] sm:$0xff] %v255_v1  ;;  %v259_v3 = vld [vmem:[%s1673_s22 + $0x818] sm:$0xff]  ;;  %v261_v4 = vld [vmem:[%s1673_s22 + $0x880] sm:$0xff] }
  0x33   : > { %258 = vst [vmem:[%s1678_s23 + $0x210] sm:$0xff] %v257_v2  ;;  %260 = vst [vmem:[%s1678_s23 + $0x218] sm:$0xff] %v259_v3  ;;  %v263_v5 = vld [vmem:[%s1673_s22 + $0x888] sm:$0xff]  ;;  %v265_v6 = vld [vmem:[%s1673_s22 + $0x890] sm:$0xff] }
  0x34   : > { %262 = vst [vmem:[%s1678_s23 + $0x220] sm:$0xff] %v261_v4  ;;  %v267_v7 = vld [vmem:[%s1673_s22 + $0x898] sm:$0xff]  ;;  %264 = vst [vmem:[%s1678_s23 + $0x228] sm:$0xff] %v263_v5  ;;  %v269_v8 = vld [vmem:[%s1673_s22 + $0x900] sm:$0xff] }
  0x35   : > { %266 = vst [vmem:[%s1678_s23 + $0x230] sm:$0xff] %v265_v6  ;;  %268 = vst [vmem:[%s1678_s23 + $0x238] sm:$0xff] %v267_v7  ;;  %v271_v9 = vld [vmem:[%s1673_s22 + $0x908] sm:$0xff]  ;;  %v273_v10 = vld [vmem:[%s1673_s22 + $0x910] sm:$0xff] }
  0x36   : > { %270 = vst [vmem:[%s1678_s23 + $0x240] sm:$0xff] %v269_v8  ;;  %272 = vst [vmem:[%s1678_s23 + $0x248] sm:$0xff] %v271_v9  ;;  %v275_v11 = vld [vmem:[%s1673_s22 + $0x918] sm:$0xff]  ;;  %v277_v12 = vld [vmem:[%s1673_s22 + $0x980] sm:$0xff] }
  0x37   : > { %274 = vst [vmem:[%s1678_s23 + $0x250] sm:$0xff] %v273_v10  ;;  %v279_v13 = vld [vmem:[%s1673_s22 + $0x988] sm:$0xff]  ;;  %276 = vst [vmem:[%s1678_s23 + $0x258] sm:$0xff] %v275_v11  ;;  %v281_v14 = vld [vmem:[%s1673_s22 + $0x990] sm:$0xff] }
  0x38   : > { %278 = vst [vmem:[%s1678_s23 + $0x260] sm:$0xff] %v277_v12  ;;  %280 = vst [vmem:[%s1678_s23 + $0x268] sm:$0xff] %v279_v13  ;;  %v283_v15 = vld [vmem:[%s1673_s22 + $0x998] sm:$0xff]  ;;  %v285_v16 = vld [vmem:[%s1673_s22 + $0xa00] sm:$0xff] }
  0x39   : > { %282 = vst [vmem:[%s1678_s23 + $0x270] sm:$0xff] %v281_v14  ;;  %284 = vst [vmem:[%s1678_s23 + $0x278] sm:$0xff] %v283_v15  ;;  %v287_v17 = vld [vmem:[%s1673_s22 + $0xa08] sm:$0xff]  ;;  %v289_v18 = vld [vmem:[%s1673_s22 + $0xa10] sm:$0xff] }
  0x3a   : > { %286 = vst [vmem:[%s1678_s23 + $0x280] sm:$0xff] %v285_v16  ;;  %v291_v19 = vld [vmem:[%s1673_s22 + $0xa18] sm:$0xff]  ;;  %288 = vst [vmem:[%s1678_s23 + $0x288] sm:$0xff] %v287_v17  ;;  %v293_v20 = vld [vmem:[%s1673_s22 + $0xa80] sm:$0xff] }
  0x3b   : > { %290 = vst [vmem:[%s1678_s23 + $0x290] sm:$0xff] %v289_v18  ;;  %292 = vst [vmem:[%s1678_s23 + $0x298] sm:$0xff] %v291_v19  ;;  %v295_v21 = vld [vmem:[%s1673_s22 + $0xa88] sm:$0xff]  ;;  %v297_v22 = vld [vmem:[%s1673_s22 + $0xa90] sm:$0xff] }
  0x3c   : > { %294 = vst [vmem:[%s1678_s23 + $0x2a0] sm:$0xff] %v293_v20  ;;  %296 = vst [vmem:[%s1678_s23 + $0x2a8] sm:$0xff] %v295_v21  ;;  %v299_v23 = vld [vmem:[%s1673_s22 + $0xa98] sm:$0xff]  ;;  %v301_v24 = vld [vmem:[%s1673_s22 + $0xb00] sm:$0xff] }
  0x3d   : > { %298 = vst [vmem:[%s1678_s23 + $0x2b0] sm:$0xff] %v297_v22  ;;  %v303_v25 = vld [vmem:[%s1673_s22 + $0xb08] sm:$0xff]  ;;  %300 = vst [vmem:[%s1678_s23 + $0x2b8] sm:$0xff] %v299_v23  ;;  %v305_v26 = vld [vmem:[%s1673_s22 + $0xb10] sm:$0xff] }
  0x3e   : > { %302 = vst [vmem:[%s1678_s23 + $0x2c0] sm:$0xff] %v301_v24  ;;  %304 = vst [vmem:[%s1678_s23 + $0x2c8] sm:$0xff] %v303_v25  ;;  %v307_v27 = vld [vmem:[%s1673_s22 + $0xb18] sm:$0xff]  ;;  %v309_v28 = vld [vmem:[%s1673_s22 + $0xb80] sm:$0xff] }
  0x3f   : > { %306 = vst [vmem:[%s1678_s23 + $0x2d0] sm:$0xff] %v305_v26  ;;  %308 = vst [vmem:[%s1678_s23 + $0x2d8] sm:$0xff] %v307_v27  ;;  %v311_v29 = vld [vmem:[%s1673_s22 + $0xb88] sm:$0xff]  ;;  %v313_v30 = vld [vmem:[%s1673_s22 + $0xb90] sm:$0xff] }
  0x40   : > { %310 = vst [vmem:[%s1678_s23 + $0x2e0] sm:$0xff] %v309_v28  ;;  %v315_v31 = vld [vmem:[%s1673_s22 + $0xb98] sm:$0xff]  ;;  %312 = vst [vmem:[%s1678_s23 + $0x2e8] sm:$0xff] %v311_v29  ;;  %v317_v32 = vld [vmem:[%s1673_s22 + $0xc00] sm:$0xff] }
  0x41   : > { %314 = vst [vmem:[%s1678_s23 + $0x2f0] sm:$0xff] %v313_v30  ;;  %316 = vst [vmem:[%s1678_s23 + $0x2f8] sm:$0xff] %v315_v31  ;;  %v319_v33 = vld [vmem:[%s1673_s22 + $0xc08] sm:$0xff]  ;;  %v321_v34 = vld [vmem:[%s1673_s22 + $0xc10] sm:$0xff] }
  0x42   : > { %318 = vst [vmem:[%s1678_s23 + $0x300] sm:$0xff] %v317_v32  ;;  %320 = vst [vmem:[%s1678_s23 + $0x308] sm:$0xff] %v319_v33  ;;  %v323_v35 = vld [vmem:[%s1673_s22 + $0xc18] sm:$0xff]  ;;  %v325_v36 = vld [vmem:[%s1673_s22 + $0xc80] sm:$0xff] }
  0x43   : > { %322 = vst [vmem:[%s1678_s23 + $0x310] sm:$0xff] %v321_v34  ;;  %v327_v37 = vld [vmem:[%s1673_s22 + $0xc88] sm:$0xff]  ;;  %324 = vst [vmem:[%s1678_s23 + $0x318] sm:$0xff] %v323_v35  ;;  %v329_v38 = vld [vmem:[%s1673_s22 + $0xc90] sm:$0xff] }
  0x44   : > { %326 = vst [vmem:[%s1678_s23 + $0x320] sm:$0xff] %v325_v36  ;;  %328 = vst [vmem:[%s1678_s23 + $0x328] sm:$0xff] %v327_v37  ;;  %v331_v39 = vld [vmem:[%s1673_s22 + $0xc98] sm:$0xff]  ;;  %v333_v40 = vld [vmem:[%s1673_s22 + $0xd00] sm:$0xff] }
  0x45   : > { %330 = vst [vmem:[%s1678_s23 + $0x330] sm:$0xff] %v329_v38  ;;  %332 = vst [vmem:[%s1678_s23 + $0x338] sm:$0xff] %v331_v39  ;;  %v335_v41 = vld [vmem:[%s1673_s22 + $0xd08] sm:$0xff]  ;;  %v337_v42 = vld [vmem:[%s1673_s22 + $0xd10] sm:$0xff] }
  0x46   : > { %334 = vst [vmem:[%s1678_s23 + $0x340] sm:$0xff] %v333_v40  ;;  %v339_v43 = vld [vmem:[%s1673_s22 + $0xd18] sm:$0xff]  ;;  %336 = vst [vmem:[%s1678_s23 + $0x348] sm:$0xff] %v335_v41  ;;  %v341_v44 = vld [vmem:[%s1673_s22 + $0xd80] sm:$0xff] }
  0x47   : > { %338 = vst [vmem:[%s1678_s23 + $0x350] sm:$0xff] %v337_v42  ;;  %340 = vst [vmem:[%s1678_s23 + $0x358] sm:$0xff] %v339_v43  ;;  %v343_v45 = vld [vmem:[%s1673_s22 + $0xd88] sm:$0xff]  ;;  %v345_v46 = vld [vmem:[%s1673_s22 + $0xd90] sm:$0xff] }
  0x48   : > { %342 = vst [vmem:[%s1678_s23 + $0x360] sm:$0xff] %v341_v44  ;;  %344 = vst [vmem:[%s1678_s23 + $0x368] sm:$0xff] %v343_v45  ;;  %v347_v47 = vld [vmem:[%s1673_s22 + $0xd98] sm:$0xff]  ;;  %v349_v48 = vld [vmem:[%s1673_s22 + $0xe00] sm:$0xff] }
  0x49   : > { %346 = vst [vmem:[%s1678_s23 + $0x370] sm:$0xff] %v345_v46  ;;  %v351_v49 = vld [vmem:[%s1673_s22 + $0xe08] sm:$0xff]  ;;  %348 = vst [vmem:[%s1678_s23 + $0x378] sm:$0xff] %v347_v47  ;;  %v353_v50 = vld [vmem:[%s1673_s22 + $0xe10] sm:$0xff] }
  0x4a   : > { %350 = vst [vmem:[%s1678_s23 + $0x380] sm:$0xff] %v349_v48  ;;  %352 = vst [vmem:[%s1678_s23 + $0x388] sm:$0xff] %v351_v49  ;;  %v355_v51 = vld [vmem:[%s1673_s22 + $0xe18] sm:$0xff]  ;;  %v357_v52 = vld [vmem:[%s1673_s22 + $0xe80] sm:$0xff] }
  0x4b   : > { %354 = vst [vmem:[%s1678_s23 + $0x390] sm:$0xff] %v353_v50  ;;  %356 = vst [vmem:[%s1678_s23 + $0x398] sm:$0xff] %v355_v51  ;;  %v359_v53 = vld [vmem:[%s1673_s22 + $0xe88] sm:$0xff]  ;;  %v361_v54 = vld [vmem:[%s1673_s22 + $0xe90] sm:$0xff] }
  0x4c   : > { %358 = vst [vmem:[%s1678_s23 + $0x3a0] sm:$0xff] %v357_v52  ;;  %v363_v55 = vld [vmem:[%s1673_s22 + $0xe98] sm:$0xff]  ;;  %360 = vst [vmem:[%s1678_s23 + $0x3a8] sm:$0xff] %v359_v53  ;;  %v365_v56 = vld [vmem:[%s1673_s22 + $0xf00] sm:$0xff] }
  0x4d   : > { %362 = vst [vmem:[%s1678_s23 + $0x3b0] sm:$0xff] %v361_v54  ;;  %364 = vst [vmem:[%s1678_s23 + $0x3b8] sm:$0xff] %v363_v55  ;;  %v367_v57 = vld [vmem:[%s1673_s22 + $0xf08] sm:$0xff]  ;;  %v369_v58 = vld [vmem:[%s1673_s22 + $0xf10] sm:$0xff] }
  0x4e   : > { %366 = vst [vmem:[%s1678_s23 + $0x3c0] sm:$0xff] %v365_v56  ;;  %368 = vst [vmem:[%s1678_s23 + $0x3c8] sm:$0xff] %v367_v57  ;;  %v371_v59 = vld [vmem:[%s1673_s22 + $0xf18] sm:$0xff]  ;;  %v373_v60 = vld [vmem:[%s1673_s22 + $0xf80] sm:$0xff] }
  0x4f   : > { %370 = vst [vmem:[%s1678_s23 + $0x3d0] sm:$0xff] %v369_v58  ;;  %v375_v61 = vld [vmem:[%s1673_s22 + $0xf88] sm:$0xff]  ;;  %372 = vst [vmem:[%s1678_s23 + $0x3d8] sm:$0xff] %v371_v59  ;;  %v377_v62 = vld [vmem:[%s1673_s22 + $0xf90] sm:$0xff] }
  0x50   : > { %374 = vst [vmem:[%s1678_s23 + $0x3e0] sm:$0xff] %v373_v60  ;;  %376 = vst [vmem:[%s1678_s23 + $0x3e8] sm:$0xff] %v375_v61  ;;  %v379_v63 = vld [vmem:[%s1673_s22 + $0xf98] sm:$0xff] }
  0x51   : > { %378 = vst [vmem:[%s1678_s23 + $0x3f0] sm:$0xff] %v377_v62  ;;  %380 = vst [vmem:[%s1678_s23 + $0x3f8] sm:$0xff] %v379_v63 }
  0x52 PF: > { %p1437_p5 = scmp.ge.s32.totalorder %s1622_s11, 1  ;;  %p385_p6 = scmp.lt.s32.totalorder %s1622_s11, 5 }
  0x54   : > { %p386_p7 = pnand %p1437_p5, %p385_p6 }
  0x55   : > { %s392_s24 = sand.u32 (!%p386_p7), 1, %s1614_s9   ;;  %v1939_v0 = vld [vmem:[%s2102_s0] sm:$0xff] (!%p386_p7)  ;;  %s1439_s29 = sshll.u32 (!%p386_p7), %s1430_s12, 3 }
  0x56   : > { %389 = sbr.rel (%p386_p7) target bundleno = 435 (0x1b3), region = 47  ;;  %s1438_s27 = sshll.u32 (!%p386_p7), %s392_s24, 10  ;;  %v1943_v1 = vcombine.high (!%p386_p7), %v1939_v0, %v1939_v0 }
  0x57   : > { %s1945_s28 = scalar_lea.vmem (!%p386_p7), [#allocation2], %s1438_s27  ;;  %p415_p8 = scmp.lt.s32.totalorder (!%p386_p7), %s1439_s29, 31 }
  0x58   : > { %v421_v2 = vld [vmem:[%s1945_s28] sm:$0xff] (!%p386_p7)  ;;  %v422_v4 = vld [vmem:[%s1945_s28 + $0x8] sm:$0xff] (!%p386_p7)  ;;  %1228 = vmatprep.mubr.bf16.mxu0 (!%p386_p7), %v1943_v1  ;;  %1269 = vmatprep.mubr.bf16.mxu1 (!%p386_p7), %v1943_v1 }
  0x59   : > { %v425_v3 = vld [vmem:[%s1945_s28 + $0x20] sm:$0xff] (!%p386_p7)  ;;  %v426_v6 = vld [vmem:[%s1945_s28 + $0x28] sm:$0xff] (!%p386_p7) }
  0x5a   : > { %v1444_v5 = vcombine.high (!%p386_p7), %v421_v2, %v425_v3  ;;  %v1443_v7 = vcombine.low (!%p386_p7), %v421_v2, %v425_v3  ;;  %v429_v8 = vld [vmem:[%s1945_s28 + $0x40] sm:$0xff] (!%p386_p7)  ;;  %v1446_v10 = vcombine.high (!%p386_p7), %v422_v4, %v426_v6  ;;  %v1445_v11 = vcombine.low (!%p386_p7), %v422_v4, %v426_v6  ;;  %v430_v13 = vld [vmem:[%s1945_s28 + $0x48] sm:$0xff] (!%p386_p7) }
  0x5b   : > { %v433_v9 = vld [vmem:[%s1945_s28 + $0x60] sm:$0xff] (!%p386_p7)  ;;  %v434_v14 = vld [vmem:[%s1945_s28 + $0x68] sm:$0xff] (!%p386_p7) }
  0x5c   : > { %v1452_v12 = vcombine.high (!%p386_p7), %v429_v8, %v433_v9  ;;  %v437_v15 = vld [vmem:[%s1945_s28 + $0x80] sm:$0xff] (!%p386_p7)  ;;  %1196 = vmatprep.subr.bf16.mxu0 (!%p386_p7), %v1444_v5  ;;  %v1454_v16 = vcombine.high (!%p386_p7), %v430_v13, %v434_v14  ;;  %v438_v18 = vld [vmem:[%s1945_s28 + $0x88] sm:$0xff] (!%p386_p7)  ;;  %1237 = vmatprep.subr.bf16.mxu1 (!%p386_p7), %v1446_v10  ;;  %v1451_v20 = vcombine.low (!%p386_p7), %v429_v8, %v433_v9 }
  0x5d   : > { %v441_v17 = vld [vmem:[%s1945_s28 + $0xa0] sm:$0xff]  ;;  %v442_v19 = vld [vmem:[%s1945_s28 + $0xa8] sm:$0xff]  ;;  %1197 = vmatpush1.bf16.msra.mxu0 %v1443_v7  ;;  %1238 = vmatpush1.bf16.msra.mxu1 %v1445_v11  ;;  %v1453_v21 = vcombine.low %v430_v13, %v434_v14  ;;  %s2109_s29 = smov (!%p415_p8, %s1439_s29), 31 }
  0x5e   : > { %1198 = vmatprep.subr.bf16.mxu0 %v1452_v12  ;;  %v1460_v22 = vcombine.high %v437_v15, %v441_v17  ;;  %1239 = vmatprep.subr.bf16.mxu1 %v1454_v16  ;;  %v1462_v23 = vcombine.high %v438_v18, %v442_v19  ;;  %v445_v24 = vld [vmem:[%s1945_s28 + $0xc0] sm:$0xff]  ;;  %v446_v26 = vld [vmem:[%s1945_s28 + $0xc8] sm:$0xff]  ;;  %v1459_v28 = vcombine.low %v437_v15, %v441_v17  ;;  %s1440_s30 = sshll.u32 %s2109_s29, 3 }
  0x5f   : > { %v449_v25 = vld [vmem:[%s1945_s28 + $0xe0] sm:$0xff]  ;;  %v450_v27 = vld [vmem:[%s1945_s28 + $0xe8] sm:$0xff]  ;;  %v1461_v29 = vcombine.low %v438_v18, %v442_v19  ;;  %s418_s5 = scalar_lea.vmem %s2104_s2, %s1440_s30 }
  0x60   : > { %v1468_v30 = vcombine.high %v445_v24, %v449_v25  ;;  %v1470_v31 = vcombine.high %v446_v26, %v450_v27  ;;  %v453_v32 = vld [vmem:[%s1945_s28 + $0x100] sm:$0xff]  ;;  %v454_v34 = vld [vmem:[%s1945_s28 + $0x108] sm:$0xff]  ;;  %v1467_v36 = vcombine.low %v445_v24, %v449_v25  ;;  %v1469_v37 = vcombine.low %v446_v26, %v450_v27 }
  0x61   : > { %1199 = vmatpush1.bf16.msra.mxu0 %v1451_v20  ;;  %1240 = vmatpush1.bf16.msra.mxu1 %v1453_v21  ;;  %v457_v33 = vld [vmem:[%s1945_s28 + $0x120] sm:$0xff]  ;;  %v458_v35 = vld [vmem:[%s1945_s28 + $0x128] sm:$0xff] }
  0x62   : > { %1200 = vmatprep.subr.bf16.mxu0 %v1460_v22  ;;  %1241 = vmatprep.subr.bf16.mxu1 %v1462_v23  ;;  %v1476_v38 = vcombine.high %v453_v32, %v457_v33  ;;  %v1478_v39 = vcombine.high %v454_v34, %v458_v35  ;;  %v461_v40 = vld [vmem:[%s1945_s28 + $0x140] sm:$0xff]  ;;  %v462_v42 = vld [vmem:[%s1945_s28 + $0x148] sm:$0xff]  ;;  %v1475_v44 = vcombine.low %v453_v32, %v457_v33 }
  0x63   : > { %v465_v41 = vld [vmem:[%s1945_s28 + $0x160] sm:$0xff]  ;;  %v466_v43 = vld [vmem:[%s1945_s28 + $0x168] sm:$0xff]  ;;  %v1477_v45 = vcombine.low %v454_v34, %v458_v35 }
  0x64   : > { %v1484_v46 = vcombine.high %v461_v40, %v465_v41  ;;  %v1486_v47 = vcombine.high %v462_v42, %v466_v43  ;;  %v469_v48 = vld [vmem:[%s1945_s28 + $0x180] sm:$0xff]  ;;  %v470_v50 = vld [vmem:[%s1945_s28 + $0x188] sm:$0xff]  ;;  %v1483_v52 = vcombine.low %v461_v40, %v465_v41  ;;  %v1485_v53 = vcombine.low %v462_v42, %v466_v43 }
  0x65   : > { %1201 = vmatpush1.bf16.msra.mxu0 %v1459_v28  ;;  %1242 = vmatpush1.bf16.msra.mxu1 %v1461_v29  ;;  %v473_v49 = vld [vmem:[%s1945_s28 + $0x1a0] sm:$0xff]  ;;  %v474_v51 = vld [vmem:[%s1945_s28 + $0x1a8] sm:$0xff] }
  0x66   : > { %1202 = vmatprep.subr.bf16.mxu0 %v1468_v30  ;;  %1243 = vmatprep.subr.bf16.mxu1 %v1470_v31  ;;  %v1492_v54 = vcombine.high %v469_v48, %v473_v49  ;;  %v1494_v55 = vcombine.high %v470_v50, %v474_v51  ;;  %v477_v56 = vld [vmem:[%s1945_s28 + $0x1c0] sm:$0xff]  ;;  %v478_v58 = vld [vmem:[%s1945_s28 + $0x1c8] sm:$0xff]  ;;  %v1491_v60 = vcombine.low %v469_v48, %v473_v49 }
  0x67   : > { %v481_v57 = vld [vmem:[%s1945_s28 + $0x1e0] sm:$0xff]  ;;  %v482_v59 = vld [vmem:[%s1945_s28 + $0x1e8] sm:$0xff]  ;;  %v1493_v61 = vcombine.low %v470_v50, %v474_v51 }
  0x68   : > { %v1500_v62 = vcombine.high %v477_v56, %v481_v57  ;;  %v1502_v63 = vcombine.high %v478_v58, %v482_v59  ;;  %v485_v2 = vld [vmem:[%s1945_s28 + $0x200] sm:$0xff]  ;;  %v486_v4 = vld [vmem:[%s1945_s28 + $0x208] sm:$0xff]  ;;  %v1499_v6 = vcombine.low %v477_v56, %v481_v57  ;;  %v1501_v7 = vcombine.low %v478_v58, %v482_v59 }
  0x69   : > { %1203 = vmatpush1.bf16.msra.mxu0 %v1467_v36  ;;  %1244 = vmatpush1.bf16.msra.mxu1 %v1469_v37  ;;  %v489_v3 = vld [vmem:[%s1945_s28 + $0x220] sm:$0xff]  ;;  %v490_v5 = vld [vmem:[%s1945_s28 + $0x228] sm:$0xff] }
  0x6a   : > { %1204 = vmatprep.subr.bf16.mxu0 %v1476_v38  ;;  %1245 = vmatprep.subr.bf16.mxu1 %v1478_v39  ;;  %v1508_v8 = vcombine.high %v485_v2, %v489_v3  ;;  %v1510_v9 = vcombine.high %v486_v4, %v490_v5  ;;  %v493_v10 = vld [vmem:[%s1945_s28 + $0x240] sm:$0xff]  ;;  %v494_v12 = vld [vmem:[%s1945_s28 + $0x248] sm:$0xff]  ;;  %v1507_v14 = vcombine.low %v485_v2, %v489_v3 }
  0x6b   : > { %v497_v11 = vld [vmem:[%s1945_s28 + $0x260] sm:$0xff]  ;;  %v498_v13 = vld [vmem:[%s1945_s28 + $0x268] sm:$0xff]  ;;  %v1509_v15 = vcombine.low %v486_v4, %v490_v5  ;;  %v423_v4 = vld [vmem:[%s1945_s28 + $0x10] sm:$0xff] }
  0x6c   : > { %v1516_v16 = vcombine.high %v493_v10, %v497_v11  ;;  %v1518_v17 = vcombine.high %v494_v12, %v498_v13  ;;  %v501_v18 = vld [vmem:[%s1945_s28 + $0x280] sm:$0xff]  ;;  %v502_v20 = vld [vmem:[%s1945_s28 + $0x288] sm:$0xff]  ;;  %v1515_v22 = vcombine.low %v493_v10, %v497_v11  ;;  %v1517_v23 = vcombine.low %v494_v12, %v498_v13  ;;  %v427_v5 = vld [vmem:[%s1945_s28 + $0x30] sm:$0xff] }
  0x6d   : > { %1205 = vmatpush1.bf16.msra.mxu0 %v1475_v44  ;;  %1246 = vmatpush1.bf16.msra.mxu1 %v1477_v45  ;;  %v505_v19 = vld [vmem:[%s1945_s28 + $0x2a0] sm:$0xff]  ;;  %v506_v21 = vld [vmem:[%s1945_s28 + $0x2a8] sm:$0xff]  ;;  %v1448_v10 = vcombine.high %v423_v4, %v427_v5  ;;  %v431_v12 = vld [vmem:[%s1945_s28 + $0x50] sm:$0xff] }
  0x6e   : > { %1206 = vmatprep.subr.bf16.mxu0 %v1484_v46  ;;  %1247 = vmatprep.subr.bf16.mxu1 %v1486_v47  ;;  %v1524_v24 = vcombine.high %v501_v18, %v505_v19  ;;  %v1526_v25 = vcombine.high %v502_v20, %v506_v21  ;;  %v509_v26 = vld [vmem:[%s1945_s28 + $0x2c0] sm:$0xff]  ;;  %v510_v28 = vld [vmem:[%s1945_s28 + $0x2c8] sm:$0xff]  ;;  %v1523_v30 = vcombine.low %v501_v18, %v505_v19  ;;  %v435_v13 = vld [vmem:[%s1945_s28 + $0x70] sm:$0xff] }
  0x6f   : > { %v513_v27 = vld [vmem:[%s1945_s28 + $0x2e0] sm:$0xff]  ;;  %v514_v29 = vld [vmem:[%s1945_s28 + $0x2e8] sm:$0xff]  ;;  %v1525_v31 = vcombine.low %v502_v20, %v506_v21  ;;  %v1456_v19 = vcombine.high %v431_v12, %v435_v13  ;;  %v439_v21 = vld [vmem:[%s1945_s28 + $0x90] sm:$0xff] }
  0x70   : > { %v1532_v32 = vcombine.high %v509_v26, %v513_v27  ;;  %v1534_v33 = vcombine.high %v510_v28, %v514_v29  ;;  %v517_v34 = vld [vmem:[%s1945_s28 + $0x300] sm:$0xff]  ;;  %v518_v36 = vld [vmem:[%s1945_s28 + $0x308] sm:$0xff]  ;;  %v1531_v38 = vcombine.low %v509_v26, %v513_v27  ;;  %v1533_v39 = vcombine.low %v510_v28, %v514_v29  ;;  %v447_v28 = vld [vmem:[%s1945_s28 + $0xd0] sm:$0xff] }
  0x71   : > { %1207 = vmatpush1.bf16.msra.mxu0 %v1483_v52  ;;  %1248 = vmatpush1.bf16.msra.mxu1 %v1485_v53  ;;  %v521_v35 = vld [vmem:[%s1945_s28 + $0x320] sm:$0xff]  ;;  %v522_v37 = vld [vmem:[%s1945_s28 + $0x328] sm:$0xff]  ;;  %v451_v29 = vld [vmem:[%s1945_s28 + $0xf0] sm:$0xff] }
  0x72   : > { %1208 = vmatprep.subr.bf16.mxu0 %v1492_v54  ;;  %1249 = vmatprep.subr.bf16.mxu1 %v1494_v55  ;;  %v1540_v40 = vcombine.high %v517_v34, %v521_v35  ;;  %v1542_v41 = vcombine.high %v518_v36, %v522_v37  ;;  %v525_v42 = vld [vmem:[%s1945_s28 + $0x340] sm:$0xff]  ;;  %v526_v44 = vld [vmem:[%s1945_s28 + $0x348] sm:$0xff]  ;;  %v1539_v46 = vcombine.low %v517_v34, %v521_v35 }
  0x73   : > { %v529_v43 = vld [vmem:[%s1945_s28 + $0x360] sm:$0xff]  ;;  %v530_v45 = vld [vmem:[%s1945_s28 + $0x368] sm:$0xff]  ;;  %v1541_v47 = vcombine.low %v518_v36, %v522_v37  ;;  %v1472_v34 = vcombine.high %v447_v28, %v451_v29  ;;  %v455_v36 = vld [vmem:[%s1945_s28 + $0x110] sm:$0xff] }
  0x74   : > { %v1548_v48 = vcombine.high %v525_v42, %v529_v43  ;;  %v1550_v49 = vcombine.high %v526_v44, %v530_v45  ;;  %v533_v50 = vld [vmem:[%s1945_s28 + $0x380] sm:$0xff]  ;;  %v534_v52 = vld [vmem:[%s1945_s28 + $0x388] sm:$0xff]  ;;  %v1547_v54 = vcombine.low %v525_v42, %v529_v43  ;;  %v1549_v55 = vcombine.low %v526_v44, %v530_v45  ;;  %v459_v37 = vld [vmem:[%s1945_s28 + $0x130] sm:$0xff] }
  0x75   : > { %1209 = vmatpush1.bf16.msra.mxu0 %v1491_v60  ;;  %1250 = vmatpush1.bf16.msra.mxu1 %v1493_v61  ;;  %v537_v51 = vld [vmem:[%s1945_s28 + $0x3a0] sm:$0xff]  ;;  %v538_v53 = vld [vmem:[%s1945_s28 + $0x3a8] sm:$0xff]  ;;  %v463_v43 = vld [vmem:[%s1945_s28 + $0x150] sm:$0xff] }
  0x76   : > { %1210 = vmatprep.subr.bf16.mxu0 %v1500_v62  ;;  %1251 = vmatprep.subr.bf16.mxu1 %v1502_v63  ;;  %v1556_v56 = vcombine.high %v533_v50, %v537_v51  ;;  %v1558_v57 = vcombine.high %v534_v52, %v538_v53  ;;  %v541_v58 = vld [vmem:[%s1945_s28 + $0x3c0] sm:$0xff]  ;;  %v542_v60 = vld [vmem:[%s1945_s28 + $0x3c8] sm:$0xff]  ;;  %v1555_v62 = vcombine.low %v533_v50, %v537_v51  ;;  %v467_v44 = vld [vmem:[%s1945_s28 + $0x170] sm:$0xff] }
  0x77   : > { %v545_v59 = vld [vmem:[%s1945_s28 + $0x3e0] sm:$0xff]  ;;  %v546_v61 = vld [vmem:[%s1945_s28 + $0x3e8] sm:$0xff]  ;;  %v1557_v63 = vcombine.low %v534_v52, %v538_v53  ;;  %v464_v45 = vld [vmem:[%s1945_s28 + $0x158] sm:$0xff] }
  0x78   : > { %v1564_v2 = vcombine.high %v541_v58, %v545_v59  ;;  %v1566_v3 = vcombine.high %v542_v60, %v546_v61  ;;  %v471_v51 = vld [vmem:[%s1945_s28 + $0x190] sm:$0xff]  ;;  %v472_v53 = vld [vmem:[%s1945_s28 + $0x198] sm:$0xff] }
  0x79   : > { %1211 = vmatpush1.bf16.msra.mxu0 %v1499_v6  ;;  %1252 = vmatpush1.bf16.msra.mxu1 %v1501_v7  ;;  %v424_v6 = vld [vmem:[%s1945_s28 + $0x18] sm:$0xff]  ;;  %v475_v52 = vld [vmem:[%s1945_s28 + $0x1b0] sm:$0xff] }
  0x7a   : > { %1212 = vmatprep.subr.bf16.mxu0 %v1508_v8  ;;  %1253 = vmatprep.subr.bf16.mxu1 %v1510_v9  ;;  %v428_v7 = vld [vmem:[%s1945_s28 + $0x38] sm:$0xff]  ;;  %v1563_v8 = vcombine.low %v541_v58, %v545_v59  ;;  %v1565_v9 = vcombine.low %v542_v60, %v546_v61  ;;  %v479_v59 = vld [vmem:[%s1945_s28 + $0x1d0] sm:$0xff] }
  0x7b   : > { %v1450_v11 = vcombine.high %v424_v6, %v428_v7  ;;  %v1449_v18 = vcombine.low %v424_v6, %v428_v7  ;;  %v483_v60 = vld [vmem:[%s1945_s28 + $0x1f0] sm:$0xff]  ;;  %v480_v61 = vld [vmem:[%s1945_s28 + $0x1d8] sm:$0xff] }
  0x7c   : > { %v491_v6 = vld [vmem:[%s1945_s28 + $0x230] sm:$0xff]  ;;  %v488_v7 = vld [vmem:[%s1945_s28 + $0x218] sm:$0xff] }
  0x7d   : > { %1213 = vmatpush1.bf16.msra.mxu0 %v1507_v14  ;;  %1254 = vmatpush1.bf16.msra.mxu1 %v1509_v15  ;;  %v2021_v14 = vcombine.low %v1939_v0, %v1939_v0  ;;  %v432_v15 = vld [vmem:[%s1945_s28 + $0x58] sm:$0xff] }
  0x7e   : > { %1214 = vmatprep.subr.bf16.mxu0 %v1516_v16  ;;  %1255 = vmatprep.subr.bf16.mxu1 %v1518_v17  ;;  %v436_v16 = vld [vmem:[%s1945_s28 + $0x78] sm:$0xff]  ;;  %v1447_v17 = vcombine.low %v423_v4, %v427_v5  ;;  %v487_v5 = vld [vmem:[%s1945_s28 + $0x210] sm:$0xff] }
  0x7f   : > { %v1458_v20 = vcombine.high %v432_v15, %v436_v16  ;;  %v440_v0 = vld [vmem:[%s1945_s28 + $0x98] sm:$0xff] }
  0x81   : > { %1215 = vmatpush1.bf16.msra.mxu0 %v1515_v22  ;;  %1256 = vmatpush1.bf16.msra.mxu1 %v1517_v23  ;;  %v443_v22 = vld [vmem:[%s1945_s28 + $0xb0] sm:$0xff]  ;;  %v444_v23 = vld [vmem:[%s1945_s28 + $0xb8] sm:$0xff] }
  0x82   : > { %1216 = vmatprep.subr.bf16.mxu0 %v1524_v24  ;;  %1257 = vmatprep.subr.bf16.mxu1 %v1526_v25  ;;  %v1455_v24 = vcombine.low %v431_v12, %v435_v13  ;;  %v1457_v25 = vcombine.low %v432_v15, %v436_v16  ;;  %v1464_v26 = vcombine.high %v439_v21, %v443_v22  ;;  %v495_v13 = vld [vmem:[%s1945_s28 + $0x250] sm:$0xff]  ;;  %v496_v16 = vld [vmem:[%s1945_s28 + $0x258] sm:$0xff] }
  0x83   : > { %v1466_v27 = vcombine.high %v440_v0, %v444_v23  ;;  %v499_v15 = vld [vmem:[%s1945_s28 + $0x270] sm:$0xff] }
  0x85   : > { %1217 = vmatpush1.bf16.msra.mxu0 %v1523_v30  ;;  %1258 = vmatpush1.bf16.msra.mxu1 %v1525_v31  ;;  %v448_v30 = vld [vmem:[%s1945_s28 + $0xd8] sm:$0xff] }
  0x86   : > { %1218 = vmatprep.subr.bf16.mxu0 %v1532_v32  ;;  %1259 = vmatprep.subr.bf16.mxu1 %v1534_v33  ;;  %v452_v31 = vld [vmem:[%s1945_s28 + $0xf8] sm:$0xff]  ;;  %v1463_v32 = vcombine.low %v439_v21, %v443_v22  ;;  %v1465_v33 = vcombine.low %v440_v0, %v444_v23  ;;  %v503_v22 = vld [vmem:[%s1945_s28 + $0x290] sm:$0xff] }
  0x87   : > { %v1474_v35 = vcombine.high %v448_v30, %v452_v31  ;;  %v507_v0 = vld [vmem:[%s1945_s28 + $0x2b0] sm:$0xff]  ;;  %v504_v23 = vld [vmem:[%s1945_s28 + $0x298] sm:$0xff] }
  0x89   : > { %1219 = vmatpush1.bf16.msra.mxu0 %v1531_v38  ;;  %1260 = vmatpush1.bf16.msra.mxu1 %v1533_v39  ;;  %v456_v38 = vld [vmem:[%s1945_s28 + $0x118] sm:$0xff] }
  0x8a   : > { %1220 = vmatprep.subr.bf16.mxu0 %v1540_v40  ;;  %1261 = vmatprep.subr.bf16.mxu1 %v1542_v41  ;;  %v460_v39 = vld [vmem:[%s1945_s28 + $0x138] sm:$0xff]  ;;  %v1471_v40 = vcombine.low %v447_v28, %v451_v29  ;;  %v1480_v41 = vcombine.high %v455_v36, %v459_v37  ;;  %v511_v29 = vld [vmem:[%s1945_s28 + $0x2d0] sm:$0xff] }
  0x8b   : > { %v1482_v42 = vcombine.high %v456_v38, %v460_v39 }
  0x8d   : > { %1221 = vmatpush1.bf16.msra.mxu0 %v1539_v46  ;;  %1262 = vmatpush1.bf16.msra.mxu1 %v1541_v47  ;;  %v468_v46 = vld [vmem:[%s1945_s28 + $0x178] sm:$0xff]  ;;  %v1479_v47 = vcombine.low %v455_v36, %v459_v37  ;;  %v519_v37 = vld [vmem:[%s1945_s28 + $0x310] sm:$0xff] }
  0x8e   : > { %1222 = vmatprep.subr.bf16.mxu0 %v1548_v48  ;;  %1263 = vmatprep.subr.bf16.mxu1 %v1550_v49  ;;  %v1481_v48 = vcombine.low %v456_v38, %v460_v39  ;;  %v1488_v49 = vcombine.high %v463_v43, %v467_v44  ;;  %v1490_v50 = vcombine.high %v464_v45, %v468_v46  ;;  %v523_v38 = vld [vmem:[%s1945_s28 + $0x330] sm:$0xff]  ;;  %v520_v39 = vld [vmem:[%s1945_s28 + $0x318] sm:$0xff] }
  0x91   : > { %1223 = vmatpush1.bf16.msra.mxu0 %v1547_v54  ;;  %1264 = vmatpush1.bf16.msra.mxu1 %v1549_v55  ;;  %v476_v54 = vld [vmem:[%s1945_s28 + $0x1b8] sm:$0xff]  ;;  %v1487_v55 = vcombine.low %v463_v43, %v467_v44  ;;  %v527_v44 = vld [vmem:[%s1945_s28 + $0x350] sm:$0xff] }
  0x92   : > { %1224 = vmatprep.subr.bf16.mxu0 %v1556_v56  ;;  %1265 = vmatprep.subr.bf16.mxu1 %v1558_v57  ;;  %v1489_v56 = vcombine.low %v464_v45, %v468_v46  ;;  %v1496_v57 = vcombine.high %v471_v51, %v475_v52  ;;  %v1498_v58 = vcombine.high %v472_v53, %v476_v54  ;;  %v531_v45 = vld [vmem:[%s1945_s28 + $0x370] sm:$0xff]  ;;  %v528_v46 = vld [vmem:[%s1945_s28 + $0x358] sm:$0xff] }
  0x95   : > { %1225 = vmatpush1.bf16.msra.mxu0 %v1555_v62  ;;  %1266 = vmatpush1.bf16.msra.mxu1 %v1557_v63  ;;  %v484_v62 = vld [vmem:[%s1945_s28 + $0x1f8] sm:$0xff]  ;;  %v1495_v63 = vcombine.low %v471_v51, %v475_v52  ;;  %v535_v52 = vld [vmem:[%s1945_s28 + $0x390] sm:$0xff] }
  0x96   : > { %1226 = vmatprep.subr.bf16.mxu0 %v1564_v2  ;;  %1267 = vmatprep.subr.bf16.mxu1 %v1566_v3  ;;  %v1497_v2 = vcombine.low %v472_v53, %v476_v54  ;;  %v1504_v3 = vcombine.high %v479_v59, %v483_v60  ;;  %v1506_v4 = vcombine.high %v480_v61, %v484_v62  ;;  %v539_v53 = vld [vmem:[%s1945_s28 + $0x3b0] sm:$0xff]  ;;  %v536_v54 = vld [vmem:[%s1945_s28 + $0x398] sm:$0xff] }
  0x99   : > { %1227 = vmatpush1.bf16.msra.mxu0 %v1563_v8  ;;  %1268 = vmatpush1.bf16.msra.mxu1 %v1565_v9  ;;  %v492_v8 = vld [vmem:[%s1945_s28 + $0x238] sm:$0xff]  ;;  %v1503_v9 = vcombine.low %v479_v59, %v483_v60  ;;  %v543_v60 = vld [vmem:[%s1945_s28 + $0x3d0] sm:$0xff] }
  0x9a   : > { %1278 = vmatprep.subr.bf16.mxu0 %v1448_v10  ;;  %1319 = vmatprep.subr.bf16.mxu1 %v1450_v11  ;;  %v1505_v10 = vcombine.low %v480_v61, %v484_v62  ;;  %v1512_v11 = vcombine.high %v487_v5, %v491_v6  ;;  %v1514_v12 = vcombine.high %v488_v7, %v492_v8  ;;  %v547_v61 = vld [vmem:[%s1945_s28 + $0x3f0] sm:$0xff]  ;;  %v544_v62 = vld [vmem:[%s1945_s28 + $0x3d8] sm:$0xff] }
  0x9c   : > { %1229 = vmatmul.mubr.bf16.vlgmr.msra.gmra.mrb[0].mxu0 %v2021_v14  ;;  %1270 = vmatmul.mubr.bf16.vlgmr.msra.gmra.mrb[0].mxu1 %v2021_v14 }
  0x9d   : > { %1279 = vmatpush1.bf16.msra.mxu0 %v1447_v17  ;;  %1320 = vmatpush1.bf16.msra.mxu1 %v1449_v18  ;;  %v500_v17 = vld [vmem:[%s1945_s28 + $0x278] sm:$0xff]  ;;  %v1511_v18 = vcombine.low %v487_v5, %v491_v6  ;;  %v1567_v6 = vcombine.low %v543_v60, %v547_v61 }
  0x9e   : > { %1280 = vmatprep.subr.bf16.mxu0 %v1456_v19  ;;  %1321 = vmatprep.subr.bf16.mxu1 %v1458_v20  ;;  %v1513_v19 = vcombine.low %v488_v7, %v492_v8  ;;  %v1520_v20 = vcombine.high %v495_v13, %v499_v15  ;;  %v1522_v21 = vcombine.high %v496_v16, %v500_v17 }
  0x9f   : > { %1310 = vmatprep.mubr.bf16.mxu0 %v1943_v1  ;;  %1351 = vmatprep.mubr.bf16.mxu1 %v1943_v1  ;;  %v1473_v1 = vcombine.low %v448_v30, %v452_v31  ;;  %v515_v30 = vld [vmem:[%s1945_s28 + $0x2f0] sm:$0xff]  ;;  %v512_v31 = vld [vmem:[%s1945_s28 + $0x2d8] sm:$0xff] }
  0xa1   : > { %1281 = vmatpush1.bf16.msra.mxu0 %v1455_v24  ;;  %1322 = vmatpush1.bf16.msra.mxu1 %v1457_v25  ;;  %v508_v24 = vld [vmem:[%s1945_s28 + $0x2b8] sm:$0xff]  ;;  %v1519_v25 = vcombine.low %v495_v13, %v499_v15 }
  0xa2   : > { %1282 = vmatprep.subr.bf16.mxu0 %v1464_v26  ;;  %1323 = vmatprep.subr.bf16.mxu1 %v1466_v27  ;;  %v1521_v26 = vcombine.low %v496_v16, %v500_v17  ;;  %v1528_v27 = vcombine.high %v503_v22, %v507_v0  ;;  %v1530_v28 = vcombine.high %v504_v23, %v508_v24 }
  0xa5   : > { %1283 = vmatpush1.bf16.msra.mxu0 %v1463_v32  ;;  %1324 = vmatpush1.bf16.msra.mxu1 %v1465_v33  ;;  %v516_v32 = vld [vmem:[%s1945_s28 + $0x2f8] sm:$0xff]  ;;  %v1527_v33 = vcombine.low %v503_v22, %v507_v0 }
  0xa6   : > { %1284 = vmatprep.subr.bf16.mxu0 %v1472_v34  ;;  %1325 = vmatprep.subr.bf16.mxu1 %v1474_v35  ;;  %v1529_v34 = vcombine.low %v504_v23, %v508_v24  ;;  %v1536_v35 = vcombine.high %v511_v29, %v515_v30  ;;  %v1538_v36 = vcombine.high %v512_v31, %v516_v32 }
  0xa9   : > { %1285 = vmatpush1.bf16.msra.mxu0 %v1471_v40  ;;  %1326 = vmatpush1.bf16.msra.mxu1 %v1473_v1  ;;  %v524_v40 = vld [vmem:[%s1945_s28 + $0x338] sm:$0xff]  ;;  %v1535_v1 = vcombine.low %v511_v29, %v515_v30 }
  0xaa   : > { %1286 = vmatprep.subr.bf16.mxu0 %v1480_v41  ;;  %1327 = vmatprep.subr.bf16.mxu1 %v1482_v42  ;;  %v1537_v41 = vcombine.low %v512_v31, %v516_v32  ;;  %v1544_v42 = vcombine.high %v519_v37, %v523_v38  ;;  %v1546_v43 = vcombine.high %v520_v39, %v524_v40 }
  0xad   : > { %1287 = vmatpush1.bf16.msra.mxu0 %v1479_v47  ;;  %1328 = vmatpush1.bf16.msra.mxu1 %v1481_v48  ;;  %v532_v47 = vld [vmem:[%s1945_s28 + $0x378] sm:$0xff]  ;;  %v1543_v48 = vcombine.low %v519_v37, %v523_v38 }
  0xae   : > { %1288 = vmatprep.subr.bf16.mxu0 %v1488_v49  ;;  %1329 = vmatprep.subr.bf16.mxu1 %v1490_v50  ;;  %v1545_v49 = vcombine.low %v520_v39, %v524_v40  ;;  %v1552_v50 = vcombine.high %v527_v44, %v531_v45  ;;  %v1554_v51 = vcombine.high %v528_v46, %v532_v47 }
  0xb1   : > { %1289 = vmatpush1.bf16.msra.mxu0 %v1487_v55  ;;  %1330 = vmatpush1.bf16.msra.mxu1 %v1489_v56  ;;  %v540_v55 = vld [vmem:[%s1945_s28 + $0x3b8] sm:$0xff]  ;;  %v1551_v56 = vcombine.low %v527_v44, %v531_v45 }
  0xb2   : > { %1290 = vmatprep.subr.bf16.mxu0 %v1496_v57  ;;  %1331 = vmatprep.subr.bf16.mxu1 %v1498_v58  ;;  %v1553_v57 = vcombine.low %v528_v46, %v532_v47  ;;  %v1560_v58 = vcombine.high %v535_v52, %v539_v53  ;;  %v1562_v59 = vcombine.high %v536_v54, %v540_v55 }
  0xb5   : > { %1291 = vmatpush1.bf16.msra.mxu0 %v1495_v63  ;;  %1332 = vmatpush1.bf16.msra.mxu1 %v1497_v2  ;;  %v548_v63 = vld [vmem:[%s1945_s28 + $0x3f8] sm:$0xff]  ;;  %v1559_v2 = vcombine.low %v535_v52, %v539_v53 }
  0xb6   : > { %1292 = vmatprep.subr.bf16.mxu0 %v1504_v3  ;;  %1333 = vmatprep.subr.bf16.mxu1 %v1506_v4  ;;  %v1561_v3 = vcombine.low %v536_v54, %v540_v55  ;;  %v1568_v4 = vcombine.high %v543_v60, %v547_v61  ;;  %v1570_v5 = vcombine.high %v544_v62, %v548_v63 }
  0xb7   : > { %v1569_v7 = vcombine.low %v544_v62, %v548_v63 }
  0xb9   : > { %1293 = vmatpush1.bf16.msra.mxu0 %v1503_v9  ;;  %1334 = vmatpush1.bf16.msra.mxu1 %v1505_v10 }
  0xba   : > { %1294 = vmatprep.subr.bf16.mxu0 %v1512_v11  ;;  %1335 = vmatprep.subr.bf16.mxu1 %v1514_v12 }
  0xbd   : > { %1295 = vmatpush1.bf16.msra.mxu0 %v1511_v18  ;;  %1336 = vmatpush1.bf16.msra.mxu1 %v1513_v19 }
  0xbe   : > { %1296 = vmatprep.subr.bf16.mxu0 %v1520_v20  ;;  %1337 = vmatprep.subr.bf16.mxu1 %v1522_v21 }
  0xc1   : > { %1297 = vmatpush1.bf16.msra.mxu0 %v1519_v25  ;;  %1338 = vmatpush1.bf16.msra.mxu1 %v1521_v26 }
  0xc2   : > { %1298 = vmatprep.subr.bf16.mxu0 %v1528_v27  ;;  %1339 = vmatprep.subr.bf16.mxu1 %v1530_v28 }
  0xc5   : > { %1299 = vmatpush1.bf16.msra.mxu0 %v1527_v33  ;;  %1340 = vmatpush1.bf16.msra.mxu1 %v1529_v34 }
  0xc6   : > { %1300 = vmatprep.subr.bf16.mxu0 %v1536_v35  ;;  %1341 = vmatprep.subr.bf16.mxu1 %v1538_v36 }
  0xc9   : > { %1301 = vmatpush1.bf16.msra.mxu0 %v1535_v1  ;;  %1342 = vmatpush1.bf16.msra.mxu1 %v1537_v41 }
  0xca   : > { %1302 = vmatprep.subr.bf16.mxu0 %v1544_v42  ;;  %1343 = vmatprep.subr.bf16.mxu1 %v1546_v43 }
  0xcd   : > { %1303 = vmatpush1.bf16.msra.mxu0 %v1543_v48  ;;  %1344 = vmatpush1.bf16.msra.mxu1 %v1545_v49 }
  0xce   : > { %1304 = vmatprep.subr.bf16.mxu0 %v1552_v50  ;;  %1345 = vmatprep.subr.bf16.mxu1 %v1554_v51 }
  0xd1   : > { %1305 = vmatpush1.bf16.msra.mxu0 %v1551_v56  ;;  %1346 = vmatpush1.bf16.msra.mxu1 %v1553_v57 }
  0xd2   : > { %1306 = vmatprep.subr.bf16.mxu0 %v1560_v58  ;;  %1347 = vmatprep.subr.bf16.mxu1 %v1562_v59 }
  0xd5   : > { %1307 = vmatpush1.bf16.msra.mxu0 %v1559_v2  ;;  %1348 = vmatpush1.bf16.msra.mxu1 %v1561_v3 }
  0xd6   : > { %1308 = vmatprep.subr.bf16.mxu0 %v1568_v4  ;;  %1349 = vmatprep.subr.bf16.mxu1 %v1570_v5 }
  0xd9   : > { %1309 = vmatpush1.bf16.msra.mxu0 %v1567_v6  ;;  %1350 = vmatpush1.bf16.msra.mxu1 %v1569_v7 }
  0xdc   : > { %1311 = vmatmul.mubr.bf16.vlgmr.msra.gmra.mrb[4].mxu0 %v2021_v14  ;;  %1352 = vmatmul.mubr.bf16.vlgmr.msra.gmra.mrb[4].mxu1 %v2021_v14 }
 0x16f   : > { %v1230_v8 = vpop.f32.mrb[0].mxu0  ;;  %v1271_v9 = vpop.f32.mrb[0].mxu1 }
 0x170   : > { %1360 = vst [vmem:[%s418_s5] sm:$0xff] %v1230_v8  ;;  %v1232_v10 = vpop.f32.mrb[1].mxu0  ;;  %1362 = vst [vmem:[%s418_s5 + $0x10] sm:$0xff] %v1271_v9  ;;  %v1273_v11 = vpop.f32.mrb[1].mxu1 }
 0x171   : > { %1361 = vst [vmem:[%s418_s5 + $0x8] sm:$0xff] %v1232_v10  ;;  %v1234_v12 = vpop.f32.mrb[2].mxu0  ;;  %1363 = vst [vmem:[%s418_s5 + $0x18] sm:$0xff] %v1273_v11  ;;  %v1275_v13 = vpop.f32.mrb[2].mxu1 }
 0x172   : > { %v1235_v14 = vpop.f32.mrb[3].mxu0  ;;  %v1276_v15 = vpop.f32.mrb[3].mxu1 }
 0x1af   : > { %v1312_v16 = vpop.f32.mrb[4].mxu0  ;;  %v1353_v17 = vpop.f32.mrb[4].mxu1 }
 0x1b0   : > { %1364 = vst [vmem:[%s418_s5 + $0x20] sm:$0xff] %v1312_v16  ;;  %v1314_v18 = vpop.f32.mrb[5].mxu0  ;;  %1366 = vst [vmem:[%s418_s5 + $0x30] sm:$0xff] %v1353_v17  ;;  %v1355_v19 = vpop.f32.mrb[5].mxu1 }
 0x1b1   : > { %1365 = vst [vmem:[%s418_s5 + $0x28] sm:$0xff] %v1314_v18  ;;  %v1316_v20 = vpop.f32.mrb[6].mxu0  ;;  %1367 = vst [vmem:[%s418_s5 + $0x38] sm:$0xff] %v1355_v19  ;;  %v1357_v21 = vpop.f32.mrb[6].mxu1 }
 0x1b2   : > { %v1317_v22 = vpop.f32.mrb[7].mxu0  ;;  %v1358_v0 = vpop.f32.mrb[7].mxu1 }
 0x1b3 PF: > { %p9_p9 = scmp.ge.s32.totalorder %s1656_s13, 6   ;;  %s2105_s9 = smov %s1618_s10 }
 0x1b4   : > { %s2106_s10 = smov %s1665_s16  ;;  %s2107_s11 = smov %s1656_s13 }
 0x1b5   :  { %11 = sbr.rel (!%p9_p9) target bundleno = 2 (0x2), region = 86 }

</bundles_post_ra>
